<compile_context>
chip_gen: v7x
topology: tpu7x:2x2x1
jax: 0.10.0
libtpu: 0.0.40
codegen_flags: <defaults>
</compile_context>

<pallas_src>
import jax
import jax.numpy as jnp
import numpy as np
from jax.experimental import pallas as pl
from jax.experimental.pallas import tpu as pltpu

_VMEM_LIMIT = 48 * 1024 * 1024  # stay well inside v7x's 64 MiB physical VMEM


# --------------------------------------------------------------------------
# helpers
# --------------------------------------------------------------------------
def _round_up(n, m):
    return ((n + m - 1) // m) * m


def _pad_to(x, m, axis):
    pad = (-x.shape[axis]) % m
    if pad == 0:
        return x
    widths = [(0, 0)] * x.ndim
    widths[axis] = (0, pad)
    return jnp.pad(x, widths)


def _choose_tm(m, cap, min_blocks=2):
    """M tile with minimal padding; >=2 blocks when possible (v7x megacore)."""
    max_blocks = max(1, -(-m // 8))          # blocks must have >= 8 rows
    nb = max(-(-m // cap), min_blocks)
    nb = min(nb, max_blocks)
    tm = _round_up(-(-m // nb), 8)
    return nb * tm, tm


# --------------------------------------------------------------------------
# Pallas kernels
# --------------------------------------------------------------------------
def _conv_relu_pool_kernel(a_ref, w_ref, b_ref, o_ref):
    """Fused conv-as-GEMM + bias + ReLU + 2x2 max-pool.

    a_ref: (4*tm, Kp) bf16 -- im2col rows of the 4 pool-window corners for one
           M block, stacked as 4 contiguous tm-row chunks.
    w_ref: (Kp, 128) bf16, b_ref: (1, 128) f32, o_ref: (tm, 128) f32.
    The pool is the max over the 4 corner chunks (pure VPU work).
    """
    tm = o_ref.shape[0]
    y = jnp.dot(a_ref[...], w_ref[...], preferred_element_type=jnp.float32)
    y = jnp.maximum(y + b_ref[...], 0.0)
    o_ref[...] = jnp.maximum(jnp.maximum(y[0:tm], y[tm:2 * tm]),
                             jnp.maximum(y[2 * tm:3 * tm], y[3 * tm:4 * tm]))


def _fc_fused_kernel(x_ref, w1_ref, b1_ref, w2_ref, b2_ref, w3_ref, b3_ref,
                     o_ref):
    """fc1 -> fc2 -> fc3 in one kernel; intermediates never leave VMEM."""
    z1 = jnp.dot(x_ref[...], w1_ref[...],
                 preferred_element_type=jnp.float32) + b1_ref[...]
    z2 = jnp.dot(z1.astype(jnp.bfloat16), w2_ref[...],
                 preferred_element_type=jnp.float32) + b2_ref[...]
    z3 = jnp.dot(z2.astype(jnp.bfloat16), w3_ref[...],
                 preferred_element_type=jnp.float32) + b3_ref[...]
    o_ref[...] = z3


# --------------------------------------------------------------------------
# wrappers
# --------------------------------------------------------------------------
def conv_relu_pool(x_nhwc, w_kc, b_1c, cout, *, k=5, pad=2, m_cap=256):
    """y = maxpool2x2(relu(conv2d_same(x, w) + b));  x NHWC -> y NHWC.

    w_kc is the prepared (Kp, 128) bf16 weight (K ordered ci*k*k + kh*k + kw,
    zero-padded), b_1c the prepared (1, 128) f32 bias.
    """
    N, H, W, C = x_nhwc.shape
    H2, W2 = H // 2, W // 2
    K = C * k * k
    Kp, Cp = w_kc.shape

    # cast BEFORE the 25x im2col expansion (halves HBM traffic of cols)
    x = x_nhwc.astype(jnp.bfloat16)
    xp = jnp.pad(x, ((0, 0), (pad, pad), (pad, pad), (0, 0)))
    cols = jnp.stack(
        [xp[:, kh:kh + H, kw:kw + W, :] for kh in range(k) for kw in range(k)],
        axis=-1)                                    # (N,H,W,C,k*k)
    cols = cols.reshape(N, H2, 2, W2, 2, K)         # K index = ci*kk + kh*k + kw
    cols = cols.transpose(2, 4, 0, 1, 3, 5).reshape(4, N * H2 * W2, K)

    M = N * H2 * W2
    Mp, tm = _choose_tm(M, m_cap)
    nb = Mp // tm

    cols = jnp.pad(cols, ((0, 0), (0, Mp - M), (0, Kp - K)))
    # per-M-block layout: block i holds its 4 corner chunks contiguously
    cols = cols.reshape(4, nb, tm, Kp).transpose(1, 0, 2, 3)
    cols = cols.reshape(nb * 4 * tm, Kp)

    out = pl.pallas_call(
        _conv_relu_pool_kernel,
        out_shape=jax.ShapeDtypeStruct((Mp, Cp), jnp.float32),
        grid_spec=pltpu.PrefetchScalarGridSpec(
            num_scalar_prefetch=0,
            grid=(nb,),
            in_specs=[
                pl.BlockSpec((4 * tm, Kp), lambda i: (i, 0)),
                pl.BlockSpec((Kp, Cp), lambda i: (0, 0)),
                pl.BlockSpec((1, Cp), lambda i: (0, 0)),
            ],
            out_specs=pl.BlockSpec((tm, Cp), lambda i: (i, 0)),
        ),
        compiler_params=pltpu.CompilerParams(
            dimension_semantics=("parallel",),
            vmem_limit_bytes=_VMEM_LIMIT),
    )(cols, w_kc, b_1c)

    return out[:M, :cout].reshape(N, H2, W2, cout)


def fc3_fused(x, fw1, fb1, fw2, fb2, fw3, fb3, n_out, *, m_cap=128):
    """z = fc3(fc2(fc1(x))) with prepared (padded, transposed, bf16) weights."""
    M, K1 = x.shape                      # (batch, 3136)
    N1 = fw1.shape[1]                    # 1024
    N2 = fw2.shape[1]                    # 128 (100 padded)
    N3 = fw3.shape[1]                    # 128 (10 padded)

    Mp, tm = _choose_tm(M, m_cap)
    x_p = jnp.pad(x, ((0, Mp - M), (0, 0))).astype(jnp.bfloat16)

    out = pl.pallas_call(
        _fc_fused_kernel,
        out_shape=jax.ShapeDtypeStruct((Mp, N3), jnp.float32),
        grid_spec=pltpu.PrefetchScalarGridSpec(
            num_scalar_prefetch=0,
            grid=(Mp // tm,),
            in_specs=[
                pl.BlockSpec((tm, K1), lambda i: (i, 0)),
                pl.BlockSpec((K1, N1), lambda i: (0, 0)),
                pl.BlockSpec((1, N1), lambda i: (0, 0)),
                pl.BlockSpec((N1, N2), lambda i: (0, 0)),
                pl.BlockSpec((1, N2), lambda i: (0, 0)),
                pl.BlockSpec((N2, N3), lambda i: (0, 0)),
                pl.BlockSpec((1, N3), lambda i: (0, 0)),
            ],
            out_specs=pl.BlockSpec((tm, N3), lambda i: (i, 0)),
        ),
        compiler_params=pltpu.CompilerParams(
            dimension_semantics=("parallel",),
            vmem_limit_bytes=_VMEM_LIMIT),
    )(x_p, fw1, fb1, fw2, fb2, fw3, fb3)

    return out[:M, :n_out]


# --------------------------------------------------------------------------
# parameters
# --------------------------------------------------------------------------
def init_params(key):
    ks = jax.random.split(key, 10)

    def u(k, shape, fan_in):
        lim = 1.0 / np.sqrt(fan_in)
        return jax.random.uniform(k, shape, jnp.float32, -lim, lim)

    return {
        "w1": u(ks[0], (32, 1, 5, 5), 25),        # torch OIHW
        "b1": u(ks[1], (32,), 25),
        "w2": u(ks[2], (64, 32, 5, 5), 800),
        "b2": u(ks[3], (64,), 800),
        "fw1": u(ks[4], (1024, 3136), 3136),       # torch Linear (out, in)
        "fb1": u(ks[5], (1024,), 3136),
        "fw2": u(ks[6], (100, 1024), 1024),
        "fb2": u(ks[7], (100,), 1024),
        "fw3": u(ks[8], (10, 100), 100),
        "fb3": u(ks[9], (10,), 100),
    }


def prepare_params(p):
    """One-time, off-critical-path conversion to kernel-ready layouts."""
    def conv_w(w_oihw):
        cout, cin, k, _ = w_oihw.shape
        K = cin * k * k
        Kp = _round_up(K, 128)
        w = w_oihw.reshape(cout, K).T                      # (K, cout)
        return jnp.pad(w, ((0, Kp - K), (0, 128 - cout))).astype(jnp.bfloat16)

    def bias128(b):
        b = b.reshape(1, -1)
        return jnp.pad(b, ((0, 0), (0, 128 - b.shape[1]))).astype(jnp.float32)

    # fc1: permute input columns NCHW->NHWC once, so the conv output is
    # flattened directly in NHWC order at runtime (no activation transpose).
    fw1 = p["fw1"].reshape(1024, 64, 7, 7).transpose(0, 2, 3, 1)
    fw1 = fw1.reshape(1024, 3136).T.astype(jnp.bfloat16)            # (3136,1024)
    fb1 = p["fb1"].reshape(1, -1).astype(jnp.float32)

    fw2 = _pad_to(p["fw2"].T, 128, 1).astype(jnp.bfloat16)          # (1024,128)
    fb2 = bias128(p["fb2"])
    fw3 = _pad_to(_pad_to(p["fw3"].T, 128, 0), 128, 1).astype(jnp.bfloat16)
    fb3 = bias128(p["fb3"])

    return {
        "cw1": conv_w(p["w1"]), "cb1": bias128(p["b1"]),
        "cw2": conv_w(p["w2"]), "cb2": bias128(p["b2"]),
        "fw1": fw1, "fb1": fb1, "fw2": fw2, "fb2": fb2,
        "fw3": fw3, "fb3": fb3,
    }


# --------------------------------------------------------------------------
# model
# --------------------------------------------------------------------------
def cnn_forward(x_nchw, cp):
    N = x_nchw.shape[0]
    x = jnp.transpose(x_nchw, (0, 2, 3, 1))               # NCHW -> NHWC (N,28,28,1)

    h = conv_relu_pool(x, cp["cw1"], cp["cb1"], cout=32)  # -> (N,14,14,32)
    h = conv_relu_pool(h, cp["cw2"], cp["cb2"], cout=64)  # -> (N,7,7,64)

    # flatten directly in NHWC order; fw1 columns were pre-permuted to match
    flat = h.reshape(N, 7 * 7 * 64)

    return fc3_fused(flat, cp["fw1"], cp["fb1"], cp["fw2"], cp["fb2"],
                     cp["fw3"], cp["fb3"], n_out=10)


def cnn_forward_ref(x_nchw, p):
    """Pure-JAX (XLA, f32) reference for the correctness check."""
    h = jax.lax.conv_general_dilated(
        x_nchw, p["w1"], (1, 1), ((2, 2), (2, 2)),
        dimension_numbers=("NCHW", "OIHW", "NCHW")) + p["b1"][None, :, None, None]
    h = jnp.maximum(h, 0.0)
    h = jax.lax.reduce_window(h, -jnp.inf, jax.lax.max,
                              (1, 1, 2, 2), (1, 1, 2, 2), "VALID")
    h = jax.lax.conv_general_dilated(
        h, p["w2"], (1, 1), ((2, 2), (2, 2)),
        dimension_numbers=("NCHW", "OIHW", "NCHW")) + p["b2"][None, :, None, None]
    h = jnp.maximum(h, 0.0)
    h = jax.lax.reduce_window(h, -jnp.inf, jax.lax.max,
                              (1, 1, 2, 2), (1, 1, 2, 2), "VALID")
    flat = h.reshape(h.shape[0], -1)
    z = flat @ p["fw1"].T + p["fb1"]
    z = z @ p["fw2"].T + p["fb2"]
    z = z @ p["fw3"].T + p["fb3"]
    return z


if __name__ == "__main__":
    key = jax.random.PRNGKey(0)
    kx, kp = jax.random.split(key)
    # MNIST-like input implied by fc1 = Linear(64*7*7, ...): (batch, 1, 28, 28)
    x = jax.random.normal(kx, (2, 1, 28, 28), jnp.float32)
    params = init_params(kp)

    # one-time parameter preparation (padding / transposes / bf16 casts)
    cparams = jax.tree_util.tree_map(jax.block_until_ready,
                                     prepare_params(params))

    out = jax.block_until_ready(jax.jit(cnn_forward)(x, cparams))
    assert out.shape == (2, 10) and out.dtype == jnp.float32

    ref = jax.block_until_ready(cnn_forward_ref(x, params))
    np.testing.assert_allclose(np.asarray(out), np.asarray(ref),
                               rtol=2e-2, atol=2e-2)

    print("KERNEL_OK")
</pallas_src>

<mosaic_0001>
module attributes {stable_mosaic.version = 11 : i64} {
  func.func @_conv_relu_pool_kernel(%arg0: i32, %arg1: memref<800x128xbf16, #tpu.memory_space<vmem>>, %arg2: memref<128x128xbf16, #tpu.memory_space<vmem>>, %arg3: memref<1x128xf32, #tpu.memory_space<vmem>>, %arg4: memref<200x128xf32, #tpu.memory_space<vmem>>) attributes {dimension_semantics = [#tpu.dimension_semantics<parallel>], iteration_bounds = array<i64: 2>, scalar_prefetch = 0 : i64, scratch_operands = 0 : i64, tpu.core_type = #tpu.core_type<tc>, window_params = [{transform_indices = @transform_0, window_bounds = array<i64: 800, 128>}, {pipeline_mode = #tpu.pipeline_mode<synchronous>, transform_indices = @transform_1, window_bounds = array<i64: 128, 128>}, {pipeline_mode = #tpu.pipeline_mode<synchronous>, transform_indices = @transform_2, window_bounds = array<i64: 1, 128>}, {transform_indices = @transform_3, window_bounds = array<i64: 200, 128>}]} {
    %c0 = arith.constant 0 : index
    %c0_0 = arith.constant 0 : index
    %0 = vector.load %arg1[%c0, %c0_0] : memref<800x128xbf16, #tpu.memory_space<vmem>>, vector<800x128xbf16>
    %c0_1 = arith.constant 0 : index
    %c0_2 = arith.constant 0 : index
    %1 = vector.load %arg2[%c0_1, %c0_2] : memref<128x128xbf16, #tpu.memory_space<vmem>>, vector<128x128xbf16>
    %cst = arith.constant dense<0.000000e+00> : vector<800x128xf32>
    %2 = tpu.matmul %0, %1, %cst {dimension_numbers = #tpu.dot_dimension_numbers<[1], [0], [0], [1], [0, 0, 1, 1], [], []>} : vector<800x128xbf16>, vector<128x128xbf16>, vector<800x128xf32> -> vector<800x128xf32>
    %c0_3 = arith.constant 0 : index
    %c0_4 = arith.constant 0 : index
    %3 = vector.load %arg3[%c0_3, %c0_4] : memref<1x128xf32, #tpu.memory_space<vmem>>, vector<1x128xf32>
    %4 = vector.broadcast %3 : vector<1x128xf32> to vector<800x128xf32>
    %5 = arith.addf %2, %4 : vector<800x128xf32>
    %cst_5 = arith.constant 0.000000e+00 : f32
    %6 = vector.broadcast %cst_5 : f32 to vector<800x128xf32>
    %7 = arith.maximumf %5, %6 : vector<800x128xf32>
    %8 = vector.extract_strided_slice %7 {offsets = [0, 0], sizes = [200, 128], strides = [1, 1]} : vector<800x128xf32> to vector<200x128xf32>
    %9 = vector.extract_strided_slice %7 {offsets = [200, 0], sizes = [200, 128], strides = [1, 1]} : vector<800x128xf32> to vector<200x128xf32>
    %10 = arith.maximumf %8, %9 : vector<200x128xf32>
    %11 = vector.extract_strided_slice %7 {offsets = [400, 0], sizes = [200, 128], strides = [1, 1]} : vector<800x128xf32> to vector<200x128xf32>
    %12 = vector.extract_strided_slice %7 {offsets = [600, 0], sizes = [200, 128], strides = [1, 1]} : vector<800x128xf32> to vector<200x128xf32>
    %13 = arith.maximumf %11, %12 : vector<200x128xf32>
    %14 = arith.maximumf %10, %13 : vector<200x128xf32>
    %c0_6 = arith.constant 0 : index
    %c0_7 = arith.constant 0 : index
    %15 = vector.load %arg4[%c0_6, %c0_7] : memref<200x128xf32, #tpu.memory_space<vmem>>, vector<200x128xf32>
    tpu.vector_store %arg4[%c0_6, %c0_7], %14 {strides = array<i32>} : memref<200x128xf32, #tpu.memory_space<vmem>>, vector<200x128xf32>,
    return
  }
  func.func @transform_0(%arg0: i32) -> (i32, i32) {
    %c0_i32 = arith.constant 0 : i32
    %c0_i32_0 = arith.constant 0 : i32
    return %arg0, %c0_i32 : i32, i32
  }
  func.func @transform_1(%arg0: i32) -> (i32, i32) {
    %c0_i32 = arith.constant 0 : i32
    %c0_i32_0 = arith.constant 0 : i32
    %c0_i32_1 = arith.constant 0 : i32
    return %c0_i32, %c0_i32_0 : i32, i32
  }
  func.func @transform_2(%arg0: i32) -> (i32, i32) {
    %c0_i32 = arith.constant 0 : i32
    %c0_i32_0 = arith.constant 0 : i32
    %c0_i32_1 = arith.constant 0 : i32
    return %c0_i32, %c0_i32_0 : i32, i32
  }
  func.func @transform_3(%arg0: i32) -> (i32, i32) {
    %c0_i32 = arith.constant 0 : i32
    %c0_i32_0 = arith.constant 0 : i32
    return %arg0, %c0_i32 : i32, i32
  }
}

module attributes {stable_mosaic.version = 11 : i64} {
  func.func @_conv_relu_pool_kernel(%arg0: i32, %arg1: memref<224x896xbf16, #tpu.memory_space<vmem>>, %arg2: memref<896x128xbf16, #tpu.memory_space<vmem>>, %arg3: memref<1x128xf32, #tpu.memory_space<vmem>>, %arg4: memref<56x128xf32, #tpu.memory_space<vmem>>) attributes {dimension_semantics = [#tpu.dimension_semantics<parallel>], iteration_bounds = array<i64: 2>, scalar_prefetch = 0 : i64, scratch_operands = 0 : i64, tpu.core_type = #tpu.core_type<tc>, window_params = [{transform_indices = @transform_0, window_bounds = array<i64: 224, 896>}, {pipeline_mode = #tpu.pipeline_mode<synchronous>, transform_indices = @transform_1, window_bounds = array<i64: 896, 128>}, {pipeline_mode = #tpu.pipeline_mode<synchronous>, transform_indices = @transform_2, window_bounds = array<i64: 1, 128>}, {transform_indices = @transform_3, window_bounds = array<i64: 56, 128>}]} {
    %c0 = arith.constant 0 : index
    %c0_0 = arith.constant 0 : index
    %0 = vector.load %arg1[%c0, %c0_0] : memref<224x896xbf16, #tpu.memory_space<vmem>>, vector<224x896xbf16>
    %c0_1 = arith.constant 0 : index
    %c0_2 = arith.constant 0 : index
    %1 = vector.load %arg2[%c0_1, %c0_2] : memref<896x128xbf16, #tpu.memory_space<vmem>>, vector<896x128xbf16>
    %cst = arith.constant dense<0.000000e+00> : vector<224x128xf32>
    %2 = tpu.matmul %0, %1, %cst {dimension_numbers = #tpu.dot_dimension_numbers<[1], [0], [0], [1], [0, 0, 1, 1], [], []>} : vector<224x896xbf16>, vector<896x128xbf16>, vector<224x128xf32> -> vector<224x128xf32>
    %c0_3 = arith.constant 0 : index
    %c0_4 = arith.constant 0 : index
    %3 = vector.load %arg3[%c0_3, %c0_4] : memref<1x128xf32, #tpu.memory_space<vmem>>, vector<1x128xf32>
    %4 = vector.broadcast %3 : vector<1x128xf32> to vector<224x128xf32>
    %5 = arith.addf %2, %4 : vector<224x128xf32>
    %cst_5 = arith.constant 0.000000e+00 : f32
    %6 = vector.broadcast %cst_5 : f32 to vector<224x128xf32>
    %7 = arith.maximumf %5, %6 : vector<224x128xf32>
    %8 = vector.extract_strided_slice %7 {offsets = [0, 0], sizes = [56, 128], strides = [1, 1]} : vector<224x128xf32> to vector<56x128xf32>
    %9 = vector.extract_strided_slice %7 {offsets = [56, 0], sizes = [56, 128], strides = [1, 1]} : vector<224x128xf32> to vector<56x128xf32>
    %10 = arith.maximumf %8, %9 : vector<56x128xf32>
    %11 = vector.extract_strided_slice %7 {offsets = [112, 0], sizes = [56, 128], strides = [1, 1]} : vector<224x128xf32> to vector<56x128xf32>
    %12 = vector.extract_strided_slice %7 {offsets = [168, 0], sizes = [56, 128], strides = [1, 1]} : vector<224x128xf32> to vector<56x128xf32>
    %13 = arith.maximumf %11, %12 : vector<56x128xf32>
    %14 = arith.maximumf %10, %13 : vector<56x128xf32>
    %c0_6 = arith.constant 0 : index
    %c0_7 = arith.constant 0 : index
    %15 = vector.load %arg4[%c0_6, %c0_7] : memref<56x128xf32, #tpu.memory_space<vmem>>, vector<56x128xf32>
    tpu.vector_store %arg4[%c0_6, %c0_7], %14 {strides = array<i32>} : memref<56x128xf32, #tpu.memory_space<vmem>>, vector<56x128xf32>,
    return
  }
  func.func @transform_0(%arg0: i32) -> (i32, i32) {
    %c0_i32 = arith.constant 0 : i32
    %c0_i32_0 = arith.constant 0 : i32
    return %arg0, %c0_i32 : i32, i32
  }
  func.func @transform_1(%arg0: i32) -> (i32, i32) {
    %c0_i32 = arith.constant 0 : i32
    %c0_i32_0 = arith.constant 0 : i32
    %c0_i32_1 = arith.constant 0 : i32
    return %c0_i32, %c0_i32_0 : i32, i32
  }
  func.func @transform_2(%arg0: i32) -> (i32, i32) {
    %c0_i32 = arith.constant 0 : i32
    %c0_i32_0 = arith.constant 0 : i32
    %c0_i32_1 = arith.constant 0 : i32
    return %c0_i32, %c0_i32_0 : i32, i32
  }
  func.func @transform_3(%arg0: i32) -> (i32, i32) {
    %c0_i32 = arith.constant 0 : i32
    %c0_i32_0 = arith.constant 0 : i32
    return %arg0, %c0_i32 : i32, i32
  }
}

module attributes {stable_mosaic.version = 11 : i64} {
  func.func @_fc_fused_kernel(%arg0: i32, %arg1: memref<8x3136xbf16, #tpu.memory_space<vmem>>, %arg2: memref<3136x1024xbf16, #tpu.memory_space<vmem>>, %arg3: memref<1x1024xf32, #tpu.memory_space<vmem>>, %arg4: memref<1024x128xbf16, #tpu.memory_space<vmem>>, %arg5: memref<1x128xf32, #tpu.memory_space<vmem>>, %arg6: memref<128x128xbf16, #tpu.memory_space<vmem>>, %arg7: memref<1x128xf32, #tpu.memory_space<vmem>>, %arg8: memref<8x128xf32, #tpu.memory_space<vmem>>) attributes {dimension_semantics = [#tpu.dimension_semantics<parallel>], iteration_bounds = array<i64: 1>, scalar_prefetch = 0 : i64, scratch_operands = 0 : i64, tpu.core_type = #tpu.core_type<tc>, window_params = [{transform_indices = @transform_0, window_bounds = array<i64: 8, 3136>}, {pipeline_mode = #tpu.pipeline_mode<synchronous>, transform_indices = @transform_1, window_bounds = array<i64: 3136, 1024>}, {pipeline_mode = #tpu.pipeline_mode<synchronous>, transform_indices = @transform_2, window_bounds = array<i64: 1, 1024>}, {pipeline_mode = #tpu.pipeline_mode<synchronous>, transform_indices = @transform_3, window_bounds = array<i64: 1024, 128>}, {pipeline_mode = #tpu.pipeline_mode<synchronous>, transform_indices = @transform_4, window_bounds = array<i64: 1, 128>}, {pipeline_mode = #tpu.pipeline_mode<synchronous>, transform_indices = @transform_5, window_bounds = array<i64: 128, 128>}, {pipeline_mode = #tpu.pipeline_mode<synchronous>, transform_indices = @transform_6, window_bounds = array<i64: 1, 128>}, {transform_indices = @transform_7, window_bounds = array<i64: 8, 128>}]} {
    %c0 = arith.constant 0 : index
    %c0_0 = arith.constant 0 : index
    %0 = vector.load %arg1[%c0, %c0_0] : memref<8x3136xbf16, #tpu.memory_space<vmem>>, vector<8x3136xbf16>
    %c0_1 = arith.constant 0 : index
    %c0_2 = arith.constant 0 : index
    %1 = vector.load %arg2[%c0_1, %c0_2] : memref<3136x1024xbf16, #tpu.memory_space<vmem>>, vector<3136x1024xbf16>
    %cst = arith.constant dense<0.000000e+00> : vector<8x1024xf32>
    %2 = tpu.matmul %0, %1, %cst {dimension_numbers = #tpu.dot_dimension_numbers<[1], [0], [0], [1], [0, 0, 1, 1], [], []>} : vector<8x3136xbf16>, vector<3136x1024xbf16>, vector<8x1024xf32> -> vector<8x1024xf32>
    %c0_3 = arith.constant 0 : index
    %c0_4 = arith.constant 0 : index
    %3 = vector.load %arg3[%c0_3, %c0_4] : memref<1x1024xf32, #tpu.memory_space<vmem>>, vector<1x1024xf32>
    %4 = vector.broadcast %3 : vector<1x1024xf32> to vector<8x1024xf32>
    %5 = arith.addf %2, %4 : vector<8x1024xf32>
    %6 = arith.truncf %5 : vector<8x1024xf32> to vector<8x1024xbf16>
    %c0_5 = arith.constant 0 : index
    %c0_6 = arith.constant 0 : index
    %7 = vector.load %arg4[%c0_5, %c0_6] : memref<1024x128xbf16, #tpu.memory_space<vmem>>, vector<1024x128xbf16>
    %cst_7 = arith.constant dense<0.000000e+00> : vector<8x128xf32>
    %8 = tpu.matmul %6, %7, %cst_7 {dimension_numbers = #tpu.dot_dimension_numbers<[1], [0], [0], [1], [0, 0, 1, 1], [], []>} : vector<8x1024xbf16>, vector<1024x128xbf16>, vector<8x128xf32> -> vector<8x128xf32>
    %c0_8 = arith.constant 0 : index
    %c0_9 = arith.constant 0 : index
    %9 = vector.load %arg5[%c0_8, %c0_9] : memref<1x128xf32, #tpu.memory_space<vmem>>, vector<1x128xf32>
    %10 = vector.broadcast %9 : vector<1x128xf32> to vector<8x128xf32>
    %11 = arith.addf %8, %10 : vector<8x128xf32>
    %12 = arith.truncf %11 : vector<8x128xf32> to vector<8x128xbf16>
    %c0_10 = arith.constant 0 : index
    %c0_11 = arith.constant 0 : index
    %13 = vector.load %arg6[%c0_10, %c0_11] : memref<128x128xbf16, #tpu.memory_space<vmem>>, vector<128x128xbf16>
    %cst_12 = arith.constant dense<0.000000e+00> : vector<8x128xf32>
    %14 = tpu.matmul %12, %13, %cst_12 {dimension_numbers = #tpu.dot_dimension_numbers<[1], [0], [0], [1], [0, 0, 1, 1], [], []>} : vector<8x128xbf16>, vector<128x128xbf16>, vector<8x128xf32> -> vector<8x128xf32>
    %c0_13 = arith.constant 0 : index
    %c0_14 = arith.constant 0 : index
    %15 = vector.load %arg7[%c0_13, %c0_14] : memref<1x128xf32, #tpu.memory_space<vmem>>, vector<1x128xf32>
    %16 = vector.broadcast %15 : vector<1x128xf32> to vector<8x128xf32>
    %17 = arith.addf %14, %16 : vector<8x128xf32>
    %c0_15 = arith.constant 0 : index
    %c0_16 = arith.constant 0 : index
    %18 = vector.load %arg8[%c0_15, %c0_16] : memref<8x128xf32, #tpu.memory_space<vmem>>, vector<8x128xf32>
    tpu.vector_store %arg8[%c0_15, %c0_16], %17 {strides = array<i32>} : memref<8x128xf32, #tpu.memory_space<vmem>>, vector<8x128xf32>,
    return
  }
  func.func @transform_0(%arg0: i32) -> (i32, i32) {
    %c0_i32 = arith.constant 0 : i32
    %c0_i32_0 = arith.constant 0 : i32
    return %arg0, %c0_i32 : i32, i32
  }
  func.func @transform_1(%arg0: i32) -> (i32, i32) {
    %c0_i32 = arith.constant 0 : i32
    %c0_i32_0 = arith.constant 0 : i32
    %c0_i32_1 = arith.constant 0 : i32
    return %c0_i32, %c0_i32_0 : i32, i32
  }
  func.func @transform_2(%arg0: i32) -> (i32, i32) {
    %c0_i32 = arith.constant 0 : i32
    %c0_i32_0 = arith.constant 0 : i32
    %c0_i32_1 = arith.constant 0 : i32
    return %c0_i32, %c0_i32_0 : i32, i32
  }
  func.func @transform_3(%arg0: i32) -> (i32, i32) {
    %c0_i32 = arith.constant 0 : i32
    %c0_i32_0 = arith.constant 0 : i32
    %c0_i32_1 = arith.constant 0 : i32
    return %c0_i32, %c0_i32_0 : i32, i32
  }
  func.func @transform_4(%arg0: i32) -> (i32, i32) {
    %c0_i32 = arith.constant 0 : i32
    %c0_i32_0 = arith.constant 0 : i32
    %c0_i32_1 = arith.constant 0 : i32
    return %c0_i32, %c0_i32_0 : i32, i32
  }
  func.func @transform_5(%arg0: i32) -> (i32, i32) {
    %c0_i32 = arith.constant 0 : i32
    %c0_i32_0 = arith.constant 0 : i32
    %c0_i32_1 = arith.constant 0 : i32
    return %c0_i32, %c0_i32_0 : i32, i32
  }
  func.func @transform_6(%arg0: i32) -> (i32, i32) {
    %c0_i32 = arith.constant 0 : i32
    %c0_i32_0 = arith.constant 0 : i32
    %c0_i32_1 = arith.constant 0 : i32
    return %c0_i32, %c0_i32_0 : i32, i32
  }
  func.func @transform_7(%arg0: i32) -> (i32, i32) {
    %c0_i32 = arith.constant 0 : i32
    %c0_i32_0 = arith.constant 0 : i32
    return %arg0, %c0_i32 : i32, i32
  }
}

</mosaic_0001>

<bundles_post_ra>
// kernel: cnn_forward.3
= control target key start
LH: loop header
LB: loop body
LE: loop exit
PB: predicated region body
PF: predicated region fallthrough
CT: control target
= control target key end

     0   :  { %s1687_s12 = smov 0   ;;  %s2270_s0 = inlined_call_operand.vmem [shape: bf16[1600,128], index: 0, kind: input, shape index: {}]   ;;  %s2271_s1 = inlined_call_operand.vmem [shape: bf16[128,128], index: 1, kind: input, shape index: {}]   ;;  %s2272_s2 = inlined_call_operand.vmem [shape: f32[1,128], index: 2, kind: input, shape index: {}]   ;;  %s2273_s3 = inlined_call_operand.vmem [shape: f32[400,128], index: 3, kind: output, shape index: {}]  }
   0x1 LB: > { %s1335_s13 = sadd.s32 4294967295, %s1665_s12   ;;  %p1339_p0 = scmp.ge.s32.totalorder %s1665_s12, 1  ;;  %s1665_s12 = sphi %s1687_s12, %s13_s12  }
   0x2   : > { %p138_p1 = scmp.lt.s32.totalorder %s1665_s12, 3 }
   0x4   : > { %p139_p2 = pnand %p1339_p0, %p138_p1 }
   0x6   : > { %142 = sbr.rel (%p139_p2) target bundleno = 373 (0x175), region = 32 }
   0xd   : > { %v1601_v0 = vld [vmem:[%s2271_s1] sm:$0xff]   ;;  %s162_s16 = smul.u32 100, %s1335_s13  ;;  %v1602_v1 = vld [vmem:[%s2271_s1 + $0x8] sm:$0xff]   ;;  %v1603_v2 = vld [vmem:[%s2271_s1 + $0x10] sm:$0xff]  }
   0xe   : > { %1461 = vmatprep.subr.bf16.mxu0 %v1601_v0  ;;  %1577 = vmatprep.subr.bf16.mxu1 %v1601_v0  ;;  %v1604_v3 = vld [vmem:[%s2271_s1 + $0x18] sm:$0xff]   ;;  %v1605_v6 = vld [vmem:[%s2271_s1 + $0x20] sm:$0xff]   ;;  %v1606_v7 = vld [vmem:[%s2271_s1 + $0x28] sm:$0xff]   ;;  %s1908_s10 = smul.u32 25, %s1335_s13 }
   0xf   : > { %p163_p3 = scmp.lt.s32.totalorder %s162_s16, 199  ;;  %1462 = vmatpush3.bf16.msra.mxu0 %v1601_v0  ;;  %1585 = vmatpush3.bf16.msra.mxu1 %v1601_v0  ;;  %v1607_v8 = vld [vmem:[%s2271_s1 + $0x30] sm:$0xff]   ;;  %v1608_v9 = vld [vmem:[%s2271_s1 + $0x38] sm:$0xff]  }
  0x10   : > { %1463 = vmatprep.subr.bf16.mxu0 %v1602_v1  ;;  %1578 = vmatprep.subr.bf16.mxu1 %v1602_v1  ;;  %p169_p4 = scmp.lt.s32.totalorder %s1908_s10, 49 }
  0x11   : > { %s2326_s16 = smov (!%p163_p3, %s162_s16), 199 }
  0x12   : > { %s1340_s21 = sshll.u32 %s2326_s16, 2  ;;  %s2328_s10 = smov (!%p169_p4, %s1908_s10), 49 }
  0x13   : > { %1464 = vmatpush3.bf16.msra.mxu0 %v1602_v1  ;;  %1586 = vmatpush3.bf16.msra.mxu1 %v1602_v1  ;;  %s1712_s26 = scalar_lea.vmem %s2270_s0, %s1340_s21  ;;  %s1341_s11 = sshll.u32 %s2328_s10, 3 }
  0x14   : > { %1465 = vmatprep.subr.bf16.mxu0 %v1603_v2  ;;  %1579 = vmatprep.subr.bf16.mxu1 %v1603_v2  ;;  %v1609_v4 = vld [vmem:[%s1712_s26] sm:$0xff]   ;;  %v1610_v5 = vld [vmem:[%s1712_s26 + $0xd0] sm:$0xff]   ;;  %v1611_v10 = vld [vmem:[%s1712_s26 + $0x8] sm:$0xff]   ;;  %s2050_s15 = scalar_lea.vmem %s2273_s3, %s1341_s11 }
  0x15   : > { %1477 = vmatprep.mubr.bf16.mxu0 %v1609_v4  ;;  %1529 = vmatprep.mubr.bf16.mxu1 %v1610_v5  ;;  %v1612_v11 = vld [vmem:[%s1712_s26 + $0xd8] sm:$0xff]   ;;  %v1613_v12 = vld [vmem:[%s1712_s26 + $0x10] sm:$0xff]   ;;  %v1614_v13 = vld [vmem:[%s1712_s26 + $0xe0] sm:$0xff]  }
  0x16   : > { %v1615_v14 = vld [vmem:[%s1712_s26 + $0x18] sm:$0xff]   ;;  %v1616_v15 = vld [vmem:[%s1712_s26 + $0xe8] sm:$0xff]   ;;  %v1617_v16 = vld [vmem:[%s1712_s26 + $0x20] sm:$0xff]  }
  0x17   : > { %1466 = vmatpush3.bf16.msra.mxu0 %v1603_v2  ;;  %1587 = vmatpush3.bf16.msra.mxu1 %v1603_v2  ;;  %v1618_v17 = vld [vmem:[%s1712_s26 + $0xf0] sm:$0xff]   ;;  %v1619_v18 = vld [vmem:[%s1712_s26 + $0x28] sm:$0xff]   ;;  %v1620_v19 = vld [vmem:[%s1712_s26 + $0xf8] sm:$0xff]  }
  0x18   : > { %1467 = vmatprep.subr.bf16.mxu0 %v1604_v3  ;;  %1580 = vmatprep.subr.bf16.mxu1 %v1604_v3  ;;  %v1621_v20 = vld [vmem:[%s1712_s26 + $0x30] sm:$0xff]   ;;  %v1622_v21 = vld [vmem:[%s1712_s26 + $0x100] sm:$0xff]   ;;  %v1623_v22 = vld [vmem:[%s1712_s26 + $0x38] sm:$0xff]  }
  0x19   : > { %v1624_v23 = vld [vmem:[%s1712_s26 + $0x108] sm:$0xff]   ;;  %v1625_v24 = vld [vmem:[%s1712_s26 + $0x40] sm:$0xff]   ;;  %v1626_v25 = vld [vmem:[%s1712_s26 + $0x110] sm:$0xff]  }
  0x1a   : > { %v1627_v26 = vld [vmem:[%s1712_s26 + $0x48] sm:$0xff]   ;;  %v1628_v27 = vld [vmem:[%s1712_s26 + $0x118] sm:$0xff]   ;;  %v1629_v28 = vld [vmem:[%s1712_s26 + $0x50] sm:$0xff]  }
  0x1b   : > { %1468 = vmatpush3.bf16.msra.mxu0 %v1604_v3  ;;  %1588 = vmatpush3.bf16.msra.mxu1 %v1604_v3  ;;  %v1630_v29 = vld [vmem:[%s1712_s26 + $0x120] sm:$0xff]   ;;  %v1631_v30 = vld [vmem:[%s1712_s26 + $0x58] sm:$0xff]   ;;  %v1632_v31 = vld [vmem:[%s1712_s26 + $0x128] sm:$0xff]  }
  0x1c   : > { %1469 = vmatprep.subr.bf16.mxu0 %v1605_v6  ;;  %1581 = vmatprep.subr.bf16.mxu1 %v1605_v6  ;;  %v1633_v32 = vld [vmem:[%s1712_s26 + $0x60] sm:$0xff]   ;;  %v1634_v33 = vld [vmem:[%s1712_s26 + $0x130] sm:$0xff]   ;;  %v1635_v34 = vld [vmem:[%s1712_s26 + $0x68] sm:$0xff]  }
  0x1d   : > { %v1636_v35 = vld [vmem:[%s1712_s26 + $0x138] sm:$0xff]   ;;  %v1637_v36 = vld [vmem:[%s1712_s26 + $0x70] sm:$0xff]   ;;  %v1638_v37 = vld [vmem:[%s1712_s26 + $0x140] sm:$0xff]  }
  0x1e   : > { %v1639_v38 = vld [vmem:[%s1712_s26 + $0x78] sm:$0xff]   ;;  %v1640_v39 = vld [vmem:[%s1712_s26 + $0x148] sm:$0xff]   ;;  %v1641_v40 = vld [vmem:[%s1712_s26 + $0x80] sm:$0xff]  }
  0x1f   : > { %1470 = vmatpush3.bf16.msra.mxu0 %v1605_v6  ;;  %1589 = vmatpush3.bf16.msra.mxu1 %v1605_v6  ;;  %v1642_v41 = vld [vmem:[%s1712_s26 + $0x150] sm:$0xff]   ;;  %v1643_v42 = vld [vmem:[%s1712_s26 + $0x88] sm:$0xff]   ;;  %v1644_v43 = vld [vmem:[%s1712_s26 + $0x158] sm:$0xff]  }
  0x20   : > { %1471 = vmatprep.subr.bf16.mxu0 %v1606_v7  ;;  %1582 = vmatprep.subr.bf16.mxu1 %v1606_v7  ;;  %v1645_v44 = vld [vmem:[%s1712_s26 + $0x90] sm:$0xff]   ;;  %v1646_v45 = vld [vmem:[%s1712_s26 + $0x160] sm:$0xff]   ;;  %v1647_v46 = vld [vmem:[%s1712_s26 + $0x98] sm:$0xff]  }
  0x21   : > { %v1648_v47 = vld [vmem:[%s1712_s26 + $0x168] sm:$0xff]   ;;  %v1649_v48 = vld [vmem:[%s1712_s26 + $0xa0] sm:$0xff]   ;;  %v1650_v49 = vld [vmem:[%s1712_s26 + $0x170] sm:$0xff]  }
  0x22   : > { %v1651_v50 = vld [vmem:[%s1712_s26 + $0xa8] sm:$0xff]   ;;  %v1652_v51 = vld [vmem:[%s1712_s26 + $0x178] sm:$0xff]   ;;  %v1653_v52 = vld [vmem:[%s1712_s26 + $0xb0] sm:$0xff]  }
  0x23   : > { %1472 = vmatpush3.bf16.msra.mxu0 %v1606_v7  ;;  %1590 = vmatpush3.bf16.msra.mxu1 %v1606_v7  ;;  %v1654_v53 = vld [vmem:[%s1712_s26 + $0x180] sm:$0xff]   ;;  %v1655_v54 = vld [vmem:[%s1712_s26 + $0xb8] sm:$0xff]   ;;  %v1656_v55 = vld [vmem:[%s1712_s26 + $0x188] sm:$0xff]  }
  0x24   : > { %1473 = vmatprep.subr.bf16.mxu0 %v1607_v8  ;;  %1583 = vmatprep.subr.bf16.mxu1 %v1607_v8  ;;  %v1657_v56 = vld [vmem:[%s1712_s26 + $0xc0] sm:$0xff]   ;;  %v1658_v57 = vld [vmem:[%s1712_s26 + $0xc8] sm:$0xff]  }
  0x27   : > { %1474 = vmatpush3.bf16.msra.mxu0 %v1607_v8  ;;  %1591 = vmatpush3.bf16.msra.mxu1 %v1607_v8 }
  0x28   : > { %1475 = vmatprep.subr.bf16.mxu0 %v1608_v9  ;;  %1584 = vmatprep.subr.bf16.mxu1 %v1608_v9 }
  0x2b   : > { %1476 = vmatpush3.bf16.msra.mxu0 %v1608_v9  ;;  %1592 = vmatpush3.bf16.msra.mxu1 %v1608_v9 }
  0x2e   : > { %1478 = vmatmul.mubr.bf16.vlgmr.msra.gmra.mrb[0].mxu0 %v1611_v10  ;;  %1530 = vmatmul.mubr.bf16.vlgmr.msra.gmra.mrb[0].mxu1 %v1612_v11 }
  0x2f   : > { %1481 = vmatprep.mubr.bf16.mxu0 %v1613_v12  ;;  %1533 = vmatprep.mubr.bf16.mxu1 %v1614_v13 }
  0x36   : > { %1482 = vmatmul.mubr.bf16.gmra.mrb[4].mxu0 %v1615_v14  ;;  %1534 = vmatmul.mubr.bf16.gmra.mrb[4].mxu1 %v1616_v15 }
  0x37   : > { %1485 = vmatprep.mubr.bf16.mxu0 %v1617_v16  ;;  %1537 = vmatprep.mubr.bf16.mxu1 %v1618_v17 }
  0x3e   : > { %1486 = vmatmul.mubr.bf16.gmra.mrb[8].mxu0 %v1619_v18  ;;  %1538 = vmatmul.mubr.bf16.gmra.mrb[8].mxu1 %v1620_v19 }
  0x3f   : > { %1489 = vmatprep.mubr.bf16.mxu0 %v1621_v20  ;;  %1541 = vmatprep.mubr.bf16.mxu1 %v1622_v21 }
  0x46   : > { %1490 = vmatmul.mubr.bf16.gmra.mrb[12].mxu0 %v1623_v22  ;;  %1542 = vmatmul.mubr.bf16.gmra.mrb[12].mxu1 %v1624_v23 }
  0x47   : > { %1493 = vmatprep.mubr.bf16.mxu0 %v1625_v24  ;;  %1545 = vmatprep.mubr.bf16.mxu1 %v1626_v25 }
  0x4e   : > { %1494 = vmatmul.mubr.bf16.gmra.mrb[16].mxu0 %v1627_v26  ;;  %1546 = vmatmul.mubr.bf16.gmra.mrb[16].mxu1 %v1628_v27  ;;  %v1801_v26 = vld [vmem:[%s2272_s2] ss:$0 sm:$0xff] }
  0x4f   : > { %1497 = vmatprep.mubr.bf16.mxu0 %v1629_v28  ;;  %1549 = vmatprep.mubr.bf16.mxu1 %v1630_v29 }
  0x56   : > { %1498 = vmatmul.mubr.bf16.gmra.mrb[20].mxu0 %v1631_v30  ;;  %1550 = vmatmul.mubr.bf16.gmra.mrb[20].mxu1 %v1632_v31 }
  0x57   : > { %1501 = vmatprep.mubr.bf16.mxu0 %v1633_v32  ;;  %1553 = vmatprep.mubr.bf16.mxu1 %v1634_v33 }
  0x5e   : > { %1502 = vmatmul.mubr.bf16.gmra.mrb[24].mxu0 %v1635_v34  ;;  %1554 = vmatmul.mubr.bf16.gmra.mrb[24].mxu1 %v1636_v35 }
  0x5f   : > { %1505 = vmatprep.mubr.bf16.mxu0 %v1637_v36  ;;  %1557 = vmatprep.mubr.bf16.mxu1 %v1638_v37 }
  0x66   : > { %1506 = vmatmul.mubr.bf16.gmra.mrb[28].mxu0 %v1639_v38  ;;  %1558 = vmatmul.mubr.bf16.gmra.mrb[28].mxu1 %v1640_v39 }
  0x67   : > { %1509 = vmatprep.mubr.bf16.mxu0 %v1641_v40  ;;  %1561 = vmatprep.mubr.bf16.mxu1 %v1642_v41 }
  0x6e   : > { %1510 = vmatmul.mubr.bf16.gmra.mrb[32].mxu0 %v1643_v42  ;;  %1562 = vmatmul.mubr.bf16.gmra.mrb[32].mxu1 %v1644_v43 }
  0x6f   : > { %1513 = vmatprep.mubr.bf16.mxu0 %v1645_v44  ;;  %1565 = vmatprep.mubr.bf16.mxu1 %v1646_v45 }
  0x76   : > { %1514 = vmatmul.mubr.bf16.gmra.mrb[36].mxu0 %v1647_v46  ;;  %1566 = vmatmul.mubr.bf16.gmra.mrb[36].mxu1 %v1648_v47 }
  0x77   : > { %1517 = vmatprep.mubr.bf16.mxu0 %v1649_v48  ;;  %1569 = vmatprep.mubr.bf16.mxu1 %v1650_v49 }
  0x7e   : > { %1518 = vmatmul.mubr.bf16.gmra.mrb[40].mxu0 %v1651_v50  ;;  %1570 = vmatmul.mubr.bf16.gmra.mrb[40].mxu1 %v1652_v51 }
  0x7f   : > { %1521 = vmatprep.mubr.bf16.mxu0 %v1653_v52  ;;  %1573 = vmatprep.mubr.bf16.mxu1 %v1654_v53 }
  0x86   : > { %1522 = vmatmul.mubr.bf16.gmra.mrb[44].mxu0 %v1655_v54  ;;  %1574 = vmatmul.mubr.bf16.gmra.mrb[44].mxu1 %v1656_v55 }
  0x87   : > { %1525 = vmatprep.mubr.bf16.mxu0 %v1657_v56 }
  0x8e   : > { %1526 = vmatmul.mubr.bf16.gmra.mrb[48].mxu0 %v1658_v57 }
 0x101   : > { %v1479_v58 = vpop.f32.mrb[0].mxu0  ;;  %v1531_v59 = vpop.f32.mrb[0].mxu1 }
 0x102   : > { %v680_v60 = vpop.f32.mrb[1].mxu0  ;;  %v888_v61 = vpop.f32.mrb[1].mxu1  ;;  %v1808_v29 = vadd.f32 %v1479_v58, %v1801_v26  ;;  %v1811_v30 = vadd.f32 %v1531_v59, %v1801_v26 }
 0x103   : > { %v1480_v62 = vpop.f32.mrb[2].mxu0  ;;  %v1532_v63 = vpop.f32.mrb[2].mxu1  ;;  %v1818_v33 = vadd.f32 %v1801_v26, %v680_v60  ;;  %v1821_v34 = vadd.f32 %v1801_v26, %v888_v61 }
 0x104   : > { %v683_v0 = vpop.f32.mrb[3].mxu0  ;;  %v891_v1 = vpop.f32.mrb[3].mxu1  ;;  %v1828_v37 = vadd.f32 %v1480_v62, %v1801_v26  ;;  %v1834_v39 = vadd.f32 %v1532_v63, %v1801_v26 }
 0x105   : > { %v1831_v38 = vadd.f32 %v1801_v26, %v683_v0  ;;  %v1837_v40 = vadd.f32 %v1801_v26, %v891_v1 }
 0x109   : > { %v1483_v2 = vpop.f32.mrb[4].mxu0  ;;  %v1535_v3 = vpop.f32.mrb[4].mxu1 }
 0x10a   : > { %v696_v4 = vpop.f32.mrb[5].mxu0  ;;  %v904_v5 = vpop.f32.mrb[5].mxu1  ;;  %v1844_v43 = vadd.f32 %v1483_v2, %v1801_v26  ;;  %v1850_v45 = vadd.f32 %v1535_v3, %v1801_v26 }
 0x10b   : > { %v1484_v6 = vpop.f32.mrb[6].mxu0  ;;  %v1536_v7 = vpop.f32.mrb[6].mxu1  ;;  %v1847_v44 = vadd.f32 %v1801_v26, %v696_v4  ;;  %v1853_v46 = vadd.f32 %v1801_v26, %v904_v5 }
 0x10c   : > { %v699_v8 = vpop.f32.mrb[7].mxu0  ;;  %v907_v9 = vpop.f32.mrb[7].mxu1  ;;  %v1858_v49 = vadd.f32 %v1484_v6, %v1801_v26  ;;  %v1866_v53 = vadd.f32 %v1536_v7, %v1801_v26 }
 0x10d   : > { %v1863_v52 = vadd.f32 %v1801_v26, %v699_v8  ;;  %v1885_v2 = vadd.f32 %v1801_v26, %v907_v9 }
 0x111   : > { %v1487_v10 = vpop.f32.mrb[8].mxu0  ;;  %v1539_v11 = vpop.f32.mrb[8].mxu1 }
 0x112   : > { %v712_v12 = vpop.f32.mrb[9].mxu0  ;;  %v920_v13 = vpop.f32.mrb[9].mxu1  ;;  %v1882_v1 = vadd.f32 %v1487_v10, %v1801_v26  ;;  %v1888_v3 = vadd.f32 %v1539_v11, %v1801_v26 }
 0x113   : > { %v1776_v14 = vpop.f32.mrb[10].mxu0  ;;  %v1778_v15 = vpop.f32.mrb[10].mxu1  ;;  %v1897_v8 = vadd.f32 %v1801_v26, %v712_v12  ;;  %v1900_v10 = vadd.f32 %v1801_v26, %v920_v13 }
 0x114   : > { %v715_v16 = vpop.f32.mrb[11].mxu0  ;;  %v1780_v17 = vpop.f32.mrb[11].mxu1  ;;  %v1912_v11 = vadd.f32 %v1776_v14, %v1801_v26  ;;  %v1919_v12 = vadd.f32 %v1778_v15, %v1801_v26 }
 0x115   : > { %v1915_v61 = vadd.f32 %v1801_v26, %v715_v16  ;;  %v1923_v13 = vadd.f32 %v1801_v26, %v1780_v17 }
 0x119   : > { %v1782_v18 = vpop.f32.mrb[12].mxu0  ;;  %v1784_v19 = vpop.f32.mrb[12].mxu1 }
 0x11a   : > { %v1786_v20 = vpop.f32.mrb[13].mxu0  ;;  %v1788_v21 = vpop.f32.mrb[13].mxu1  ;;  %v1931_v14 = vadd.f32 %v1782_v18, %v1801_v26  ;;  %v1939_v15 = vadd.f32 %v1784_v19, %v1801_v26 }
 0x11b   : > { %v1790_v22 = vpop.f32.mrb[14].mxu0  ;;  %v1792_v23 = vpop.f32.mrb[14].mxu1  ;;  %v1935_v16 = vadd.f32 %v1801_v26, %v1786_v20  ;;  %v1943_v17 = vadd.f32 %v1801_v26, %v1788_v21 }
 0x11c   : > { %v1794_v24 = vpop.f32.mrb[15].mxu0  ;;  %v1796_v25 = vpop.f32.mrb[15].mxu1  ;;  %v1950_v18 = vadd.f32 %v1790_v22, %v1801_v26  ;;  %v1960_v21 = vadd.f32 %v1792_v23, %v1801_v26 }
 0x11d   : > { %v1956_v19 = vadd.f32 %v1801_v26, %v1794_v24  ;;  %v1974_v56 = vadd.f32 %v1801_v26, %v1796_v25 }
 0x11e   : > { %2277 = vst [vmem:[#allocation4_spill] sm:$0xff] %v1960_v21 }
 0x121   : > { %v1803_v27 = vpop.f32.mrb[16].mxu0  ;;  %v1805_v28 = vpop.f32.mrb[16].mxu1 }
 0x122   : > { %v1813_v31 = vpop.f32.mrb[17].mxu0  ;;  %v1815_v32 = vpop.f32.mrb[17].mxu1  ;;  %v1986_v50 = vadd.f32 %v1803_v27, %v1801_v26  ;;  %v1990_v25 = vadd.f32 %v1805_v28, %v1801_v26 }
 0x123   : > { %v1823_v35 = vpop.f32.mrb[18].mxu0  ;;  %v1825_v36 = vpop.f32.mrb[18].mxu1  ;;  %v2001_v27 = vadd.f32 %v1801_v26, %v1813_v31  ;;  %v2005_v28 = vadd.f32 %v1801_v26, %v1815_v32 }
 0x124   : > { %v1839_v41 = vpop.f32.mrb[19].mxu0  ;;  %v1841_v42 = vpop.f32.mrb[19].mxu1 }
 0x129   : > { %v1876_v62 = vpop.f32.mrb[20].mxu0  ;;  %v1878_v63 = vpop.f32.mrb[20].mxu1 }
 0x12a   : > { %v1890_v4 = vpop.f32.mrb[21].mxu0  ;;  %v1892_v5 = vpop.f32.mrb[21].mxu1 }
 0x12b   : > { %v1902_v0 = vpop.f32.mrb[22].mxu0  ;;  %v1904_v9 = vpop.f32.mrb[22].mxu1 }
 0x12c   : > { %2275 = vst [vmem:[#allocation2_spill] sm:$0xff] %v1902_v0  ;;  %2276 = vst [vmem:[#allocation3_spill] sm:$0xff] %v1904_v9  ;;  %v1925_v7 = vpop.f32.mrb[23].mxu0  ;;  %v1927_v59 = vpop.f32.mrb[23].mxu1 }
 0x131   : > { %v1503_v6 = vpop.f32.mrb[24].mxu0  ;;  %v1555_v51 = vpop.f32.mrb[24].mxu1 }
 0x132   : > { %v785_v22 = vadd.f32 %v1503_v6, %v1801_v26  ;;  %v993_v20 = vadd.f32 %v1555_v51, %v1801_v26  ;;  %v1978_v58 = vpop.f32.mrb[25].mxu0  ;;  %v1980_v54 = vpop.f32.mrb[25].mxu1 }
 0x133   : > { %2278 = vst [vmem:[#allocation5_spill] sm:$0xff] %v1978_v58  ;;  %2279 = vst [vmem:[#allocation6_spill] sm:$0xff] %v1980_v54  ;;  %v1504_v60 = vpop.f32.mrb[26].mxu0  ;;  %v1556_v6 = vpop.f32.mrb[26].mxu1 }
 0x134   : > { %v1105_v51 = vmax.f32 %v785_v22, 0.0  ;;  %v1157_v48 = vmax.f32 %v993_v20, 0.0  ;;  %v788_v24 = vadd.f32 %v1504_v60, %v1801_v26  ;;  %v996_v23 = vadd.f32 %v1556_v6, %v1801_v26  ;;  %v779_v47 = vpop.f32.mrb[27].mxu0  ;;  %v987_v57 = vpop.f32.mrb[27].mxu1 }
 0x135   : > { %v780_v55 = vadd.f32 %v1801_v26, %v779_v47  ;;  %v988_v22 = vadd.f32 %v1801_v26, %v987_v57  ;;  %v2280_v20 = vmax.f32 %v1831_v38, 0.0  ;;  %v2282_v60 = vmax.f32 %v1837_v40, 0.0 }
 0x136   : > { %v1106_v54 = vmax.f32 %v788_v24, 0.0  ;;  %v1158_v9 = vmax.f32 %v996_v23, 0.0  ;;  %v2022_v47 = vadd.f32 %v1823_v35, %v1801_v26  ;;  %v2283_v57 = vmax.f32 %v1808_v29, 0.0 }
 0x137   : > { %v2011_v58 = vmax.f32 %v2280_v20, %v1105_v51  ;;  %v2015_v6 = vmax.f32 %v2282_v60, %v1157_v48  ;;  %v1104_v32 = vmax.f32 %v780_v55, 0.0  ;;  %v1156_v21 = vmax.f32 %v988_v22, 0.0 }
 0x138   : > { %v1181_v40 = vmax.f32 %v2283_v57, %v1106_v54  ;;  %v2284_v48 = vmax.f32 %v1811_v30, 0.0  ;;  %v2034_v55 = vadd.f32 %v1825_v36, %v1801_v26  ;;  %v2285_v51 = vmax.f32 %v1818_v33, 0.0 }
 0x139   : > { %2281 = vst [vmem:[#allocation7_spill] sm:$0xff] %v2011_v58  ;;  %v2287_v35 = vmax.f32 %v1821_v34, 0.0  ;;  %v1507_v60 = vpop.f32.mrb[28].mxu0  ;;  %v1559_v29 = vpop.f32.mrb[28].mxu1  ;;  %v2044_v30 = vadd.f32 %v1801_v26, %v1839_v41 }
 0x13a   : > { %v2029_v24 = vmax.f32 %v2284_v48, %v1158_v9  ;;  %v2038_v22 = vmax.f32 %v2285_v51, %v1104_v32  ;;  %v801_v33 = vadd.f32 %v1507_v60, %v1801_v26  ;;  %v1009_v36 = vadd.f32 %v1559_v29, %v1801_v26  ;;  %v792_v34 = vpop.f32.mrb[29].mxu0  ;;  %v1000_v9 = vpop.f32.mrb[29].mxu1 }
 0x13b   : > { %v1206_v20 = vmax.f32 %v2287_v35, %v1156_v21  ;;  %v2056_v21 = vadd.f32 %v1801_v26, %v1841_v42  ;;  %v793_v32 = vadd.f32 %v1801_v26, %v792_v34  ;;  %v1001_v57 = vadd.f32 %v1801_v26, %v1000_v9  ;;  %v1508_v48 = vpop.f32.mrb[30].mxu0  ;;  %v1560_v51 = vpop.f32.mrb[30].mxu1 }
 0x13c   : > { %2286 = vst [vmem:[#allocation8_spill] sm:$0xff] %v2038_v22  ;;  %v1109_v35 = vmax.f32 %v801_v33, 0.0  ;;  %v1161_v54 = vmax.f32 %v1009_v36, 0.0  ;;  %v804_v60 = vadd.f32 %v1508_v48, %v1801_v26  ;;  %v1012_v23 = vadd.f32 %v1560_v51, %v1801_v26  ;;  %v795_v29 = vpop.f32.mrb[31].mxu0  ;;  %v1003_v38 = vpop.f32.mrb[31].mxu1 }
 0x13d   : > { %v1231_v41 = vmax.f32 %v1181_v40, %v1206_v20  ;;  %v1107_v31 = vmax.f32 %v793_v32, 0.0  ;;  %v1159_v0 = vmax.f32 %v1001_v57, 0.0  ;;  %v796_v42 = vadd.f32 %v1801_v26, %v795_v29 }
 0x13e   : > { %v1004_v40 = vadd.f32 %v1801_v26, %v1003_v38  ;;  %v2288_v20 = vmax.f32 %v1863_v52, 0.0  ;;  %v2289_v9 = vmax.f32 %v1885_v2, 0.0  ;;  %v1110_v36 = vmax.f32 %v804_v60, 0.0 }
 0x13f   : > { %1256 = vst [vmem:[%s2050_s15 + $0x10] sm:$0xff] %v1231_v41  ;;  %v1162_v48 = vmax.f32 %v1012_v23, 0.0  ;;  %v2290_v51 = vmax.f32 %v1828_v37, 0.0  ;;  %v2291_v41 = vmax.f32 %v1834_v39, 0.0  ;;  %v1108_v57 = vmax.f32 %v796_v42, 0.0 }
 0x140   : > { %v1184_v34 = vmax.f32 %v2288_v20, %v1109_v35  ;;  %v2069_v33 = vmax.f32 %v2289_v9, %v1161_v54  ;;  %v1160_v22 = vmax.f32 %v1004_v40, 0.0  ;;  %v1098_v29 = vmax.f32 %v2022_v47, 0.0 }
 0x141   : > { %v1182_v58 = vmax.f32 %v2290_v51, %v1107_v31  ;;  %v1209_v32 = vmax.f32 %v2291_v41, %v1159_v0  ;;  %v1150_v52 = vmax.f32 %v2034_v55, 0.0  ;;  %v2292_v38 = vmax.f32 %v1844_v43, 0.0  ;;  %v1511_v42 = vpop.f32.mrb[32].mxu0  ;;  %v1563_v40 = vpop.f32.mrb[32].mxu1 }
 0x142   : > { %v2293_v54 = vmax.f32 %v1850_v45, 0.0  ;;  %v2294_v39 = vmax.f32 %v1847_v44, 0.0  ;;  %v2295_v35 = vmax.f32 %v1853_v46, 0.0  ;;  %v1096_v20 = vmax.f32 %v2044_v30, 0.0 }
 0x143   : > { %v1185_v2 = vmax.f32 %v2292_v38, %v1110_v36  ;;  %v1232_v37 = vmax.f32 %v1182_v58, %v2015_v6  ;;  %v1234_v31 = vmax.f32 %v1184_v34, %v1209_v32  ;;  %v1148_v43 = vmax.f32 %v2056_v21, 0.0  ;;  %v808_v36 = vpop.f32.mrb[33].mxu0  ;;  %v1016_v58 = vpop.f32.mrb[33].mxu1 }
 0x144   : > { %v2081_v23 = vmax.f32 %v2293_v54, %v1162_v48  ;;  %v1183_v0 = vmax.f32 %v2294_v39, %v1108_v57  ;;  %v1210_v60 = vmax.f32 %v2295_v35, %v1160_v22  ;;  %v817_v9 = vadd.f32 %v1511_v42, %v1801_v26  ;;  %v1512_v34 = vpop.f32.mrb[34].mxu0  ;;  %v1564_v48 = vpop.f32.mrb[34].mxu1 }
 0x145   : > { %v1025_v45 = vadd.f32 %v1563_v40, %v1801_v26  ;;  %1257 = vst [vmem:[%s2050_s15 + $0x18] sm:$0xff] %v1232_v37  ;;  %1259 = vst [vmem:[%s2050_s15 + $0x28] sm:$0xff] %v1234_v31  ;;  %v809_v6 = vadd.f32 %v1801_v26, %v808_v36  ;;  %v1017_v22 = vadd.f32 %v1801_v26, %v1016_v58  ;;  %v811_v38 = vpop.f32.mrb[35].mxu0  ;;  %v1019_v54 = vpop.f32.mrb[35].mxu1  ;;  %v2296_v39 = vmax.f32 %v1915_v61, 0.0 }
 0x146   : > { %v1233_v44 = vmax.f32 %v1183_v0, %v2029_v24  ;;  %v1235_v46 = vmax.f32 %v1185_v2, %v1210_v60  ;;  %v1113_v51 = vmax.f32 %v817_v9, 0.0  ;;  %v820_v32 = vadd.f32 %v1512_v34, %v1801_v26 }
 0x147   : > { %v1165_v41 = vmax.f32 %v1025_v45, 0.0  ;;  %v1028_v57 = vadd.f32 %v1564_v48, %v1801_v26  ;;  %v1111_v37 = vmax.f32 %v809_v6, 0.0  ;;  %v1163_v31 = vmax.f32 %v1017_v22, 0.0 }
 0x148   : > { %1258 = vst [vmem:[%s2050_s15 + $0x20] sm:$0xff] %v1233_v44  ;;  %1260 = vst [vmem:[%s2050_s15 + $0x30] sm:$0xff] %v1235_v46  ;;  %v812_v24 = vadd.f32 %v1801_v26, %v811_v38  ;;  %v1020_v2 = vadd.f32 %v1801_v26, %v1019_v54  ;;  %v1188_v0 = vmax.f32 %v2296_v39, %v1113_v51  ;;  %v2297_v35 = vmax.f32 %v1923_v13, 0.0 }
 0x149   : > { %v1114_v42 = vmax.f32 %v820_v32, 0.0  ;;  %v1166_v40 = vmax.f32 %v1028_v57, 0.0  ;;  %v2298_v9 = vmax.f32 %v1858_v49, 0.0  ;;  %v2299_v36 = vmax.f32 %v1866_v53, 0.0  ;;  %v1515_v57 = vpop.f32.mrb[36].mxu0 }
 0x14a   : > { %v2107_v60 = vmax.f32 %v2297_v35, %v1165_v41  ;;  %v1112_v44 = vmax.f32 %v812_v24, 0.0  ;;  %v1164_v46 = vmax.f32 %v1020_v2, 0.0  ;;  %v2115_v6 = vadd.f32 %v1876_v62, %v1801_v26  ;;  %v824_v54 = vpop.f32.mrb[37].mxu0 }
 0x14b   : > { %v1186_v45 = vmax.f32 %v2298_v9, %v1111_v37  ;;  %v1213_v58 = vmax.f32 %v2299_v36, %v1163_v31  ;;  %v2119_v61 = vadd.f32 %v1878_v63, %v1801_v26  ;;  %v2300_v13 = vmax.f32 %v1882_v1, 0.0  ;;  %v1567_v63 = vpop.f32.mrb[36].mxu1  ;;  %v1516_v24 = vpop.f32.mrb[38].mxu0 }
 0x14c   : > { %v2301_v49 = vmax.f32 %v1888_v3, 0.0  ;;  %v2302_v51 = vmax.f32 %v1897_v8, 0.0  ;;  %v2303_v41 = vmax.f32 %v1900_v10, 0.0  ;;  %v2134_v1 = vadd.f32 %v1801_v26, %v1890_v4  ;;  %v1032_v8 = vpop.f32.mrb[37].mxu1 }
 0x14d   : > { %v1189_v22 = vmax.f32 %v2300_v13, %v1114_v42  ;;  %v1236_v53 = vmax.f32 %v1186_v45, %v2069_v33  ;;  %v1238_v48 = vmax.f32 %v1188_v0, %v1213_v58  ;;  %v2138_v3 = vadd.f32 %v1801_v26, %v1892_v5  ;;  %v1568_v5 = vpop.f32.mrb[38].mxu1  ;;  %v827_v42 = vpop.f32.mrb[39].mxu0 }
 0x14e   : > { %v2125_v34 = vmax.f32 %v2301_v49, %v1166_v40  ;;  %v1187_v62 = vmax.f32 %v2302_v51, %v1112_v44  ;;  %v1214_v32 = vmax.f32 %v2303_v41, %v1164_v46  ;;  %v833_v38 = vadd.f32 %v1515_v57, %v1801_v26  ;;  %v1035_v40 = vpop.f32.mrb[39].mxu1 }
 0x14f   : > { %v1041_v33 = vadd.f32 %v1567_v63, %v1801_v26  ;;  %1261 = vst [vmem:[%s2050_s15 + $0x38] sm:$0xff] %v1236_v53  ;;  %1263 = vst [vmem:[%s2050_s15 + $0x48] sm:$0xff] %v1238_v48  ;;  %v825_v4 = vadd.f32 %v1801_v26, %v824_v54  ;;  %v1033_v31 = vadd.f32 %v1801_v26, %v1032_v8  ;;  %v2304_v58 = vmax.f32 %v1956_v19, 0.0 }
 0x150   : > { %v1237_v10 = vmax.f32 %v1187_v62, %v2081_v23  ;;  %v1239_v37 = vmax.f32 %v1189_v22, %v1214_v32  ;;  %v1117_v2 = vmax.f32 %v833_v38, 0.0  ;;  %v836_v0 = vadd.f32 %v1516_v24, %v1801_v26 }
 0x151   : > { %v1169_v39 = vmax.f32 %v1041_v33, 0.0  ;;  %v1044_v35 = vadd.f32 %v1568_v5, %v1801_v26  ;;  %v1115_v9 = vmax.f32 %v825_v4, 0.0  ;;  %v1167_v45 = vmax.f32 %v1033_v31, 0.0  ;;  %v1519_v4 = vpop.f32.mrb[40].mxu0  ;;  %v1571_v31 = vpop.f32.mrb[40].mxu1 }
 0x152   : > { %1262 = vst [vmem:[%s2050_s15 + $0x40] sm:$0xff] %v1237_v10  ;;  %1264 = vst [vmem:[%s2050_s15 + $0x50] sm:$0xff] %v1239_v37  ;;  %v828_v23 = vadd.f32 %v1801_v26, %v827_v42  ;;  %v1036_v36 = vadd.f32 %v1801_v26, %v1035_v40  ;;  %v1192_v44 = vmax.f32 %v2304_v58, %v1117_v2  ;;  %v2305_v46 = vmax.f32 %v1974_v56, 0.0  ;;  %v840_v5 = vpop.f32.mrb[41].mxu0 }
 0x153   : > { %v1118_v22 = vmax.f32 %v836_v0, 0.0  ;;  %v1170_v49 = vmax.f32 %v1044_v35, 0.0  ;;  %v2306_v53 = vmax.f32 %v1912_v11, 0.0  ;;  %v2307_v51 = vmax.f32 %v1919_v12, 0.0  ;;  %v1520_v0 = vpop.f32.mrb[42].mxu0 }
 0x154   : > { %v2157_v13 = vmax.f32 %v2305_v46, %v1169_v39  ;;  %v1116_v41 = vmax.f32 %v828_v23, 0.0  ;;  %v1168_v32 = vmax.f32 %v1036_v36, 0.0  ;;  %v1101_v57 = vmax.f32 %v2115_v6, 0.0 }
 0x155   : > { %v1190_v48 = vmax.f32 %v2306_v53, %v1115_v9  ;;  %v1217_v62 = vmax.f32 %v2307_v51, %v1167_v45  ;;  %v1153_v19 = vmax.f32 %v2119_v61, 0.0  ;;  %v2308_v63 = vmax.f32 %v1931_v14, 0.0  ;;  %v843_v45 = vpop.f32.mrb[43].mxu0 }
 0x156   : > { %v2309_v38 = vmax.f32 %v1939_v15, 0.0  ;;  %v2310_v12 = vmax.f32 %v1935_v16, 0.0  ;;  %v2311_v10 = vmax.f32 %v1943_v17, 0.0  ;;  %v2178_v14 = vadd.f32 %v1801_v26, %v1925_v7  ;;  %v1048_v16 = vpop.f32.mrb[41].mxu1 }
 0x157   : > { %v1193_v56 = vmax.f32 %v2308_v63, %v1118_v22  ;;  %v1240_v11 = vmax.f32 %v1190_v48, %v2107_v60  ;;  %v1242_v54 = vmax.f32 %v1192_v44, %v1217_v62  ;;  %v2182_v15 = vadd.f32 %v1801_v26, %v1927_v59  ;;  %v1572_v59 = vpop.f32.mrb[42].mxu1  ;;  %v2313_v62 = vld [vmem:[#allocation4_spill] sm:$0xff] }
 0x158   : > { %v2169_v33 = vmax.f32 %v2309_v38, %v1170_v49  ;;  %v1191_v8 = vmax.f32 %v2310_v12, %v1116_v41  ;;  %v1218_v37 = vmax.f32 %v2311_v10, %v1168_v32  ;;  %v849_v24 = vadd.f32 %v1519_v4, %v1801_v26  ;;  %v1051_v23 = vpop.f32.mrb[43].mxu1 }
 0x159   : > { %v1057_v60 = vadd.f32 %v1571_v31, %v1801_v26  ;;  %1265 = vst [vmem:[%s2050_s15 + $0x58] sm:$0xff] %v1240_v11  ;;  %1267 = vst [vmem:[%s2050_s15 + $0x68] sm:$0xff] %v1242_v54  ;;  %v841_v7 = vadd.f32 %v1801_v26, %v840_v5  ;;  %v1049_v39 = vadd.f32 %v1801_v26, %v1048_v16  ;;  %v2312_v48 = vmax.f32 %v1950_v18, 0.0  ;;  %v1575_v4 = vpop.f32.mrb[44].mxu1 }
 0x15a   : > { %v1241_v17 = vmax.f32 %v1191_v8, %v2125_v34  ;;  %v1243_v2 = vmax.f32 %v1193_v56, %v1218_v37  ;;  %v1121_v35 = vmax.f32 %v849_v24, 0.0  ;;  %v852_v40 = vadd.f32 %v1520_v0, %v1801_v26  ;;  %v1523_v37 = vpop.f32.mrb[44].mxu0 }
 0x15b   : > { %v1173_v42 = vmax.f32 %v1057_v60, 0.0  ;;  %v1060_v9 = vadd.f32 %v1572_v59, %v1801_v26  ;;  %v1119_v36 = vmax.f32 %v841_v7, 0.0  ;;  %v1171_v58 = vmax.f32 %v1049_v39, 0.0  ;;  %v856_v24 = vpop.f32.mrb[45].mxu0 }
 0x15c   : > { %1266 = vst [vmem:[%s2050_s15 + $0x60] sm:$0xff] %v1241_v17  ;;  %1268 = vst [vmem:[%s2050_s15 + $0x70] sm:$0xff] %v1243_v2  ;;  %v844_v34 = vadd.f32 %v1801_v26, %v843_v45  ;;  %v1052_v44 = vadd.f32 %v1801_v26, %v1051_v23  ;;  %v1196_v46 = vmax.f32 %v1096_v20, %v1121_v35  ;;  %v1122_v49 = vmax.f32 %v852_v40, 0.0 }
 0x15d   : > { %v2201_v22 = vmax.f32 %v1148_v43, %v1173_v42  ;;  %v1174_v53 = vmax.f32 %v1060_v9, 0.0  ;;  %v1194_v51 = vmax.f32 %v2312_v48, %v1119_v36  ;;  %v2314_v41 = vmax.f32 %v2313_v62, 0.0 }
 0x15e   : > { %v1120_v63 = vmax.f32 %v844_v34, 0.0  ;;  %v1172_v56 = vmax.f32 %v1052_v44, 0.0  ;;  %v1099_v38 = vmax.f32 %v2134_v1, 0.0  ;;  %v1151_v30 = vmax.f32 %v2138_v3, 0.0 }
 0x15f   : > { %v1221_v32 = vmax.f32 %v2314_v41, %v1171_v58  ;;  %v2315_v20 = vmax.f32 %v1986_v50, 0.0  ;;  %v2316_v43 = vmax.f32 %v1990_v25, 0.0  ;;  %v1244_v18 = vmax.f32 %v1194_v51, %v2157_v13  ;;  %v1064_v13 = vpop.f32.mrb[45].mxu1 }
 0x160   : > { %v2317_v12 = vmax.f32 %v2001_v27, 0.0  ;;  %v2318_v10 = vmax.f32 %v2005_v28, 0.0  ;;  %v1100_v3 = vmax.f32 %v2178_v14, 0.0  ;;  %v1152_v50 = vmax.f32 %v2182_v15, 0.0  ;;  %v1524_v14 = vpop.f32.mrb[46].mxu0  ;;  %v1576_v16 = vpop.f32.mrb[46].mxu1 }
 0x161   : > { %v1197_v21 = vmax.f32 %v2315_v20, %v1122_v49  ;;  %v2213_v11 = vmax.f32 %v2316_v43, %v1174_v53  ;;  %v1246_v54 = vmax.f32 %v1196_v46, %v1221_v32  ;;  %v865_v31 = vadd.f32 %v1523_v37, %v1801_v26  ;;  %1269 = vst [vmem:[%s2050_s15 + $0x78] sm:$0xff] %v1244_v18  ;;  %v859_v39 = vpop.f32.mrb[47].mxu0  ;;  %v1067_v0 = vpop.f32.mrb[47].mxu1  ;;  %v2319_v46 = vld [vmem:[#allocation2_spill] sm:$0xff]  ;;  %v2320_v53 = vld [vmem:[#allocation3_spill] sm:$0xff] }
 0x162   : > { %v1195_v8 = vmax.f32 %v2317_v12, %v1120_v63  ;;  %v1222_v1 = vmax.f32 %v2318_v10, %v1172_v56  ;;  %v1073_v25 = vadd.f32 %v1575_v4, %v1801_v26  ;;  %v857_v60 = vadd.f32 %v1801_v26, %v856_v24  ;;  %v1527_v41 = vpop.f32.mrb[48].mxu0  ;;  %v2321_v32 = vld [vmem:[#allocation6_spill] sm:$0xff] }
 0x163   : > { %1271 = vst [vmem:[%s2050_s15 + $0x88] sm:$0xff] %v1246_v54  ;;  %v1065_v5 = vadd.f32 %v1801_v26, %v1064_v13  ;;  %v1125_v15 = vmax.f32 %v865_v31, 0.0  ;;  %v868_v2 = vadd.f32 %v1524_v14, %v1801_v26  ;;  %v1076_v7 = vadd.f32 %v1576_v16, %v1801_v26  ;;  %v872_v20 = vpop.f32.mrb[49].mxu0 }
 0x164   : > { %v1245_v27 = vmax.f32 %v1195_v8, %v2169_v33  ;;  %v1247_v28 = vmax.f32 %v1197_v21, %v1222_v1  ;;  %v1177_v17 = vmax.f32 %v1073_v25, 0.0  ;;  %v1123_v59 = vmax.f32 %v857_v60, 0.0  ;;  %v2322_v21 = vld [vmem:[#allocation5_spill] sm:$0xff] }
 0x165   : > { %v1175_v35 = vmax.f32 %v1065_v5, 0.0  ;;  %v860_v33 = vadd.f32 %v1801_v26, %v859_v39  ;;  %v1068_v42 = vadd.f32 %v1801_v26, %v1067_v0  ;;  %v1200_v40 = vmax.f32 %v1100_v3, %v1125_v15 }
 0x166   : > { %1270 = vst [vmem:[%s2050_s15 + $0x80] sm:$0xff] %v1245_v27  ;;  %1272 = vst [vmem:[%s2050_s15 + $0x90] sm:$0xff] %v1247_v28  ;;  %v1227_v9 = vmax.f32 %v1152_v50, %v1177_v17  ;;  %v1126_v45 = vmax.f32 %v868_v2, 0.0  ;;  %v1178_v23 = vmax.f32 %v1076_v7, 0.0  ;;  %v1198_v36 = vmax.f32 %v1098_v29, %v1123_v59  ;;  %v2323_v50 = vld [vmem:[#allocation8_spill] sm:$0xff]  ;;  %v2324_v27 = vld [vmem:[#allocation7_spill] sm:$0xff] }
 0x167   : > { %v1225_v58 = vmax.f32 %v1150_v52, %v1175_v35  ;;  %v1124_v34 = vmax.f32 %v860_v33, 0.0  ;;  %v1176_v44 = vmax.f32 %v1068_v42, 0.0  ;;  %v772_v49 = vadd.f32 %v2319_v46, %v1801_v26 }
 0x168   : > { %v980_v48 = vadd.f32 %v2320_v53, %v1801_v26  ;;  %v1201_v51 = vmax.f32 %v1101_v57, %v1126_v45  ;;  %v1228_v47 = vmax.f32 %v1153_v19, %v1178_v23  ;;  %v1248_v29 = vmax.f32 %v1198_v36, %v2201_v22  ;;  %v1528_v22 = vpop.f32.mrb[50].mxu0 }
 0x169   : > { %v1250_v55 = vmax.f32 %v1200_v40, %v1225_v58  ;;  %v1199_v52 = vmax.f32 %v1099_v38, %v1124_v34  ;;  %v1226_v62 = vmax.f32 %v1151_v30, %v1176_v44  ;;  %v985_v63 = vadd.f32 %v1801_v26, %v2321_v32  ;;  %v875_v18 = vpop.f32.mrb[51].mxu0 }
 0x16a   : > { %v881_v56 = vadd.f32 %v1527_v41, %v1801_v26  ;;  %v777_v6 = vadd.f32 %v1801_v26, %v2322_v21  ;;  %1273 = vst [vmem:[%s2050_s15 + $0x98] sm:$0xff] %v1248_v29  ;;  %v873_v19 = vadd.f32 %v1801_v26, %v872_v20  ;;  %v1154_v38 = vmax.f32 %v980_v48, 0.0 }
 0x16b   : > { %1275 = vst [vmem:[%s2050_s15 + $0xa8] sm:$0xff] %v1250_v55  ;;  %v1249_v61 = vmax.f32 %v1199_v52, %v2213_v11  ;;  %v1251_v57 = vmax.f32 %v1201_v51, %v1226_v62  ;;  %v884_v43 = vadd.f32 %v1528_v22, %v1801_v26  ;;  %v1102_v54 = vmax.f32 %v772_v49, 0.0 }
 0x16c   : > { %v1129_v30 = vmax.f32 %v881_v56, 0.0  ;;  %v1127_v12 = vmax.f32 %v873_v19, 0.0  ;;  %v876_v8 = vadd.f32 %v1801_v26, %v875_v18  ;;  %v1155_v11 = vmax.f32 %v985_v63, 0.0 }
 0x16d   : > { %1274 = vst [vmem:[%s2050_s15 + $0xa0] sm:$0xff] %v1249_v61  ;;  %1276 = vst [vmem:[%s2050_s15 + $0xb0] sm:$0xff] %v1251_v57  ;;  %v1130_v1 = vmax.f32 %v884_v43, 0.0  ;;  %v1103_v37 = vmax.f32 %v777_v6, 0.0 }
 0x16e   : > { %v1204_v10 = vmax.f32 %v1129_v30, %v1154_v38  ;;  %v1202_v4 = vmax.f32 %v1102_v54, %v1127_v12  ;;  %v1128_v3 = vmax.f32 %v876_v8, 0.0 }
 0x16f   : > { %v1205_v25 = vmax.f32 %v1130_v1, %v1155_v11 }
 0x170   : > { %v1229_v31 = vmax.f32 %v2323_v50, %v1204_v10  ;;  %v1252_v24 = vmax.f32 %v1202_v4, %v1227_v9  ;;  %v1203_v13 = vmax.f32 %v1103_v37, %v1128_v3 }
 0x171   : > { %v1230_v28 = vmax.f32 %v2324_v27, %v1205_v25 }
 0x172   : > { %1254 = vst [vmem:[%s2050_s15] sm:$0xff] %v1229_v31  ;;  %1277 = vst [vmem:[%s2050_s15 + $0xb8] sm:$0xff] %v1252_v24  ;;  %v1253_v60 = vmax.f32 %v1203_v13, %v1228_v47 }
 0x173   : > { %1255 = vst [vmem:[%s2050_s15 + $0x8] sm:$0xff] %v1230_v28 }
 0x174   : > { %1278 = vst [vmem:[%s2050_s15 + $0xc0] sm:$0xff] %v1253_v60 }
 0x175 PF: > { %s13_s12 = sadd.s32 1, %s1665_s12  }
 0x176   : > { %p10_p5 = scmp.ge.s32.totalorder %s13_s12, 4  }
 0x178   :  { %12 = sbr.rel (!%p10_p5) target bundleno = 1 (0x1), region = 62 }

// kernel: cnn_forward.4
= control target key start
LH: loop header
LB: loop body
LE: loop exit
PB: predicated region body
PF: predicated region fallthrough
CT: control target
= control target key end

     0   :  { %s2704_s12 = smov 0   ;;  %s3209_s0 = inlined_call_operand.vmem [shape: bf16[448,896], index: 0, kind: input, shape index: {}]   ;;  %s3210_s1 = inlined_call_operand.vmem [shape: bf16[896,128], index: 1, kind: input, shape index: {}]   ;;  %s3211_s2 = inlined_call_operand.vmem [shape: f32[1,128], index: 2, kind: input, shape index: {}]   ;;  %s3212_s3 = inlined_call_operand.vmem [shape: f32[112,128], index: 3, kind: output, shape index: {}]  }
   0x1 LB: > { %s1941_s13 = sadd.s32 4294967295, %s2682_s12   ;;  %p1945_p0 = scmp.ge.s32.totalorder %s2682_s12, 1  ;;  %s2682_s12 = sphi %s2704_s12, %s13_s12  }
   0x2   : > { %p139_p1 = scmp.lt.s32.totalorder %s2682_s12, 3 }
   0x4   : > { %p140_p2 = pnand %p1945_p0, %p139_p1 }
   0x5   : > { %v2480_v0 = vld [vmem:[%s3210_s1 + $0x40] sm:$0xff] (!%p140_p2)   ;;  %v2484_v4 = vld [vmem:[%s3210_s1 + $0x48] sm:$0xff] (!%p140_p2)   ;;  %v2488_v8 = vld [vmem:[%s3210_s1 + $0x50] sm:$0xff] (!%p140_p2)   ;;  %s164_s15 = smul.u32 (!%p140_p2), 28, %s1941_s13 }
   0x6   : > { %143 = sbr.rel (%p140_p2) target bundleno = 482 (0x1e2), region = 32  ;;  %v2481_v1 = vld [vmem:[%s3210_s1] sm:$0xff] (!%p140_p2)   ;;  %2105 = vmatprep.subr.bf16.mxu0 (!%p140_p2), %v2480_v0  ;;  %v2485_v5 = vld [vmem:[%s3210_s1 + $0x8] sm:$0xff] (!%p140_p2)   ;;  %v2489_v9 = vld [vmem:[%s3210_s1 + $0x10] sm:$0xff] (!%p140_p2)  }
   0x7   : > { %v2482_v2 = vld [vmem:[%s3210_s1 + $0xc0] sm:$0xff] (!%p140_p2)   ;;  %2106 = vmatpush3.bf16.msra.mxu0 (!%p140_p2), %v2481_v1  ;;  %v2486_v6 = vld [vmem:[%s3210_s1 + $0xc8] sm:$0xff] (!%p140_p2)   ;;  %v2490_v10 = vld [vmem:[%s3210_s1 + $0xd0] sm:$0xff] (!%p140_p2)   ;;  %p165_p3 = scmp.lt.s32.totalorder (!%p140_p2), %s164_s15, 55 }
   0x8   : > { %v2483_v3 = vld [vmem:[%s3210_s1 + $0x80] sm:$0xff] (!%p140_p2)   ;;  %2205 = vmatprep.subr.bf16.mxu1 (!%p140_p2), %v2482_v2  ;;  %2107 = vmatprep.subr.bf16.mxu0 (!%p140_p2), %v2484_v4  ;;  %v2487_v7 = vld [vmem:[%s3210_s1 + $0x88] sm:$0xff] (!%p140_p2)   ;;  %v2491_v11 = vld [vmem:[%s3210_s1 + $0x90] sm:$0xff] (!%p140_p2)  }
   0x9   : > { %2206 = vmatpush3.bf16.msra.mxu1 (!%p140_p2), %v2483_v3  ;;  %v2492_v12 = vld [vmem:[%s3210_s1 + $0x58] sm:$0xff] (!%p140_p2)   ;;  %v2496_v16 = vld [vmem:[%s3210_s1 + $0x60] sm:$0xff] (!%p140_p2)   ;;  %v2500_v20 = vld [vmem:[%s3210_s1 + $0x68] sm:$0xff] (!%p140_p2)  }
   0xa   : > { %2207 = vmatprep.subr.bf16.mxu1 (!%p140_p2), %v2486_v6  ;;  %v2493_v13 = vld [vmem:[%s3210_s1 + $0x18] sm:$0xff] (!%p140_p2)   ;;  %v2497_v17 = vld [vmem:[%s3210_s1 + $0x20] sm:$0xff] (!%p140_p2)   ;;  %v2501_v21 = vld [vmem:[%s3210_s1 + $0x28] sm:$0xff] (!%p140_p2)  }
   0xb   : > { %2108 = vmatpush3.bf16.msra.mxu0 (!%p140_p2), %v2485_v5  ;;  %v2494_v14 = vld [vmem:[%s3210_s1 + $0xd8] sm:$0xff] (!%p140_p2)   ;;  %v2498_v18 = vld [vmem:[%s3210_s1 + $0xe0] sm:$0xff] (!%p140_p2)   ;;  %v2502_v22 = vld [vmem:[%s3210_s1 + $0xe8] sm:$0xff] (!%p140_p2)  }
   0xc   : > { %2109 = vmatprep.subr.bf16.mxu0 (!%p140_p2), %v2488_v8  ;;  %v2495_v15 = vld [vmem:[%s3210_s1 + $0x98] sm:$0xff] (!%p140_p2)   ;;  %v2499_v19 = vld [vmem:[%s3210_s1 + $0xa0] sm:$0xff] (!%p140_p2)   ;;  %v2503_v23 = vld [vmem:[%s3210_s1 + $0xa8] sm:$0xff] (!%p140_p2)  }
   0xd   : > { %2208 = vmatpush3.bf16.msra.mxu1 %v2487_v7  ;;  %s3214_s15 = smov (!%p165_p3, %s164_s15), 55  ;;  %v2504_v24 = vld [vmem:[%s3210_s1 + $0x70] sm:$0xff]   ;;  %v2508_v28 = vld [vmem:[%s3210_s1 + $0x78] sm:$0xff]   ;;  %v2515_v34 = vld [vmem:[%s3210_s1 + $0x140] sm:$0xff]  }
   0xe   : > { %2209 = vmatprep.subr.bf16.mxu1 %v2490_v10  ;;  %s2471_s16 = smul.u32 28, %s3214_s15  ;;  %v2505_v25 = vld [vmem:[%s3210_s1 + $0x30] sm:$0xff]   ;;  %v2509_v29 = vld [vmem:[%s3210_s1 + $0x38] sm:$0xff]   ;;  %v2519_v37 = vld [vmem:[%s3210_s1 + $0x100] sm:$0xff]  }
   0xf   : > { %2110 = vmatpush3.bf16.msra.mxu0 %v2489_v9  ;;  %v2506_v26 = vld [vmem:[%s3210_s1 + $0xf0] sm:$0xff]   ;;  %v2510_v30 = vld [vmem:[%s3210_s1 + $0xf8] sm:$0xff]   ;;  %v2526_v41 = vld [vmem:[%s3210_s1 + $0x148] sm:$0xff]  }
  0x10   : > { %2111 = vmatprep.subr.bf16.mxu0 %v2492_v12  ;;  %v2507_v27 = vld [vmem:[%s3210_s1 + $0xb0] sm:$0xff]   ;;  %s2804_s26 = scalar_lea.vmem %s3209_s0, %s2471_s16  ;;  %v2514_v33 = vld [vmem:[%s3210_s1 + $0xb8] sm:$0xff]   ;;  %v2529_v44 = vld [vmem:[%s3210_s1 + $0x108] sm:$0xff]  }
  0x11   : > { %2210 = vmatpush3.bf16.msra.mxu1 %v2491_v11  ;;  %v2511_v31 = vld [vmem:[%s2804_s26] ss:$28 sps:$4 sm:$0xff]   ;;  %v2516_v35 = vld [vmem:[%s2804_s26 + $0x8] ss:$28 sps:$4 sm:$0xff]   ;;  %v2522_v40 = vld [vmem:[%s2804_s26 + $0x38] ss:$28 sps:$4 sm:$0xff]  }
  0x12   : > { %2211 = vmatprep.subr.bf16.mxu1 %v2494_v14  ;;  %v2513_v32 = vld [vmem:[%s2804_s26 + $0x4] ss:$28 sps:$4 sm:$0xff]   ;;  %v2518_v36 = vld [vmem:[%s2804_s26 + $0xc] ss:$28 sps:$4 sm:$0xff]   ;;  %v2520_v38 = vld [vmem:[%s2804_s26 + $0x3c] ss:$28 sps:$4 sm:$0xff]  }
  0x13   : > { %2112 = vmatpush3.bf16.msra.mxu0 %v2493_v13  ;;  %1281 = vmatprep.mubr.bf16.mxu0 %v2513_v32  ;;  %v2523_v39 = vld [vmem:[%s2804_s26 + $0x44] ss:$28 sps:$4 sm:$0xff]   ;;  %v2527_v42 = vld [vmem:[%s2804_s26 + $0x74] ss:$28 sps:$4 sm:$0xff]   ;;  %v2531_v45 = vld [vmem:[%s2804_s26 + $0x7c] ss:$28 sps:$4 sm:$0xff]  }
  0x14   : > { %2113 = vmatprep.subr.bf16.mxu0 %v2496_v16  ;;  %1426 = vmatprep.mubr.bf16.mxu1 %v2518_v36  ;;  %v2525_v43 = vld [vmem:[%s2804_s26 + $0x40] ss:$28 sps:$4 sm:$0xff]   ;;  %v2530_v46 = vld [vmem:[%s2804_s26 + $0x70] ss:$28 sps:$4 sm:$0xff]   ;;  %v2533_v50 = vld [vmem:[%s2804_s26 + $0x78] ss:$28 sps:$4 sm:$0xff]  }
  0x15   : > { %2212 = vmatpush3.bf16.msra.mxu1 %v2495_v15  ;;  %v2534_v47 = vld [vmem:[%s2804_s26 + $0xac] ss:$28 sps:$4 sm:$0xff]   ;;  %v2540_v48 = vld [vmem:[%s3210_s1 + $0x150] sm:$0xff]   ;;  %v2554_v53 = vld [vmem:[%s3210_s1 + $0x158] sm:$0xff]  }
  0x16   : > { %2213 = vmatprep.subr.bf16.mxu1 %v2498_v18  ;;  %v2541_v49 = vld [vmem:[%s3210_s1 + $0x110] sm:$0xff]   ;;  %v2536_v52 = vld [vmem:[%s2804_s26 + $0xa8] ss:$28 sps:$4 sm:$0xff]   ;;  %v2555_v54 = vld [vmem:[%s3210_s1 + $0x118] sm:$0xff]  }
  0x17   : > { %2114 = vmatpush3.bf16.msra.mxu0 %v2497_v17  ;;  %v2537_v51 = vld [vmem:[%s2804_s26 + $0xb4] ss:$28 sps:$4 sm:$0xff]   ;;  %v2542_v55 = vld [vmem:[%s2804_s26 + $0xe4] ss:$28 sps:$4 sm:$0xff]   ;;  %v2545_v57 = vld [vmem:[%s2804_s26 + $0xec] ss:$28 sps:$4 sm:$0xff]  }
  0x18   : > { %2115 = vmatprep.subr.bf16.mxu0 %v2500_v20  ;;  %v2539_v56 = vld [vmem:[%s2804_s26 + $0xb0] ss:$28 sps:$4 sm:$0xff]   ;;  %v2565_v58 = vld [vmem:[%s3210_s1 + $0x160] sm:$0xff]   ;;  %v2548_v61 = vld [vmem:[%s2804_s26 + $0x11c] ss:$28 sps:$4 sm:$0xff]  }
  0x19   : > { %2214 = vmatpush3.bf16.msra.mxu1 %v2499_v19  ;;  %v2544_v59 = vld [vmem:[%s2804_s26 + $0xe0] ss:$28 sps:$4 sm:$0xff]   ;;  %v2547_v63 = vld [vmem:[%s2804_s26 + $0xe8] ss:$28 sps:$4 sm:$0xff]   ;;  %v2550_v3 = vld [vmem:[%s2804_s26 + $0x118] ss:$28 sps:$4 sm:$0xff]  }
  0x1a   : > { %2215 = vmatprep.subr.bf16.mxu1 %v2502_v22  ;;  %v2568_v60 = vld [vmem:[%s3210_s1 + $0x120] sm:$0xff]   ;;  %v2577_v1 = vld [vmem:[%s3210_s1 + $0x168] sm:$0xff]   ;;  %v2556_v4 = vld [vmem:[%s2804_s26 + $0x154] ss:$28 sps:$4 sm:$0xff]  }
  0x1b   : > { %2116 = vmatpush3.bf16.msra.mxu0 %v2501_v21  ;;  %v2570_v62 = vld [vmem:[%s3210_s1 + $0x180] sm:$0xff]   ;;  %v2580_v2 = vld [vmem:[%s3210_s1 + $0x128] sm:$0xff]   ;;  %v2559_v7 = vld [vmem:[%s2804_s26 + $0x15c] ss:$28 sps:$4 sm:$0xff]  }
  0x1c   : > { %2117 = vmatprep.subr.bf16.mxu0 %v2504_v24  ;;  %v2551_v0 = vld [vmem:[%s2804_s26 + $0x124] ss:$28 sps:$4 sm:$0xff]   ;;  %v2585_v5 = vld [vmem:[%s3210_s1 + $0x188] sm:$0xff]   ;;  %v2592_v8 = vld [vmem:[%s3210_s1 + $0x170] sm:$0xff]  }
  0x1d   : > { %2216 = vmatpush3.bf16.msra.mxu1 %v2503_v23  ;;  %v2553_v6 = vld [vmem:[%s2804_s26 + $0x120] ss:$28 sps:$4 sm:$0xff]   ;;  %v2593_v9 = vld [vmem:[%s3210_s1 + $0x130] sm:$0xff]   ;;  %v2562_v12 = vld [vmem:[%s2804_s26 + $0x18c] ss:$28 sps:$4 sm:$0xff]  }
  0x1e   : > { %2217 = vmatprep.subr.bf16.mxu1 %v2506_v26  ;;  %v2558_v10 = vld [vmem:[%s2804_s26 + $0x150] ss:$28 sps:$4 sm:$0xff]   ;;  %v2561_v13 = vld [vmem:[%s2804_s26 + $0x158] ss:$28 sps:$4 sm:$0xff]   ;;  %v2564_v16 = vld [vmem:[%s2804_s26 + $0x188] ss:$28 sps:$4 sm:$0xff]  }
  0x1f   : > { %2118 = vmatpush3.bf16.msra.mxu0 %v2505_v25  ;;  %v2597_v11 = vld [vmem:[%s3210_s1 + $0x190] sm:$0xff]   ;;  %v2604_v15 = vld [vmem:[%s3210_s1 + $0x198] sm:$0xff]   ;;  %v2610_v19 = vld [vmem:[%s3210_s1 + $0x1a0] sm:$0xff]  }
  0x20   : > { %2119 = vmatprep.subr.bf16.mxu0 %v2508_v28  ;;  %v2566_v14 = vld [vmem:[%s2804_s26 + $0x194] ss:$28 sps:$4 sm:$0xff]   ;;  %v2608_v17 = vld [vmem:[%s3210_s1 + $0x178] sm:$0xff]   ;;  %v2571_v20 = vld [vmem:[%s2804_s26 + $0x1c4] ss:$28 sps:$4 sm:$0xff]  }
  0x21   : > { %2218 = vmatpush3.bf16.msra.mxu1 %v2507_v27  ;;  %v2609_v18 = vld [vmem:[%s3210_s1 + $0x138] sm:$0xff]   ;;  %v2614_v21 = vld [vmem:[%s3210_s1 + $0x1a8] sm:$0xff]   ;;  %v2618_v24 = vld [vmem:[%s3210_s1 + $0x1b0] sm:$0xff]  }
  0x22   : > { %2219 = vmatprep.subr.bf16.mxu1 %v2510_v30  ;;  %v2569_v22 = vld [vmem:[%s2804_s26 + $0x190] ss:$28 sps:$4 sm:$0xff]   ;;  %v2573_v25 = vld [vmem:[%s2804_s26 + $0x1c0] ss:$28 sps:$4 sm:$0xff]   ;;  %v2576_v28 = vld [vmem:[%s2804_s26 + $0x1c8] ss:$28 sps:$4 sm:$0xff]  }
  0x23   : > { %2120 = vmatpush3.bf16.msra.mxu0 %v2509_v29  ;;  %v2574_v23 = vld [vmem:[%s2804_s26 + $0x1cc] ss:$28 sps:$4 sm:$0xff]   ;;  %v2578_v26 = vld [vmem:[%s2804_s26 + $0x1fc] ss:$28 sps:$4 sm:$0xff]   ;;  %v2582_v29 = vld [vmem:[%s2804_s26 + $0x204] ss:$28 sps:$4 sm:$0xff]  }
  0x24   : > { %2305 = vmatprep.subr.bf16.mxu0 %v2515_v34  ;;  %v2622_v27 = vld [vmem:[%s3210_s1 + $0x1b8] sm:$0xff]   ;;  %v2588_v34 = vld [vmem:[%s2804_s26 + $0x230] ss:$28 sps:$4 sm:$0xff]  }
  0x25   : > { %2220 = vmatpush3.bf16.msra.mxu1 %v2514_v33  ;;  %v2581_v30 = vld [vmem:[%s2804_s26 + $0x1f8] ss:$28 sps:$4 sm:$0xff]   ;;  %v2584_v32 = vld [vmem:[%s2804_s26 + $0x200] ss:$28 sps:$4 sm:$0xff]  }
  0x26   : > { %1282 = vmatmul.mubr.bf16.vlgmr.msra.gmra.mrb[0].mxu0 %v2511_v31  ;;  %2427 = vmatprep.subr.bf16.mxu1 %v2570_v62  ;;  %v2586_v31 = vld [vmem:[%s2804_s26 + $0x234] ss:$28 sps:$4 sm:$0xff]   ;;  %v2589_v33 = vld [vmem:[%s2804_s26 + $0x23c] ss:$28 sps:$4 sm:$0xff]  }
  0x27   : > { %2306 = vmatpush3.bf16.msra.mxu0 %v2519_v37  ;;  %1289 = vmatprep.mubr.bf16.mxu0 %v2520_v38  ;;  %v2591_v36 = vld [vmem:[%s2804_s26 + $0x238] ss:$28 sps:$4 sm:$0xff]   ;;  %v2596_v38 = vld [vmem:[%s2804_s26 + $0x268] ss:$28 sps:$4 sm:$0xff]  }
  0x28   : > { %1427 = vmatmul.mubr.bf16.vlgmr.msra.gmra.mrb[0].mxu1 %v2516_v35  ;;  %2307 = vmatprep.subr.bf16.mxu0 %v2526_v41  ;;  %v2594_v35 = vld [vmem:[%s2804_s26 + $0x26c] ss:$28 sps:$4 sm:$0xff]   ;;  %v2598_v37 = vld [vmem:[%s2804_s26 + $0x274] ss:$28 sps:$4 sm:$0xff]  }
  0x29   : > { %1434 = vmatprep.mubr.bf16.mxu1 %v2523_v39  ;;  %2428 = vmatpush3.bf16.msra.mxu1 %v2570_v62  ;;  %v2601_v39 = vld [vmem:[%s2804_s26 + $0x2a4] ss:$28 sps:$4 sm:$0xff]   ;;  %v2605_v41 = vld [vmem:[%s2804_s26 + $0x2ac] ss:$28 sps:$4 sm:$0xff]   ;;  %v2635_v62 = vld [vmem:[%s2804_s26 + $0xb8] ss:$28 sps:$4 sm:$0xff]  }
  0x2a   : > { %2429 = vmatprep.subr.bf16.mxu1 %v2585_v5 }
  0x2b   : > { %2308 = vmatpush3.bf16.msra.mxu0 %v2529_v44  ;;  %v2607_v44 = vld [vmem:[%s2804_s26 + $0x2a8] ss:$28 sps:$4 sm:$0xff]  }
  0x2c   : > { %2309 = vmatprep.subr.bf16.mxu0 %v2540_v48  ;;  %v2617_v48 = vld [vmem:[%s2804_s26 + $0x2e0] ss:$28 sps:$4 sm:$0xff]  }
  0x2d   : > { %2430 = vmatpush3.bf16.msra.mxu1 %v2585_v5  ;;  %v2663_v5 = vld [vmem:[%s2804_s26 + $0x248] ss:$28 sps:$4 sm:$0xff]  }
  0x2e   : > { %1290 = vmatmul.mubr.bf16.gmra.mrb[4].mxu0 %v2522_v40  ;;  %2431 = vmatprep.subr.bf16.mxu1 %v2597_v11  ;;  %v2600_v40 = vld [vmem:[%s2804_s26 + $0x270] ss:$28 sps:$4 sm:$0xff]  }
  0x2f   : > { %1297 = vmatprep.mubr.bf16.mxu0 %v2527_v42  ;;  %2310 = vmatpush3.bf16.msra.mxu0 %v2541_v49  ;;  %v2603_v42 = vld [vmem:[%s2804_s26 + $0x2a0] ss:$28 sps:$4 sm:$0xff]   ;;  %v2623_v49 = vld [vmem:[%s2804_s26 + $0x18] ss:$28 sps:$4 sm:$0xff]  }
  0x30   : > { %1435 = vmatmul.mubr.bf16.gmra.mrb[4].mxu1 %v2525_v43  ;;  %2311 = vmatprep.subr.bf16.mxu0 %v2554_v53  ;;  %v2611_v43 = vld [vmem:[%s2804_s26 + $0x2dc] ss:$28 sps:$4 sm:$0xff]   ;;  %v2631_v53 = vld [vmem:[%s2804_s26 + $0x88] ss:$28 sps:$4 sm:$0xff]  }
  0x31   : > { %1442 = vmatprep.mubr.bf16.mxu1 %v2531_v45  ;;  %2432 = vmatpush3.bf16.msra.mxu1 %v2597_v11  ;;  %v2615_v45 = vld [vmem:[%s2804_s26 + $0x2e4] ss:$28 sps:$4 sm:$0xff]   ;;  %v2649_v11 = vld [vmem:[%s2804_s26 + $0x19c] ss:$28 sps:$4 sm:$0xff]  }
  0x32   : > { %2433 = vmatprep.subr.bf16.mxu1 %v2604_v15 }
  0x33   : > { %2312 = vmatpush3.bf16.msra.mxu0 %v2555_v54  ;;  %v2627_v54 = vld [vmem:[%s2804_s26 + $0x48] ss:$28 sps:$4 sm:$0xff]  }
  0x34   : > { %2313 = vmatprep.subr.bf16.mxu0 %v2565_v58  ;;  %v2630_v58 = vld [vmem:[%s2804_s26 + $0x80] ss:$28 sps:$4 sm:$0xff]  }
  0x35   : > { %2434 = vmatpush3.bf16.msra.mxu1 %v2604_v15  ;;  %v2654_v15 = vld [vmem:[%s2804_s26 + $0x1d0] ss:$28 sps:$4 sm:$0xff]  }
  0x36   : > { %1298 = vmatmul.mubr.bf16.gmra.mrb[8].mxu0 %v2530_v46  ;;  %2435 = vmatprep.subr.bf16.mxu1 %v2610_v19  ;;  %v2613_v46 = vld [vmem:[%s2804_s26 + $0x2d8] ss:$28 sps:$4 sm:$0xff]  }
  0x37   : > { %1305 = vmatprep.mubr.bf16.mxu0 %v2534_v47  ;;  %2314 = vmatpush3.bf16.msra.mxu0 %v2568_v60  ;;  %v2621_v47 = vld [vmem:[%s2804_s26 + $0x14] ss:$28 sps:$4 sm:$0xff]  }
  0x38   : > { %1443 = vmatmul.mubr.bf16.gmra.mrb[8].mxu1 %v2533_v50  ;;  %2315 = vmatprep.subr.bf16.mxu0 %v2577_v1  ;;  %v2619_v50 = vld [vmem:[%s2804_s26 + $0x10] ss:$28 sps:$4 sm:$0xff]   ;;  %v2655_v1 = vld [vmem:[%s2804_s26 + $0x1d8] ss:$28 sps:$4 sm:$0xff]  }
  0x39   : > { %1450 = vmatprep.mubr.bf16.mxu1 %v2537_v51  ;;  %2436 = vmatpush3.bf16.msra.mxu1 %v2610_v19  ;;  %v2625_v51 = vld [vmem:[%s2804_s26 + $0x4c] ss:$28 sps:$4 sm:$0xff]   ;;  %v2662_v19 = vld [vmem:[%s2804_s26 + $0x240] ss:$28 sps:$4 sm:$0xff]  }
  0x3a   : > { %2437 = vmatprep.subr.bf16.mxu1 %v2614_v21  ;;  %v2640_v60 = vld [vmem:[%s2804_s26 + $0x130] ss:$28 sps:$4 sm:$0xff]  }
  0x3b   : > { %2316 = vmatpush3.bf16.msra.mxu0 %v2580_v2  ;;  %v2638_v2 = vld [vmem:[%s2804_s26 + $0xf0] ss:$28 sps:$4 sm:$0xff]  }
  0x3c   : > { %2317 = vmatprep.subr.bf16.mxu0 %v2592_v8  ;;  %v2664_v8 = vld [vmem:[%s2804_s26 + $0x280] ss:$28 sps:$4 sm:$0xff]  }
  0x3d   : > { %2438 = vmatpush3.bf16.msra.mxu1 %v2614_v21  ;;  %v2667_v21 = vld [vmem:[%s2804_s26 + $0x278] ss:$28 sps:$4 sm:$0xff]  }
  0x3e   : > { %1306 = vmatmul.mubr.bf16.gmra.mrb[12].mxu0 %v2536_v52  ;;  %2439 = vmatprep.subr.bf16.mxu1 %v2618_v24  ;;  %v2624_v52 = vld [vmem:[%s2804_s26 + $0x50] ss:$28 sps:$4 sm:$0xff]  }
  0x3f   : > { %1313 = vmatprep.mubr.bf16.mxu0 %v2542_v55  ;;  %2318 = vmatpush3.bf16.msra.mxu0 %v2593_v9  ;;  %v2628_v55 = vld [vmem:[%s2804_s26 + $0x84] ss:$28 sps:$4 sm:$0xff]   ;;  %v2671_v9 = vld [vmem:[%s2804_s26 + $0x2b8] ss:$28 sps:$4 sm:$0xff]  }
  0x40   : > { %1451 = vmatmul.mubr.bf16.gmra.mrb[12].mxu1 %v2539_v56  ;;  %2319 = vmatprep.subr.bf16.mxu0 %v2608_v17  ;;  %v2632_v56 = vld [vmem:[%s2804_s26 + $0xc0] ss:$28 sps:$4 sm:$0xff]   ;;  %v2659_v17 = vld [vmem:[%s2804_s26 + $0x208] ss:$28 sps:$4 sm:$0xff]  }
  0x41   : > { %1458 = vmatprep.mubr.bf16.mxu1 %v2545_v57  ;;  %2440 = vmatpush3.bf16.msra.mxu1 %v2618_v24  ;;  %v2639_v57 = vld [vmem:[%s2804_s26 + $0xf8] ss:$28 sps:$4 sm:$0xff]   ;;  %v2673_v24 = vld [vmem:[%s2804_s26 + $0x2ec] ss:$28 sps:$4 sm:$0xff]  }
  0x42   : > { %2441 = vmatprep.subr.bf16.mxu1 %v2622_v27 }
  0x43   : > { %2320 = vmatpush3.bf16.msra.mxu0 %v2609_v18  ;;  %v2660_v18 = vld [vmem:[%s2804_s26 + $0x244] ss:$28 sps:$4 sm:$0xff]  }
  0x45   : > { %2442 = vmatpush3.bf16.msra.mxu1 %v2622_v27 }
  0x46   : > { %1314 = vmatmul.mubr.bf16.gmra.mrb[16].mxu0 %v2544_v59  ;;  %v2633_v59 = vld [vmem:[%s2804_s26 + $0xbc] ss:$28 sps:$4 sm:$0xff]  }
  0x47   : > { %1321 = vmatprep.mubr.bf16.mxu0 %v2548_v61  ;;  %v2647_v61 = vld [vmem:[%s2804_s26 + $0x168] ss:$28 sps:$4 sm:$0xff]  }
  0x48   : > { %1459 = vmatmul.mubr.bf16.gmra.mrb[16].mxu1 %v2547_v63  ;;  %v2636_v63 = vld [vmem:[%s2804_s26 + $0xf4] ss:$28 sps:$4 sm:$0xff]  }
  0x49   : > { %1466 = vmatprep.mubr.bf16.mxu1 %v2551_v0  ;;  %v2648_v0 = vld [vmem:[%s2804_s26 + $0x1a0] ss:$28 sps:$4 sm:$0xff]  }
  0x4e   : > { %1322 = vmatmul.mubr.bf16.gmra.mrb[20].mxu0 %v2550_v3  ;;  %v2641_v3 = vld [vmem:[%s2804_s26 + $0x12c] ss:$28 sps:$4 sm:$0xff]  }
  0x4f   : > { %1329 = vmatprep.mubr.bf16.mxu0 %v2556_v4  ;;  %v2656_v4 = vld [vmem:[%s2804_s26 + $0x210] ss:$28 sps:$4 sm:$0xff]  }
  0x50   : > { %1467 = vmatmul.mubr.bf16.gmra.mrb[20].mxu1 %v2553_v6  ;;  %v2643_v6 = vld [vmem:[%s2804_s26 + $0x128] ss:$28 sps:$4 sm:$0xff]  }
  0x51   : > { %1474 = vmatprep.mubr.bf16.mxu1 %v2559_v7  ;;  %v2644_v7 = vld [vmem:[%s2804_s26 + $0x164] ss:$28 sps:$4 sm:$0xff]  }
  0x56   : > { %1330 = vmatmul.mubr.bf16.gmra.mrb[24].mxu0 %v2558_v10  ;;  %v2646_v10 = vld [vmem:[%s2804_s26 + $0x160] ss:$28 sps:$4 sm:$0xff]  }
  0x57   : > { %1337 = vmatprep.mubr.bf16.mxu0 %v2562_v12  ;;  %v2672_v12 = vld [vmem:[%s2804_s26 + $0x2f0] ss:$28 sps:$4 sm:$0xff]  }
  0x58   : > { %1475 = vmatmul.mubr.bf16.gmra.mrb[24].mxu1 %v2561_v13  ;;  %v2651_v13 = vld [vmem:[%s2804_s26 + $0x198] ss:$28 sps:$4 sm:$0xff]  }
  0x59   : > { %1482 = vmatprep.mubr.bf16.mxu1 %v2566_v14  ;;  %v2652_v14 = vld [vmem:[%s2804_s26 + $0x1d4] ss:$28 sps:$4 sm:$0xff]  }
  0x5e   : > { %1338 = vmatmul.mubr.bf16.gmra.mrb[28].mxu0 %v2564_v16  ;;  %v2657_v16 = vld [vmem:[%s2804_s26 + $0x20c] ss:$28 sps:$4 sm:$0xff]  }
  0x5f   : > { %1345 = vmatprep.mubr.bf16.mxu0 %v2571_v20  ;;  %v2665_v20 = vld [vmem:[%s2804_s26 + $0x27c] ss:$28 sps:$4 sm:$0xff]  }
  0x60   : > { %1483 = vmatmul.mubr.bf16.gmra.mrb[28].mxu1 %v2569_v22  ;;  %v2668_v22 = vld [vmem:[%s2804_s26 + $0x2b4] ss:$28 sps:$4 sm:$0xff]  }
  0x61   : > { %1490 = vmatprep.mubr.bf16.mxu1 %v2574_v23  ;;  %v2670_v23 = vld [vmem:[%s2804_s26 + $0x2b0] ss:$28 sps:$4 sm:$0xff]  }
  0x66   : > { %1346 = vmatmul.mubr.bf16.gmra.mrb[32].mxu0 %v2573_v25 }
  0x67   : > { %1353 = vmatprep.mubr.bf16.mxu0 %v2578_v26  ;;  %v2987_v26 = vld [vmem:[%s3211_s2] ss:$0 sm:$0xff] }
  0x68   : > { %1491 = vmatmul.mubr.bf16.gmra.mrb[32].mxu1 %v2576_v28  ;;  %v2675_v28 = vld [vmem:[%s2804_s26 + $0x2e8] ss:$28 sps:$4 sm:$0xff]   ;;  %s171_s26 = smul.u32 7, %s1941_s13 }
  0x69   : > { %1498 = vmatprep.mubr.bf16.mxu1 %v2582_v29 }
  0x6a   : > { %p172_p4 = scmp.lt.s32.totalorder %s171_s26, 13 }
  0x6c   : > { %s3216_s26 = smov (!%p172_p4, %s171_s26), 13 }
  0x6d   : > { %s1947_s13 = sshll.u32 %s3216_s26, 3 }
  0x6e   : > { %1354 = vmatmul.mubr.bf16.gmra.mrb[36].mxu0 %v2581_v30  ;;  %s3175_s10 = scalar_lea.vmem %s3212_s3, %s1947_s13 }
  0x6f   : > { %1361 = vmatprep.mubr.bf16.mxu0 %v2586_v31 }
  0x70   : > { %1499 = vmatmul.mubr.bf16.gmra.mrb[36].mxu1 %v2584_v32 }
  0x71   : > { %1506 = vmatprep.mubr.bf16.mxu1 %v2589_v33 }
  0x76   : > { %1362 = vmatmul.mubr.bf16.gmra.mrb[40].mxu0 %v2588_v34 }
  0x77   : > { %1369 = vmatprep.mubr.bf16.mxu0 %v2594_v35 }
  0x78   : > { %1507 = vmatmul.mubr.bf16.gmra.mrb[40].mxu1 %v2591_v36 }
  0x79   : > { %1514 = vmatprep.mubr.bf16.mxu1 %v2598_v37 }
  0x7e   : > { %1370 = vmatmul.mubr.bf16.gmra.mrb[44].mxu0 %v2596_v38 }
  0x7f   : > { %1377 = vmatprep.mubr.bf16.mxu0 %v2601_v39 }
  0x80   : > { %1515 = vmatmul.mubr.bf16.gmra.mrb[44].mxu1 %v2600_v40 }
  0x81   : > { %1522 = vmatprep.mubr.bf16.mxu1 %v2605_v41 }
  0x86   : > { %1378 = vmatmul.mubr.bf16.gmra.mrb[48].mxu0 %v2603_v42 }
  0x87   : > { %1385 = vmatprep.mubr.bf16.mxu0 %v2611_v43 }
  0x88   : > { %1523 = vmatmul.mubr.bf16.gmra.mrb[48].mxu1 %v2607_v44 }
  0x89   : > { %1530 = vmatprep.mubr.bf16.mxu1 %v2615_v45 }
  0x8e   : > { %1386 = vmatmul.mubr.bf16.gmra.mrb[52].mxu0 %v2613_v46 }
  0x8f   : > { %1571 = vmatprep.mubr.bf16.mxu0 %v2621_v47 }
  0x90   : > { %1531 = vmatmul.mubr.bf16.gmra.mrb[52].mxu1 %v2617_v48 }
  0x91   : > { %2443 = vmatprep.mubr.bf16.mxu1 %v2623_v49 }
  0x96   : > { %1572 = vmatmul.mubr.bf16.vlgmr.msra.gmra.mrb[56].mxu0 %v2619_v50 }
  0x97   : > { %1579 = vmatprep.mubr.bf16.mxu0 %v2625_v51 }
  0x98   : > { %2444 = vmatmul.mubr.bf16.vlgmr.msra.gmra.mrb[56].mxu1 %v2624_v52 }
  0x99   : > { %2447 = vmatprep.mubr.bf16.mxu1 %v2631_v53 }
  0x9e   : > { %1580 = vmatmul.mubr.bf16.gmra.mrb[60].mxu0 %v2627_v54 }
  0x9f   : > { %1587 = vmatprep.mubr.bf16.mxu0 %v2628_v55 }
  0xa0   : > { %2448 = vmatmul.mubr.bf16.gmra.mrb[60].mxu1 %v2632_v56 }
  0xa1   : > { %2451 = vmatprep.mubr.bf16.mxu1 %v2639_v57 }
  0xa6   : > { %1588 = vmatmul.mubr.bf16.gmra.mrb[64].mxu0 %v2630_v58 }
  0xa7   : > { %1595 = vmatprep.mubr.bf16.mxu0 %v2633_v59 }
  0xa8   : > { %2452 = vmatmul.mubr.bf16.gmra.mrb[64].mxu1 %v2640_v60 }
  0xa9   : > { %2455 = vmatprep.mubr.bf16.mxu1 %v2647_v61 }
  0xae   : > { %1596 = vmatmul.mubr.bf16.gmra.mrb[68].mxu0 %v2635_v62 }
  0xaf   : > { %1603 = vmatprep.mubr.bf16.mxu0 %v2636_v63 }
  0xb0   : > { %2456 = vmatmul.mubr.bf16.gmra.mrb[68].mxu1 %v2648_v0 }
  0xb1   : > { %2459 = vmatprep.mubr.bf16.mxu1 %v2655_v1 }
  0xb6   : > { %1604 = vmatmul.mubr.bf16.gmra.mrb[72].mxu0 %v2638_v2 }
  0xb7   : > { %1611 = vmatprep.mubr.bf16.mxu0 %v2641_v3 }
  0xb8   : > { %2460 = vmatmul.mubr.bf16.gmra.mrb[72].mxu1 %v2656_v4 }
  0xb9   : > { %2463 = vmatprep.mubr.bf16.mxu1 %v2663_v5 }
  0xbe   : > { %1612 = vmatmul.mubr.bf16.gmra.mrb[76].mxu0 %v2643_v6 }
  0xbf   : > { %1619 = vmatprep.mubr.bf16.mxu0 %v2644_v7 }
  0xc0   : > { %2464 = vmatmul.mubr.bf16.gmra.mrb[76].mxu1 %v2664_v8 }
  0xc1   : > { %2467 = vmatprep.mubr.bf16.mxu1 %v2671_v9 }
  0xc6   : > { %1620 = vmatmul.mubr.bf16.gmra.mrb[80].mxu0 %v2646_v10 }
  0xc7   : > { %1627 = vmatprep.mubr.bf16.mxu0 %v2649_v11 }
  0xc8   : > { %2468 = vmatmul.mubr.bf16.gmra.mrb[80].mxu1 %v2672_v12 }
  0xce   : > { %1628 = vmatmul.mubr.bf16.gmra.mrb[84].mxu0 %v2651_v13 }
  0xcf   : > { %1635 = vmatprep.mubr.bf16.mxu0 %v2652_v14 }
  0xd6   : > { %1636 = vmatmul.mubr.bf16.gmra.mrb[88].mxu0 %v2654_v15 }
  0xd7   : > { %1643 = vmatprep.mubr.bf16.mxu0 %v2657_v16 }
  0xde   : > { %1644 = vmatmul.mubr.bf16.gmra.mrb[92].mxu0 %v2659_v17 }
  0xdf   : > { %1651 = vmatprep.mubr.bf16.mxu0 %v2660_v18 }
  0xe6   : > { %1652 = vmatmul.mubr.bf16.gmra.mrb[96].mxu0 %v2662_v19 }
  0xe7   : > { %1659 = vmatprep.mubr.bf16.mxu0 %v2665_v20 }
  0xee   : > { %1660 = vmatmul.mubr.bf16.gmra.mrb[100].mxu0 %v2667_v21 }
  0xef   : > { %1667 = vmatprep.mubr.bf16.mxu0 %v2668_v22 }
  0xf6   : > { %1668 = vmatmul.mubr.bf16.gmra.mrb[104].mxu0 %v2670_v23 }
  0xf7   : > { %1675 = vmatprep.mubr.bf16.mxu0 %v2673_v24 }
  0xf9   : > { %v2121_v25 = vpop.f32.mrb[0].mxu0 }
  0xfa   : > { %v2122_v27 = vpop.f32.mrb[1].mxu0 }
  0xfb   : > { %v2123_v29 = vadd.f32 %v2122_v27, %v2121_v25  ;;  %v2124_v30 = vpop.f32.mrb[2].mxu0  ;;  %v2221_v31 = vpop.f32.mrb[0].mxu1 }
  0xfc   : > { %v2125_v32 = vpop.f32.mrb[3].mxu0  ;;  %v2222_v35 = vpop.f32.mrb[1].mxu1 }
  0xfd   : > { %v1284_v33 = vadd.f32 %v2123_v29, %v2987_v26  ;;  %v2126_v34 = vadd.f32 %v2125_v32, %v2124_v30  ;;  %v2223_v36 = vadd.f32 %v2222_v35, %v2221_v31  ;;  %v2224_v37 = vpop.f32.mrb[2].mxu1 }
  0xfe   : > { %1676 = vmatmul.mubr.bf16.gmra.mrb[108].mxu0 %v2675_v28  ;;  %v2225_v39 = vpop.f32.mrb[3].mxu1 }
  0xff   : > { %v1287_v38 = vadd.f32 %v2126_v34, %v2987_v26  ;;  %v2992_v40 = vadd.f32 %v2223_v36, %v1284_v33  ;;  %v2226_v41 = vadd.f32 %v2225_v39, %v2224_v37 }
 0x101   : > { %v2127_v42 = vpop.f32.mrb[4].mxu0  ;;  %v2994_v43 = vadd.f32 %v2226_v41, %v1287_v38 }
 0x102   : > { %v2128_v44 = vpop.f32.mrb[5].mxu0 }
 0x103   : > { %v2129_v45 = vadd.f32 %v2128_v44, %v2127_v42  ;;  %v2130_v46 = vpop.f32.mrb[6].mxu0  ;;  %v2227_v47 = vpop.f32.mrb[4].mxu1 }
 0x104   : > { %v2131_v48 = vpop.f32.mrb[7].mxu0  ;;  %v2228_v51 = vpop.f32.mrb[5].mxu1 }
 0x105   : > { %v1292_v49 = vadd.f32 %v2129_v45, %v2987_v26  ;;  %v2132_v50 = vadd.f32 %v2131_v48, %v2130_v46  ;;  %v2229_v52 = vadd.f32 %v2228_v51, %v2227_v47  ;;  %v2230_v53 = vpop.f32.mrb[6].mxu1 }
 0x106   : > { %v2231_v55 = vpop.f32.mrb[7].mxu1 }
 0x107   : > { %v1295_v54 = vadd.f32 %v2132_v50, %v2987_v26  ;;  %v2998_v56 = vadd.f32 %v2229_v52, %v1292_v49  ;;  %v2232_v57 = vadd.f32 %v2231_v55, %v2230_v53 }
 0x109   : > { %v2133_v58 = vpop.f32.mrb[8].mxu0  ;;  %v3000_v59 = vadd.f32 %v2232_v57, %v1295_v54 }
 0x10a   : > { %v2134_v60 = vpop.f32.mrb[9].mxu0 }
 0x10b   : > { %v2135_v61 = vadd.f32 %v2134_v60, %v2133_v58  ;;  %v2136_v62 = vpop.f32.mrb[10].mxu0  ;;  %v2233_v63 = vpop.f32.mrb[8].mxu1 }
 0x10c   : > { %v2137_v0 = vpop.f32.mrb[11].mxu0  ;;  %v2234_v3 = vpop.f32.mrb[9].mxu1 }
 0x10d   : > { %v1300_v1 = vadd.f32 %v2135_v61, %v2987_v26  ;;  %v2138_v2 = vadd.f32 %v2137_v0, %v2136_v62  ;;  %v2235_v4 = vadd.f32 %v2234_v3, %v2233_v63  ;;  %v2236_v5 = vpop.f32.mrb[10].mxu1 }
 0x10e   : > { %v2237_v7 = vpop.f32.mrb[11].mxu1 }
 0x10f   : > { %v1303_v6 = vadd.f32 %v2138_v2, %v2987_v26  ;;  %v3004_v8 = vadd.f32 %v2235_v4, %v1300_v1  ;;  %v2238_v9 = vadd.f32 %v2237_v7, %v2236_v5 }
 0x111   : > { %v2139_v10 = vpop.f32.mrb[12].mxu0  ;;  %v3006_v11 = vadd.f32 %v2238_v9, %v1303_v6 }
 0x112   : > { %v2140_v12 = vpop.f32.mrb[13].mxu0 }
 0x113   : > { %v2141_v13 = vadd.f32 %v2140_v12, %v2139_v10  ;;  %v2142_v14 = vpop.f32.mrb[14].mxu0  ;;  %v2239_v15 = vpop.f32.mrb[12].mxu1 }
 0x114   : > { %v2143_v16 = vpop.f32.mrb[15].mxu0  ;;  %v2240_v19 = vpop.f32.mrb[13].mxu1 }
 0x115   : > { %v1308_v17 = vadd.f32 %v2141_v13, %v2987_v26  ;;  %v2144_v18 = vadd.f32 %v2143_v16, %v2142_v14  ;;  %v2241_v20 = vadd.f32 %v2240_v19, %v2239_v15  ;;  %v2242_v21 = vpop.f32.mrb[14].mxu1 }
 0x116   : > { %v2243_v23 = vpop.f32.mrb[15].mxu1 }
 0x117   : > { %v1311_v22 = vadd.f32 %v2144_v18, %v2987_v26  ;;  %v3010_v24 = vadd.f32 %v2241_v20, %v1308_v17  ;;  %v2244_v25 = vadd.f32 %v2243_v23, %v2242_v21 }
 0x119   : > { %v2145_v27 = vpop.f32.mrb[16].mxu0  ;;  %v3012_v28 = vadd.f32 %v2244_v25, %v1311_v22 }
 0x11a   : > { %v2146_v29 = vpop.f32.mrb[17].mxu0 }
 0x11b   : > { %v2147_v30 = vadd.f32 %v2146_v29, %v2145_v27  ;;  %v2148_v31 = vpop.f32.mrb[18].mxu0  ;;  %v2245_v32 = vpop.f32.mrb[16].mxu1 }
 0x11c   : > { %v2149_v33 = vpop.f32.mrb[19].mxu0  ;;  %v2246_v36 = vpop.f32.mrb[17].mxu1 }
 0x11d   : > { %v1316_v34 = vadd.f32 %v2147_v30, %v2987_v26  ;;  %v2150_v35 = vadd.f32 %v2149_v33, %v2148_v31  ;;  %v2247_v37 = vadd.f32 %v2246_v36, %v2245_v32  ;;  %v2248_v38 = vpop.f32.mrb[18].mxu1 }
 0x11e   : > { %v2249_v41 = vpop.f32.mrb[19].mxu1 }
 0x11f   : > { %v1319_v39 = vadd.f32 %v2150_v35, %v2987_v26  ;;  %v3016_v42 = vadd.f32 %v2247_v37, %v1316_v34  ;;  %v2250_v44 = vadd.f32 %v2249_v41, %v2248_v38 }
 0x121   : > { %v2151_v45 = vpop.f32.mrb[20].mxu0  ;;  %v3018_v46 = vadd.f32 %v2250_v44, %v1319_v39 }
 0x122   : > { %v2152_v47 = vpop.f32.mrb[21].mxu0 }
 0x123   : > { %v2153_v48 = vadd.f32 %v2152_v47, %v2151_v45  ;;  %v2154_v49 = vpop.f32.mrb[22].mxu0  ;;  %v2251_v50 = vpop.f32.mrb[20].mxu1 }
 0x124   : > { %v2155_v51 = vpop.f32.mrb[23].mxu0  ;;  %v2252_v54 = vpop.f32.mrb[21].mxu1 }
 0x125   : > { %v1324_v52 = vadd.f32 %v2153_v48, %v2987_v26  ;;  %v2156_v53 = vadd.f32 %v2155_v51, %v2154_v49  ;;  %v2253_v55 = vadd.f32 %v2252_v54, %v2251_v50  ;;  %v2254_v57 = vpop.f32.mrb[22].mxu1 }
 0x126   : > { %v2255_v60 = vpop.f32.mrb[23].mxu1 }
 0x127   : > { %v1327_v58 = vadd.f32 %v2156_v53, %v2987_v26  ;;  %v3022_v61 = vadd.f32 %v2253_v55, %v1324_v52  ;;  %v2256_v62 = vadd.f32 %v2255_v60, %v2254_v57 }
 0x129   : > { %v2157_v63 = vpop.f32.mrb[24].mxu0  ;;  %v3024_v0 = vadd.f32 %v2256_v62, %v1327_v58 }
 0x12a   : > { %v2158_v1 = vpop.f32.mrb[25].mxu0 }
 0x12b   : > { %v2159_v2 = vadd.f32 %v2158_v1, %v2157_v63  ;;  %v2160_v3 = vpop.f32.mrb[26].mxu0  ;;  %v2257_v4 = vpop.f32.mrb[24].mxu1 }
 0x12c   : > { %v2161_v5 = vpop.f32.mrb[27].mxu0  ;;  %v2258_v9 = vpop.f32.mrb[25].mxu1 }
 0x12d   : > { %v1332_v6 = vadd.f32 %v2159_v2, %v2987_v26  ;;  %v2162_v7 = vadd.f32 %v2161_v5, %v2160_v3  ;;  %v2259_v10 = vadd.f32 %v2258_v9, %v2257_v4  ;;  %v2260_v12 = vpop.f32.mrb[26].mxu1 }
 0x12e   : > { %v2261_v14 = vpop.f32.mrb[27].mxu1 }
 0x12f   : > { %v1335_v13 = vadd.f32 %v2162_v7, %v2987_v26  ;;  %v3028_v15 = vadd.f32 %v2259_v10, %v1332_v6  ;;  %v2262_v16 = vadd.f32 %v2261_v14, %v2260_v12 }
 0x131   : > { %v2163_v17 = vpop.f32.mrb[28].mxu0  ;;  %v3030_v18 = vadd.f32 %v2262_v16, %v1335_v13 }
 0x132   : > { %v2164_v19 = vpop.f32.mrb[29].mxu0 }
 0x133   : > { %v2165_v20 = vadd.f32 %v2164_v19, %v2163_v17  ;;  %v2166_v21 = vpop.f32.mrb[30].mxu0  ;;  %v2263_v22 = vpop.f32.mrb[28].mxu1 }
 0x134   : > { %v2167_v23 = vpop.f32.mrb[31].mxu0  ;;  %v2264_v29 = vpop.f32.mrb[29].mxu1 }
 0x135   : > { %v1340_v25 = vadd.f32 %v2165_v20, %v2987_v26  ;;  %v2168_v27 = vadd.f32 %v2167_v23, %v2166_v21  ;;  %v2265_v30 = vadd.f32 %v2264_v29, %v2263_v22  ;;  %v2266_v31 = vpop.f32.mrb[30].mxu1 }
 0x136   : > { %v2267_v33 = vpop.f32.mrb[31].mxu1 }
 0x137   : > { %v1343_v32 = vadd.f32 %v2168_v27, %v2987_v26  ;;  %v3034_v34 = vadd.f32 %v2265_v30, %v1340_v25  ;;  %v2268_v35 = vadd.f32 %v2267_v33, %v2266_v31 }
 0x139   : > { %v2169_v36 = vpop.f32.mrb[32].mxu0  ;;  %v3036_v37 = vadd.f32 %v2268_v35, %v1343_v32 }
 0x13a   : > { %v2170_v38 = vpop.f32.mrb[33].mxu0 }
 0x13b   : > { %v2171_v39 = vadd.f32 %v2170_v38, %v2169_v36  ;;  %v2172_v41 = vpop.f32.mrb[34].mxu0  ;;  %v2269_v44 = vpop.f32.mrb[32].mxu1 }
 0x13c   : > { %v2173_v45 = vpop.f32.mrb[35].mxu0  ;;  %v2270_v49 = vpop.f32.mrb[33].mxu1 }
 0x13d   : > { %v1348_v47 = vadd.f32 %v2171_v39, %v2987_v26  ;;  %v2174_v48 = vadd.f32 %v2173_v45, %v2172_v41  ;;  %v2271_v50 = vadd.f32 %v2270_v49, %v2269_v44  ;;  %v2272_v51 = vpop.f32.mrb[34].mxu1 }
 0x13e   : > { %v2273_v53 = vpop.f32.mrb[35].mxu1 }
 0x13f   : > { %v1351_v52 = vadd.f32 %v2174_v48, %v2987_v26  ;;  %v3040_v54 = vadd.f32 %v2271_v50, %v1348_v47  ;;  %v2274_v55 = vadd.f32 %v2273_v53, %v2272_v51 }
 0x141   : > { %v2175_v57 = vpop.f32.mrb[36].mxu0  ;;  %v3042_v58 = vadd.f32 %v2274_v55, %v1351_v52 }
 0x142   : > { %v2176_v60 = vpop.f32.mrb[37].mxu0 }
 0x143   : > { %v2177_v62 = vadd.f32 %v2176_v60, %v2175_v57  ;;  %v2178_v63 = vpop.f32.mrb[38].mxu0  ;;  %v2275_v1 = vpop.f32.mrb[36].mxu1 }
 0x144   : > { %v2179_v2 = vpop.f32.mrb[39].mxu0  ;;  %v2276_v5 = vpop.f32.mrb[37].mxu1 }
 0x145   : > { %v1356_v3 = vadd.f32 %v2177_v62, %v2987_v26  ;;  %v2180_v4 = vadd.f32 %v2179_v2, %v2178_v63  ;;  %v2277_v6 = vadd.f32 %v2276_v5, %v2275_v1  ;;  %v2278_v7 = vpop.f32.mrb[38].mxu1 }
 0x146   : > { %v2279_v10 = vpop.f32.mrb[39].mxu1 }
 0x147   : > { %v1359_v9 = vadd.f32 %v2180_v4, %v2987_v26  ;;  %v3046_v12 = vadd.f32 %v2277_v6, %v1356_v3  ;;  %v2280_v13 = vadd.f32 %v2279_v10, %v2278_v7 }
 0x149   : > { %v2181_v14 = vpop.f32.mrb[40].mxu0  ;;  %v3048_v16 = vadd.f32 %v2280_v13, %v1359_v9 }
 0x14a   : > { %v2182_v17 = vpop.f32.mrb[41].mxu0 }
 0x14b   : > { %v2183_v19 = vadd.f32 %v2182_v17, %v2181_v14  ;;  %v2184_v20 = vpop.f32.mrb[42].mxu0  ;;  %v2281_v21 = vpop.f32.mrb[40].mxu1 }
 0x14c   : > { %v2185_v22 = vpop.f32.mrb[43].mxu0  ;;  %v2282_v27 = vpop.f32.mrb[41].mxu1 }
 0x14d   : > { %v1364_v23 = vadd.f32 %v2183_v19, %v2987_v26  ;;  %v2186_v25 = vadd.f32 %v2185_v22, %v2184_v20  ;;  %v2283_v29 = vadd.f32 %v2282_v27, %v2281_v21  ;;  %v2284_v30 = vpop.f32.mrb[42].mxu1 }
 0x14e   : > { %v2285_v32 = vpop.f32.mrb[43].mxu1 }
 0x14f   : > { %v1367_v31 = vadd.f32 %v2186_v25, %v2987_v26  ;;  %v3052_v33 = vadd.f32 %v2283_v29, %v1364_v23  ;;  %v2286_v35 = vadd.f32 %v2285_v32, %v2284_v30 }
 0x151   : > { %v2187_v36 = vpop.f32.mrb[44].mxu0  ;;  %v3054_v38 = vadd.f32 %v2286_v35, %v1367_v31 }
 0x152   : > { %v2188_v39 = vpop.f32.mrb[45].mxu0 }
 0x153   : > { %v2189_v41 = vadd.f32 %v2188_v39, %v2187_v36  ;;  %v2190_v44 = vpop.f32.mrb[46].mxu0  ;;  %v2287_v45 = vpop.f32.mrb[44].mxu1 }
 0x154   : > { %v2191_v47 = vpop.f32.mrb[47].mxu0  ;;  %v2288_v50 = vpop.f32.mrb[45].mxu1 }
 0x155   : > { %v1372_v48 = vadd.f32 %v2189_v41, %v2987_v26  ;;  %v2192_v49 = vadd.f32 %v2191_v47, %v2190_v44  ;;  %v2289_v51 = vadd.f32 %v2288_v50, %v2287_v45  ;;  %v2290_v52 = vpop.f32.mrb[46].mxu1 }
 0x156   : > { %v2291_v55 = vpop.f32.mrb[47].mxu1 }
 0x157   : > { %v1375_v53 = vadd.f32 %v2192_v49, %v2987_v26  ;;  %v3058_v57 = vadd.f32 %v2289_v51, %v1372_v48  ;;  %v2292_v60 = vadd.f32 %v2291_v55, %v2290_v52 }
 0x159   : > { %v2193_v62 = vpop.f32.mrb[48].mxu0  ;;  %v3060_v63 = vadd.f32 %v2292_v60, %v1375_v53 }
 0x15a   : > { %v2194_v1 = vpop.f32.mrb[49].mxu0 }
 0x15b   : > { %v2195_v2 = vadd.f32 %v2194_v1, %v2193_v62  ;;  %v2196_v3 = vpop.f32.mrb[50].mxu0  ;;  %v2293_v4 = vpop.f32.mrb[48].mxu1 }
 0x15c   : > { %v2197_v5 = vpop.f32.mrb[51].mxu0  ;;  %v2294_v9 = vpop.f32.mrb[49].mxu1 }
 0x15d   : > { %v1380_v6 = vadd.f32 %v2195_v2, %v2987_v26  ;;  %v2198_v7 = vadd.f32 %v2197_v5, %v2196_v3  ;;  %v2295_v10 = vadd.f32 %v2294_v9, %v2293_v4  ;;  %v2296_v13 = vpop.f32.mrb[50].mxu1 }
 0x15e   : > { %v2297_v17 = vpop.f32.mrb[51].mxu1 }
 0x15f   : > { %v1383_v14 = vadd.f32 %v2198_v7, %v2987_v26  ;;  %v3064_v19 = vadd.f32 %v2295_v10, %v1380_v6  ;;  %v2298_v20 = vadd.f32 %v2297_v17, %v2296_v13 }
 0x161   : > { %v2199_v21 = vpop.f32.mrb[52].mxu0  ;;  %v3066_v22 = vadd.f32 %v2298_v20, %v1383_v14 }
 0x162   : > { %v2200_v23 = vpop.f32.mrb[53].mxu0 }
 0x163   : > { %v2201_v25 = vadd.f32 %v2200_v23, %v2199_v21  ;;  %v2202_v27 = vpop.f32.mrb[54].mxu0  ;;  %v2299_v29 = vpop.f32.mrb[52].mxu1 }
 0x164   : > { %v2203_v30 = vpop.f32.mrb[55].mxu0  ;;  %v2300_v35 = vpop.f32.mrb[53].mxu1 }
 0x165   : > { %v1388_v31 = vadd.f32 %v2201_v25, %v2987_v26  ;;  %v2204_v32 = vadd.f32 %v2203_v30, %v2202_v27  ;;  %v2301_v36 = vadd.f32 %v2300_v35, %v2299_v29  ;;  %v2302_v39 = vpop.f32.mrb[54].mxu1 }
 0x166   : > { %v2303_v44 = vpop.f32.mrb[55].mxu1 }
 0x167   : > { %v1391_v41 = vadd.f32 %v2204_v32, %v2987_v26  ;;  %v3070_v45 = vadd.f32 %v2301_v36, %v1388_v31  ;;  %v2304_v47 = vadd.f32 %v2303_v44, %v2302_v39 }
 0x169   : > { %v2321_v48 = vpop.f32.mrb[56].mxu0  ;;  %v3072_v49 = vadd.f32 %v2304_v47, %v1391_v41 }
 0x16a   : > { %v2322_v50 = vpop.f32.mrb[57].mxu0 }
 0x16b   : > { %v2323_v51 = vadd.f32 %v2322_v50, %v2321_v48  ;;  %v2324_v52 = vpop.f32.mrb[58].mxu0  ;;  %v2445_v55 = vpop.f32.mrb[56].mxu1 }
 0x16c   : > { %v2325_v53 = vpop.f32.mrb[59].mxu0  ;;  %v1718_v1 = vpop.f32.mrb[57].mxu1 }
 0x16d   : > { %v2326_v60 = vadd.f32 %v2325_v53, %v2324_v52  ;;  %v1574_v62 = vadd.f32 %v2323_v51, %v2992_v40  ;;  %v2446_v2 = vpop.f32.mrb[58].mxu1 }
 0x16e   : > { %v1721_v4 = vpop.f32.mrb[59].mxu1 }
 0x16f   : > { %v1719_v3 = vadd.f32 %v1718_v1, %v1574_v62  ;;  %v1577_v26 = vadd.f32 %v2326_v60, %v2994_v43 }
 0x171   : > { %v3076_v5 = vadd.f32 %v1721_v4, %v1577_v26  ;;  %v2327_v6 = vpop.f32.mrb[60].mxu0 }
 0x172   : > { %v2328_v7 = vpop.f32.mrb[61].mxu0 }
 0x173   : > { %v2329_v9 = vadd.f32 %v2328_v7, %v2327_v6  ;;  %v2330_v10 = vpop.f32.mrb[62].mxu0  ;;  %v2449_v14 = vpop.f32.mrb[60].mxu1 }
 0x174   : > { %v2331_v13 = vpop.f32.mrb[63].mxu0  ;;  %v1734_v21 = vpop.f32.mrb[61].mxu1 }
 0x175   : > { %v1582_v17 = vadd.f32 %v2329_v9, %v2998_v56  ;;  %v2332_v20 = vadd.f32 %v2331_v13, %v2330_v10  ;;  %v2450_v23 = vpop.f32.mrb[62].mxu1  ;;  %v1829_v13 = vmax.f32 %v1719_v3, 0.0  ;;  %v1830_v3 = vmax.f32 %v3076_v5, 0.0 }
 0x176   : > { %v1737_v27 = vpop.f32.mrb[63].mxu1 }
 0x177   : > { %v1727_v40 = vadd.f32 %v2445_v55, %v1582_v17  ;;  %v1585_v25 = vadd.f32 %v2332_v20, %v3000_v59 }
 0x179   : > { %v3080_v29 = vadd.f32 %v2446_v2, %v1585_v25  ;;  %v2333_v43 = vpop.f32.mrb[64].mxu0 }
 0x17a   : > { %v2334_v30 = vpop.f32.mrb[65].mxu0 }
 0x17b   : > { %v2335_v31 = vadd.f32 %v2334_v30, %v2333_v43  ;;  %v2336_v32 = vpop.f32.mrb[66].mxu0  ;;  %v2453_v36 = vpop.f32.mrb[64].mxu1 }
 0x17c   : > { %v2337_v35 = vpop.f32.mrb[67].mxu0  ;;  %v1750_v44 = vpop.f32.mrb[65].mxu1 }
 0x17d   : > { %v2338_v39 = vadd.f32 %v2337_v35, %v2336_v32  ;;  %v1590_v41 = vadd.f32 %v2335_v31, %v3004_v8  ;;  %v2454_v56 = vpop.f32.mrb[66].mxu1 }
 0x17e   : > { %v1753_v50 = vpop.f32.mrb[67].mxu1 }
 0x17f   : > { %v3083_v47 = vadd.f32 %v1734_v21, %v1590_v41  ;;  %v1593_v48 = vadd.f32 %v2338_v39, %v3006_v11 }
 0x181   : > { %v3086_v59 = vadd.f32 %v1737_v27, %v1593_v48  ;;  %v2339_v51 = vpop.f32.mrb[68].mxu0 }
 0x182   : > { %v2340_v52 = vpop.f32.mrb[69].mxu0 }
 0x183   : > { %v2341_v53 = vadd.f32 %v2340_v52, %v2339_v51  ;;  %v2342_v55 = vpop.f32.mrb[70].mxu0  ;;  %v3088_v62 = vpop.f32.mrb[68].mxu1 }
 0x184   : > { %v2343_v60 = vpop.f32.mrb[71].mxu0  ;;  %v1766_v8 = vpop.f32.mrb[69].mxu1 }
 0x185   : > { %v1598_v1 = vadd.f32 %v2341_v53, %v3010_v24  ;;  %v2344_v2 = vadd.f32 %v2343_v60, %v2342_v55  ;;  %v3091_v26 = vpop.f32.mrb[70].mxu1 }
 0x186   : > { %v1769_v6 = vpop.f32.mrb[71].mxu1 }
 0x187   : > { %v3093_v4 = vadd.f32 %v2449_v14, %v1598_v1  ;;  %v1601_v11 = vadd.f32 %v2344_v2, %v3012_v28 }
 0x189   : > { %v1746_v7 = vadd.f32 %v2450_v23, %v1601_v11  ;;  %v2345_v9 = vpop.f32.mrb[72].mxu0 }
 0x18a   : > { %v2346_v10 = vpop.f32.mrb[73].mxu0 }
 0x18b   : > { %v1836_v17 = vmax.f32 %v1746_v7, 0.0  ;;  %v2347_v20 = vadd.f32 %v2346_v10, %v2345_v9  ;;  %v2348_v21 = vpop.f32.mrb[74].mxu0  ;;  %v3096_v27 = vpop.f32.mrb[72].mxu1 }
 0x18c   : > { %v2349_v25 = vpop.f32.mrb[75].mxu0  ;;  %v3099_v30 = vpop.f32.mrb[73].mxu1 }
 0x18d   : > { %v2350_v24 = vadd.f32 %v2349_v25, %v2348_v21  ;;  %v1606_v43 = vadd.f32 %v2347_v20, %v3016_v42  ;;  %v3101_v14 = vmax.f32 %v1829_v13, %v1836_v17  ;;  %v3103_v31 = vpop.f32.mrb[74].mxu1  ;;  %v1831_v42 = vmax.f32 %v1727_v40, 0.0 }
 0x18e   : > { %v3106_v32 = vpop.f32.mrb[75].mxu1  ;;  %v1832_v40 = vmax.f32 %v3080_v29, 0.0  ;;  %v1833_v21 = vmax.f32 %v3083_v47, 0.0 }
 0x18f   : > { %v1751_v28 = vadd.f32 %v1750_v44, %v1606_v43  ;;  %v1609_v23 = vadd.f32 %v2350_v24, %v3018_v46 }
 0x191   : > { %v1837_v35 = vmax.f32 %v1751_v28, 0.0  ;;  %v1754_v39 = vadd.f32 %v1753_v50, %v1609_v23  ;;  %v2351_v41 = vpop.f32.mrb[76].mxu0 }
 0x192   : > { %v2352_v48 = vpop.f32.mrb[77].mxu0 }
 0x193   : > { %v3109_v51 = vmax.f32 %v1830_v3, %v1837_v35  ;;  %v1838_v52 = vmax.f32 %v1754_v39, 0.0  ;;  %v2353_v53 = vadd.f32 %v2352_v48, %v2351_v41  ;;  %v2354_v55 = vpop.f32.mrb[78].mxu0  ;;  %v3111_v1 = vpop.f32.mrb[76].mxu1  ;;  %v1834_v41 = vmax.f32 %v3086_v59, 0.0 }
 0x194   : > { %v2355_v60 = vpop.f32.mrb[79].mxu0  ;;  %v3116_v11 = vpop.f32.mrb[77].mxu1 }
 0x195   : > { %v3113_v44 = vmax.f32 %v1831_v42, %v1838_v52  ;;  %v1614_v46 = vadd.f32 %v2353_v53, %v3022_v61  ;;  %v2356_v2 = vadd.f32 %v2355_v60, %v2354_v55  ;;  %v3118_v5 = vpop.f32.mrb[78].mxu1 }
 0x196   : > { %v3121_v9 = vpop.f32.mrb[79].mxu1 }
 0x197   : > { %v1759_v50 = vadd.f32 %v2453_v36, %v1614_v46  ;;  %v1617_v7 = vadd.f32 %v2356_v2, %v3024_v0 }
 0x199   : > { %v1839_v10 = vmax.f32 %v1759_v50, 0.0  ;;  %v1762_v13 = vadd.f32 %v2454_v56, %v1617_v7  ;;  %v2357_v17 = vpop.f32.mrb[80].mxu0 }
 0x19a   : > { %v2358_v20 = vpop.f32.mrb[81].mxu0 }
 0x19b   : > { %v1840_v25 = vmax.f32 %v1762_v13, 0.0  ;;  %v2359_v61 = vadd.f32 %v2358_v20, %v2357_v17  ;;  %v2360_v24 = vpop.f32.mrb[82].mxu0  ;;  %v3125_v43 = vmax.f32 %v1832_v40, %v1839_v10  ;;  %v3127_v23 = vpop.f32.mrb[80].mxu1 }
 0x19c   : > { %v2361_v28 = vpop.f32.mrb[83].mxu0  ;;  %v3130_v3 = vpop.f32.mrb[81].mxu1 }
 0x19d   : > { %v2362_v36 = vadd.f32 %v2361_v28, %v2360_v24  ;;  %v1622_v0 = vadd.f32 %v2359_v61, %v3028_v15  ;;  %v3132_v29 = vmax.f32 %v1833_v21, %v1840_v25  ;;  %v3134_v56 = vpop.f32.mrb[82].mxu1  ;;  %v1835_v15 = vmax.f32 %v3093_v4, 0.0 }
 0x19e   : > { %v3137_v39 = vpop.f32.mrb[83].mxu1 }
 0x19f   : > { %v1767_v35 = vadd.f32 %v1766_v8, %v1622_v0  ;;  %v1625_v47 = vadd.f32 %v2362_v36, %v3030_v18 }
 0x1a1   : > { %v1841_v48 = vmax.f32 %v1767_v35, 0.0  ;;  %v1770_v42 = vadd.f32 %v1769_v6, %v1625_v47  ;;  %v2363_v52 = vpop.f32.mrb[84].mxu0 }
 0x1a2   : > { %v2364_v53 = vpop.f32.mrb[85].mxu0 }
 0x1a3   : > { %v3140_v55 = vmax.f32 %v1834_v41, %v1841_v48  ;;  %v1842_v60 = vmax.f32 %v1770_v42, 0.0  ;;  %v2365_v46 = vadd.f32 %v2364_v53, %v2363_v52  ;;  %v2366_v2 = vpop.f32.mrb[86].mxu0 }
 0x1a4   : > { %v2367_v50 = vpop.f32.mrb[87].mxu0 }
 0x1a5   : > { %v3143_v7 = vmax.f32 %v1835_v15, %v1842_v60  ;;  %v1630_v18 = vadd.f32 %v2365_v46, %v3034_v34  ;;  %v2368_v8 = vadd.f32 %v2367_v50, %v2366_v2 }
 0x1a7   : > { %v1775_v40 = vadd.f32 %v3088_v62, %v1630_v18  ;;  %v1633_v59 = vadd.f32 %v2368_v8, %v3036_v37 }
 0x1a9   : > { %v1778_v6 = vadd.f32 %v3091_v26, %v1633_v59  ;;  %v2369_v10 = vpop.f32.mrb[88].mxu0  ;;  %v1843_v60 = vmax.f32 %v1775_v40, 0.0 }
 0x1aa   : > { %v2370_v13 = vpop.f32.mrb[89].mxu0 }
 0x1ab   : > { %v2371_v17 = vadd.f32 %v2370_v13, %v2369_v10  ;;  %v2372_v20 = vpop.f32.mrb[90].mxu0  ;;  %v1844_v40 = vmax.f32 %v1778_v6, 0.0 }
 0x1ac   : > { %v2373_v4 = vpop.f32.mrb[91].mxu0 }
 0x1ad   : > { %v2374_v21 = vadd.f32 %v2373_v4, %v2372_v20  ;;  %v1638_v25 = vadd.f32 %v2371_v17, %v3040_v54 }
 0x1af   : > { %v1783_v61 = vadd.f32 %v3099_v30, %v1638_v25  ;;  %v1641_v34 = vadd.f32 %v2374_v21, %v3042_v58 }
 0x1b1   : > { %v3153_v24 = vadd.f32 %v3106_v32, %v1641_v34  ;;  %v2375_v62 = vpop.f32.mrb[92].mxu0  ;;  %v1845_v20 = vmax.f32 %v1783_v61, 0.0 }
 0x1b2   : > { %v2376_v37 = vpop.f32.mrb[93].mxu0 }
 0x1b3   : > { %v2377_v28 = vadd.f32 %v2376_v37, %v2375_v62  ;;  %v2378_v26 = vpop.f32.mrb[94].mxu0  ;;  %v1846_v61 = vmax.f32 %v3153_v24, 0.0 }
 0x1b4   : > { %v2379_v36 = vpop.f32.mrb[95].mxu0 }
 0x1b5   : > { %v1646_v0 = vadd.f32 %v2377_v28, %v3046_v12  ;;  %v2380_v35 = vadd.f32 %v2379_v36, %v2378_v26 }
 0x1b7   : > { %v3157_v47 = vadd.f32 %v3096_v27, %v1646_v0  ;;  %v1649_v54 = vadd.f32 %v2380_v35, %v3048_v16 }
 0x1b9   : > { %v3163_v58 = vadd.f32 %v3103_v31, %v1649_v54  ;;  %v2381_v30 = vpop.f32.mrb[96].mxu0 }
 0x1ba   : > { %v2382_v32 = vpop.f32.mrb[97].mxu0 }
 0x1bb   : > { %v2383_v41 = vadd.f32 %v2382_v32, %v2381_v30  ;;  %v2384_v48 = vpop.f32.mrb[98].mxu0 }
 0x1bc   : > { %v2385_v42 = vpop.f32.mrb[99].mxu0 }
 0x1bd   : > { %v2386_v52 = vadd.f32 %v2385_v42, %v2384_v48  ;;  %v1654_v12 = vadd.f32 %v2383_v41, %v3052_v33 }
 0x1bf   : > { %v3167_v53 = vadd.f32 %v3116_v11, %v1654_v12  ;;  %v1657_v16 = vadd.f32 %v2386_v52, %v3054_v38 }
 0x1c1   : > { %v1802_v27 = vadd.f32 %v3121_v9, %v1657_v16  ;;  %v2387_v15 = vpop.f32.mrb[100].mxu0 }
 0x1c2   : > { %v2388_v31 = vpop.f32.mrb[101].mxu0 }
 0x1c3   : > { %v1850_v46 = vmax.f32 %v1802_v27, 0.0  ;;  %v2389_v2 = vadd.f32 %v2388_v31, %v2387_v15  ;;  %v2390_v50 = vpop.f32.mrb[102].mxu0 }
 0x1c4   : > { %v2391_v18 = vpop.f32.mrb[103].mxu0 }
 0x1c5   : > { %v1864_v8 = vmax.f32 %v1843_v60, %v1850_v46  ;;  %v1662_v59 = vadd.f32 %v2389_v2, %v3058_v57  ;;  %v2392_v33 = vadd.f32 %v2391_v18, %v2390_v50 }
 0x1c7   : > { %v1871_v38 = vmax.f32 %v3101_v14, %v1864_v8  ;;  %v1807_v11 = vadd.f32 %v3111_v1, %v1662_v59  ;;  %v1665_v9 = vadd.f32 %v2392_v33, %v3060_v63 }
 0x1c9   : > { %1878 = vst [vmem:[%s3175_s10] sm:$0xff] %v1871_v38  ;;  %v1851_v10 = vmax.f32 %v1807_v11, 0.0  ;;  %v1810_v13 = vadd.f32 %v3118_v5, %v1665_v9  ;;  %v2393_v57 = vpop.f32.mrb[104].mxu0 }
 0x1ca   : > { %v2394_v17 = vpop.f32.mrb[105].mxu0 }
 0x1cb   : > { %v1865_v4 = vmax.f32 %v1844_v40, %v1851_v10  ;;  %v1852_v21 = vmax.f32 %v1810_v13, 0.0  ;;  %v2395_v25 = vadd.f32 %v2394_v17, %v2393_v57  ;;  %v2396_v34 = vpop.f32.mrb[106].mxu0 }
 0x1cc   : > { %v2397_v62 = vpop.f32.mrb[107].mxu0 }
 0x1cd   : > { %v1872_v14 = vmax.f32 %v3109_v51, %v1865_v4  ;;  %v1866_v1 = vmax.f32 %v1845_v20, %v1852_v21  ;;  %v2398_v37 = vadd.f32 %v2397_v62, %v2396_v34  ;;  %v1670_v63 = vadd.f32 %v2395_v25, %v3064_v19 }
 0x1ce   : > { %v1847_v19 = vmax.f32 %v3157_v47, 0.0  ;;  %v1848_v47 = vmax.f32 %v3163_v58, 0.0 }
 0x1cf   : > { %1879 = vst [vmem:[%s3175_s10 + $0x8] sm:$0xff] %v1872_v14  ;;  %v1873_v6 = vmax.f32 %v3113_v44, %v1866_v1  ;;  %v1815_v5 = vadd.f32 %v3130_v3, %v1670_v63  ;;  %v1673_v28 = vadd.f32 %v2398_v37, %v3066_v22 }
 0x1d1   : > { %1880 = vst [vmem:[%s3175_s10 + $0x10] sm:$0xff] %v1873_v6  ;;  %v1853_v26 = vmax.f32 %v1815_v5, 0.0  ;;  %v1818_v36 = vadd.f32 %v3137_v39, %v1673_v28  ;;  %v2399_v0 = vpop.f32.mrb[108].mxu0 }
 0x1d2   : > { %v2400_v51 = vpop.f32.mrb[109].mxu0 }
 0x1d3   : > { %v1867_v35 = vmax.f32 %v1846_v61, %v1853_v26  ;;  %v1854_v54 = vmax.f32 %v1818_v36, 0.0  ;;  %v2401_v30 = vadd.f32 %v2400_v51, %v2399_v0  ;;  %v2402_v44 = vpop.f32.mrb[110].mxu0 }
 0x1d4   : > { %v2403_v32 = vpop.f32.mrb[111].mxu0 }
 0x1d5   : > { %v1874_v3 = vmax.f32 %v3125_v43, %v1867_v35  ;;  %v1868_v22 = vmax.f32 %v1847_v19, %v1854_v54  ;;  %v1678_v24 = vadd.f32 %v2401_v30, %v3070_v45  ;;  %v2404_v41 = vadd.f32 %v2403_v32, %v2402_v44 }
 0x1d6   : > { %v1849_v43 = vmax.f32 %v3167_v53, 0.0 }
 0x1d7   : > { %1881 = vst [vmem:[%s3175_s10 + $0x18] sm:$0xff] %v1874_v3  ;;  %v1875_v39 = vmax.f32 %v3132_v29, %v1868_v22  ;;  %v1823_v48 = vadd.f32 %v3127_v23, %v1678_v24  ;;  %v1681_v42 = vadd.f32 %v2404_v41, %v3072_v49 }
 0x1d9   : > { %1882 = vst [vmem:[%s3175_s10 + $0x20] sm:$0xff] %v1875_v39  ;;  %v1855_v52 = vmax.f32 %v1823_v48, 0.0  ;;  %v1826_v12 = vadd.f32 %v3134_v56, %v1681_v42 }
 0x1db   : > { %v1869_v16 = vmax.f32 %v1848_v47, %v1855_v52  ;;  %v1856_v27 = vmax.f32 %v1826_v12, 0.0 }
 0x1dd   : > { %v1876_v45 = vmax.f32 %v3140_v55, %v1869_v16  ;;  %v1870_v15 = vmax.f32 %v1849_v43, %v1856_v27 }
 0x1df   : > { %1883 = vst [vmem:[%s3175_s10 + $0x28] sm:$0xff] %v1876_v45  ;;  %v1877_v29 = vmax.f32 %v3143_v7, %v1870_v15 }
 0x1e1   : > { %1884 = vst [vmem:[%s3175_s10 + $0x30] sm:$0xff] %v1877_v29 }
 0x1e2 PF: > { %s13_s12 = sadd.s32 1, %s2682_s12  }
 0x1e3   : > { %p10_p5 = scmp.ge.s32.totalorder %s13_s12, 4  }
 0x1e5   :  { %12 = sbr.rel (!%p10_p5) target bundleno = 1 (0x1), region = 62 }

// kernel: cnn_forward.5
= control target key start
LH: loop header
LB: loop body
LE: loop exit
PB: predicated region body
PF: predicated region fallthrough
CT: control target
= control target key end

     0   :  { %v14606_v3 = vmov 0   ;;  %vm9577_vm0 = vcmask 523264   ;;  %vm14608_vm1 = vmmov 0   ;;  %s19895_s1 = inlined_call_operand.vmem [shape: bf16[3136,1024], index: 1, kind: input, shape index: {}]   ;;  %s19896_s0 = inlined_call_operand.vmem [shape: bf16[8,3136], index: 0, kind: input, shape index: {}]   ;;  %s19897_s2 = inlined_call_operand.vmem [shape: f32[1,1024], index: 2, kind: input, shape index: {}]   ;;  %s19898_s3 = inlined_call_operand.vmem [shape: bf16[1024,128], index: 3, kind: input, shape index: {}]   ;;  %s19899_s4 = inlined_call_operand.vmem [shape: f32[1,128], index: 4, kind: input, shape index: {}]   ;;  %s19900_s5 = inlined_call_operand.vmem [shape: bf16[128,128], index: 5, kind: input, shape index: {}]   ;;  %s19901_s6 = inlined_call_operand.vmem [shape: f32[1,128], index: 6, kind: input, shape index: {}]   ;;  %s19902_s7 = inlined_call_operand.vmem [shape: f32[8,128], index: 7, kind: output, shape index: {}]  }
   0x1   :  { %v40_v0 = vld [vmem:[%s19895_s1] sm:$0xff]  ;;  %10105 = vmatprep.mubr.bf16.mxu1 %v14606_v3  ;;  %v41_v33 = vld [vmem:[%s19895_s1 + $0x8] sm:$0xff] }
   0x2   :  { %v44_v1 = vld [vmem:[%s19895_s1 + $0x20] sm:$0xff]  ;;  %v45_v34 = vld [vmem:[%s19895_s1 + $0x28] sm:$0xff] }
   0x3   :  { %v1576_v2 = vld [vmem:[%s19895_s1 + $0x3000] sm:$0xff]  ;;  %v12543_v4 = vcombine.high %v40_v0, %v44_v1  ;;  %v12542_v6 = vcombine.low %v40_v0, %v44_v1  ;;  %v12545_v38 = vcombine.high %v41_v33, %v45_v34  ;;  %v49_v41 = vld [vmem:[%s19895_s1 + $0x48] sm:$0xff]  ;;  %v12544_v45 = vcombine.low %v41_v33, %v45_v34 }
   0x4   :  { %v1580_v5 = vld [vmem:[%s19895_s1 + $0x3020] sm:$0xff]  ;;  %v53_v42 = vld [vmem:[%s19895_s1 + $0x68] sm:$0xff] }
   0x5   :  { %v48_v7 = vld [vmem:[%s19895_s1 + $0x40] sm:$0xff]  ;;  %v14079_v9 = vcombine.high %v1576_v2, %v1580_v5  ;;  %v14078_v10 = vcombine.low %v1576_v2, %v1580_v5  ;;  %9581 = vmatprep.subr.bf16.mxu0 %v12543_v4  ;;  %v12553_v47 = vcombine.high %v49_v41, %v53_v42  ;;  %v57_v50 = vld [vmem:[%s19895_s1 + $0x88] sm:$0xff]  ;;  %v12552_v53 = vcombine.low %v49_v41, %v53_v42 }
   0x6   :  { %v52_v8 = vld [vmem:[%s19895_s1 + $0x60] sm:$0xff]  ;;  %9582 = vmatpush1.bf16.msra.mxu0 %v12542_v6  ;;  %v61_v51 = vld [vmem:[%s19895_s1 + $0xa8] sm:$0xff] }
   0x7   :  { %v12551_v11 = vcombine.high %v48_v7, %v52_v8  ;;  %v1584_v12 = vld [vmem:[%s19895_s1 + $0x3040] sm:$0xff]  ;;  %10073 = vmatprep.subr.bf16.mxu1 %v14079_v9  ;;  %v12550_v19 = vcombine.low %v48_v7, %v52_v8  ;;  %v12561_v55 = vcombine.high %v57_v50, %v61_v51  ;;  %v65_v59 = vld [vmem:[%s19895_s1 + $0xc8] sm:$0xff]  ;;  %v12560_v63 = vcombine.low %v57_v50, %v61_v51 }
   0x8   :  { %v1588_v13 = vld [vmem:[%s19895_s1 + $0x3060] sm:$0xff]  ;;  %10074 = vmatpush1.bf16.msra.mxu1 %v14078_v10  ;;  %v69_v60 = vld [vmem:[%s19895_s1 + $0xe8] sm:$0xff] }
   0x9   :  { %v56_v14 = vld [vmem:[%s19895_s1 + $0x80] sm:$0xff]  ;;  %v14087_v15 = vcombine.high %v1584_v12, %v1588_v13  ;;  %9583 = vmatprep.subr.bf16.mxu0 %v12551_v11  ;;  %v14086_v20 = vcombine.low %v1584_v12, %v1588_v13  ;;  %v12569_v1 = vcombine.high %v65_v59, %v69_v60  ;;  %v73_v5 = vld [vmem:[%s19895_s1 + $0x108] sm:$0xff]  ;;  %v12568_v8 = vcombine.low %v65_v59, %v69_v60 }
   0xa   :  { %v60_v16 = vld [vmem:[%s19895_s1 + $0xa0] sm:$0xff]  ;;  %9584 = vmatpush1.bf16.msra.mxu0 %v12550_v19  ;;  %v77_v6 = vld [vmem:[%s19895_s1 + $0x128] sm:$0xff] }
   0xb   :  { %v1592_v17 = vld [vmem:[%s19895_s1 + $0x3080] sm:$0xff]  ;;  %v12559_v21 = vcombine.high %v56_v14, %v60_v16  ;;  %10075 = vmatprep.subr.bf16.mxu1 %v14087_v15  ;;  %v12558_v27 = vcombine.low %v56_v14, %v60_v16  ;;  %v12577_v10 = vcombine.high %v73_v5, %v77_v6  ;;  %v81_v13 = vld [vmem:[%s19895_s1 + $0x148] sm:$0xff]  ;;  %v12576_v16 = vcombine.low %v73_v5, %v77_v6 }
   0xc   :  { %v1596_v18 = vld [vmem:[%s19895_s1 + $0x30a0] sm:$0xff]  ;;  %10076 = vmatpush1.bf16.msra.mxu1 %v14086_v20  ;;  %v85_v14 = vld [vmem:[%s19895_s1 + $0x168] sm:$0xff] }
   0xd   :  { %v14095_v22 = vcombine.high %v1592_v17, %v1596_v18  ;;  %v64_v23 = vld [vmem:[%s19895_s1 + $0xc0] sm:$0xff]  ;;  %9585 = vmatprep.subr.bf16.mxu0 %v12559_v21  ;;  %v14094_v28 = vcombine.low %v1592_v17, %v1596_v18  ;;  %v12585_v18 = vcombine.high %v81_v13, %v85_v14  ;;  %v89_v21 = vld [vmem:[%s19895_s1 + $0x188] sm:$0xff] }
   0xe   :  { %v68_v24 = vld [vmem:[%s19895_s1 + $0xe0] sm:$0xff]  ;;  %9586 = vmatpush1.bf16.msra.mxu0 %v12558_v27 }
   0xf   :  { %v1600_v25 = vld [vmem:[%s19895_s1 + $0x30c0] sm:$0xff]  ;;  %v12567_v29 = vcombine.high %v64_v23, %v68_v24  ;;  %10077 = vmatprep.subr.bf16.mxu1 %v14095_v22  ;;  %v12566_v35 = vcombine.low %v64_v23, %v68_v24  ;;  %v93_v22 = vld [vmem:[%s19895_s1 + $0x1a8] sm:$0xff]  ;;  %v12584_v24 = vcombine.low %v81_v13, %v85_v14 }
  0x10   :  { %v1604_v26 = vld [vmem:[%s19895_s1 + $0x30e0] sm:$0xff]  ;;  %10078 = vmatpush1.bf16.msra.mxu1 %v14094_v28  ;;  %v14872_v13 = vld [vmem:[%s19896_s0 + $0x8] sm:$0xff] }
  0x11   :  { %v14103_v30 = vcombine.high %v1600_v25, %v1604_v26  ;;  %v72_v31 = vld [vmem:[%s19895_s1 + $0x100] sm:$0xff]  ;;  %9587 = vmatprep.subr.bf16.mxu0 %v12567_v29  ;;  %v14102_v36 = vcombine.low %v1600_v25, %v1604_v26  ;;  %v12593_v26 = vcombine.high %v89_v21, %v93_v22  ;;  %v97_v29 = vld [vmem:[%s19895_s1 + $0x1c8] sm:$0xff] }
  0x12   :  { %v76_v32 = vld [vmem:[%s19895_s1 + $0x120] sm:$0xff]  ;;  %9588 = vmatpush1.bf16.msra.mxu0 %v12566_v35 }
  0x13   :  { %v12575_v37 = vcombine.high %v72_v31, %v76_v32  ;;  %10079 = vmatprep.subr.bf16.mxu1 %v14103_v30  ;;  %v80_v39 = vld [vmem:[%s19895_s1 + $0x140] sm:$0xff]  ;;  %v12574_v44 = vcombine.low %v72_v31, %v76_v32  ;;  %v101_v30 = vld [vmem:[%s19895_s1 + $0x1e8] sm:$0xff]  ;;  %v12592_v32 = vcombine.low %v89_v21, %v93_v22  ;;  %v14892_v21 = vcombine.high %v14872_v13, %v14872_v13 }
  0x14   :  { %v84_v40 = vld [vmem:[%s19895_s1 + $0x160] sm:$0xff]  ;;  %10080 = vmatpush1.bf16.msra.mxu1 %v14102_v36  ;;  %v12601_v34 = vcombine.high %v97_v29, %v101_v30 }
  0x15   :  { %v14506_v43 = vld [vmem:[%s19896_s0 + $0x60] ss:$0 sps:$4 sm:$0xff]   ;;  %9589 = vmatprep.subr.bf16.mxu0 %v12575_v37  ;;  %v12583_v46 = vcombine.high %v80_v39, %v84_v40  ;;  %10114 = vmatprep.subr.bf16.mxu1 %v12545_v38  ;;  %v12582_v52 = vcombine.low %v80_v39, %v84_v40  ;;  %v105_v37 = vld [vmem:[%s19895_s1 + $0x208] sm:$0xff]  ;;  %v12600_v40 = vcombine.low %v97_v29, %v101_v30 }
  0x16   :  { %v88_v48 = vld [vmem:[%s19895_s1 + $0x180] sm:$0xff]  ;;  %9590 = vmatpush1.bf16.msra.mxu0 %v12574_v44  ;;  %v109_v38 = vld [vmem:[%s19895_s1 + $0x228] sm:$0xff] }
  0x17   :  { %v92_v49 = vld [vmem:[%s19895_s1 + $0x1a0] sm:$0xff]  ;;  %14110 = vmatmul.mubr.msk.bf16.vlgmr.msra.gmra.mrb[0].mxu1 %vm9577_vm0, %v14506_v43  ;;  %9591 = vmatprep.subr.bf16.mxu0 %v12583_v46  ;;  %v12609_v42 = vcombine.high %v105_v37, %v109_v38  ;;  %v117_v46 = vld [vmem:[%s19895_s1 + $0x268] sm:$0xff] }
  0x18   :  { %10115 = vmatpush1.bf16.msra.mxu1 %v12544_v45  ;;  %v12591_v54 = vcombine.high %v88_v48, %v92_v49  ;;  %v96_v56 = vld [vmem:[%s19895_s1 + $0x1c0] sm:$0xff]  ;;  %v12590_v62 = vcombine.low %v88_v48, %v92_v49  ;;  %v113_v45 = vld [vmem:[%s19895_s1 + $0x248] sm:$0xff]  ;;  %v12608_v48 = vcombine.low %v105_v37, %v109_v38 }
  0x19   :  { %10116 = vmatprep.subr.bf16.mxu1 %v12553_v47  ;;  %v100_v57 = vld [vmem:[%s19895_s1 + $0x1e0] sm:$0xff]  ;;  %v12617_v50 = vcombine.high %v113_v45, %v117_v46 }
  0x1a   :  { %v14747_v58 = vld [vmem:[%s19896_s0] sm:$0xff]  ;;  %9592 = vmatpush1.bf16.msra.mxu0 %v12582_v52  ;;  %v12599_v0 = vcombine.high %v96_v56, %v100_v57  ;;  %v12598_v7 = vcombine.low %v96_v56, %v100_v57  ;;  %v12616_v56 = vcombine.low %v113_v45, %v117_v46 }
  0x1b   :  { %v14757_v61 = vcombine.high %v14747_v58, %v14747_v58  ;;  %9593 = vmatprep.subr.bf16.mxu0 %v12591_v54  ;;  %v104_v2 = vld [vmem:[%s19895_s1 + $0x200] sm:$0xff]  ;;  %v125_v54 = vld [vmem:[%s19895_s1 + $0x2a8] sm:$0xff] }
  0x1c   :  { %10117 = vmatpush1.bf16.msra.mxu1 %v12552_v53  ;;  %v108_v4 = vld [vmem:[%s19895_s1 + $0x220] sm:$0xff]  ;;  %v121_v53 = vld [vmem:[%s19895_s1 + $0x288] sm:$0xff] }
  0x1d   :  { %10118 = vmatprep.subr.bf16.mxu1 %v12561_v55  ;;  %9613 = vmatprep.mubr.bf16.mxu0 %v14757_v61  ;;  %v12607_v9 = vcombine.high %v104_v2, %v108_v4  ;;  %v112_v11 = vld [vmem:[%s19895_s1 + $0x240] sm:$0xff]  ;;  %v12606_v15 = vcombine.low %v104_v2, %v108_v4  ;;  %v12625_v59 = vcombine.high %v121_v53, %v125_v54 }
  0x1e   :  { %10146 = vmatprep.mubr.bf16.mxu1 %v14757_v61  ;;  %9594 = vmatpush1.bf16.msra.mxu0 %v12590_v62  ;;  %v116_v12 = vld [vmem:[%s19895_s1 + $0x260] sm:$0xff]  ;;  %v12624_v2 = vcombine.low %v121_v53, %v125_v54 }
  0x1f   :  { %9595 = vmatprep.subr.bf16.mxu0 %v12599_v0  ;;  %v12615_v17 = vcombine.high %v112_v11, %v116_v12  ;;  %v120_v19 = vld [vmem:[%s19895_s1 + $0x280] sm:$0xff]  ;;  %v12614_v23 = vcombine.low %v112_v11, %v116_v12  ;;  %v133_v0 = vld [vmem:[%s19895_s1 + $0x2e8] sm:$0xff] }
  0x20   :  { %10119 = vmatpush1.bf16.msra.mxu1 %v12560_v63  ;;  %v124_v20 = vld [vmem:[%s19895_s1 + $0x2a0] sm:$0xff]  ;;  %v129_v63 = vld [vmem:[%s19895_s1 + $0x2c8] sm:$0xff] }
  0x21   :  { %10120 = vmatprep.subr.bf16.mxu1 %v12569_v1  ;;  %v12623_v25 = vcombine.high %v120_v19, %v124_v20  ;;  %v128_v27 = vld [vmem:[%s19895_s1 + $0x2c0] sm:$0xff]  ;;  %v12622_v31 = vcombine.low %v120_v19, %v124_v20  ;;  %v12633_v5 = vcombine.high %v129_v63, %v133_v0  ;;  %v12632_v11 = vcombine.low %v129_v63, %v133_v0  ;;  %v149_v19 = vld [vmem:[%s19895_s1 + $0x368] sm:$0xff] }
  0x22   :  { %9596 = vmatpush1.bf16.msra.mxu0 %v12598_v7  ;;  %v132_v28 = vld [vmem:[%s19895_s1 + $0x2e0] sm:$0xff] }
  0x23   :  { %9597 = vmatprep.subr.bf16.mxu0 %v12607_v9  ;;  %v12631_v33 = vcombine.high %v128_v27, %v132_v28  ;;  %v136_v35 = vld [vmem:[%s19895_s1 + $0x300] sm:$0xff]  ;;  %v12630_v39 = vcombine.low %v128_v27, %v132_v28  ;;  %v141_v9 = vld [vmem:[%s19895_s1 + $0x328] sm:$0xff] }
  0x24   :  { %10121 = vmatpush1.bf16.msra.mxu1 %v12568_v8  ;;  %v140_v36 = vld [vmem:[%s19895_s1 + $0x320] sm:$0xff]  ;;  %v137_v8 = vld [vmem:[%s19895_s1 + $0x308] sm:$0xff] }
  0x25   :  { %10122 = vmatprep.subr.bf16.mxu1 %v12577_v10  ;;  %v12639_v41 = vcombine.high %v136_v35, %v140_v36  ;;  %v144_v43 = vld [vmem:[%s19895_s1 + $0x340] sm:$0xff]  ;;  %v12638_v47 = vcombine.low %v136_v35, %v140_v36  ;;  %v12641_v14 = vcombine.high %v137_v8, %v141_v9  ;;  %v12640_v22 = vcombine.low %v137_v8, %v141_v9  ;;  %v157_v27 = vld [vmem:[%s19895_s1 + $0x3a8] sm:$0xff] }
  0x26   :  { %9598 = vmatpush1.bf16.msra.mxu0 %v12606_v15  ;;  %v148_v44 = vld [vmem:[%s19895_s1 + $0x360] sm:$0xff]  ;;  %v165_v35 = vld [vmem:[%s19895_s1 + $0x3e8] sm:$0xff] }
  0x27   :  { %9599 = vmatprep.subr.bf16.mxu0 %v12615_v17  ;;  %v12647_v49 = vcombine.high %v144_v43, %v148_v44  ;;  %v152_v51 = vld [vmem:[%s19895_s1 + $0x380] sm:$0xff]  ;;  %v12646_v55 = vcombine.low %v144_v43, %v148_v44  ;;  %v14882_v17 = vcombine.low %v14747_v58, %v14747_v58  ;;  %v173_v43 = vld [vmem:[%s19895_s1 + $0x428] sm:$0xff] }
  0x28   :  { %10123 = vmatpush1.bf16.msra.mxu1 %v12576_v16  ;;  %v156_v52 = vld [vmem:[%s19895_s1 + $0x3a0] sm:$0xff] }
  0x29   :  { %10124 = vmatprep.subr.bf16.mxu1 %v12585_v18  ;;  %v12655_v57 = vcombine.high %v152_v51, %v156_v52  ;;  %v160_v60 = vld [vmem:[%s19895_s1 + $0x3c0] sm:$0xff]  ;;  %v12654_v1 = vcombine.low %v152_v51, %v156_v52  ;;  %v145_v18 = vld [vmem:[%s19895_s1 + $0x348] sm:$0xff] }
  0x2a   :  { %9600 = vmatpush1.bf16.msra.mxu0 %v12614_v23  ;;  %v164_v62 = vld [vmem:[%s19895_s1 + $0x3e0] sm:$0xff]  ;;  %v12649_v58 = vcombine.high %v145_v18, %v149_v19  ;;  %v12648_v29 = vcombine.low %v145_v18, %v149_v19  ;;  %v181_v51 = vld [vmem:[%s19895_s1 + $0x468] sm:$0xff] }
  0x2b   :  { %9601 = vmatprep.subr.bf16.mxu0 %v12623_v25  ;;  %v12663_v4 = vcombine.high %v160_v60, %v164_v62  ;;  %v168_v6 = vld [vmem:[%s19895_s1 + $0x400] sm:$0xff]  ;;  %v12662_v10 = vcombine.low %v160_v60, %v164_v62  ;;  %v189_v60 = vld [vmem:[%s19895_s1 + $0x4a8] sm:$0xff] }
  0x2c   :  { %10125 = vmatpush1.bf16.msra.mxu1 %v12584_v24  ;;  %v172_v7 = vld [vmem:[%s19895_s1 + $0x420] sm:$0xff] }
  0x2d   :  { %10126 = vmatprep.subr.bf16.mxu1 %v12593_v26  ;;  %v12671_v12 = vcombine.high %v168_v6, %v172_v7  ;;  %v176_v15 = vld [vmem:[%s19895_s1 + $0x440] sm:$0xff]  ;;  %v12670_v20 = vcombine.low %v168_v6, %v172_v7  ;;  %v153_v26 = vld [vmem:[%s19895_s1 + $0x388] sm:$0xff] }
  0x2e   :  { %9602 = vmatpush1.bf16.msra.mxu0 %v12622_v31  ;;  %v180_v16 = vld [vmem:[%s19895_s1 + $0x460] sm:$0xff]  ;;  %v12657_v31 = vcombine.high %v153_v26, %v157_v27  ;;  %v12656_v37 = vcombine.low %v153_v26, %v157_v27  ;;  %v197_v6 = vld [vmem:[%s19895_s1 + $0x4e8] sm:$0xff] }
  0x2f   :  { %9603 = vmatprep.subr.bf16.mxu0 %v12631_v33  ;;  %v12679_v23 = vcombine.high %v176_v15, %v180_v16  ;;  %v184_v24 = vld [vmem:[%s19895_s1 + $0x480] sm:$0xff]  ;;  %v12678_v28 = vcombine.low %v176_v15, %v180_v16  ;;  %v205_v15 = vld [vmem:[%s19895_s1 + $0x528] sm:$0xff] }
  0x30   :  { %10127 = vmatpush1.bf16.msra.mxu1 %v12592_v32  ;;  %v188_v25 = vld [vmem:[%s19895_s1 + $0x4a0] sm:$0xff] }
  0x31   :  { %10128 = vmatprep.subr.bf16.mxu1 %v12601_v34  ;;  %v12687_v30 = vcombine.high %v184_v24, %v188_v25  ;;  %v192_v32 = vld [vmem:[%s19895_s1 + $0x4c0] sm:$0xff]  ;;  %v161_v34 = vld [vmem:[%s19895_s1 + $0x3c8] sm:$0xff]  ;;  %v12686_v36 = vcombine.low %v184_v24, %v188_v25 }
  0x32   :  { %9604 = vmatpush1.bf16.msra.mxu0 %v12630_v39  ;;  %v196_v33 = vld [vmem:[%s19895_s1 + $0x4e0] sm:$0xff]  ;;  %v12665_v39 = vcombine.high %v161_v34, %v165_v35  ;;  %v12664_v45 = vcombine.low %v161_v34, %v165_v35  ;;  %v213_v24 = vld [vmem:[%s19895_s1 + $0x568] sm:$0xff] }
  0x33   :  { %9605 = vmatprep.subr.bf16.mxu0 %v12639_v41  ;;  %v12695_v38 = vcombine.high %v192_v32, %v196_v33  ;;  %v204_v41 = vld [vmem:[%s19895_s1 + $0x520] sm:$0xff]  ;;  %v12694_v44 = vcombine.low %v192_v32, %v196_v33  ;;  %v221_v32 = vld [vmem:[%s19895_s1 + $0x5a8] sm:$0xff] }
  0x34   :  { %10129 = vmatpush1.bf16.msra.mxu1 %v12600_v40  ;;  %v200_v40 = vld [vmem:[%s19895_s1 + $0x500] sm:$0xff] }
  0x35   :  { %10130 = vmatprep.subr.bf16.mxu1 %v12609_v42  ;;  %v169_v42 = vld [vmem:[%s19895_s1 + $0x408] sm:$0xff]  ;;  %v12703_v46 = vcombine.high %v200_v40, %v204_v41  ;;  %v12702_v52 = vcombine.low %v200_v40, %v204_v41 }
  0x36   :  { %9606 = vmatpush1.bf16.msra.mxu0 %v12638_v47  ;;  %v12673_v47 = vcombine.high %v169_v42, %v173_v43  ;;  %v12672_v53 = vcombine.low %v169_v42, %v173_v43  ;;  %v229_v40 = vld [vmem:[%s19895_s1 + $0x5e8] sm:$0xff] }
  0x37   :  { %9607 = vmatprep.subr.bf16.mxu0 %v12647_v49  ;;  %v212_v49 = vld [vmem:[%s19895_s1 + $0x560] sm:$0xff] }
  0x38   :  { %10131 = vmatpush1.bf16.msra.mxu1 %v12608_v48  ;;  %v208_v48 = vld [vmem:[%s19895_s1 + $0x540] sm:$0xff] }
  0x39   :  { %10132 = vmatprep.subr.bf16.mxu1 %v12617_v50  ;;  %v177_v50 = vld [vmem:[%s19895_s1 + $0x448] sm:$0xff]  ;;  %v12711_v54 = vcombine.high %v208_v48, %v212_v49  ;;  %v12710_v62 = vcombine.low %v208_v48, %v212_v49 }
  0x3a   :  { %9608 = vmatpush1.bf16.msra.mxu0 %v12646_v55  ;;  %v12681_v55 = vcombine.high %v177_v50, %v181_v51  ;;  %v12680_v63 = vcombine.low %v177_v50, %v181_v51  ;;  %v237_v48 = vld [vmem:[%s19895_s1 + $0x628] sm:$0xff] }
  0x3b   :  { %9609 = vmatprep.subr.bf16.mxu0 %v12655_v57  ;;  %v220_v57 = vld [vmem:[%s19895_s1 + $0x5a0] sm:$0xff] }
  0x3c   :  { %10133 = vmatpush1.bf16.msra.mxu1 %v12616_v56  ;;  %v216_v56 = vld [vmem:[%s19895_s1 + $0x580] sm:$0xff] }
  0x3d   :  { %10134 = vmatprep.subr.bf16.mxu1 %v12625_v59  ;;  %v185_v59 = vld [vmem:[%s19895_s1 + $0x488] sm:$0xff]  ;;  %v12719_v0 = vcombine.high %v216_v56, %v220_v57  ;;  %v12718_v7 = vcombine.low %v216_v56, %v220_v57 }
  0x3e   :  { %9610 = vmatpush1.bf16.msra.mxu0 %v12654_v1  ;;  %v12689_v1 = vcombine.high %v185_v59, %v189_v60  ;;  %v12688_v8 = vcombine.low %v185_v59, %v189_v60  ;;  %v245_v56 = vld [vmem:[%s19895_s1 + $0x668] sm:$0xff] }
  0x3f   :  { %9611 = vmatprep.subr.bf16.mxu0 %v12663_v4  ;;  %v228_v4 = vld [vmem:[%s19895_s1 + $0x5e0] sm:$0xff] }
  0x40   :  { %10135 = vmatpush1.bf16.msra.mxu1 %v12624_v2  ;;  %v224_v2 = vld [vmem:[%s19895_s1 + $0x5c0] sm:$0xff] }
  0x41   :  { %10136 = vmatprep.subr.bf16.mxu1 %v12633_v5  ;;  %v193_v5 = vld [vmem:[%s19895_s1 + $0x4c8] sm:$0xff]  ;;  %v12727_v9 = vcombine.high %v224_v2, %v228_v4  ;;  %v12726_v16 = vcombine.low %v224_v2, %v228_v4 }
  0x42   :  { %9612 = vmatpush1.bf16.msra.mxu0 %v12662_v10  ;;  %v12697_v10 = vcombine.high %v193_v5, %v197_v6  ;;  %v12696_v18 = vcombine.low %v193_v5, %v197_v6  ;;  %v253_v2 = vld [vmem:[%s19895_s1 + $0x6a8] sm:$0xff] }
  0x43   :  { %9622 = vmatprep.subr.bf16.mxu0 %v12671_v12  ;;  %v236_v12 = vld [vmem:[%s19895_s1 + $0x620] sm:$0xff] }
  0x44   :  { %10137 = vmatpush1.bf16.msra.mxu1 %v12632_v11  ;;  %v232_v11 = vld [vmem:[%s19895_s1 + $0x600] sm:$0xff] }
  0x45   :  { %10138 = vmatprep.subr.bf16.mxu1 %v12641_v14  ;;  %9614 = vmatmul.mubr.bf16.vlgmr.msra.gmra.mrb[0].mxu0 %v14882_v17  ;;  %v201_v14 = vld [vmem:[%s19895_s1 + $0x508] sm:$0xff]  ;;  %v12735_v19 = vcombine.high %v232_v11, %v236_v12  ;;  %v12734_v25 = vcombine.low %v232_v11, %v236_v12 }
  0x46   :  { %9623 = vmatpush1.bf16.msra.mxu0 %v12670_v20  ;;  %9654 = vmatprep.mubr.bf16.mxu0 %v14892_v21  ;;  %v12705_v20 = vcombine.high %v201_v14, %v205_v15  ;;  %v12704_v26 = vcombine.low %v201_v14, %v205_v15  ;;  %v261_v11 = vld [vmem:[%s19895_s1 + $0x6e8] sm:$0xff] }
  0x47   :  { %9624 = vmatprep.subr.bf16.mxu0 %v12679_v23  ;;  %v244_v23 = vld [vmem:[%s19895_s1 + $0x660] sm:$0xff] }
  0x48   :  { %10139 = vmatpush1.bf16.msra.mxu1 %v12640_v22  ;;  %v240_v22 = vld [vmem:[%s19895_s1 + $0x640] sm:$0xff] }
  0x49   :  { %10140 = vmatprep.subr.bf16.mxu1 %v12649_v58  ;;  %v209_v58 = vld [vmem:[%s19895_s1 + $0x548] sm:$0xff]  ;;  %v12743_v27 = vcombine.high %v240_v22, %v244_v23  ;;  %v12742_v33 = vcombine.low %v240_v22, %v244_v23 }
  0x4a   :  { %9625 = vmatpush1.bf16.msra.mxu0 %v12678_v28  ;;  %v12713_v28 = vcombine.high %v209_v58, %v213_v24  ;;  %v12712_v34 = vcombine.low %v209_v58, %v213_v24  ;;  %v269_v22 = vld [vmem:[%s19895_s1 + $0x728] sm:$0xff] }
  0x4b   :  { %9626 = vmatprep.subr.bf16.mxu0 %v12687_v30  ;;  %v252_v30 = vld [vmem:[%s19895_s1 + $0x6a0] sm:$0xff] }
  0x4c   :  { %10141 = vmatpush1.bf16.msra.mxu1 %v12648_v29  ;;  %v248_v29 = vld [vmem:[%s19895_s1 + $0x680] sm:$0xff] }
  0x4d   :  { %10142 = vmatprep.subr.bf16.mxu1 %v12657_v31  ;;  %v217_v31 = vld [vmem:[%s19895_s1 + $0x588] sm:$0xff]  ;;  %v12751_v35 = vcombine.high %v248_v29, %v252_v30  ;;  %v12750_v41 = vcombine.low %v248_v29, %v252_v30  ;;  %v15091_v29 = vcombine.low %v14872_v13, %v14872_v13 }
  0x4e   :  { %9627 = vmatpush1.bf16.msra.mxu0 %v12686_v36  ;;  %v12721_v36 = vcombine.high %v217_v31, %v221_v32  ;;  %v12720_v42 = vcombine.low %v217_v31, %v221_v32  ;;  %v273_v30 = vld [vmem:[%s19895_s1 + $0x748] sm:$0xff] }
  0x4f   :  { %9628 = vmatprep.subr.bf16.mxu0 %v12695_v38  ;;  %v260_v38 = vld [vmem:[%s19895_s1 + $0x6e0] sm:$0xff]  ;;  %v277_v31 = vld [vmem:[%s19895_s1 + $0x768] sm:$0xff] }
  0x50   :  { %10143 = vmatpush1.bf16.msra.mxu1 %v12656_v37  ;;  %v256_v37 = vld [vmem:[%s19895_s1 + $0x6c0] sm:$0xff]  ;;  %v12777_v13 = vcombine.high %v273_v30, %v277_v31 }
  0x51   :  { %10144 = vmatprep.subr.bf16.mxu1 %v12665_v39  ;;  %v225_v39 = vld [vmem:[%s19895_s1 + $0x5c8] sm:$0xff]  ;;  %v12759_v43 = vcombine.high %v256_v37, %v260_v38  ;;  %v12758_v49 = vcombine.low %v256_v37, %v260_v38  ;;  %v316_v37 = vld [vmem:[%s19895_s1 + $0x8a0] sm:$0xff] }
  0x52   :  { %9629 = vmatpush1.bf16.msra.mxu0 %v12694_v44  ;;  %v12729_v44 = vcombine.high %v225_v39, %v229_v40  ;;  %v12728_v50 = vcombine.low %v225_v39, %v229_v40  ;;  %v281_v38 = vld [vmem:[%s19895_s1 + $0x788] sm:$0xff] }
  0x53   :  { %9630 = vmatprep.subr.bf16.mxu0 %v12703_v46  ;;  %v268_v46 = vld [vmem:[%s19895_s1 + $0x720] sm:$0xff]  ;;  %v285_v39 = vld [vmem:[%s19895_s1 + $0x7a8] sm:$0xff] }
  0x54   :  { %10145 = vmatpush1.bf16.msra.mxu1 %v12664_v45  ;;  %v264_v45 = vld [vmem:[%s19895_s1 + $0x700] sm:$0xff] }
  0x55   :  { %10155 = vmatprep.subr.bf16.mxu1 %v12673_v47  ;;  %v233_v47 = vld [vmem:[%s19895_s1 + $0x608] sm:$0xff]  ;;  %v12767_v51 = vcombine.high %v264_v45, %v268_v46  ;;  %v12766_v57 = vcombine.low %v264_v45, %v268_v46  ;;  %v324_v45 = vld [vmem:[%s19895_s1 + $0x8e0] sm:$0xff] }
  0x56   :  { %9631 = vmatpush1.bf16.msra.mxu0 %v12702_v52  ;;  %v12737_v52 = vcombine.high %v233_v47, %v237_v48  ;;  %v12736_v59 = vcombine.low %v233_v47, %v237_v48  ;;  %v289_v46 = vld [vmem:[%s19895_s1 + $0x7c8] sm:$0xff] }
  0x57   :  { %10147 = vmatmul.mubr.bf16.vlgmr.msra.gmra.mrb[4].mxu1 %v14882_v17  ;;  %9632 = vmatprep.subr.bf16.mxu0 %v12711_v54  ;;  %v276_v54 = vld [vmem:[%s19895_s1 + $0x760] sm:$0xff]  ;;  %v293_v47 = vld [vmem:[%s19895_s1 + $0x7e8] sm:$0xff] }
  0x58   :  { %10156 = vmatpush1.bf16.msra.mxu1 %v12672_v53  ;;  %10187 = vmatprep.mubr.bf16.mxu1 %v14892_v21  ;;  %v272_v53 = vld [vmem:[%s19895_s1 + $0x740] sm:$0xff] }
  0x59   :  { %10157 = vmatprep.subr.bf16.mxu1 %v12681_v55  ;;  %v241_v55 = vld [vmem:[%s19895_s1 + $0x648] sm:$0xff]  ;;  %v12775_v60 = vcombine.high %v272_v53, %v276_v54  ;;  %v12774_v4 = vcombine.low %v272_v53, %v276_v54  ;;  %v332_v53 = vld [vmem:[%s19895_s1 + $0x920] sm:$0xff] }
  0x5a   :  { %9633 = vmatpush1.bf16.msra.mxu0 %v12710_v62  ;;  %v12745_v62 = vcombine.high %v241_v55, %v245_v56  ;;  %v12744_v5 = vcombine.low %v241_v55, %v245_v56  ;;  %v297_v54 = vld [vmem:[%s19895_s1 + $0x808] sm:$0xff] }
  0x5b   :  { %9634 = vmatprep.subr.bf16.mxu0 %v12719_v0  ;;  %v284_v0 = vld [vmem:[%s19895_s1 + $0x7a0] sm:$0xff]  ;;  %v301_v55 = vld [vmem:[%s19895_s1 + $0x828] sm:$0xff] }
  0x5c   :  { %10158 = vmatpush1.bf16.msra.mxu1 %v12680_v63  ;;  %v280_v63 = vld [vmem:[%s19895_s1 + $0x780] sm:$0xff] }
  0x5d   :  { %10159 = vmatprep.subr.bf16.mxu1 %v12689_v1  ;;  %v249_v1 = vld [vmem:[%s19895_s1 + $0x688] sm:$0xff]  ;;  %v12783_v6 = vcombine.high %v280_v63, %v284_v0  ;;  %v12782_v12 = vcombine.low %v280_v63, %v284_v0  ;;  %v340_v63 = vld [vmem:[%s19895_s1 + $0x960] sm:$0xff] }
  0x5e   :  { %9635 = vmatpush1.bf16.msra.mxu0 %v12718_v7  ;;  %v12753_v7 = vcombine.high %v249_v1, %v253_v2  ;;  %v12752_v14 = vcombine.low %v249_v1, %v253_v2  ;;  %v305_v0 = vld [vmem:[%s19895_s1 + $0x848] sm:$0xff] }
  0x5f   :  { %9636 = vmatprep.subr.bf16.mxu0 %v12727_v9  ;;  %v292_v9 = vld [vmem:[%s19895_s1 + $0x7e0] sm:$0xff]  ;;  %v309_v1 = vld [vmem:[%s19895_s1 + $0x868] sm:$0xff] }
  0x60   :  { %10160 = vmatpush1.bf16.msra.mxu1 %v12688_v8  ;;  %v288_v8 = vld [vmem:[%s19895_s1 + $0x7c0] sm:$0xff] }
  0x61   :  { %10161 = vmatprep.subr.bf16.mxu1 %v12697_v10  ;;  %v257_v10 = vld [vmem:[%s19895_s1 + $0x6c8] sm:$0xff]  ;;  %v12791_v15 = vcombine.high %v288_v8, %v292_v9  ;;  %v12790_v23 = vcombine.low %v288_v8, %v292_v9  ;;  %v348_v8 = vld [vmem:[%s19895_s1 + $0x9a0] sm:$0xff] }
  0x62   :  { %9637 = vmatpush1.bf16.msra.mxu0 %v12726_v16  ;;  %v12761_v16 = vcombine.high %v257_v10, %v261_v11  ;;  %v12760_v58 = vcombine.low %v257_v10, %v261_v11  ;;  %v313_v9 = vld [vmem:[%s19895_s1 + $0x888] sm:$0xff] }
  0x63   :  { %9638 = vmatprep.subr.bf16.mxu0 %v12735_v19  ;;  %v300_v19 = vld [vmem:[%s19895_s1 + $0x820] sm:$0xff]  ;;  %v317_v10 = vld [vmem:[%s19895_s1 + $0x8a8] sm:$0xff] }
  0x64   :  { %10162 = vmatpush1.bf16.msra.mxu1 %v12696_v18  ;;  %v296_v18 = vld [vmem:[%s19895_s1 + $0x800] sm:$0xff] }
  0x65   :  { %10163 = vmatprep.subr.bf16.mxu1 %v12705_v20  ;;  %v265_v20 = vld [vmem:[%s19895_s1 + $0x708] sm:$0xff]  ;;  %v12799_v24 = vcombine.high %v296_v18, %v300_v19  ;;  %v12798_v32 = vcombine.low %v296_v18, %v300_v19  ;;  %v356_v18 = vld [vmem:[%s19895_s1 + $0x9e0] sm:$0xff] }
  0x66   :  { %9639 = vmatpush1.bf16.msra.mxu0 %v12734_v25  ;;  %v15081_v25 = vld [vmem:[%s19896_s0 + $0x10] sm:$0xff]  ;;  %v321_v19 = vld [vmem:[%s19895_s1 + $0x8c8] sm:$0xff] }
  0x67   :  { %9640 = vmatprep.subr.bf16.mxu0 %v12743_v27  ;;  %v304_v27 = vld [vmem:[%s19895_s1 + $0x840] sm:$0xff] }
  0x68   :  { %10164 = vmatpush1.bf16.msra.mxu1 %v12704_v26  ;;  %v12769_v26 = vcombine.high %v265_v20, %v269_v22 }
  0x69   :  { %10165 = vmatprep.subr.bf16.mxu1 %v12713_v28  ;;  %v308_v28 = vld [vmem:[%s19895_s1 + $0x860] sm:$0xff] }
  0x6a   :  { %9641 = vmatpush1.bf16.msra.mxu0 %v12742_v33  ;;  %v15101_v33 = vcombine.high %v15081_v25, %v15081_v25  ;;  %v12806_v40 = vcombine.low %v304_v27, %v308_v28 }
  0x6b   :  { %9642 = vmatprep.subr.bf16.mxu0 %v12751_v35  ;;  %v12807_v35 = vcombine.high %v304_v27, %v308_v28  ;;  %v364_v27 = vld [vmem:[%s19895_s1 + $0xa20] sm:$0xff]  ;;  %v329_v28 = vld [vmem:[%s19895_s1 + $0x908] sm:$0xff] }
  0x6c   :  { %10166 = vmatpush1.bf16.msra.mxu1 %v12712_v34  ;;  %v12768_v34 = vcombine.low %v265_v20, %v269_v22  ;;  %v325_v20 = vld [vmem:[%s19895_s1 + $0x8e8] sm:$0xff] }
  0x6d   :  { %10167 = vmatprep.subr.bf16.mxu1 %v12721_v36  ;;  %v312_v36 = vld [vmem:[%s19895_s1 + $0x880] sm:$0xff] }
  0x6e   :  { %9643 = vmatpush1.bf16.msra.mxu0 %v12750_v41  ;;  %v12776_v41 = vcombine.low %v273_v30, %v277_v31  ;;  %v12814_v48 = vcombine.low %v312_v36, %v316_v37  ;;  %v333_v30 = vld [vmem:[%s19895_s1 + $0x928] sm:$0xff] }
  0x6f   :  { %9644 = vmatprep.subr.bf16.mxu0 %v12759_v43  ;;  %v12785_v43 = vcombine.high %v281_v38, %v285_v39 }
  0x70   :  { %10168 = vmatpush1.bf16.msra.mxu1 %v12720_v42  ;;  %v12815_v42 = vcombine.high %v312_v36, %v316_v37  ;;  %v372_v36 = vld [vmem:[%s19895_s1 + $0xa60] sm:$0xff]  ;;  %v337_v37 = vld [vmem:[%s19895_s1 + $0x948] sm:$0xff] }
  0x71   :  { %10169 = vmatprep.subr.bf16.mxu1 %v12729_v44  ;;  %v320_v44 = vld [vmem:[%s19895_s1 + $0x8c0] sm:$0xff] }
  0x72   :  { %9645 = vmatpush1.bf16.msra.mxu0 %v12758_v49  ;;  %v12784_v49 = vcombine.low %v281_v38, %v285_v39  ;;  %v12822_v56 = vcombine.low %v320_v44, %v324_v45  ;;  %v341_v38 = vld [vmem:[%s19895_s1 + $0x968] sm:$0xff] }
  0x73   :  { %9646 = vmatprep.subr.bf16.mxu0 %v12767_v51  ;;  %v12793_v51 = vcombine.high %v289_v46, %v293_v47 }
  0x74   :  { %10170 = vmatpush1.bf16.msra.mxu1 %v12728_v50  ;;  %v12823_v50 = vcombine.high %v320_v44, %v324_v45  ;;  %v380_v44 = vld [vmem:[%s19895_s1 + $0xaa0] sm:$0xff]  ;;  %v345_v45 = vld [vmem:[%s19895_s1 + $0x988] sm:$0xff] }
  0x75   :  { %10171 = vmatprep.subr.bf16.mxu1 %v12737_v52  ;;  %v328_v52 = vld [vmem:[%s19895_s1 + $0x900] sm:$0xff] }
  0x76   :  { %9647 = vmatpush1.bf16.msra.mxu0 %v12766_v57  ;;  %v12792_v57 = vcombine.low %v289_v46, %v293_v47  ;;  %v12830_v2 = vcombine.low %v328_v52, %v332_v53  ;;  %v349_v46 = vld [vmem:[%s19895_s1 + $0x9a8] sm:$0xff] }
  0x77   :  { %9648 = vmatprep.subr.bf16.mxu0 %v12775_v60  ;;  %v12801_v60 = vcombine.high %v297_v54, %v301_v55 }
  0x78   :  { %10172 = vmatpush1.bf16.msra.mxu1 %v12736_v59  ;;  %v12831_v59 = vcombine.high %v328_v52, %v332_v53  ;;  %v388_v52 = vld [vmem:[%s19895_s1 + $0xae0] sm:$0xff]  ;;  %v353_v53 = vld [vmem:[%s19895_s1 + $0x9c8] sm:$0xff] }
  0x79   :  { %10173 = vmatprep.subr.bf16.mxu1 %v12745_v62  ;;  %v336_v62 = vld [vmem:[%s19895_s1 + $0x940] sm:$0xff] }
  0x7a   :  { %9649 = vmatpush1.bf16.msra.mxu0 %v12774_v4  ;;  %v12800_v4 = vcombine.low %v297_v54, %v301_v55  ;;  %v12838_v11 = vcombine.low %v336_v62, %v340_v63  ;;  %v357_v54 = vld [vmem:[%s19895_s1 + $0x9e8] sm:$0xff] }
  0x7b   :  { %9650 = vmatprep.subr.bf16.mxu0 %v12783_v6  ;;  %v12809_v6 = vcombine.high %v305_v0, %v309_v1 }
  0x7c   :  { %10174 = vmatpush1.bf16.msra.mxu1 %v12744_v5  ;;  %v12839_v5 = vcombine.high %v336_v62, %v340_v63  ;;  %v396_v62 = vld [vmem:[%s19895_s1 + $0xb20] sm:$0xff]  ;;  %v361_v63 = vld [vmem:[%s19895_s1 + $0xa08] sm:$0xff] }
  0x7d   :  { %10175 = vmatprep.subr.bf16.mxu1 %v12753_v7  ;;  %v344_v7 = vld [vmem:[%s19895_s1 + $0x980] sm:$0xff] }
  0x7e   :  { %9651 = vmatpush1.bf16.msra.mxu0 %v12782_v12  ;;  %v12808_v12 = vcombine.low %v305_v0, %v309_v1  ;;  %v12846_v22 = vcombine.low %v344_v7, %v348_v8  ;;  %v365_v0 = vld [vmem:[%s19895_s1 + $0xa28] sm:$0xff] }
  0x7f   :  { %9652 = vmatprep.subr.bf16.mxu0 %v12791_v15  ;;  %v12817_v15 = vcombine.high %v313_v9, %v317_v10 }
  0x80   :  { %10176 = vmatpush1.bf16.msra.mxu1 %v12752_v14  ;;  %v12847_v14 = vcombine.high %v344_v7, %v348_v8  ;;  %v404_v7 = vld [vmem:[%s19895_s1 + $0xb60] sm:$0xff]  ;;  %v369_v8 = vld [vmem:[%s19895_s1 + $0xa48] sm:$0xff] }
  0x81   :  { %10177 = vmatprep.subr.bf16.mxu1 %v12761_v16  ;;  %v352_v16 = vld [vmem:[%s19895_s1 + $0x9c0] sm:$0xff] }
  0x82   :  { %9653 = vmatpush1.bf16.msra.mxu0 %v12790_v23  ;;  %v12816_v23 = vcombine.low %v313_v9, %v317_v10  ;;  %v12854_v31 = vcombine.low %v352_v16, %v356_v18  ;;  %v373_v9 = vld [vmem:[%s19895_s1 + $0xa68] sm:$0xff] }
  0x83   :  { %9663 = vmatprep.subr.bf16.mxu0 %v12799_v24  ;;  %v12825_v24 = vcombine.high %v321_v19, %v325_v20 }
  0x84   :  { %10178 = vmatpush1.bf16.msra.mxu1 %v12760_v58  ;;  %v12855_v58 = vcombine.high %v352_v16, %v356_v18  ;;  %v412_v16 = vld [vmem:[%s19895_s1 + $0xba0] sm:$0xff]  ;;  %v377_v18 = vld [vmem:[%s19895_s1 + $0xa88] sm:$0xff] }
  0x85   :  { %10179 = vmatprep.subr.bf16.mxu1 %v12769_v26  ;;  %9655 = vmatmul.mubr.bf16.vlgmr.msra.gmra.mrb[0].mxu0 %v15091_v29  ;;  %v360_v26 = vld [vmem:[%s19895_s1 + $0xa00] sm:$0xff] }
  0x86   :  { %9664 = vmatpush1.bf16.msra.mxu0 %v12798_v32  ;;  %9695 = vmatprep.mubr.bf16.mxu0 %v15101_v33  ;;  %v12824_v32 = vcombine.low %v321_v19, %v325_v20  ;;  %v12862_v39 = vcombine.low %v360_v26, %v364_v27  ;;  %v381_v19 = vld [vmem:[%s19895_s1 + $0xaa8] sm:$0xff] }
  0x87   :  { %9665 = vmatprep.subr.bf16.mxu0 %v12807_v35  ;;  %v12833_v35 = vcombine.high %v329_v28, %v333_v30 }
  0x88   :  { %10180 = vmatpush1.bf16.msra.mxu1 %v12768_v34  ;;  %v12863_v34 = vcombine.high %v360_v26, %v364_v27  ;;  %v420_v26 = vld [vmem:[%s19895_s1 + $0xbe0] sm:$0xff]  ;;  %v385_v27 = vld [vmem:[%s19895_s1 + $0xac8] sm:$0xff] }
  0x89   :  { %10181 = vmatprep.subr.bf16.mxu1 %v12777_v13  ;;  %v368_v13 = vld [vmem:[%s19895_s1 + $0xa40] sm:$0xff] }
  0x8a   :  { %9666 = vmatpush1.bf16.msra.mxu0 %v12806_v40  ;;  %v12832_v40 = vcombine.low %v329_v28, %v333_v30  ;;  %v12870_v47 = vcombine.low %v368_v13, %v372_v36  ;;  %v389_v28 = vld [vmem:[%s19895_s1 + $0xae8] sm:$0xff] }
  0x8b   :  { %9667 = vmatprep.subr.bf16.mxu0 %v12815_v42  ;;  %v12841_v42 = vcombine.high %v337_v37, %v341_v38 }
  0x8c   :  { %10182 = vmatpush1.bf16.msra.mxu1 %v12776_v41  ;;  %v12871_v41 = vcombine.high %v368_v13, %v372_v36  ;;  %v428_v13 = vld [vmem:[%s19895_s1 + $0xc20] sm:$0xff]  ;;  %v393_v36 = vld [vmem:[%s19895_s1 + $0xb08] sm:$0xff] }
  0x8d   :  { %10183 = vmatprep.subr.bf16.mxu1 %v12785_v43  ;;  %v376_v43 = vld [vmem:[%s19895_s1 + $0xa80] sm:$0xff] }
  0x8e   :  { %9668 = vmatpush1.bf16.msra.mxu0 %v12814_v48  ;;  %v12840_v48 = vcombine.low %v337_v37, %v341_v38  ;;  %v12878_v55 = vcombine.low %v376_v43, %v380_v44  ;;  %v397_v37 = vld [vmem:[%s19895_s1 + $0xb28] sm:$0xff] }
  0x8f   :  { %9669 = vmatprep.subr.bf16.mxu0 %v12823_v50  ;;  %v12849_v50 = vcombine.high %v345_v45, %v349_v46 }
  0x90   :  { %10184 = vmatpush1.bf16.msra.mxu1 %v12784_v49  ;;  %v12879_v49 = vcombine.high %v376_v43, %v380_v44  ;;  %v432_v43 = vld [vmem:[%s19895_s1 + $0xc40] sm:$0xff] }
  0x91   :  { %10185 = vmatprep.subr.bf16.mxu1 %v12793_v51  ;;  %v384_v51 = vld [vmem:[%s19895_s1 + $0xac0] sm:$0xff] }
  0x92   :  { %9670 = vmatpush1.bf16.msra.mxu0 %v12822_v56  ;;  %v12848_v56 = vcombine.low %v345_v45, %v349_v46  ;;  %v12886_v1 = vcombine.low %v384_v51, %v388_v52  ;;  %v436_v44 = vld [vmem:[%s19895_s1 + $0xc60] sm:$0xff]  ;;  %v15300_v45 = vcombine.low %v15081_v25, %v15081_v25  ;;  %v401_v46 = vld [vmem:[%s19895_s1 + $0xb48] sm:$0xff] }
  0x93   :  { %9671 = vmatprep.subr.bf16.mxu0 %v12831_v59  ;;  %v12857_v59 = vcombine.high %v353_v53, %v357_v54 }
  0x94   :  { %10186 = vmatpush1.bf16.msra.mxu1 %v12792_v57  ;;  %v12887_v57 = vcombine.high %v384_v51, %v388_v52  ;;  %v12935_v51 = vcombine.high %v432_v43, %v436_v44  ;;  %v440_v52 = vld [vmem:[%s19895_s1 + $0xc80] sm:$0xff] }
  0x95   :  { %10196 = vmatprep.subr.bf16.mxu1 %v12801_v60  ;;  %v392_v60 = vld [vmem:[%s19895_s1 + $0xb00] sm:$0xff] }
  0x96   :  { %9672 = vmatpush1.bf16.msra.mxu0 %v12830_v2  ;;  %v12856_v2 = vcombine.low %v353_v53, %v357_v54  ;;  %v12894_v10 = vcombine.low %v392_v60, %v396_v62  ;;  %v444_v53 = vld [vmem:[%s19895_s1 + $0xca0] sm:$0xff]  ;;  %v409_v54 = vld [vmem:[%s19895_s1 + $0xb88] sm:$0xff] }
  0x97   :  { %10188 = vmatmul.mubr.bf16.vlgmr.msra.gmra.mrb[4].mxu1 %v15091_v29  ;;  %9673 = vmatprep.subr.bf16.mxu0 %v12839_v5  ;;  %v12865_v5 = vcombine.high %v361_v63, %v365_v0 }
  0x98   :  { %10197 = vmatpush1.bf16.msra.mxu1 %v12800_v4  ;;  %10228 = vmatprep.mubr.bf16.mxu1 %v15101_v33  ;;  %v12895_v4 = vcombine.high %v392_v60, %v396_v62  ;;  %v448_v62 = vld [vmem:[%s19895_s1 + $0xcc0] sm:$0xff] }
  0x99   :  { %10198 = vmatprep.subr.bf16.mxu1 %v12809_v6  ;;  %v400_v6 = vld [vmem:[%s19895_s1 + $0xb40] sm:$0xff] }
  0x9a   :  { %9674 = vmatpush1.bf16.msra.mxu0 %v12838_v11  ;;  %v12864_v11 = vcombine.low %v361_v63, %v365_v0  ;;  %v12902_v20 = vcombine.low %v400_v6, %v404_v7  ;;  %v452_v63 = vld [vmem:[%s19895_s1 + $0xce0] sm:$0xff]  ;;  %v417_v0 = vld [vmem:[%s19895_s1 + $0xbc8] sm:$0xff] }
  0x9b   :  { %9675 = vmatprep.subr.bf16.mxu0 %v12847_v14  ;;  %v12873_v14 = vcombine.high %v369_v8, %v373_v9 }
  0x9c   :  { %10199 = vmatpush1.bf16.msra.mxu1 %v12808_v12  ;;  %v12903_v12 = vcombine.high %v400_v6, %v404_v7  ;;  %v456_v7 = vld [vmem:[%s19895_s1 + $0xd00] sm:$0xff] }
  0x9d   :  { %10200 = vmatprep.subr.bf16.mxu1 %v12817_v15  ;;  %v408_v15 = vld [vmem:[%s19895_s1 + $0xb80] sm:$0xff] }
  0x9e   :  { %9676 = vmatpush1.bf16.msra.mxu0 %v12846_v22  ;;  %v12872_v22 = vcombine.low %v369_v8, %v373_v9  ;;  %v12910_v30 = vcombine.low %v408_v15, %v412_v16  ;;  %v460_v8 = vld [vmem:[%s19895_s1 + $0xd20] sm:$0xff]  ;;  %v425_v9 = vld [vmem:[%s19895_s1 + $0xc08] sm:$0xff] }
  0x9f   :  { %9677 = vmatprep.subr.bf16.mxu0 %v12855_v58  ;;  %v12881_v58 = vcombine.high %v377_v18, %v381_v19 }
  0xa0   :  { %10201 = vmatpush1.bf16.msra.mxu1 %v12816_v23  ;;  %v12911_v23 = vcombine.high %v408_v15, %v412_v16  ;;  %v464_v16 = vld [vmem:[%s19895_s1 + $0xd40] sm:$0xff] }
  0xa1   :  { %10202 = vmatprep.subr.bf16.mxu1 %v12825_v24  ;;  %v416_v24 = vld [vmem:[%s19895_s1 + $0xbc0] sm:$0xff] }
  0xa2   :  { %9678 = vmatpush1.bf16.msra.mxu0 %v12854_v31  ;;  %v12880_v31 = vcombine.low %v377_v18, %v381_v19  ;;  %v12918_v38 = vcombine.low %v416_v24, %v420_v26  ;;  %v468_v18 = vld [vmem:[%s19895_s1 + $0xd60] sm:$0xff]  ;;  %v433_v19 = vld [vmem:[%s19895_s1 + $0xc48] sm:$0xff] }
  0xa3   :  { %9679 = vmatprep.subr.bf16.mxu0 %v12863_v34  ;;  %v12889_v34 = vcombine.high %v385_v27, %v389_v28 }
  0xa4   :  { %10203 = vmatpush1.bf16.msra.mxu1 %v12824_v32  ;;  %v12919_v32 = vcombine.high %v416_v24, %v420_v26  ;;  %v472_v26 = vld [vmem:[%s19895_s1 + $0xd80] sm:$0xff] }
  0xa5   :  { %10204 = vmatprep.subr.bf16.mxu1 %v12833_v35  ;;  %v424_v35 = vld [vmem:[%s19895_s1 + $0xc00] sm:$0xff] }
  0xa6   :  { %9680 = vmatpush1.bf16.msra.mxu0 %v12862_v39  ;;  %v12888_v39 = vcombine.low %v385_v27, %v389_v28  ;;  %v476_v27 = vld [vmem:[%s19895_s1 + $0xda0] sm:$0xff]  ;;  %v441_v28 = vld [vmem:[%s19895_s1 + $0xc88] sm:$0xff] }
  0xa7   :  { %9681 = vmatprep.subr.bf16.mxu0 %v12871_v41  ;;  %v15290_v41 = vld [vmem:[%s19896_s0 + $0x18] sm:$0xff] }
  0xa8   :  { %10205 = vmatpush1.bf16.msra.mxu1 %v12832_v40  ;;  %v12927_v40 = vcombine.high %v424_v35, %v428_v13 }
  0xa9   :  { %10206 = vmatprep.subr.bf16.mxu1 %v12841_v42  ;;  %v12897_v42 = vcombine.high %v393_v36, %v397_v37 }
  0xaa   :  { %9682 = vmatpush1.bf16.msra.mxu0 %v12870_v47  ;;  %v405_v47 = vld [vmem:[%s19895_s1 + $0xb68] sm:$0xff] }
  0xab   :  { %9683 = vmatprep.subr.bf16.mxu0 %v12879_v49  ;;  %v15310_v49 = vcombine.high %v15290_v41, %v15290_v41  ;;  %v12905_v25 = vcombine.high %v401_v46, %v405_v47 }
  0xac   :  { %10207 = vmatpush1.bf16.msra.mxu1 %v12840_v48  ;;  %v12926_v48 = vcombine.low %v424_v35, %v428_v13  ;;  %v480_v13 = vld [vmem:[%s19895_s1 + $0xdc0] sm:$0xff] }
  0xad   :  { %10208 = vmatprep.subr.bf16.mxu1 %v12849_v50  ;;  %v12896_v50 = vcombine.low %v393_v36, %v397_v37  ;;  %v484_v36 = vld [vmem:[%s19895_s1 + $0xde0] sm:$0xff]  ;;  %v449_v37 = vld [vmem:[%s19895_s1 + $0xcc8] sm:$0xff] }
  0xae   :  { %9684 = vmatpush1.bf16.msra.mxu0 %v12878_v55  ;;  %v413_v55 = vld [vmem:[%s19895_s1 + $0xba8] sm:$0xff] }
  0xaf   :  { %9685 = vmatprep.subr.bf16.mxu0 %v12887_v57  ;;  %v12904_v57 = vcombine.low %v401_v46, %v405_v47  ;;  %v12913_v60 = vcombine.high %v409_v54, %v413_v55  ;;  %v492_v46 = vld [vmem:[%s19895_s1 + $0xe20] sm:$0xff]  ;;  %v457_v47 = vld [vmem:[%s19895_s1 + $0xd08] sm:$0xff] }
  0xb0   :  { %10209 = vmatpush1.bf16.msra.mxu1 %v12848_v56  ;;  %v12934_v56 = vcombine.low %v432_v43, %v436_v44  ;;  %v488_v44 = vld [vmem:[%s19895_s1 + $0xe00] sm:$0xff] }
  0xb1   :  { %10210 = vmatprep.subr.bf16.mxu1 %v12857_v59  ;;  %v12943_v59 = vcombine.high %v440_v52, %v444_v53 }
  0xb2   :  { %9686 = vmatpush1.bf16.msra.mxu0 %v12886_v1  ;;  %v421_v1 = vld [vmem:[%s19895_s1 + $0xbe8] sm:$0xff] }
  0xb3   :  { %9687 = vmatprep.subr.bf16.mxu0 %v12895_v4  ;;  %v12912_v4 = vcombine.low %v409_v54, %v413_v55  ;;  %v12921_v6 = vcombine.high %v417_v0, %v421_v1  ;;  %v500_v54 = vld [vmem:[%s19895_s1 + $0xe60] sm:$0xff]  ;;  %v465_v55 = vld [vmem:[%s19895_s1 + $0xd48] sm:$0xff] }
  0xb4   :  { %10211 = vmatpush1.bf16.msra.mxu1 %v12856_v2  ;;  %v12942_v2 = vcombine.low %v440_v52, %v444_v53  ;;  %v496_v53 = vld [vmem:[%s19895_s1 + $0xe40] sm:$0xff] }
  0xb5   :  { %10212 = vmatprep.subr.bf16.mxu1 %v12865_v5  ;;  %v12951_v5 = vcombine.high %v448_v62, %v452_v63 }
  0xb6   :  { %9688 = vmatpush1.bf16.msra.mxu0 %v12894_v10  ;;  %v429_v10 = vld [vmem:[%s19895_s1 + $0xc28] sm:$0xff] }
  0xb7   :  { %9689 = vmatprep.subr.bf16.mxu0 %v12903_v12  ;;  %v12920_v12 = vcombine.low %v417_v0, %v421_v1  ;;  %v12929_v15 = vcombine.high %v425_v9, %v429_v10  ;;  %v508_v0 = vld [vmem:[%s19895_s1 + $0xea0] sm:$0xff]  ;;  %v473_v1 = vld [vmem:[%s19895_s1 + $0xd88] sm:$0xff] }
  0xb8   :  { %10213 = vmatpush1.bf16.msra.mxu1 %v12864_v11  ;;  %v12950_v11 = vcombine.low %v448_v62, %v452_v63  ;;  %v504_v63 = vld [vmem:[%s19895_s1 + $0xe80] sm:$0xff] }
  0xb9   :  { %10214 = vmatprep.subr.bf16.mxu1 %v12873_v14  ;;  %v12959_v14 = vcombine.high %v456_v7, %v460_v8 }
  0xba   :  { %9690 = vmatpush1.bf16.msra.mxu0 %v12902_v20  ;;  %v437_v20 = vld [vmem:[%s19895_s1 + $0xc68] sm:$0xff] }
  0xbb   :  { %9691 = vmatprep.subr.bf16.mxu0 %v12911_v23  ;;  %v12928_v23 = vcombine.low %v425_v9, %v429_v10  ;;  %v12937_v24 = vcombine.high %v433_v19, %v437_v20  ;;  %v516_v9 = vld [vmem:[%s19895_s1 + $0xee0] sm:$0xff] }
  0xbc   :  { %10215 = vmatpush1.bf16.msra.mxu1 %v12872_v22  ;;  %v12958_v22 = vcombine.low %v456_v7, %v460_v8  ;;  %v512_v8 = vld [vmem:[%s19895_s1 + $0xec0] sm:$0xff] }
  0xbd   :  { %10216 = vmatprep.subr.bf16.mxu1 %v12881_v58  ;;  %v12967_v58 = vcombine.high %v464_v16, %v468_v18 }
  0xbe   :  { %9692 = vmatpush1.bf16.msra.mxu0 %v12910_v30  ;;  %v445_v30 = vld [vmem:[%s19895_s1 + $0xca8] sm:$0xff] }
  0xbf   :  { %9693 = vmatprep.subr.bf16.mxu0 %v12919_v32  ;;  %v12936_v32 = vcombine.low %v433_v19, %v437_v20  ;;  %v12945_v35 = vcombine.high %v441_v28, %v445_v30  ;;  %v13015_v19 = vcombine.high %v512_v8, %v516_v9 }
  0xc0   :  { %10217 = vmatpush1.bf16.msra.mxu1 %v12880_v31  ;;  %v12966_v31 = vcombine.low %v464_v16, %v468_v18 }
  0xc1   :  { %10218 = vmatprep.subr.bf16.mxu1 %v12889_v34  ;;  %v12975_v34 = vcombine.high %v472_v26, %v476_v27 }
  0xc2   :  { %9694 = vmatpush1.bf16.msra.mxu0 %v12918_v38  ;;  %v453_v38 = vld [vmem:[%s19895_s1 + $0xce8] sm:$0xff] }
  0xc3   :  { %9704 = vmatprep.subr.bf16.mxu0 %v12927_v40  ;;  %v12944_v40 = vcombine.low %v441_v28, %v445_v30  ;;  %v12953_v43 = vcombine.high %v449_v37, %v453_v38 }
  0xc4   :  { %10219 = vmatpush1.bf16.msra.mxu1 %v12888_v39  ;;  %v12974_v39 = vcombine.low %v472_v26, %v476_v27  ;;  %v493_v26 = vld [vmem:[%s19895_s1 + $0xe28] sm:$0xff]  ;;  %v13014_v27 = vcombine.low %v512_v8, %v516_v9  ;;  %v15513_v8 = vcombine.low %v15290_v41, %v15290_v41 }
  0xc5   :  { %10220 = vmatprep.subr.bf16.mxu1 %v12897_v42  ;;  %9696 = vmatmul.mubr.bf16.vlgmr.msra.gmra.mrb[0].mxu0 %v15300_v45  ;;  %v12983_v42 = vcombine.high %v480_v13, %v484_v36  ;;  %v529_v9 = vld [vmem:[%s19895_s1 + $0xf48] sm:$0xff] }
  0xc6   :  { %9705 = vmatpush1.bf16.msra.mxu0 %v12926_v48  ;;  %9736 = vmatprep.mubr.bf16.mxu0 %v15310_v49  ;;  %v461_v48 = vld [vmem:[%s19895_s1 + $0xd28] sm:$0xff] }
  0xc7   :  { %9706 = vmatprep.subr.bf16.mxu0 %v12935_v51  ;;  %v12952_v51 = vcombine.low %v449_v37, %v453_v38  ;;  %v12961_v52 = vcombine.high %v457_v47, %v461_v48 }
  0xc8   :  { %10221 = vmatpush1.bf16.msra.mxu1 %v12896_v50  ;;  %v12982_v50 = vcombine.low %v480_v13, %v484_v36  ;;  %v501_v13 = vld [vmem:[%s19895_s1 + $0xe68] sm:$0xff] }
  0xc9   :  { %10222 = vmatprep.subr.bf16.mxu1 %v12905_v25  ;;  %v12991_v25 = vcombine.high %v488_v44, %v492_v46 }
  0xca   :  { %9707 = vmatpush1.bf16.msra.mxu0 %v12934_v56  ;;  %v469_v56 = vld [vmem:[%s19895_s1 + $0xd68] sm:$0xff] }
  0xcb   :  { %9708 = vmatprep.subr.bf16.mxu0 %v12943_v59  ;;  %v12960_v59 = vcombine.low %v457_v47, %v461_v48  ;;  %v12969_v62 = vcombine.high %v465_v55, %v469_v56 }
  0xcc   :  { %10223 = vmatpush1.bf16.msra.mxu1 %v12904_v57  ;;  %v12990_v57 = vcombine.low %v488_v44, %v492_v46  ;;  %v509_v44 = vld [vmem:[%s19895_s1 + $0xea8] sm:$0xff] }
  0xcd   :  { %10224 = vmatprep.subr.bf16.mxu1 %v12913_v60  ;;  %v12999_v60 = vcombine.high %v496_v53, %v500_v54 }
  0xce   :  { %9709 = vmatpush1.bf16.msra.mxu0 %v12942_v2  ;;  %v477_v2 = vld [vmem:[%s19895_s1 + $0xda8] sm:$0xff] }
  0xcf   :  { %9710 = vmatprep.subr.bf16.mxu0 %v12951_v5  ;;  %v12968_v5 = vcombine.low %v465_v55, %v469_v56  ;;  %v12977_v7 = vcombine.high %v473_v1, %v477_v2  ;;  %v12976_v18 = vcombine.low %v473_v1, %v477_v2 }
  0xd0   :  { %10225 = vmatpush1.bf16.msra.mxu1 %v12912_v4  ;;  %v12998_v4 = vcombine.low %v496_v53, %v500_v54  ;;  %v517_v53 = vld [vmem:[%s19895_s1 + $0xee8] sm:$0xff] }
  0xd1   :  { %10226 = vmatprep.subr.bf16.mxu1 %v12921_v6  ;;  %v13007_v6 = vcombine.high %v504_v63, %v508_v0 }
  0xd2   :  { %9711 = vmatpush1.bf16.msra.mxu0 %v12950_v11  ;;  %v481_v11 = vld [vmem:[%s19895_s1 + $0xdc8] sm:$0xff] }
  0xd3   :  { %9712 = vmatprep.subr.bf16.mxu0 %v12959_v14 }
  0xd4   :  { %10227 = vmatpush1.bf16.msra.mxu1 %v12920_v12  ;;  %v485_v12 = vld [vmem:[%s19895_s1 + $0xde8] sm:$0xff] }
  0xd5   :  { %10237 = vmatprep.subr.bf16.mxu1 %v12929_v15  ;;  %v13006_v15 = vcombine.low %v504_v63, %v508_v0  ;;  %v12984_v28 = vcombine.low %v481_v11, %v485_v12  ;;  %v525_v63 = vld [vmem:[%s19895_s1 + $0xf28] sm:$0xff] }
  0xd6   :  { %9713 = vmatpush1.bf16.msra.mxu0 %v12958_v22  ;;  %v12985_v22 = vcombine.high %v481_v11, %v485_v12  ;;  %v533_v11 = vld [vmem:[%s19895_s1 + $0xf68] sm:$0xff] }
  0xd7   :  { %10229 = vmatmul.mubr.bf16.vlgmr.msra.gmra.mrb[4].mxu1 %v15300_v45  ;;  %9714 = vmatprep.subr.bf16.mxu0 %v12967_v58  ;;  %v524_v58 = vld [vmem:[%s19895_s1 + $0xf20] sm:$0xff]  ;;  %v13033_v41 = vcombine.high %v529_v9, %v533_v11 }
  0xd8   :  { %10238 = vmatpush1.bf16.msra.mxu1 %v12928_v23  ;;  %10269 = vmatprep.mubr.bf16.mxu1 %v15310_v49  ;;  %v520_v23 = vld [vmem:[%s19895_s1 + $0xf00] sm:$0xff] }
  0xd9   :  { %10239 = vmatprep.subr.bf16.mxu1 %v12937_v24  ;;  %v489_v24 = vld [vmem:[%s19895_s1 + $0xe08] sm:$0xff]  ;;  %v13023_v30 = vcombine.high %v520_v23, %v524_v58  ;;  %v13022_v36 = vcombine.low %v520_v23, %v524_v58 }
  0xda   :  { %9715 = vmatpush1.bf16.msra.mxu0 %v12966_v31  ;;  %v12993_v31 = vcombine.high %v489_v24, %v493_v26  ;;  %v12992_v37 = vcombine.low %v489_v24, %v493_v26  ;;  %v541_v23 = vld [vmem:[%s19895_s1 + $0xfa8] sm:$0xff]  ;;  %v13032_v24 = vcombine.low %v529_v9, %v533_v11 }
  0xdb   :  { %9716 = vmatprep.subr.bf16.mxu0 %v12975_v34  ;;  %v532_v34 = vld [vmem:[%s19895_s1 + $0xf60] sm:$0xff] }
  0xdc   :  { %10240 = vmatpush1.bf16.msra.mxu1 %v12936_v32  ;;  %v528_v32 = vld [vmem:[%s19895_s1 + $0xf40] sm:$0xff] }
  0xdd   :  { %10241 = vmatprep.subr.bf16.mxu1 %v12945_v35  ;;  %v497_v35 = vld [vmem:[%s19895_s1 + $0xe48] sm:$0xff]  ;;  %v13031_v38 = vcombine.high %v528_v32, %v532_v34  ;;  %v13030_v46 = vcombine.low %v528_v32, %v532_v34 }
  0xde   :  { %9717 = vmatpush1.bf16.msra.mxu0 %v12974_v39  ;;  %v13001_v39 = vcombine.high %v497_v35, %v501_v13  ;;  %v13000_v47 = vcombine.low %v497_v35, %v501_v13  ;;  %v549_v32 = vld [vmem:[%s19895_s1 + $0xfe8] sm:$0xff] }
  0xdf   :  { %9718 = vmatprep.subr.bf16.mxu0 %v12983_v42  ;;  %v540_v42 = vld [vmem:[%s19895_s1 + $0xfa0] sm:$0xff] }
  0xe0   :  { %10242 = vmatpush1.bf16.msra.mxu1 %v12944_v40  ;;  %v536_v40 = vld [vmem:[%s19895_s1 + $0xf80] sm:$0xff] }
  0xe1   :  { %10243 = vmatprep.subr.bf16.mxu1 %v12953_v43  ;;  %v505_v43 = vld [vmem:[%s19895_s1 + $0xe88] sm:$0xff]  ;;  %v13039_v48 = vcombine.high %v536_v40, %v540_v42  ;;  %v13038_v54 = vcombine.low %v536_v40, %v540_v42 }
  0xe2   :  { %9719 = vmatpush1.bf16.msra.mxu0 %v12982_v50  ;;  %v13009_v50 = vcombine.high %v505_v43, %v509_v44  ;;  %v13008_v55 = vcombine.low %v505_v43, %v509_v44  ;;  %v557_v40 = vld [vmem:[%s19895_s1 + $0x1028] sm:$0xff] }
  0xe3   :  { %9720 = vmatprep.subr.bf16.mxu0 %v12991_v25  ;;  %v548_v25 = vld [vmem:[%s19895_s1 + $0xfe0] sm:$0xff] }
  0xe4   :  { %10244 = vmatpush1.bf16.msra.mxu1 %v12952_v51  ;;  %v544_v51 = vld [vmem:[%s19895_s1 + $0xfc0] sm:$0xff] }
  0xe5   :  { %10245 = vmatprep.subr.bf16.mxu1 %v12961_v52  ;;  %v513_v52 = vld [vmem:[%s19895_s1 + $0xec8] sm:$0xff]  ;;  %v13047_v56 = vcombine.high %v544_v51, %v548_v25  ;;  %v13046_v0 = vcombine.low %v544_v51, %v548_v25 }
  0xe6   :  { %9721 = vmatpush1.bf16.msra.mxu0 %v12990_v57  ;;  %v13017_v57 = vcombine.high %v513_v52, %v517_v53  ;;  %v13016_v1 = vcombine.low %v513_v52, %v517_v53  ;;  %v565_v51 = vld [vmem:[%s19895_s1 + $0x1068] sm:$0xff] }
  0xe7   :  { %9722 = vmatprep.subr.bf16.mxu0 %v12999_v60  ;;  %v556_v60 = vld [vmem:[%s19895_s1 + $0x1020] sm:$0xff] }
  0xe8   :  { %10246 = vmatpush1.bf16.msra.mxu1 %v12960_v59  ;;  %v552_v59 = vld [vmem:[%s19895_s1 + $0x1000] sm:$0xff] }
  0xe9   :  { %10247 = vmatprep.subr.bf16.mxu1 %v12969_v62  ;;  %v521_v62 = vld [vmem:[%s19895_s1 + $0xf08] sm:$0xff]  ;;  %v13055_v2 = vcombine.high %v552_v59, %v556_v60  ;;  %v13054_v12 = vcombine.low %v552_v59, %v556_v60 }
  0xea   :  { %v15430_v10 = vpop.f32.mrb[0].mxu1  ;;  %9723 = vmatpush1.bf16.msra.mxu0 %v12998_v4  ;;  %v15503_v4 = vld [vmem:[%s19896_s0 + $0x20] sm:$0xff]  ;;  %v573_v59 = vld [vmem:[%s19895_s1 + $0x10a8] sm:$0xff] }
  0xeb   :  { %v15438_v14 = vpop.f32.mrb[1].mxu1  ;;  %9724 = vmatprep.subr.bf16.mxu0 %v13007_v6  ;;  %v560_v6 = vld [vmem:[%s19895_s1 + $0x1040] sm:$0xff] }
  0xec   :  { %v10111_v16 = vpop.f32.mrb[2].mxu1  ;;  %10248 = vmatpush1.bf16.msra.mxu1 %v12968_v5  ;;  %v13025_v5 = vcombine.high %v521_v62, %v525_v63 }
  0xed   :  { %v10112_v20 = vpop.f32.mrb[3].mxu1  ;;  %10249 = vmatprep.subr.bf16.mxu1 %v12977_v7  ;;  %v564_v7 = vld [vmem:[%s19895_s1 + $0x1060] sm:$0xff]  ;;  %v13024_v16 = vcombine.low %v521_v62, %v525_v63 }
  0xee   :  { %9725 = vmatpush1.bf16.msra.mxu0 %v13006_v15  ;;  %v15523_v15 = vcombine.high %v15503_v4, %v15503_v4  ;;  %v572_v20 = vld [vmem:[%s19895_s1 + $0x10a0] sm:$0xff]  ;;  %v13062_v58 = vcombine.low %v560_v6, %v564_v7 }
  0xef   :  { %9726 = vmatprep.subr.bf16.mxu0 %v13015_v19  ;;  %v568_v19 = vld [vmem:[%s19895_s1 + $0x1080] sm:$0xff] }
  0xf0   :  { %10250 = vmatpush1.bf16.msra.mxu1 %v12976_v18  ;;  %v13063_v18 = vcombine.high %v560_v6, %v564_v7  ;;  %v13071_v26 = vcombine.high %v568_v19, %v572_v20  ;;  %v13070_v34 = vcombine.low %v568_v19, %v572_v20  ;;  %v581_v6 = vld [vmem:[%s19895_s1 + $0x10e8] sm:$0xff] }
  0xf1   :  { %10251 = vmatprep.subr.bf16.mxu1 %v12985_v22  ;;  %v537_v22 = vld [vmem:[%s19895_s1 + $0xf88] sm:$0xff] }
  0xf2   :  { %9727 = vmatpush1.bf16.msra.mxu0 %v13014_v27  ;;  %v13041_v27 = vcombine.high %v537_v22, %v541_v23  ;;  %v13040_v35 = vcombine.low %v537_v22, %v541_v23  ;;  %v589_v19 = vld [vmem:[%s19895_s1 + $0x1128] sm:$0xff] }
  0xf3   :  { %9728 = vmatprep.subr.bf16.mxu0 %v13023_v30  ;;  %v580_v30 = vld [vmem:[%s19895_s1 + $0x10e0] sm:$0xff] }
  0xf4   :  { %10252 = vmatpush1.bf16.msra.mxu1 %v12984_v28  ;;  %v576_v28 = vld [vmem:[%s19895_s1 + $0x10c0] sm:$0xff] }
  0xf5   :  { %10253 = vmatprep.subr.bf16.mxu1 %v12993_v31  ;;  %v545_v31 = vld [vmem:[%s19895_s1 + $0xfc8] sm:$0xff]  ;;  %v13079_v13 = vcombine.high %v576_v28, %v580_v30  ;;  %v13078_v42 = vcombine.low %v576_v28, %v580_v30 }
  0xf6   :  { %9729 = vmatpush1.bf16.msra.mxu0 %v13022_v36  ;;  %v13049_v36 = vcombine.high %v545_v31, %v549_v32  ;;  %v13048_v43 = vcombine.low %v545_v31, %v549_v32  ;;  %v597_v28 = vld [vmem:[%s19895_s1 + $0x1168] sm:$0xff] }
  0xf7   :  { %9730 = vmatprep.subr.bf16.mxu0 %v13031_v38  ;;  %v588_v38 = vld [vmem:[%s19895_s1 + $0x1120] sm:$0xff] }
  0xf8   :  { %10254 = vmatpush1.bf16.msra.mxu1 %v12992_v37  ;;  %v584_v37 = vld [vmem:[%s19895_s1 + $0x1100] sm:$0xff] }
  0xf9   :  { %10255 = vmatprep.subr.bf16.mxu1 %v13001_v39  ;;  %v553_v39 = vld [vmem:[%s19895_s1 + $0x1008] sm:$0xff]  ;;  %v13087_v44 = vcombine.high %v584_v37, %v588_v38  ;;  %v13086_v25 = vcombine.low %v584_v37, %v588_v38 }
  0xfa   :  { %9731 = vmatpush1.bf16.msra.mxu0 %v13030_v46  ;;  %v13057_v46 = vcombine.high %v553_v39, %v557_v40  ;;  %v13056_v52 = vcombine.low %v553_v39, %v557_v40  ;;  %v605_v37 = vld [vmem:[%s19895_s1 + $0x11a8] sm:$0xff] }
  0xfb   :  { %9732 = vmatprep.subr.bf16.mxu0 %v13039_v48  ;;  %v596_v48 = vld [vmem:[%s19895_s1 + $0x1160] sm:$0xff] }
  0xfc   :  { %10256 = vmatpush1.bf16.msra.mxu1 %v13000_v47  ;;  %v592_v47 = vld [vmem:[%s19895_s1 + $0x1140] sm:$0xff] }
  0xfd   :  { %10257 = vmatprep.subr.bf16.mxu1 %v13009_v50  ;;  %v561_v50 = vld [vmem:[%s19895_s1 + $0x1048] sm:$0xff]  ;;  %v13095_v53 = vcombine.high %v592_v47, %v596_v48  ;;  %v13094_v60 = vcombine.low %v592_v47, %v596_v48 }
  0xfe   :  { %9733 = vmatpush1.bf16.msra.mxu0 %v13038_v54  ;;  %v13065_v54 = vcombine.high %v561_v50, %v565_v51  ;;  %v13064_v62 = vcombine.low %v561_v50, %v565_v51  ;;  %v613_v47 = vld [vmem:[%s19895_s1 + $0x11e8] sm:$0xff] }
  0xff   :  { %9734 = vmatprep.subr.bf16.mxu0 %v13047_v56  ;;  %v604_v56 = vld [vmem:[%s19895_s1 + $0x11a0] sm:$0xff] }
 0x100   :  { %10258 = vmatpush1.bf16.msra.mxu1 %v13008_v55  ;;  %v600_v55 = vld [vmem:[%s19895_s1 + $0x1180] sm:$0xff] }
 0x101   :  { %10259 = vmatprep.subr.bf16.mxu1 %v13017_v57  ;;  %v569_v57 = vld [vmem:[%s19895_s1 + $0x1088] sm:$0xff]  ;;  %v13103_v63 = vcombine.high %v600_v55, %v604_v56  ;;  %v13102_v7 = vcombine.low %v600_v55, %v604_v56 }
 0x102   :  { %9735 = vmatpush1.bf16.msra.mxu0 %v13046_v0  ;;  %v13073_v0 = vcombine.high %v569_v57, %v573_v59  ;;  %v13072_v9 = vcombine.low %v569_v57, %v573_v59  ;;  %v621_v55 = vld [vmem:[%s19895_s1 + $0x1228] sm:$0xff] }
 0x103   :  { %9745 = vmatprep.subr.bf16.mxu0 %v13055_v2  ;;  %v612_v2 = vld [vmem:[%s19895_s1 + $0x11e0] sm:$0xff] }
 0x104   :  { %10260 = vmatpush1.bf16.msra.mxu1 %v13016_v1  ;;  %v608_v1 = vld [vmem:[%s19895_s1 + $0x11c0] sm:$0xff] }
 0x105   :  { %10261 = vmatprep.subr.bf16.mxu1 %v13025_v5  ;;  %9737 = vmatmul.mubr.bf16.vlgmr.msra.gmra.mrb[0].mxu0 %v15513_v8  ;;  %v577_v5 = vld [vmem:[%s19895_s1 + $0x10c8] sm:$0xff]  ;;  %v13111_v11 = vcombine.high %v608_v1, %v612_v2  ;;  %v13110_v20 = vcombine.low %v608_v1, %v612_v2 }
 0x106   :  { %9746 = vmatpush1.bf16.msra.mxu0 %v13054_v12  ;;  %9777 = vmatprep.mubr.bf16.mxu0 %v15523_v15  ;;  %v13081_v12 = vcombine.high %v577_v5, %v581_v6  ;;  %v13080_v22 = vcombine.low %v577_v5, %v581_v6  ;;  %v629_v1 = vld [vmem:[%s19895_s1 + $0x1268] sm:$0xff] }
 0x107   :  { %9747 = vmatprep.subr.bf16.mxu0 %v13063_v18  ;;  %v620_v18 = vld [vmem:[%s19895_s1 + $0x1220] sm:$0xff] }
 0x108   :  { %10262 = vmatpush1.bf16.msra.mxu1 %v13024_v16  ;;  %v616_v16 = vld [vmem:[%s19895_s1 + $0x1200] sm:$0xff] }
 0x109   :  { %10263 = vmatprep.subr.bf16.mxu1 %v13033_v41  ;;  %v585_v41 = vld [vmem:[%s19895_s1 + $0x1108] sm:$0xff]  ;;  %v13119_v23 = vcombine.high %v616_v16, %v620_v18  ;;  %v13118_v30 = vcombine.low %v616_v16, %v620_v18 }
 0x10a   :  { %9748 = vmatpush1.bf16.msra.mxu0 %v13062_v58  ;;  %v13089_v58 = vcombine.high %v585_v41, %v589_v19  ;;  %v13088_v31 = vcombine.low %v585_v41, %v589_v19  ;;  %v637_v16 = vld [vmem:[%s19895_s1 + $0x12a8] sm:$0xff] }
 0x10b   :  { %9749 = vmatprep.subr.bf16.mxu0 %v13071_v26  ;;  %v628_v26 = vld [vmem:[%s19895_s1 + $0x1260] sm:$0xff] }
 0x10c   :  { %10264 = vmatpush1.bf16.msra.mxu1 %v13032_v24  ;;  %v624_v24 = vld [vmem:[%s19895_s1 + $0x1240] sm:$0xff] }
 0x10d   :  { %10265 = vmatprep.subr.bf16.mxu1 %v13041_v27  ;;  %v593_v27 = vld [vmem:[%s19895_s1 + $0x1148] sm:$0xff]  ;;  %v13127_v32 = vcombine.high %v624_v24, %v628_v26  ;;  %v13126_v38 = vcombine.low %v624_v24, %v628_v26 }
 0x10e   :  { %9750 = vmatpush1.bf16.msra.mxu0 %v13070_v34  ;;  %v13097_v34 = vcombine.high %v593_v27, %v597_v28  ;;  %v13096_v39 = vcombine.low %v593_v27, %v597_v28  ;;  %v645_v24 = vld [vmem:[%s19895_s1 + $0x12e8] sm:$0xff] }
 0x10f   :  { %9751 = vmatprep.subr.bf16.mxu0 %v13079_v13  ;;  %v636_v13 = vld [vmem:[%s19895_s1 + $0x12a0] sm:$0xff] }
 0x110   :  { %10266 = vmatpush1.bf16.msra.mxu1 %v13040_v35  ;;  %v632_v35 = vld [vmem:[%s19895_s1 + $0x1280] sm:$0xff] }
 0x111   :  { %10267 = vmatprep.subr.bf16.mxu1 %v13049_v36  ;;  %v601_v36 = vld [vmem:[%s19895_s1 + $0x1188] sm:$0xff]  ;;  %v13135_v40 = vcombine.high %v632_v35, %v636_v13  ;;  %v13134_v48 = vcombine.low %v632_v35, %v636_v13 }
 0x112   :  { %9752 = vmatpush1.bf16.msra.mxu0 %v13078_v42  ;;  %v13105_v42 = vcombine.high %v601_v36, %v605_v37  ;;  %v13104_v50 = vcombine.low %v601_v36, %v605_v37  ;;  %v653_v35 = vld [vmem:[%s19895_s1 + $0x1328] sm:$0xff] }
 0x113   :  { %9753 = vmatprep.subr.bf16.mxu0 %v13087_v44  ;;  %v644_v44 = vld [vmem:[%s19895_s1 + $0x12e0] sm:$0xff] }
 0x114   :  { %10268 = vmatpush1.bf16.msra.mxu1 %v13048_v43  ;;  %v640_v43 = vld [vmem:[%s19895_s1 + $0x12c0] sm:$0xff] }
 0x115   :  { %10278 = vmatprep.subr.bf16.mxu1 %v13057_v46  ;;  %v609_v46 = vld [vmem:[%s19895_s1 + $0x11c8] sm:$0xff]  ;;  %v13143_v51 = vcombine.high %v640_v43, %v644_v44  ;;  %v13142_v56 = vcombine.low %v640_v43, %v644_v44  ;;  %v15722_v43 = vcombine.low %v15503_v4, %v15503_v4 }
 0x116   :  { %9754 = vmatpush1.bf16.msra.mxu0 %v13086_v25  ;;  %v13113_v25 = vcombine.high %v609_v46, %v613_v47  ;;  %v13112_v57 = vcombine.low %v609_v46, %v613_v47  ;;  %v657_v44 = vld [vmem:[%s19895_s1 + $0x1348] sm:$0xff] }
 0x117   :  { %10270 = vmatmul.mubr.bf16.vlgmr.msra.gmra.mrb[4].mxu1 %v15513_v8  ;;  %9755 = vmatprep.subr.bf16.mxu0 %v13095_v53  ;;  %v652_v53 = vld [vmem:[%s19895_s1 + $0x1320] sm:$0xff]  ;;  %v661_v46 = vld [vmem:[%s19895_s1 + $0x1368] sm:$0xff] }
 0x118   :  { %10279 = vmatpush1.bf16.msra.mxu1 %v13056_v52  ;;  %10310 = vmatprep.mubr.bf16.mxu1 %v15523_v15  ;;  %v648_v52 = vld [vmem:[%s19895_s1 + $0x1300] sm:$0xff]  ;;  %v13161_v4 = vcombine.high %v657_v44, %v661_v46 }
 0x119   :  { %10280 = vmatprep.subr.bf16.mxu1 %v13065_v54  ;;  %v617_v54 = vld [vmem:[%s19895_s1 + $0x1208] sm:$0xff]  ;;  %v13151_v59 = vcombine.high %v648_v52, %v652_v53  ;;  %v13150_v2 = vcombine.low %v648_v52, %v652_v53  ;;  %v700_v52 = vld [vmem:[%s19895_s1 + $0x14a0] sm:$0xff] }
 0x11a   :  { %9756 = vmatpush1.bf16.msra.mxu0 %v13094_v60  ;;  %v13121_v60 = vcombine.high %v617_v54, %v621_v55  ;;  %v13120_v5 = vcombine.low %v617_v54, %v621_v55  ;;  %v665_v53 = vld [vmem:[%s19895_s1 + $0x1388] sm:$0xff] }
 0x11b   :  { %9757 = vmatprep.subr.bf16.mxu0 %v13103_v63  ;;  %v660_v63 = vld [vmem:[%s19895_s1 + $0x1360] sm:$0xff]  ;;  %v669_v54 = vld [vmem:[%s19895_s1 + $0x13a8] sm:$0xff] }
 0x11c   :  { %10281 = vmatpush1.bf16.msra.mxu1 %v13064_v62  ;;  %v656_v62 = vld [vmem:[%s19895_s1 + $0x1340] sm:$0xff] }
 0x11d   :  { %10282 = vmatprep.subr.bf16.mxu1 %v13073_v0  ;;  %v625_v0 = vld [vmem:[%s19895_s1 + $0x1248] sm:$0xff]  ;;  %v13159_v6 = vcombine.high %v656_v62, %v660_v63  ;;  %v13158_v18 = vcombine.low %v656_v62, %v660_v63  ;;  %v708_v62 = vld [vmem:[%s19895_s1 + $0x14e0] sm:$0xff] }
 0x11e   :  { %9758 = vmatpush1.bf16.msra.mxu0 %v13102_v7  ;;  %v13129_v7 = vcombine.high %v625_v0, %v629_v1  ;;  %v13128_v41 = vcombine.low %v625_v0, %v629_v1  ;;  %v673_v63 = vld [vmem:[%s19895_s1 + $0x13c8] sm:$0xff] }
 0x11f   :  { %9759 = vmatprep.subr.bf16.mxu0 %v13111_v11  ;;  %v668_v11 = vld [vmem:[%s19895_s1 + $0x13a0] sm:$0xff]  ;;  %v677_v0 = vld [vmem:[%s19895_s1 + $0x13e8] sm:$0xff] }
 0x120   :  { %10283 = vmatpush1.bf16.msra.mxu1 %v13072_v9  ;;  %v664_v9 = vld [vmem:[%s19895_s1 + $0x1380] sm:$0xff] }
 0x121   :  { %10284 = vmatprep.subr.bf16.mxu1 %v13081_v12  ;;  %v633_v12 = vld [vmem:[%s19895_s1 + $0x1288] sm:$0xff]  ;;  %v13167_v19 = vcombine.high %v664_v9, %v668_v11  ;;  %v13166_v26 = vcombine.low %v664_v9, %v668_v11  ;;  %v716_v9 = vld [vmem:[%s19895_s1 + $0x1520] sm:$0xff] }
 0x122   :  { %9760 = vmatpush1.bf16.msra.mxu0 %v13110_v20  ;;  %v13137_v20 = vcombine.high %v633_v12, %v637_v16  ;;  %v13136_v27 = vcombine.low %v633_v12, %v637_v16  ;;  %v681_v11 = vld [vmem:[%s19895_s1 + $0x1408] sm:$0xff] }
 0x123   :  { %9761 = vmatprep.subr.bf16.mxu0 %v13119_v23  ;;  %v676_v23 = vld [vmem:[%s19895_s1 + $0x13e0] sm:$0xff]  ;;  %v685_v12 = vld [vmem:[%s19895_s1 + $0x1428] sm:$0xff] }
 0x124   :  { %10285 = vmatpush1.bf16.msra.mxu1 %v13080_v22  ;;  %v672_v22 = vld [vmem:[%s19895_s1 + $0x13c0] sm:$0xff] }
 0x125   :  { %10286 = vmatprep.subr.bf16.mxu1 %v13089_v58  ;;  %v641_v58 = vld [vmem:[%s19895_s1 + $0x12c8] sm:$0xff]  ;;  %v13175_v28 = vcombine.high %v672_v22, %v676_v23  ;;  %v13174_v13 = vcombine.low %v672_v22, %v676_v23  ;;  %v724_v22 = vld [vmem:[%s19895_s1 + $0x1560] sm:$0xff] }
 0x126   :  { %9762 = vmatpush1.bf16.msra.mxu0 %v13118_v30  ;;  %v13145_v30 = vcombine.high %v641_v58, %v645_v24  ;;  %v13144_v36 = vcombine.low %v641_v58, %v645_v24  ;;  %v689_v23 = vld [vmem:[%s19895_s1 + $0x1448] sm:$0xff] }
 0x127   :  { %9763 = vmatprep.subr.bf16.mxu0 %v13127_v32  ;;  %v684_v32 = vld [vmem:[%s19895_s1 + $0x1420] sm:$0xff]  ;;  %v693_v58 = vld [vmem:[%s19895_s1 + $0x1468] sm:$0xff] }
 0x128   :  { %10287 = vmatpush1.bf16.msra.mxu1 %v13088_v31  ;;  %v680_v31 = vld [vmem:[%s19895_s1 + $0x1400] sm:$0xff] }
 0x129   :  { %10288 = vmatprep.subr.bf16.mxu1 %v13097_v34  ;;  %v649_v34 = vld [vmem:[%s19895_s1 + $0x1308] sm:$0xff]  ;;  %v13183_v37 = vcombine.high %v680_v31, %v684_v32  ;;  %v13182_v47 = vcombine.low %v680_v31, %v684_v32  ;;  %v732_v31 = vld [vmem:[%s19895_s1 + $0x15a0] sm:$0xff] }
 0x12a   :  { %9764 = vmatpush1.bf16.msra.mxu0 %v13126_v38  ;;  %v15712_v38 = vld [vmem:[%s19896_s0 + $0x28] sm:$0xff] }
 0x12b   :  { %9765 = vmatprep.subr.bf16.mxu0 %v13135_v40  ;;  %v688_v40 = vld [vmem:[%s19895_s1 + $0x1440] sm:$0xff]  ;;  %v697_v32 = vld [vmem:[%s19895_s1 + $0x1488] sm:$0xff] }
 0x12c   :  { %10289 = vmatpush1.bf16.msra.mxu1 %v13096_v39  ;;  %v13153_v39 = vcombine.high %v649_v34, %v653_v35 }
 0x12d   :  { %10290 = vmatprep.subr.bf16.mxu1 %v13105_v42  ;;  %v692_v42 = vld [vmem:[%s19895_s1 + $0x1460] sm:$0xff] }
 0x12e   :  { %9766 = vmatpush1.bf16.msra.mxu0 %v13134_v48  ;;  %v15732_v48 = vcombine.high %v15712_v38, %v15712_v38  ;;  %v13190_v55 = vcombine.low %v688_v40, %v692_v42 }
 0x12f   :  { %9767 = vmatprep.subr.bf16.mxu0 %v13143_v51  ;;  %v13191_v51 = vcombine.high %v688_v40, %v692_v42  ;;  %v740_v40 = vld [vmem:[%s19895_s1 + $0x15e0] sm:$0xff]  ;;  %v705_v42 = vld [vmem:[%s19895_s1 + $0x14c8] sm:$0xff] }
 0x130   :  { %10291 = vmatpush1.bf16.msra.mxu1 %v13104_v50  ;;  %v13152_v50 = vcombine.low %v649_v34, %v653_v35  ;;  %v701_v34 = vld [vmem:[%s19895_s1 + $0x14a8] sm:$0xff] }
 0x131   :  { %10292 = vmatprep.subr.bf16.mxu1 %v13113_v25  ;;  %v696_v25 = vld [vmem:[%s19895_s1 + $0x1480] sm:$0xff] }
 0x132   :  { %9768 = vmatpush1.bf16.msra.mxu0 %v13142_v56  ;;  %v13160_v56 = vcombine.low %v657_v44, %v661_v46  ;;  %v13198_v1 = vcombine.low %v696_v25, %v700_v52  ;;  %v709_v44 = vld [vmem:[%s19895_s1 + $0x14e8] sm:$0xff] }
 0x133   :  { %9769 = vmatprep.subr.bf16.mxu0 %v13151_v59  ;;  %v13169_v59 = vcombine.high %v665_v53, %v669_v54 }
 0x134   :  { %10293 = vmatpush1.bf16.msra.mxu1 %v13112_v57  ;;  %v13199_v57 = vcombine.high %v696_v25, %v700_v52  ;;  %v748_v25 = vld [vmem:[%s19895_s1 + $0x1620] sm:$0xff]  ;;  %v713_v52 = vld [vmem:[%s19895_s1 + $0x1508] sm:$0xff] }
 0x135   :  { %10294 = vmatprep.subr.bf16.mxu1 %v13121_v60  ;;  %v704_v60 = vld [vmem:[%s19895_s1 + $0x14c0] sm:$0xff] }
 0x136   :  { %9770 = vmatpush1.bf16.msra.mxu0 %v13150_v2  ;;  %v13168_v2 = vcombine.low %v665_v53, %v669_v54  ;;  %v13206_v16 = vcombine.low %v704_v60, %v708_v62  ;;  %v717_v53 = vld [vmem:[%s19895_s1 + $0x1528] sm:$0xff] }
 0x137   :  { %9771 = vmatprep.subr.bf16.mxu0 %v13159_v6  ;;  %v13177_v6 = vcombine.high %v673_v63, %v677_v0 }
 0x138   :  { %10295 = vmatpush1.bf16.msra.mxu1 %v13120_v5  ;;  %v13207_v5 = vcombine.high %v704_v60, %v708_v62  ;;  %v756_v60 = vld [vmem:[%s19895_s1 + $0x1660] sm:$0xff]  ;;  %v721_v62 = vld [vmem:[%s19895_s1 + $0x1548] sm:$0xff] }
 0x139   :  { %10296 = vmatprep.subr.bf16.mxu1 %v13129_v7  ;;  %v712_v7 = vld [vmem:[%s19895_s1 + $0x1500] sm:$0xff] }
 0x13a   :  { %9772 = vmatpush1.bf16.msra.mxu0 %v13158_v18  ;;  %v13176_v18 = vcombine.low %v673_v63, %v677_v0  ;;  %v13214_v24 = vcombine.low %v712_v7, %v716_v9  ;;  %v725_v63 = vld [vmem:[%s19895_s1 + $0x1568] sm:$0xff] }
 0x13b   :  { %9773 = vmatprep.subr.bf16.mxu0 %v13167_v19  ;;  %v13185_v19 = vcombine.high %v681_v11, %v685_v12 }
 0x13c   :  { %10297 = vmatpush1.bf16.msra.mxu1 %v13128_v41  ;;  %v13215_v41 = vcombine.high %v712_v7, %v716_v9  ;;  %v764_v7 = vld [vmem:[%s19895_s1 + $0x16a0] sm:$0xff]  ;;  %v729_v9 = vld [vmem:[%s19895_s1 + $0x1588] sm:$0xff] }
 0x13d   :  { %10298 = vmatprep.subr.bf16.mxu1 %v13137_v20  ;;  %v720_v20 = vld [vmem:[%s19895_s1 + $0x1540] sm:$0xff] }
 0x13e   :  { %9774 = vmatpush1.bf16.msra.mxu0 %v13166_v26  ;;  %v13184_v26 = vcombine.low %v681_v11, %v685_v12  ;;  %v13222_v35 = vcombine.low %v720_v20, %v724_v22  ;;  %v733_v11 = vld [vmem:[%s19895_s1 + $0x15a8] sm:$0xff] }
 0x13f   :  { %9775 = vmatprep.subr.bf16.mxu0 %v13175_v28  ;;  %v13193_v28 = vcombine.high %v689_v23, %v693_v58 }
 0x140   :  { %10299 = vmatpush1.bf16.msra.mxu1 %v13136_v27  ;;  %v13223_v27 = vcombine.high %v720_v20, %v724_v22  ;;  %v772_v20 = vld [vmem:[%s19895_s1 + $0x16e0] sm:$0xff]  ;;  %v737_v22 = vld [vmem:[%s19895_s1 + $0x15c8] sm:$0xff] }
 0x141   :  { %10300 = vmatprep.subr.bf16.mxu1 %v13145_v30  ;;  %v728_v30 = vld [vmem:[%s19895_s1 + $0x1580] sm:$0xff] }
 0x142   :  { %9776 = vmatpush1.bf16.msra.mxu0 %v13174_v13  ;;  %v13192_v13 = vcombine.low %v689_v23, %v693_v58  ;;  %v13230_v46 = vcombine.low %v728_v30, %v732_v31  ;;  %v741_v23 = vld [vmem:[%s19895_s1 + $0x15e8] sm:$0xff] }
 0x143   :  { %9786 = vmatprep.subr.bf16.mxu0 %v13183_v37  ;;  %v13201_v37 = vcombine.high %v697_v32, %v701_v34 }
 0x144   :  { %10301 = vmatpush1.bf16.msra.mxu1 %v13144_v36  ;;  %v13231_v36 = vcombine.high %v728_v30, %v732_v31  ;;  %v780_v30 = vld [vmem:[%s19895_s1 + $0x1720] sm:$0xff]  ;;  %v745_v31 = vld [vmem:[%s19895_s1 + $0x1608] sm:$0xff] }
 0x145   :  { %10302 = vmatprep.subr.bf16.mxu1 %v13153_v39  ;;  %9778 = vmatmul.mubr.bf16.vlgmr.msra.gmra.mrb[0].mxu0 %v15722_v43  ;;  %v736_v39 = vld [vmem:[%s19895_s1 + $0x15c0] sm:$0xff] }
 0x146   :  { %9787 = vmatpush1.bf16.msra.mxu0 %v13182_v47  ;;  %9818 = vmatprep.mubr.bf16.mxu0 %v15732_v48  ;;  %v13200_v47 = vcombine.low %v697_v32, %v701_v34  ;;  %v13238_v54 = vcombine.low %v736_v39, %v740_v40  ;;  %v749_v32 = vld [vmem:[%s19895_s1 + $0x1628] sm:$0xff] }
 0x147   :  { %9788 = vmatprep.subr.bf16.mxu0 %v13191_v51  ;;  %v13209_v51 = vcombine.high %v705_v42, %v709_v44 }
 0x148   :  { %10303 = vmatpush1.bf16.msra.mxu1 %v13152_v50  ;;  %v13239_v50 = vcombine.high %v736_v39, %v740_v40  ;;  %v788_v39 = vld [vmem:[%s19895_s1 + $0x1760] sm:$0xff]  ;;  %v753_v40 = vld [vmem:[%s19895_s1 + $0x1648] sm:$0xff] }
 0x149   :  { %10304 = vmatprep.subr.bf16.mxu1 %v13161_v4  ;;  %v744_v4 = vld [vmem:[%s19895_s1 + $0x1600] sm:$0xff] }
 0x14a   :  { %9789 = vmatpush1.bf16.msra.mxu0 %v13190_v55  ;;  %v13208_v55 = vcombine.low %v705_v42, %v709_v44  ;;  %v13246_v0 = vcombine.low %v744_v4, %v748_v25  ;;  %v757_v42 = vld [vmem:[%s19895_s1 + $0x1668] sm:$0xff] }
 0x14b   :  { %9790 = vmatprep.subr.bf16.mxu0 %v13199_v57  ;;  %v13217_v57 = vcombine.high %v713_v52, %v717_v53 }
 0x14c   :  { %10305 = vmatpush1.bf16.msra.mxu1 %v13160_v56  ;;  %v13247_v56 = vcombine.high %v744_v4, %v748_v25  ;;  %v796_v4 = vld [vmem:[%s19895_s1 + $0x17a0] sm:$0xff]  ;;  %v761_v25 = vld [vmem:[%s19895_s1 + $0x1688] sm:$0xff] }
 0x14d   :  { %10306 = vmatprep.subr.bf16.mxu1 %v13169_v59  ;;  %v752_v59 = vld [vmem:[%s19895_s1 + $0x1640] sm:$0xff] }
 0x14e   :  { %9791 = vmatpush1.bf16.msra.mxu0 %v13198_v1  ;;  %v13216_v1 = vcombine.low %v713_v52, %v717_v53  ;;  %v13254_v12 = vcombine.low %v752_v59, %v756_v60  ;;  %v765_v52 = vld [vmem:[%s19895_s1 + $0x16a8] sm:$0xff] }
 0x14f   :  { %9792 = vmatprep.subr.bf16.mxu0 %v13207_v5  ;;  %v13225_v5 = vcombine.high %v721_v62, %v725_v63 }
 0x150   :  { %10307 = vmatpush1.bf16.msra.mxu1 %v13168_v2  ;;  %v13255_v2 = vcombine.high %v752_v59, %v756_v60  ;;  %v804_v59 = vld [vmem:[%s19895_s1 + $0x17e0] sm:$0xff]  ;;  %v769_v60 = vld [vmem:[%s19895_s1 + $0x16c8] sm:$0xff] }
 0x151   :  { %10308 = vmatprep.subr.bf16.mxu1 %v13177_v6  ;;  %v760_v6 = vld [vmem:[%s19895_s1 + $0x1680] sm:$0xff] }
 0x152   :  { %9793 = vmatpush1.bf16.msra.mxu0 %v13206_v16  ;;  %v13224_v16 = vcombine.low %v721_v62, %v725_v63  ;;  %v13262_v58 = vcombine.low %v760_v6, %v764_v7  ;;  %v773_v62 = vld [vmem:[%s19895_s1 + $0x16e8] sm:$0xff] }
 0x153   :  { %9794 = vmatprep.subr.bf16.mxu0 %v13215_v41  ;;  %v13233_v41 = vcombine.high %v729_v9, %v733_v11 }
 0x154   :  { %10309 = vmatpush1.bf16.msra.mxu1 %v13176_v18  ;;  %v13263_v18 = vcombine.high %v760_v6, %v764_v7  ;;  %v812_v6 = vld [vmem:[%s19895_s1 + $0x1820] sm:$0xff]  ;;  %v777_v7 = vld [vmem:[%s19895_s1 + $0x1708] sm:$0xff] }
 0x155   :  { %10319 = vmatprep.subr.bf16.mxu1 %v13185_v19  ;;  %v768_v19 = vld [vmem:[%s19895_s1 + $0x16c0] sm:$0xff] }
 0x156   :  { %9795 = vmatpush1.bf16.msra.mxu0 %v13214_v24  ;;  %v13232_v24 = vcombine.low %v729_v9, %v733_v11  ;;  %v13270_v34 = vcombine.low %v768_v19, %v772_v20  ;;  %v781_v9 = vld [vmem:[%s19895_s1 + $0x1728] sm:$0xff] }
 0x157   :  { %10311 = vmatmul.mubr.bf16.vlgmr.msra.gmra.mrb[4].mxu1 %v15722_v43  ;;  %9796 = vmatprep.subr.bf16.mxu0 %v13223_v27  ;;  %v13241_v27 = vcombine.high %v737_v22, %v741_v23 }
 0x158   :  { %10320 = vmatpush1.bf16.msra.mxu1 %v13184_v26  ;;  %10351 = vmatprep.mubr.bf16.mxu1 %v15732_v48  ;;  %v13271_v26 = vcombine.high %v768_v19, %v772_v20  ;;  %v816_v19 = vld [vmem:[%s19895_s1 + $0x1840] sm:$0xff] }
 0x159   :  { %10321 = vmatprep.subr.bf16.mxu1 %v13193_v28  ;;  %v776_v28 = vld [vmem:[%s19895_s1 + $0x1700] sm:$0xff] }
 0x15a   :  { %9797 = vmatpush1.bf16.msra.mxu0 %v13222_v35  ;;  %v13240_v35 = vcombine.low %v737_v22, %v741_v23  ;;  %v13278_v44 = vcombine.low %v776_v28, %v780_v30  ;;  %v820_v20 = vld [vmem:[%s19895_s1 + $0x1860] sm:$0xff]  ;;  %v15931_v22 = vcombine.low %v15712_v38, %v15712_v38  ;;  %v785_v23 = vld [vmem:[%s19895_s1 + $0x1748] sm:$0xff] }
 0x15b   :  { %9798 = vmatprep.subr.bf16.mxu0 %v13231_v36  ;;  %v13249_v36 = vcombine.high %v745_v31, %v749_v32 }
 0x15c   :  { %10322 = vmatpush1.bf16.msra.mxu1 %v13192_v13  ;;  %v13279_v13 = vcombine.high %v776_v28, %v780_v30  ;;  %v13319_v28 = vcombine.high %v816_v19, %v820_v20  ;;  %v824_v30 = vld [vmem:[%s19895_s1 + $0x1880] sm:$0xff] }
 0x15d   :  { %10323 = vmatprep.subr.bf16.mxu1 %v13201_v37  ;;  %v784_v37 = vld [vmem:[%s19895_s1 + $0x1740] sm:$0xff] }
 0x15e   :  { %9799 = vmatpush1.bf16.msra.mxu0 %v13230_v46  ;;  %v13248_v46 = vcombine.low %v745_v31, %v749_v32  ;;  %v13286_v53 = vcombine.low %v784_v37, %v788_v39  ;;  %v828_v31 = vld [vmem:[%s19895_s1 + $0x18a0] sm:$0xff]  ;;  %v793_v32 = vld [vmem:[%s19895_s1 + $0x1788] sm:$0xff] }
 0x15f   :  { %9800 = vmatprep.subr.bf16.mxu0 %v13239_v50  ;;  %v13257_v50 = vcombine.high %v753_v40, %v757_v42 }
 0x160   :  { %10324 = vmatpush1.bf16.msra.mxu1 %v13200_v47  ;;  %v13287_v47 = vcombine.high %v784_v37, %v788_v39  ;;  %v832_v39 = vld [vmem:[%s19895_s1 + $0x18c0] sm:$0xff] }
 0x161   :  { %10325 = vmatprep.subr.bf16.mxu1 %v13209_v51  ;;  %v792_v51 = vld [vmem:[%s19895_s1 + $0x1780] sm:$0xff] }
 0x162   :  { %9801 = vmatpush1.bf16.msra.mxu0 %v13238_v54  ;;  %v13256_v54 = vcombine.low %v753_v40, %v757_v42  ;;  %v13294_v63 = vcombine.low %v792_v51, %v796_v4  ;;  %v836_v40 = vld [vmem:[%s19895_s1 + $0x18e0] sm:$0xff]  ;;  %v801_v42 = vld [vmem:[%s19895_s1 + $0x17c8] sm:$0xff] }
 0x163   :  { %9802 = vmatprep.subr.bf16.mxu0 %v13247_v56  ;;  %v13265_v56 = vcombine.high %v761_v25, %v765_v52 }
 0x164   :  { %10326 = vmatpush1.bf16.msra.mxu1 %v13208_v55  ;;  %v13295_v55 = vcombine.high %v792_v51, %v796_v4  ;;  %v840_v4 = vld [vmem:[%s19895_s1 + $0x1900] sm:$0xff] }
 0x165   :  { %10327 = vmatprep.subr.bf16.mxu1 %v13217_v57  ;;  %v800_v57 = vld [vmem:[%s19895_s1 + $0x17c0] sm:$0xff] }
 0x166   :  { %9803 = vmatpush1.bf16.msra.mxu0 %v13246_v0  ;;  %v13264_v0 = vcombine.low %v761_v25, %v765_v52  ;;  %v13302_v11 = vcombine.low %v800_v57, %v804_v59  ;;  %v844_v25 = vld [vmem:[%s19895_s1 + $0x1920] sm:$0xff]  ;;  %v809_v52 = vld [vmem:[%s19895_s1 + $0x1808] sm:$0xff] }
 0x167   :  { %9804 = vmatprep.subr.bf16.mxu0 %v13255_v2  ;;  %v13273_v2 = vcombine.high %v769_v60, %v773_v62 }
 0x168   :  { %10328 = vmatpush1.bf16.msra.mxu1 %v13216_v1  ;;  %v13303_v1 = vcombine.high %v800_v57, %v804_v59  ;;  %v848_v59 = vld [vmem:[%s19895_s1 + $0x1940] sm:$0xff] }
 0x169   :  { %10329 = vmatprep.subr.bf16.mxu1 %v13225_v5  ;;  %v808_v5 = vld [vmem:[%s19895_s1 + $0x1800] sm:$0xff] }
 0x16a   :  { %9805 = vmatpush1.bf16.msra.mxu0 %v13254_v12  ;;  %v13272_v12 = vcombine.low %v769_v60, %v773_v62  ;;  %v852_v60 = vld [vmem:[%s19895_s1 + $0x1960] sm:$0xff]  ;;  %v817_v62 = vld [vmem:[%s19895_s1 + $0x1848] sm:$0xff] }
 0x16b   :  { %9806 = vmatprep.subr.bf16.mxu0 %v13263_v18  ;;  %v15921_v18 = vld [vmem:[%s19896_s0 + $0x30] sm:$0xff] }
 0x16c   :  { %10330 = vmatpush1.bf16.msra.mxu1 %v13224_v16  ;;  %v13311_v16 = vcombine.high %v808_v5, %v812_v6 }
 0x16d   :  { %10331 = vmatprep.subr.bf16.mxu1 %v13233_v41  ;;  %v13281_v41 = vcombine.high %v777_v7, %v781_v9 }
 0x16e   :  { %9807 = vmatpush1.bf16.msra.mxu0 %v13262_v58  ;;  %v789_v58 = vld [vmem:[%s19895_s1 + $0x1768] sm:$0xff] }
 0x16f   :  { %9808 = vmatprep.subr.bf16.mxu0 %v13271_v26  ;;  %v15941_v26 = vcombine.high %v15921_v18, %v15921_v18  ;;  %v13289_v38 = vcombine.high %v785_v23, %v789_v58 }
 0x170   :  { %10332 = vmatpush1.bf16.msra.mxu1 %v13232_v24  ;;  %v13310_v24 = vcombine.low %v808_v5, %v812_v6  ;;  %v856_v6 = vld [vmem:[%s19895_s1 + $0x1980] sm:$0xff] }
 0x171   :  { %10333 = vmatprep.subr.bf16.mxu1 %v13241_v27  ;;  %v13280_v27 = vcombine.low %v777_v7, %v781_v9  ;;  %v860_v7 = vld [vmem:[%s19895_s1 + $0x19a0] sm:$0xff]  ;;  %v825_v9 = vld [vmem:[%s19895_s1 + $0x1888] sm:$0xff] }
 0x172   :  { %9809 = vmatpush1.bf16.msra.mxu0 %v13270_v34  ;;  %v797_v34 = vld [vmem:[%s19895_s1 + $0x17a8] sm:$0xff] }
 0x173   :  { %9810 = vmatprep.subr.bf16.mxu0 %v13279_v13  ;;  %v13288_v13 = vcombine.low %v785_v23, %v789_v58  ;;  %v13297_v37 = vcombine.high %v793_v32, %v797_v34  ;;  %v868_v23 = vld [vmem:[%s19895_s1 + $0x19e0] sm:$0xff]  ;;  %v833_v58 = vld [vmem:[%s19895_s1 + $0x18c8] sm:$0xff] }
 0x174   :  { %10334 = vmatpush1.bf16.msra.mxu1 %v13240_v35  ;;  %v13318_v35 = vcombine.low %v816_v19, %v820_v20  ;;  %v864_v20 = vld [vmem:[%s19895_s1 + $0x19c0] sm:$0xff] }
 0x175   :  { %10335 = vmatprep.subr.bf16.mxu1 %v13249_v36  ;;  %v13327_v36 = vcombine.high %v824_v30, %v828_v31 }
 0x176   :  { %9811 = vmatpush1.bf16.msra.mxu0 %v13278_v44  ;;  %v805_v44 = vld [vmem:[%s19895_s1 + $0x17e8] sm:$0xff] }
 0x177   :  { %9812 = vmatprep.subr.bf16.mxu0 %v13287_v47  ;;  %v13296_v47 = vcombine.low %v793_v32, %v797_v34  ;;  %v13305_v51 = vcombine.high %v801_v42, %v805_v44  ;;  %v876_v32 = vld [vmem:[%s19895_s1 + $0x1a20] sm:$0xff]  ;;  %v841_v34 = vld [vmem:[%s19895_s1 + $0x1908] sm:$0xff] }
 0x178   :  { %10336 = vmatpush1.bf16.msra.mxu1 %v13248_v46  ;;  %v13326_v46 = vcombine.low %v824_v30, %v828_v31  ;;  %v872_v31 = vld [vmem:[%s19895_s1 + $0x1a00] sm:$0xff] }
 0x179   :  { %10337 = vmatprep.subr.bf16.mxu1 %v13257_v50  ;;  %v13335_v50 = vcombine.high %v832_v39, %v836_v40 }
 0x17a   :  { %9813 = vmatpush1.bf16.msra.mxu0 %v13286_v53  ;;  %v813_v53 = vld [vmem:[%s19895_s1 + $0x1828] sm:$0xff] }
 0x17b   :  { %9814 = vmatprep.subr.bf16.mxu0 %v13295_v55  ;;  %v13304_v55 = vcombine.low %v801_v42, %v805_v44  ;;  %v13313_v57 = vcombine.high %v809_v52, %v813_v53  ;;  %v884_v42 = vld [vmem:[%s19895_s1 + $0x1a60] sm:$0xff]  ;;  %v849_v44 = vld [vmem:[%s19895_s1 + $0x1948] sm:$0xff] }
 0x17c   :  { %10338 = vmatpush1.bf16.msra.mxu1 %v13256_v54  ;;  %v13334_v54 = vcombine.low %v832_v39, %v836_v40  ;;  %v880_v40 = vld [vmem:[%s19895_s1 + $0x1a40] sm:$0xff] }
 0x17d   :  { %10339 = vmatprep.subr.bf16.mxu1 %v13265_v56  ;;  %v13343_v56 = vcombine.high %v840_v4, %v844_v25 }
 0x17e   :  { %9815 = vmatpush1.bf16.msra.mxu0 %v13294_v63  ;;  %v821_v63 = vld [vmem:[%s19895_s1 + $0x1868] sm:$0xff] }
 0x17f   :  { %9816 = vmatprep.subr.bf16.mxu0 %v13303_v1  ;;  %v13312_v1 = vcombine.low %v809_v52, %v813_v53  ;;  %v13321_v5 = vcombine.high %v817_v62, %v821_v63  ;;  %v892_v52 = vld [vmem:[%s19895_s1 + $0x1aa0] sm:$0xff]  ;;  %v857_v53 = vld [vmem:[%s19895_s1 + $0x1988] sm:$0xff] }
 0x180   :  { %10340 = vmatpush1.bf16.msra.mxu1 %v13264_v0  ;;  %v13342_v0 = vcombine.low %v840_v4, %v844_v25  ;;  %v888_v25 = vld [vmem:[%s19895_s1 + $0x1a80] sm:$0xff] }
 0x181   :  { %10341 = vmatprep.subr.bf16.mxu1 %v13273_v2  ;;  %v13351_v2 = vcombine.high %v848_v59, %v852_v60 }
 0x182   :  { %9817 = vmatpush1.bf16.msra.mxu0 %v13302_v11  ;;  %v829_v11 = vld [vmem:[%s19895_s1 + $0x18a8] sm:$0xff] }
 0x183   :  { %9827 = vmatprep.subr.bf16.mxu0 %v13311_v16  ;;  %v13320_v16 = vcombine.low %v817_v62, %v821_v63  ;;  %v13329_v19 = vcombine.high %v825_v9, %v829_v11  ;;  %v900_v62 = vld [vmem:[%s19895_s1 + $0x1ae0] sm:$0xff]  ;;  %v865_v63 = vld [vmem:[%s19895_s1 + $0x19c8] sm:$0xff] }
 0x184   :  { %10342 = vmatpush1.bf16.msra.mxu1 %v13272_v12  ;;  %v13350_v12 = vcombine.low %v848_v59, %v852_v60  ;;  %v896_v60 = vld [vmem:[%s19895_s1 + $0x1ac0] sm:$0xff] }
 0x185   :  { %10343 = vmatprep.subr.bf16.mxu1 %v13281_v41  ;;  %9819 = vmatmul.mubr.bf16.vlgmr.msra.gmra.mrb[0].mxu0 %v15931_v22  ;;  %v13359_v41 = vcombine.high %v856_v6, %v860_v7 }
 0x186   :  { %9828 = vmatpush1.bf16.msra.mxu0 %v13310_v24  ;;  %9859 = vmatprep.mubr.bf16.mxu0 %v15941_v26  ;;  %v837_v24 = vld [vmem:[%s19895_s1 + $0x18e8] sm:$0xff] }
 0x187   :  { %9829 = vmatprep.subr.bf16.mxu0 %v13319_v28  ;;  %v13328_v28 = vcombine.low %v825_v9, %v829_v11  ;;  %v13337_v30 = vcombine.high %v833_v58, %v837_v24  ;;  %v908_v9 = vld [vmem:[%s19895_s1 + $0x1b20] sm:$0xff]  ;;  %v873_v11 = vld [vmem:[%s19895_s1 + $0x1a08] sm:$0xff] }
 0x188   :  { %10344 = vmatpush1.bf16.msra.mxu1 %v13280_v27  ;;  %v13358_v27 = vcombine.low %v856_v6, %v860_v7  ;;  %v904_v7 = vld [vmem:[%s19895_s1 + $0x1b00] sm:$0xff] }
 0x189   :  { %10345 = vmatprep.subr.bf16.mxu1 %v13289_v38  ;;  %v13367_v38 = vcombine.high %v864_v20, %v868_v23 }
 0x18a   :  { %9830 = vmatpush1.bf16.msra.mxu0 %v13318_v35  ;;  %v845_v35 = vld [vmem:[%s19895_s1 + $0x1928] sm:$0xff] }
 0x18b   :  { %9831 = vmatprep.subr.bf16.mxu0 %v13327_v36  ;;  %v13336_v36 = vcombine.low %v833_v58, %v837_v24  ;;  %v13345_v39 = vcombine.high %v841_v34, %v845_v35  ;;  %v916_v58 = vld [vmem:[%s19895_s1 + $0x1b60] sm:$0xff]  ;;  %v881_v24 = vld [vmem:[%s19895_s1 + $0x1a48] sm:$0xff] }
 0x18c   :  { %10346 = vmatpush1.bf16.msra.mxu1 %v13288_v13  ;;  %v13366_v13 = vcombine.low %v864_v20, %v868_v23  ;;  %v912_v23 = vld [vmem:[%s19895_s1 + $0x1b40] sm:$0xff] }
 0x18d   :  { %10347 = vmatprep.subr.bf16.mxu1 %v13297_v37  ;;  %v13375_v37 = vcombine.high %v872_v31, %v876_v32 }
 0x18e   :  { %9832 = vmatpush1.bf16.msra.mxu0 %v13326_v46  ;;  %v853_v46 = vld [vmem:[%s19895_s1 + $0x1968] sm:$0xff] }
 0x18f   :  { %9833 = vmatprep.subr.bf16.mxu0 %v13335_v50  ;;  %v13344_v50 = vcombine.low %v841_v34, %v845_v35  ;;  %v13353_v4 = vcombine.high %v849_v44, %v853_v46  ;;  %v924_v34 = vld [vmem:[%s19895_s1 + $0x1ba0] sm:$0xff]  ;;  %v889_v35 = vld [vmem:[%s19895_s1 + $0x1a88] sm:$0xff] }
 0x190   :  { %10348 = vmatpush1.bf16.msra.mxu1 %v13296_v47  ;;  %v13374_v47 = vcombine.low %v872_v31, %v876_v32  ;;  %v920_v32 = vld [vmem:[%s19895_s1 + $0x1b80] sm:$0xff] }
 0x191   :  { %10349 = vmatprep.subr.bf16.mxu1 %v13305_v51  ;;  %v13383_v51 = vcombine.high %v880_v40, %v884_v42 }
 0x192   :  { %9834 = vmatpush1.bf16.msra.mxu0 %v13334_v54  ;;  %v861_v54 = vld [vmem:[%s19895_s1 + $0x19a8] sm:$0xff] }
 0x193   :  { %9835 = vmatprep.subr.bf16.mxu0 %v13343_v56  ;;  %v13352_v56 = vcombine.low %v849_v44, %v853_v46  ;;  %v13361_v59 = vcombine.high %v857_v53, %v861_v54  ;;  %v932_v44 = vld [vmem:[%s19895_s1 + $0x1be0] sm:$0xff]  ;;  %v897_v46 = vld [vmem:[%s19895_s1 + $0x1ac8] sm:$0xff] }
 0x194   :  { %10350 = vmatpush1.bf16.msra.mxu1 %v13304_v55  ;;  %v13382_v55 = vcombine.low %v880_v40, %v884_v42  ;;  %v928_v42 = vld [vmem:[%s19895_s1 + $0x1bc0] sm:$0xff] }
 0x195   :  { %10360 = vmatprep.subr.bf16.mxu1 %v13313_v57  ;;  %v13391_v57 = vcombine.high %v888_v25, %v892_v52 }
 0x196   :  { %9836 = vmatpush1.bf16.msra.mxu0 %v13342_v0  ;;  %v869_v0 = vld [vmem:[%s19895_s1 + $0x19e8] sm:$0xff] }
 0x197   :  { %10352 = vmatmul.mubr.bf16.vlgmr.msra.gmra.mrb[4].mxu1 %v15931_v22  ;;  %9837 = vmatprep.subr.bf16.mxu0 %v13351_v2  ;;  %v13360_v2 = vcombine.low %v857_v53, %v861_v54  ;;  %v13369_v6 = vcombine.high %v865_v63, %v869_v0  ;;  %v940_v53 = vld [vmem:[%s19895_s1 + $0x1c20] sm:$0xff]  ;;  %v905_v54 = vld [vmem:[%s19895_s1 + $0x1b08] sm:$0xff] }
 0x198   :  { %10361 = vmatpush1.bf16.msra.mxu1 %v13312_v1  ;;  %10392 = vmatprep.mubr.bf16.mxu1 %v15941_v26  ;;  %v13390_v1 = vcombine.low %v888_v25, %v892_v52  ;;  %v936_v52 = vld [vmem:[%s19895_s1 + $0x1c00] sm:$0xff] }
 0x199   :  { %10362 = vmatprep.subr.bf16.mxu1 %v13321_v5  ;;  %v13399_v5 = vcombine.high %v896_v60, %v900_v62 }
 0x19a   :  { %9838 = vmatpush1.bf16.msra.mxu0 %v13350_v12  ;;  %v877_v12 = vld [vmem:[%s19895_s1 + $0x1a28] sm:$0xff] }
 0x19b   :  { %9839 = vmatprep.subr.bf16.mxu0 %v13359_v41  ;;  %v13368_v41 = vcombine.low %v865_v63, %v869_v0  ;;  %v13377_v20 = vcombine.high %v873_v11, %v877_v12  ;;  %v944_v63 = vld [vmem:[%s19895_s1 + $0x1c40] sm:$0xff] }
 0x19c   :  { %10363 = vmatpush1.bf16.msra.mxu1 %v13320_v16  ;;  %v13398_v16 = vcombine.low %v896_v60, %v900_v62  ;;  %v16130_v60 = vld [vmem:[%s19896_s0 + $0x38] sm:$0xff]  ;;  %v948_v0 = vld [vmem:[%s19895_s1 + $0x1c60] sm:$0xff] }
 0x19d   :  { %10364 = vmatprep.subr.bf16.mxu1 %v13329_v19  ;;  %v13407_v19 = vcombine.high %v904_v7, %v908_v9 }
 0x19e   :  { %9840 = vmatpush1.bf16.msra.mxu0 %v13358_v27  ;;  %v885_v27 = vld [vmem:[%s19895_s1 + $0x1a68] sm:$0xff] }
 0x19f   :  { %9841 = vmatprep.subr.bf16.mxu0 %v13367_v38  ;;  %v13376_v38 = vcombine.low %v873_v11, %v877_v12  ;;  %v13385_v31 = vcombine.high %v881_v24, %v885_v27  ;;  %v13447_v11 = vcombine.high %v944_v63, %v948_v0  ;;  %v952_v12 = vld [vmem:[%s19895_s1 + $0x1c80] sm:$0xff] }
 0x1a0   :  { %10365 = vmatpush1.bf16.msra.mxu1 %v13328_v28  ;;  %v13406_v28 = vcombine.low %v904_v7, %v908_v9  ;;  %v16150_v7 = vcombine.high %v16130_v60, %v16130_v60 }
 0x1a1   :  { %10366 = vmatprep.subr.bf16.mxu1 %v13337_v30  ;;  %v13415_v30 = vcombine.high %v912_v23, %v916_v58 }
 0x1a2   :  { %9842 = vmatpush1.bf16.msra.mxu0 %v13366_v13  ;;  %v893_v13 = vld [vmem:[%s19895_s1 + $0x1aa8] sm:$0xff] }
 0x1a3   :  { %9843 = vmatprep.subr.bf16.mxu0 %v13375_v37  ;;  %v13384_v37 = vcombine.low %v881_v24, %v885_v27  ;;  %v13393_v40 = vcombine.high %v889_v35, %v893_v13  ;;  %v960_v27 = vld [vmem:[%s19895_s1 + $0x1cc0] sm:$0xff] }
 0x1a4   :  { %10367 = vmatpush1.bf16.msra.mxu1 %v13336_v36  ;;  %v13414_v36 = vcombine.low %v912_v23, %v916_v58 }
 0x1a5   :  { %10368 = vmatprep.subr.bf16.mxu1 %v13345_v39  ;;  %v13423_v39 = vcombine.high %v920_v32, %v924_v34 }
 0x1a6   :  { %9844 = vmatpush1.bf16.msra.mxu0 %v13374_v47  ;;  %v901_v47 = vld [vmem:[%s19895_s1 + $0x1ae8] sm:$0xff] }
 0x1a7   :  { %9845 = vmatprep.subr.bf16.mxu0 %v13383_v51  ;;  %v13392_v51 = vcombine.low %v889_v35, %v893_v13  ;;  %v13401_v25 = vcombine.high %v897_v46, %v901_v47  ;;  %v968_v13 = vld [vmem:[%s19895_s1 + $0x1d00] sm:$0xff] }
 0x1a8   :  { %10369 = vmatpush1.bf16.msra.mxu1 %v13344_v50  ;;  %v13422_v50 = vcombine.low %v920_v32, %v924_v34 }
 0x1a9   :  { %10370 = vmatprep.subr.bf16.mxu1 %v13353_v4  ;;  %v13431_v4 = vcombine.high %v928_v42, %v932_v44 }
 0x1aa   :  { %9846 = vmatpush1.bf16.msra.mxu0 %v13382_v55  ;;  %v909_v55 = vld [vmem:[%s19895_s1 + $0x1b28] sm:$0xff] }
 0x1ab   :  { %9847 = vmatprep.subr.bf16.mxu0 %v13391_v57  ;;  %v13400_v57 = vcombine.low %v897_v46, %v901_v47  ;;  %v13409_v62 = vcombine.high %v905_v54, %v909_v55  ;;  %v13408_v9 = vcombine.low %v905_v54, %v909_v55  ;;  %v976_v47 = vld [vmem:[%s19895_s1 + $0x1d40] sm:$0xff] }
 0x1ac   :  { %10371 = vmatpush1.bf16.msra.mxu1 %v13352_v56  ;;  %v13430_v56 = vcombine.low %v928_v42, %v932_v44  ;;  %v984_v55 = vld [vmem:[%s19895_s1 + $0x1d80] sm:$0xff] }
 0x1ad   :  { %10372 = vmatprep.subr.bf16.mxu1 %v13361_v59  ;;  %v13439_v59 = vcombine.high %v936_v52, %v940_v53 }
 0x1ae   :  { %9848 = vmatpush1.bf16.msra.mxu0 %v13390_v1  ;;  %v16140_v1 = vcombine.low %v15921_v18, %v15921_v18 }
 0x1af   :  { %9849 = vmatprep.subr.bf16.mxu0 %v13399_v5  ;;  %v917_v5 = vld [vmem:[%s19895_s1 + $0x1b68] sm:$0xff] }
 0x1b0   :  { %10373 = vmatpush1.bf16.msra.mxu1 %v13360_v2  ;;  %v913_v2 = vld [vmem:[%s19895_s1 + $0x1b48] sm:$0xff] }
 0x1b1   :  { %10374 = vmatprep.subr.bf16.mxu1 %v13369_v6  ;;  %v13438_v6 = vcombine.low %v936_v52, %v940_v53  ;;  %v13417_v18 = vcombine.high %v913_v2, %v917_v5  ;;  %v13416_v23 = vcombine.low %v913_v2, %v917_v5  ;;  %v992_v5 = vld [vmem:[%s19895_s1 + $0x1dc0] sm:$0xff] }
 0x1b2   :  { %9850 = vmatpush1.bf16.msra.mxu0 %v13398_v16  ;;  %v956_v16 = vld [vmem:[%s19895_s1 + $0x1ca0] sm:$0xff] }
 0x1b3   :  { %9851 = vmatprep.subr.bf16.mxu0 %v13407_v19  ;;  %v925_v19 = vld [vmem:[%s19895_s1 + $0x1ba8] sm:$0xff]  ;;  %v13455_v58 = vcombine.high %v952_v12, %v956_v16 }
 0x1b4   :  { %10375 = vmatpush1.bf16.msra.mxu1 %v13368_v41  ;;  %v921_v41 = vld [vmem:[%s19895_s1 + $0x1b88] sm:$0xff] }
 0x1b5   :  { %10376 = vmatprep.subr.bf16.mxu1 %v13377_v20  ;;  %v13446_v20 = vcombine.low %v944_v63, %v948_v0  ;;  %v13425_v24 = vcombine.high %v921_v41, %v925_v19  ;;  %v13424_v32 = vcombine.low %v921_v41, %v925_v19  ;;  %v1000_v19 = vld [vmem:[%s19895_s1 + $0x1e00] sm:$0xff] }
 0x1b6   :  { %9852 = vmatpush1.bf16.msra.mxu0 %v13406_v28  ;;  %v964_v28 = vld [vmem:[%s19895_s1 + $0x1ce0] sm:$0xff] }
 0x1b7   :  { %9853 = vmatprep.subr.bf16.mxu0 %v13415_v30  ;;  %v933_v30 = vld [vmem:[%s19895_s1 + $0x1be8] sm:$0xff]  ;;  %v13463_v34 = vcombine.high %v960_v27, %v964_v28 }
 0x1b8   :  { %10377 = vmatpush1.bf16.msra.mxu1 %v13376_v38  ;;  %v929_v38 = vld [vmem:[%s19895_s1 + $0x1bc8] sm:$0xff] }
 0x1b9   :  { %10378 = vmatprep.subr.bf16.mxu1 %v13385_v31  ;;  %v13454_v31 = vcombine.low %v952_v12, %v956_v16  ;;  %v13433_v35 = vcombine.high %v929_v38, %v933_v30  ;;  %v13432_v42 = vcombine.low %v929_v38, %v933_v30  ;;  %v1008_v30 = vld [vmem:[%s19895_s1 + $0x1e40] sm:$0xff] }
 0x1ba   :  { %9854 = vmatpush1.bf16.msra.mxu0 %v13414_v36  ;;  %v972_v36 = vld [vmem:[%s19895_s1 + $0x1d20] sm:$0xff] }
 0x1bb   :  { %9855 = vmatprep.subr.bf16.mxu0 %v13423_v39  ;;  %v941_v39 = vld [vmem:[%s19895_s1 + $0x1c28] sm:$0xff]  ;;  %v13471_v44 = vcombine.high %v968_v13, %v972_v36 }
 0x1bc   :  { %10379 = vmatpush1.bf16.msra.mxu1 %v13384_v37  ;;  %v937_v37 = vld [vmem:[%s19895_s1 + $0x1c08] sm:$0xff] }
 0x1bd   :  { %10380 = vmatprep.subr.bf16.mxu1 %v13393_v40  ;;  %v13462_v40 = vcombine.low %v960_v27, %v964_v28  ;;  %v13441_v46 = vcombine.high %v937_v37, %v941_v39  ;;  %v13440_v52 = vcombine.low %v937_v37, %v941_v39  ;;  %v1016_v39 = vld [vmem:[%s19895_s1 + $0x1e80] sm:$0xff] }
 0x1be   :  { %9856 = vmatpush1.bf16.msra.mxu0 %v13422_v50  ;;  %v980_v50 = vld [vmem:[%s19895_s1 + $0x1d60] sm:$0xff] }
 0x1bf   :  { %9857 = vmatprep.subr.bf16.mxu0 %v13431_v4  ;;  %v949_v4 = vld [vmem:[%s19895_s1 + $0x1c68] sm:$0xff]  ;;  %v13479_v53 = vcombine.high %v976_v47, %v980_v50 }
 0x1c0   :  { %10381 = vmatpush1.bf16.msra.mxu1 %v13392_v51  ;;  %v945_v51 = vld [vmem:[%s19895_s1 + $0x1c48] sm:$0xff] }
 0x1c1   :  { %10382 = vmatprep.subr.bf16.mxu1 %v13401_v25  ;;  %v13470_v25 = vcombine.low %v968_v13, %v972_v36  ;;  %v13449_v54 = vcombine.high %v945_v51, %v949_v4  ;;  %v13448_v63 = vcombine.low %v945_v51, %v949_v4  ;;  %v1024_v4 = vld [vmem:[%s19895_s1 + $0x1ec0] sm:$0xff] }
 0x1c2   :  { %9858 = vmatpush1.bf16.msra.mxu0 %v13430_v56  ;;  %v988_v56 = vld [vmem:[%s19895_s1 + $0x1da0] sm:$0xff] }
 0x1c3   :  { %9868 = vmatprep.subr.bf16.mxu0 %v13439_v59  ;;  %v957_v59 = vld [vmem:[%s19895_s1 + $0x1ca8] sm:$0xff]  ;;  %v13487_v0 = vcombine.high %v984_v55, %v988_v56 }
 0x1c4   :  { %10383 = vmatpush1.bf16.msra.mxu1 %v13400_v57  ;;  %v953_v57 = vld [vmem:[%s19895_s1 + $0x1c88] sm:$0xff] }
 0x1c5   :  { %10384 = vmatprep.subr.bf16.mxu1 %v13409_v62  ;;  %9860 = vmatmul.mubr.bf16.vlgmr.msra.gmra.mrb[0].mxu0 %v16140_v1  ;;  %v13478_v62 = vcombine.low %v976_v47, %v980_v50  ;;  %v13457_v2 = vcombine.high %v953_v57, %v957_v59  ;;  %v13456_v12 = vcombine.low %v953_v57, %v957_v59  ;;  %v1032_v59 = vld [vmem:[%s19895_s1 + $0x1f00] sm:$0xff] }
 0x1c6   :  { %9869 = vmatpush1.bf16.msra.mxu0 %v13438_v6  ;;  %9900 = vmatprep.mubr.bf16.mxu0 %v16150_v7  ;;  %v996_v6 = vld [vmem:[%s19895_s1 + $0x1de0] sm:$0xff] }
 0x1c7   :  { %9870 = vmatprep.subr.bf16.mxu0 %v13447_v11  ;;  %v965_v11 = vld [vmem:[%s19895_s1 + $0x1ce8] sm:$0xff]  ;;  %v13495_v16 = vcombine.high %v992_v5, %v996_v6 }
 0x1c8   :  { %10385 = vmatpush1.bf16.msra.mxu1 %v13408_v9  ;;  %v961_v9 = vld [vmem:[%s19895_s1 + $0x1cc8] sm:$0xff] }
 0x1c9   :  { %10386 = vmatprep.subr.bf16.mxu1 %v13417_v18  ;;  %v13486_v18 = vcombine.low %v984_v55, %v988_v56  ;;  %v13465_v41 = vcombine.high %v961_v9, %v965_v11  ;;  %v13464_v27 = vcombine.low %v961_v9, %v965_v11  ;;  %v1040_v11 = vld [vmem:[%s19895_s1 + $0x1f40] sm:$0xff] }
 0x1ca   :  { %9871 = vmatpush1.bf16.msra.mxu0 %v13446_v20  ;;  %v1004_v20 = vld [vmem:[%s19895_s1 + $0x1e20] sm:$0xff] }
 0x1cb   :  { %9872 = vmatprep.subr.bf16.mxu0 %v13455_v58  ;;  %v973_v58 = vld [vmem:[%s19895_s1 + $0x1d28] sm:$0xff]  ;;  %v13503_v28 = vcombine.high %v1000_v19, %v1004_v20 }
 0x1cc   :  { %10387 = vmatpush1.bf16.msra.mxu1 %v13416_v23  ;;  %v969_v23 = vld [vmem:[%s19895_s1 + $0x1d08] sm:$0xff] }
 0x1cd   :  { %10388 = vmatprep.subr.bf16.mxu1 %v13425_v24  ;;  %v13494_v24 = vcombine.low %v992_v5, %v996_v6  ;;  %v13473_v38 = vcombine.high %v969_v23, %v973_v58  ;;  %v13472_v13 = vcombine.low %v969_v23, %v973_v58  ;;  %v1048_v58 = vld [vmem:[%s19895_s1 + $0x1f80] sm:$0xff] }
 0x1ce   :  { %9873 = vmatpush1.bf16.msra.mxu0 %v13454_v31  ;;  %v1012_v31 = vld [vmem:[%s19895_s1 + $0x1e60] sm:$0xff] }
 0x1cf   :  { %9874 = vmatprep.subr.bf16.mxu0 %v13463_v34  ;;  %v981_v34 = vld [vmem:[%s19895_s1 + $0x1d68] sm:$0xff]  ;;  %v13511_v36 = vcombine.high %v1008_v30, %v1012_v31 }
 0x1d0   :  { %10389 = vmatpush1.bf16.msra.mxu1 %v13424_v32  ;;  %v977_v32 = vld [vmem:[%s19895_s1 + $0x1d48] sm:$0xff] }
 0x1d1   :  { %10390 = vmatprep.subr.bf16.mxu1 %v13433_v35  ;;  %v13502_v35 = vcombine.low %v1000_v19, %v1004_v20  ;;  %v13481_v37 = vcombine.high %v977_v32, %v981_v34  ;;  %v13480_v47 = vcombine.low %v977_v32, %v981_v34  ;;  %v1056_v34 = vld [vmem:[%s19895_s1 + $0x1fc0] sm:$0xff] }
 0x1d2   :  { %9875 = vmatpush1.bf16.msra.mxu0 %v13462_v40  ;;  %v1020_v40 = vld [vmem:[%s19895_s1 + $0x1ea0] sm:$0xff] }
 0x1d3   :  { %9876 = vmatprep.subr.bf16.mxu0 %v13471_v44  ;;  %v989_v44 = vld [vmem:[%s19895_s1 + $0x1da8] sm:$0xff]  ;;  %v13519_v50 = vcombine.high %v1016_v39, %v1020_v40 }
 0x1d4   :  { %10391 = vmatpush1.bf16.msra.mxu1 %v13432_v42  ;;  %v985_v42 = vld [vmem:[%s19895_s1 + $0x1d88] sm:$0xff] }
 0x1d5   :  { %10401 = vmatprep.subr.bf16.mxu1 %v13441_v46  ;;  %v13510_v46 = vcombine.low %v1008_v30, %v1012_v31  ;;  %v13489_v51 = vcombine.high %v985_v42, %v989_v44  ;;  %v13488_v55 = vcombine.low %v985_v42, %v989_v44  ;;  %v1064_v44 = vld [vmem:[%s19895_s1 + $0x2000] sm:$0xff] }
 0x1d6   :  { %9877 = vmatpush1.bf16.msra.mxu0 %v13470_v25  ;;  %v1028_v25 = vld [vmem:[%s19895_s1 + $0x1ee0] sm:$0xff] }
 0x1d7   :  { %10393 = vmatmul.mubr.bf16.vlgmr.msra.gmra.mrb[4].mxu1 %v16140_v1  ;;  %9878 = vmatprep.subr.bf16.mxu0 %v13479_v53  ;;  %v997_v53 = vld [vmem:[%s19895_s1 + $0x1de8] sm:$0xff]  ;;  %v13527_v56 = vcombine.high %v1024_v4, %v1028_v25 }
 0x1d8   :  { %10402 = vmatpush1.bf16.msra.mxu1 %v13440_v52  ;;  %10433 = vmatprep.mubr.bf16.mxu1 %v16150_v7  ;;  %v993_v52 = vld [vmem:[%s19895_s1 + $0x1dc8] sm:$0xff] }
 0x1d9   :  { %10403 = vmatprep.subr.bf16.mxu1 %v13449_v54  ;;  %v13518_v54 = vcombine.low %v1016_v39, %v1020_v40  ;;  %v13497_v57 = vcombine.high %v993_v52, %v997_v53  ;;  %v13496_v5 = vcombine.low %v993_v52, %v997_v53  ;;  %v16339_v52 = vld [vmem:[%s19896_s0 + $0x40] sm:$0xff] }
 0x1da   :  { %9879 = vmatpush1.bf16.msra.mxu0 %v13478_v62  ;;  %v1036_v62 = vld [vmem:[%s19895_s1 + $0x1f20] sm:$0xff] }
 0x1db   :  { %9880 = vmatprep.subr.bf16.mxu0 %v13487_v0  ;;  %v1005_v0 = vld [vmem:[%s19895_s1 + $0x1e28] sm:$0xff]  ;;  %v13535_v6 = vcombine.high %v1032_v59, %v1036_v62 }
 0x1dc   :  { %10404 = vmatpush1.bf16.msra.mxu1 %v13448_v63  ;;  %v1001_v63 = vld [vmem:[%s19895_s1 + $0x1e08] sm:$0xff] }
 0x1dd   :  { %10405 = vmatprep.subr.bf16.mxu1 %v13457_v2  ;;  %v13526_v2 = vcombine.low %v1024_v4, %v1028_v25  ;;  %v13505_v9 = vcombine.high %v1001_v63, %v1005_v0  ;;  %v13504_v19 = vcombine.low %v1001_v63, %v1005_v0  ;;  %v16359_v63 = vcombine.high %v16339_v52, %v16339_v52 }
 0x1de   :  { %9881 = vmatpush1.bf16.msra.mxu0 %v13486_v18  ;;  %v1044_v18 = vld [vmem:[%s19895_s1 + $0x1f60] sm:$0xff] }
 0x1df   :  { %9882 = vmatprep.subr.bf16.mxu0 %v13495_v16  ;;  %v1013_v16 = vld [vmem:[%s19895_s1 + $0x1e68] sm:$0xff]  ;;  %v13543_v20 = vcombine.high %v1040_v11, %v1044_v18 }
 0x1e0   :  { %10406 = vmatpush1.bf16.msra.mxu1 %v13456_v12  ;;  %v1009_v12 = vld [vmem:[%s19895_s1 + $0x1e48] sm:$0xff] }
 0x1e1   :  { %10407 = vmatprep.subr.bf16.mxu1 %v13465_v41  ;;  %v13534_v41 = vcombine.low %v1032_v59, %v1036_v62  ;;  %v13513_v23 = vcombine.high %v1009_v12, %v1013_v16  ;;  %v13512_v30 = vcombine.low %v1009_v12, %v1013_v16  ;;  %v1045_v59 = vld [vmem:[%s19895_s1 + $0x1f68] sm:$0xff] }
 0x1e2   :  { %9883 = vmatpush1.bf16.msra.mxu0 %v13494_v24  ;;  %v1052_v24 = vld [vmem:[%s19895_s1 + $0x1fa0] sm:$0xff] }
 0x1e3   :  { %9884 = vmatprep.subr.bf16.mxu0 %v13503_v28  ;;  %v1021_v28 = vld [vmem:[%s19895_s1 + $0x1ea8] sm:$0xff]  ;;  %v13551_v31 = vcombine.high %v1048_v58, %v1052_v24 }
 0x1e4   :  { %10408 = vmatpush1.bf16.msra.mxu1 %v13464_v27  ;;  %v1017_v27 = vld [vmem:[%s19895_s1 + $0x1e88] sm:$0xff] }
 0x1e5   :  { %10409 = vmatprep.subr.bf16.mxu1 %v13473_v38  ;;  %v13542_v38 = vcombine.low %v1040_v11, %v1044_v18  ;;  %v13521_v32 = vcombine.high %v1017_v27, %v1021_v28  ;;  %v13520_v39 = vcombine.low %v1017_v27, %v1021_v28  ;;  %v1053_v11 = vld [vmem:[%s19895_s1 + $0x1fa8] sm:$0xff] }
 0x1e6   :  { %9885 = vmatpush1.bf16.msra.mxu0 %v13502_v35  ;;  %v1060_v35 = vld [vmem:[%s19895_s1 + $0x1fe0] sm:$0xff] }
 0x1e7   :  { %9886 = vmatprep.subr.bf16.mxu0 %v13511_v36  ;;  %v1029_v36 = vld [vmem:[%s19895_s1 + $0x1ee8] sm:$0xff]  ;;  %v13559_v40 = vcombine.high %v1056_v34, %v1060_v35 }
 0x1e8   :  { %10410 = vmatpush1.bf16.msra.mxu1 %v13472_v13  ;;  %v1025_v13 = vld [vmem:[%s19895_s1 + $0x1ec8] sm:$0xff] }
 0x1e9   :  { %10411 = vmatprep.subr.bf16.mxu1 %v13481_v37  ;;  %v13550_v37 = vcombine.low %v1048_v58, %v1052_v24  ;;  %v13529_v42 = vcombine.high %v1025_v13, %v1029_v36  ;;  %v13528_v4 = vcombine.low %v1025_v13, %v1029_v36  ;;  %v1061_v58 = vld [vmem:[%s19895_s1 + $0x1fe8] sm:$0xff] }
 0x1ea   :  { %9887 = vmatpush1.bf16.msra.mxu0 %v13510_v46  ;;  %v1068_v46 = vld [vmem:[%s19895_s1 + $0x2020] sm:$0xff] }
 0x1eb   :  { %9888 = vmatprep.subr.bf16.mxu0 %v13519_v50  ;;  %v1037_v50 = vld [vmem:[%s19895_s1 + $0x1f28] sm:$0xff]  ;;  %v13567_v25 = vcombine.high %v1064_v44, %v1068_v46  ;;  %v13566_v62 = vcombine.low %v1064_v44, %v1068_v46 }
 0x1ec   :  { %10412 = vmatpush1.bf16.msra.mxu1 %v13480_v47  ;;  %v1033_v47 = vld [vmem:[%s19895_s1 + $0x1f08] sm:$0xff] }
 0x1ed   :  { %10413 = vmatprep.subr.bf16.mxu1 %v13489_v51  ;;  %v13558_v51 = vcombine.low %v1056_v34, %v1060_v35  ;;  %v13537_v53 = vcombine.high %v1033_v47, %v1037_v50  ;;  %v13536_v0 = vcombine.low %v1033_v47, %v1037_v50  ;;  %v1069_v34 = vld [vmem:[%s19895_s1 + $0x2028] sm:$0xff] }
 0x1ee   :  { %9889 = vmatpush1.bf16.msra.mxu0 %v13518_v54  ;;  %v1072_v54 = vld [vmem:[%s19895_s1 + $0x2040] sm:$0xff]  ;;  %v1077_v44 = vld [vmem:[%s19895_s1 + $0x2068] sm:$0xff] }
 0x1ef   :  { %9890 = vmatprep.subr.bf16.mxu0 %v13527_v56  ;;  %v16349_v56 = vcombine.low %v16130_v60, %v16130_v60 }
 0x1f0   :  { %10414 = vmatpush1.bf16.msra.mxu1 %v13488_v55  ;;  %v1076_v55 = vld [vmem:[%s19895_s1 + $0x2060] sm:$0xff] }
 0x1f1   :  { %10415 = vmatprep.subr.bf16.mxu1 %v13497_v57  ;;  %v1041_v57 = vld [vmem:[%s19895_s1 + $0x1f48] sm:$0xff]  ;;  %v13574_v18 = vcombine.low %v1072_v54, %v1076_v55 }
 0x1f2   :  { %9891 = vmatpush1.bf16.msra.mxu0 %v13526_v2  ;;  %v13575_v2 = vcombine.high %v1072_v54, %v1076_v55  ;;  %v13545_v60 = vcombine.high %v1041_v57, %v1045_v59  ;;  %v13544_v12 = vcombine.low %v1041_v57, %v1045_v59  ;;  %v1085_v54 = vld [vmem:[%s19895_s1 + $0x20a8] sm:$0xff] }
 0x1f3   :  { %9892 = vmatprep.subr.bf16.mxu0 %v13535_v6  ;;  %v1084_v6 = vld [vmem:[%s19895_s1 + $0x20a0] sm:$0xff] }
 0x1f4   :  { %10416 = vmatpush1.bf16.msra.mxu1 %v13496_v5  ;;  %v1080_v5 = vld [vmem:[%s19895_s1 + $0x2080] sm:$0xff] }
 0x1f5   :  { %10417 = vmatprep.subr.bf16.mxu1 %v13505_v9  ;;  %v1049_v9 = vld [vmem:[%s19895_s1 + $0x1f88] sm:$0xff]  ;;  %v13583_v16 = vcombine.high %v1080_v5, %v1084_v6  ;;  %v13582_v24 = vcombine.low %v1080_v5, %v1084_v6 }
 0x1f6   :  { %9893 = vmatpush1.bf16.msra.mxu0 %v13534_v41  ;;  %v13553_v41 = vcombine.high %v1049_v9, %v1053_v11  ;;  %v13552_v27 = vcombine.low %v1049_v9, %v1053_v11  ;;  %v1093_v5 = vld [vmem:[%s19895_s1 + $0x20e8] sm:$0xff] }
 0x1f7   :  { %9894 = vmatprep.subr.bf16.mxu0 %v13543_v20  ;;  %v1092_v20 = vld [vmem:[%s19895_s1 + $0x20e0] sm:$0xff] }
 0x1f8   :  { %10418 = vmatpush1.bf16.msra.mxu1 %v13504_v19  ;;  %v1088_v19 = vld [vmem:[%s19895_s1 + $0x20c0] sm:$0xff] }
 0x1f9   :  { %10419 = vmatprep.subr.bf16.mxu1 %v13513_v23  ;;  %v1057_v23 = vld [vmem:[%s19895_s1 + $0x1fc8] sm:$0xff]  ;;  %v13591_v28 = vcombine.high %v1088_v19, %v1092_v20  ;;  %v13590_v35 = vcombine.low %v1088_v19, %v1092_v20 }
 0x1fa   :  { %9895 = vmatpush1.bf16.msra.mxu0 %v13542_v38  ;;  %v13561_v38 = vcombine.high %v1057_v23, %v1061_v58  ;;  %v13560_v13 = vcombine.low %v1057_v23, %v1061_v58  ;;  %v1101_v19 = vld [vmem:[%s19895_s1 + $0x2128] sm:$0xff] }
 0x1fb   :  { %9896 = vmatprep.subr.bf16.mxu0 %v13551_v31  ;;  %v1100_v31 = vld [vmem:[%s19895_s1 + $0x2120] sm:$0xff] }
 0x1fc   :  { %10420 = vmatpush1.bf16.msra.mxu1 %v13512_v30  ;;  %v1096_v30 = vld [vmem:[%s19895_s1 + $0x2100] sm:$0xff] }
 0x1fd   :  { %10421 = vmatprep.subr.bf16.mxu1 %v13521_v32  ;;  %v1065_v32 = vld [vmem:[%s19895_s1 + $0x2008] sm:$0xff]  ;;  %v13599_v36 = vcombine.high %v1096_v30, %v1100_v31  ;;  %v13598_v46 = vcombine.low %v1096_v30, %v1100_v31 }
 0x1fe   :  { %9897 = vmatpush1.bf16.msra.mxu0 %v13550_v37  ;;  %v13569_v37 = vcombine.high %v1065_v32, %v1069_v34  ;;  %v13568_v47 = vcombine.low %v1065_v32, %v1069_v34  ;;  %v1109_v30 = vld [vmem:[%s19895_s1 + $0x2168] sm:$0xff] }
 0x1ff   :  { %9898 = vmatprep.subr.bf16.mxu0 %v13559_v40  ;;  %v1108_v40 = vld [vmem:[%s19895_s1 + $0x2160] sm:$0xff] }
 0x200   :  { %10422 = vmatpush1.bf16.msra.mxu1 %v13520_v39  ;;  %v1104_v39 = vld [vmem:[%s19895_s1 + $0x2140] sm:$0xff] }
 0x201   :  { %10423 = vmatprep.subr.bf16.mxu1 %v13529_v42  ;;  %v1073_v42 = vld [vmem:[%s19895_s1 + $0x2048] sm:$0xff]  ;;  %v13607_v50 = vcombine.high %v1104_v39, %v1108_v40  ;;  %v13606_v55 = vcombine.low %v1104_v39, %v1108_v40 }
 0x202   :  { %9899 = vmatpush1.bf16.msra.mxu0 %v13558_v51  ;;  %v13577_v51 = vcombine.high %v1073_v42, %v1077_v44  ;;  %v13576_v57 = vcombine.low %v1073_v42, %v1077_v44  ;;  %v1117_v39 = vld [vmem:[%s19895_s1 + $0x21a8] sm:$0xff] }
 0x203   :  { %9909 = vmatprep.subr.bf16.mxu0 %v13567_v25  ;;  %v1116_v25 = vld [vmem:[%s19895_s1 + $0x21a0] sm:$0xff] }
 0x204   :  { %10424 = vmatpush1.bf16.msra.mxu1 %v13528_v4  ;;  %v1112_v4 = vld [vmem:[%s19895_s1 + $0x2180] sm:$0xff] }
 0x205   :  { %10425 = vmatprep.subr.bf16.mxu1 %v13537_v53  ;;  %9901 = vmatmul.mubr.bf16.vlgmr.msra.gmra.mrb[0].mxu0 %v16349_v56  ;;  %v1081_v53 = vld [vmem:[%s19895_s1 + $0x2088] sm:$0xff]  ;;  %v13615_v59 = vcombine.high %v1112_v4, %v1116_v25  ;;  %v13614_v6 = vcombine.low %v1112_v4, %v1116_v25 }
 0x206   :  { %9910 = vmatpush1.bf16.msra.mxu0 %v13566_v62  ;;  %9941 = vmatprep.mubr.bf16.mxu0 %v16359_v63  ;;  %v13585_v62 = vcombine.high %v1081_v53, %v1085_v54  ;;  %v13584_v9 = vcombine.low %v1081_v53, %v1085_v54  ;;  %v1125_v4 = vld [vmem:[%s19895_s1 + $0x21e8] sm:$0xff] }
 0x207   :  { %9911 = vmatprep.subr.bf16.mxu0 %v13575_v2  ;;  %v1124_v2 = vld [vmem:[%s19895_s1 + $0x21e0] sm:$0xff] }
 0x208   :  { %10426 = vmatpush1.bf16.msra.mxu1 %v13536_v0  ;;  %v1120_v0 = vld [vmem:[%s19895_s1 + $0x21c0] sm:$0xff] }
 0x209   :  { %10427 = vmatprep.subr.bf16.mxu1 %v13545_v60  ;;  %v1089_v60 = vld [vmem:[%s19895_s1 + $0x20c8] sm:$0xff]  ;;  %v13623_v11 = vcombine.high %v1120_v0, %v1124_v2  ;;  %v13622_v20 = vcombine.low %v1120_v0, %v1124_v2 }
 0x20a   :  { %9912 = vmatpush1.bf16.msra.mxu0 %v13574_v18  ;;  %v13593_v18 = vcombine.high %v1089_v60, %v1093_v5  ;;  %v13592_v23 = vcombine.low %v1089_v60, %v1093_v5  ;;  %v1133_v0 = vld [vmem:[%s19895_s1 + $0x2228] sm:$0xff] }
 0x20b   :  { %9913 = vmatprep.subr.bf16.mxu0 %v13583_v16  ;;  %v1132_v16 = vld [vmem:[%s19895_s1 + $0x2220] sm:$0xff] }
 0x20c   :  { %10428 = vmatpush1.bf16.msra.mxu1 %v13544_v12  ;;  %v1128_v12 = vld [vmem:[%s19895_s1 + $0x2200] sm:$0xff] }
 0x20d   :  { %10429 = vmatprep.subr.bf16.mxu1 %v13553_v41  ;;  %v1097_v41 = vld [vmem:[%s19895_s1 + $0x2108] sm:$0xff]  ;;  %v13631_v58 = vcombine.high %v1128_v12, %v1132_v16  ;;  %v13630_v31 = vcombine.low %v1128_v12, %v1132_v16 }
 0x20e   :  { %9914 = vmatpush1.bf16.msra.mxu0 %v13582_v24  ;;  %v13601_v24 = vcombine.high %v1097_v41, %v1101_v19  ;;  %v13600_v32 = vcombine.low %v1097_v41, %v1101_v19  ;;  %v1141_v12 = vld [vmem:[%s19895_s1 + $0x2268] sm:$0xff] }
 0x20f   :  { %9915 = vmatprep.subr.bf16.mxu0 %v13591_v28  ;;  %v1140_v28 = vld [vmem:[%s19895_s1 + $0x2260] sm:$0xff] }
 0x210   :  { %10430 = vmatpush1.bf16.msra.mxu1 %v13552_v27  ;;  %v1136_v27 = vld [vmem:[%s19895_s1 + $0x2240] sm:$0xff] }
 0x211   :  { %10431 = vmatprep.subr.bf16.mxu1 %v13561_v38  ;;  %v1105_v38 = vld [vmem:[%s19895_s1 + $0x2148] sm:$0xff]  ;;  %v13639_v34 = vcombine.high %v1136_v27, %v1140_v28  ;;  %v13638_v40 = vcombine.low %v1136_v27, %v1140_v28 }
 0x212   :  { %9916 = vmatpush1.bf16.msra.mxu0 %v13590_v35  ;;  %v13609_v35 = vcombine.high %v1105_v38, %v1109_v30  ;;  %v13608_v42 = vcombine.low %v1105_v38, %v1109_v30  ;;  %v1149_v27 = vld [vmem:[%s19895_s1 + $0x22a8] sm:$0xff] }
 0x213   :  { %9917 = vmatprep.subr.bf16.mxu0 %v13599_v36  ;;  %v1148_v36 = vld [vmem:[%s19895_s1 + $0x22a0] sm:$0xff] }
 0x214   :  { %10432 = vmatpush1.bf16.msra.mxu1 %v13560_v13  ;;  %v1144_v13 = vld [vmem:[%s19895_s1 + $0x2280] sm:$0xff] }
 0x215   :  { %10442 = vmatprep.subr.bf16.mxu1 %v13569_v37  ;;  %v1113_v37 = vld [vmem:[%s19895_s1 + $0x2188] sm:$0xff]  ;;  %v13647_v44 = vcombine.high %v1144_v13, %v1148_v36  ;;  %v13646_v25 = vcombine.low %v1144_v13, %v1148_v36 }
 0x216   :  { %9918 = vmatpush1.bf16.msra.mxu0 %v13598_v46  ;;  %v13617_v46 = vcombine.high %v1113_v37, %v1117_v39  ;;  %v13616_v53 = vcombine.low %v1113_v37, %v1117_v39  ;;  %v1157_v13 = vld [vmem:[%s19895_s1 + $0x22e8] sm:$0xff] }
 0x217   :  { %10434 = vmatmul.mubr.bf16.vlgmr.msra.gmra.mrb[4].mxu1 %v16349_v56  ;;  %9919 = vmatprep.subr.bf16.mxu0 %v13607_v50  ;;  %v1156_v50 = vld [vmem:[%s19895_s1 + $0x22e0] sm:$0xff] }
 0x218   :  { %10443 = vmatpush1.bf16.msra.mxu1 %v13568_v47  ;;  %10474 = vmatprep.mubr.bf16.mxu1 %v16359_v63  ;;  %v1152_v47 = vld [vmem:[%s19895_s1 + $0x22c0] sm:$0xff] }
 0x219   :  { %10444 = vmatprep.subr.bf16.mxu1 %v13577_v51  ;;  %v1121_v51 = vld [vmem:[%s19895_s1 + $0x21c8] sm:$0xff]  ;;  %v13655_v54 = vcombine.high %v1152_v47, %v1156_v50  ;;  %v13654_v2 = vcombine.low %v1152_v47, %v1156_v50 }
 0x21a   :  { %9920 = vmatpush1.bf16.msra.mxu0 %v13606_v55  ;;  %v13625_v55 = vcombine.high %v1121_v51, %v1125_v4  ;;  %v13624_v60 = vcombine.low %v1121_v51, %v1125_v4  ;;  %v1165_v47 = vld [vmem:[%s19895_s1 + $0x2328] sm:$0xff] }
 0x21b   :  { %9921 = vmatprep.subr.bf16.mxu0 %v13615_v59  ;;  %v1164_v59 = vld [vmem:[%s19895_s1 + $0x2320] sm:$0xff] }
 0x21c   :  { %10445 = vmatpush1.bf16.msra.mxu1 %v13576_v57  ;;  %v1160_v57 = vld [vmem:[%s19895_s1 + $0x2300] sm:$0xff] }
 0x21d   :  { %10446 = vmatprep.subr.bf16.mxu1 %v13585_v62  ;;  %v1129_v62 = vld [vmem:[%s19895_s1 + $0x2208] sm:$0xff]  ;;  %v13663_v5 = vcombine.high %v1160_v57, %v1164_v59  ;;  %v13662_v16 = vcombine.low %v1160_v57, %v1164_v59  ;;  %v16558_v57 = vcombine.low %v16339_v52, %v16339_v52 }
 0x21e   :  { %9922 = vmatpush1.bf16.msra.mxu0 %v13614_v6  ;;  %v13633_v6 = vcombine.high %v1129_v62, %v1133_v0  ;;  %v13632_v41 = vcombine.low %v1129_v62, %v1133_v0  ;;  %v1169_v59 = vld [vmem:[%s19895_s1 + $0x2348] sm:$0xff] }
 0x21f   :  { %9923 = vmatprep.subr.bf16.mxu0 %v13623_v11  ;;  %v1172_v11 = vld [vmem:[%s19895_s1 + $0x2360] sm:$0xff]  ;;  %v1173_v62 = vld [vmem:[%s19895_s1 + $0x2368] sm:$0xff] }
 0x220   :  { %10447 = vmatpush1.bf16.msra.mxu1 %v13584_v9  ;;  %v1168_v9 = vld [vmem:[%s19895_s1 + $0x2340] sm:$0xff]  ;;  %v13673_v52 = vcombine.high %v1169_v59, %v1173_v62 }
 0x221   :  { %10448 = vmatprep.subr.bf16.mxu1 %v13593_v18  ;;  %v1137_v18 = vld [vmem:[%s19895_s1 + $0x2248] sm:$0xff]  ;;  %v13671_v19 = vcombine.high %v1168_v9, %v1172_v11  ;;  %v13670_v28 = vcombine.low %v1168_v9, %v1172_v11  ;;  %v1212_v9 = vld [vmem:[%s19895_s1 + $0x24a0] sm:$0xff] }
 0x222   :  { %9924 = vmatpush1.bf16.msra.mxu0 %v13622_v20  ;;  %v13641_v20 = vcombine.high %v1137_v18, %v1141_v12  ;;  %v13640_v38 = vcombine.low %v1137_v18, %v1141_v12  ;;  %v1177_v11 = vld [vmem:[%s19895_s1 + $0x2388] sm:$0xff] }
 0x223   :  { %9925 = vmatprep.subr.bf16.mxu0 %v13631_v58  ;;  %v1180_v58 = vld [vmem:[%s19895_s1 + $0x23a0] sm:$0xff]  ;;  %v1181_v18 = vld [vmem:[%s19895_s1 + $0x23a8] sm:$0xff] }
 0x224   :  { %10449 = vmatpush1.bf16.msra.mxu1 %v13592_v23  ;;  %v1176_v23 = vld [vmem:[%s19895_s1 + $0x2380] sm:$0xff] }
 0x225   :  { %10450 = vmatprep.subr.bf16.mxu1 %v13601_v24  ;;  %v1145_v24 = vld [vmem:[%s19895_s1 + $0x2288] sm:$0xff]  ;;  %v13679_v30 = vcombine.high %v1176_v23, %v1180_v58  ;;  %v13678_v36 = vcombine.low %v1176_v23, %v1180_v58  ;;  %v1220_v23 = vld [vmem:[%s19895_s1 + $0x24e0] sm:$0xff] }
 0x226   :  { %9926 = vmatpush1.bf16.msra.mxu0 %v13630_v31  ;;  %v13649_v31 = vcombine.high %v1145_v24, %v1149_v27  ;;  %v13648_v37 = vcombine.low %v1145_v24, %v1149_v27  ;;  %v1185_v58 = vld [vmem:[%s19895_s1 + $0x23c8] sm:$0xff] }
 0x227   :  { %9927 = vmatprep.subr.bf16.mxu0 %v13639_v34  ;;  %v1188_v34 = vld [vmem:[%s19895_s1 + $0x23e0] sm:$0xff]  ;;  %v1189_v24 = vld [vmem:[%s19895_s1 + $0x23e8] sm:$0xff] }
 0x228   :  { %10451 = vmatpush1.bf16.msra.mxu1 %v13600_v32  ;;  %v1184_v32 = vld [vmem:[%s19895_s1 + $0x23c0] sm:$0xff] }
 0x229   :  { %10452 = vmatprep.subr.bf16.mxu1 %v13609_v35  ;;  %v1153_v35 = vld [vmem:[%s19895_s1 + $0x22c8] sm:$0xff]  ;;  %v13687_v39 = vcombine.high %v1184_v32, %v1188_v34  ;;  %v13686_v50 = vcombine.low %v1184_v32, %v1188_v34  ;;  %v1228_v32 = vld [vmem:[%s19895_s1 + $0x2520] sm:$0xff] }
 0x22a   :  { %9928 = vmatpush1.bf16.msra.mxu0 %v13638_v40  ;;  %v13657_v40 = vcombine.high %v1153_v35, %v1157_v13  ;;  %v13656_v51 = vcombine.low %v1153_v35, %v1157_v13  ;;  %v1193_v34 = vld [vmem:[%s19895_s1 + $0x2408] sm:$0xff] }
 0x22b   :  { %9929 = vmatprep.subr.bf16.mxu0 %v13647_v44  ;;  %v1196_v44 = vld [vmem:[%s19895_s1 + $0x2420] sm:$0xff]  ;;  %v1197_v35 = vld [vmem:[%s19895_s1 + $0x2428] sm:$0xff] }
 0x22c   :  { %10453 = vmatpush1.bf16.msra.mxu1 %v13608_v42  ;;  %v1192_v42 = vld [vmem:[%s19895_s1 + $0x2400] sm:$0xff] }
 0x22d   :  { %10454 = vmatprep.subr.bf16.mxu1 %v13617_v46  ;;  %v1161_v46 = vld [vmem:[%s19895_s1 + $0x2308] sm:$0xff]  ;;  %v13695_v4 = vcombine.high %v1192_v42, %v1196_v44  ;;  %v13694_v0 = vcombine.low %v1192_v42, %v1196_v44  ;;  %v1236_v42 = vld [vmem:[%s19895_s1 + $0x2560] sm:$0xff] }
 0x22e   :  { %9930 = vmatpush1.bf16.msra.mxu0 %v13646_v25  ;;  %v16548_v25 = vld [vmem:[%s19896_s0 + $0x48] sm:$0xff] }
 0x22f   :  { %9931 = vmatprep.subr.bf16.mxu0 %v13655_v54  ;;  %v1200_v54 = vld [vmem:[%s19895_s1 + $0x2440] sm:$0xff]  ;;  %v1201_v44 = vld [vmem:[%s19895_s1 + $0x2448] sm:$0xff] }
 0x230   :  { %10455 = vmatpush1.bf16.msra.mxu1 %v13616_v53  ;;  %v13665_v53 = vcombine.high %v1161_v46, %v1165_v47 }
 0x231   :  { %10456 = vmatprep.subr.bf16.mxu1 %v13625_v55  ;;  %v1204_v55 = vld [vmem:[%s19895_s1 + $0x2460] sm:$0xff] }
 0x232   :  { %9932 = vmatpush1.bf16.msra.mxu0 %v13654_v2  ;;  %v16568_v2 = vcombine.high %v16548_v25, %v16548_v25  ;;  %v13702_v12 = vcombine.low %v1200_v54, %v1204_v55 }
 0x233   :  { %9933 = vmatprep.subr.bf16.mxu0 %v13663_v5  ;;  %v13703_v5 = vcombine.high %v1200_v54, %v1204_v55  ;;  %v1244_v54 = vld [vmem:[%s19895_s1 + $0x25a0] sm:$0xff]  ;;  %v1209_v55 = vld [vmem:[%s19895_s1 + $0x2488] sm:$0xff] }
 0x234   :  { %10457 = vmatpush1.bf16.msra.mxu1 %v13624_v60  ;;  %v13664_v60 = vcombine.low %v1161_v46, %v1165_v47  ;;  %v1205_v46 = vld [vmem:[%s19895_s1 + $0x2468] sm:$0xff] }
 0x235   :  { %10458 = vmatprep.subr.bf16.mxu1 %v13633_v6  ;;  %v1208_v6 = vld [vmem:[%s19895_s1 + $0x2480] sm:$0xff] }
 0x236   :  { %9934 = vmatpush1.bf16.msra.mxu0 %v13662_v16  ;;  %v13672_v16 = vcombine.low %v1169_v59, %v1173_v62  ;;  %v13710_v27 = vcombine.low %v1208_v6, %v1212_v9  ;;  %v1213_v59 = vld [vmem:[%s19895_s1 + $0x24a8] sm:$0xff] }
 0x237   :  { %9935 = vmatprep.subr.bf16.mxu0 %v13671_v19  ;;  %v13681_v19 = vcombine.high %v1177_v11, %v1181_v18 }
 0x238   :  { %10459 = vmatpush1.bf16.msra.mxu1 %v13632_v41  ;;  %v13711_v41 = vcombine.high %v1208_v6, %v1212_v9  ;;  %v1252_v6 = vld [vmem:[%s19895_s1 + $0x25e0] sm:$0xff]  ;;  %v1217_v9 = vld [vmem:[%s19895_s1 + $0x24c8] sm:$0xff] }
 0x239   :  { %10460 = vmatprep.subr.bf16.mxu1 %v13641_v20  ;;  %v1216_v20 = vld [vmem:[%s19895_s1 + $0x24c0] sm:$0xff] }
 0x23a   :  { %9936 = vmatpush1.bf16.msra.mxu0 %v13670_v28  ;;  %v13680_v28 = vcombine.low %v1177_v11, %v1181_v18  ;;  %v13718_v13 = vcombine.low %v1216_v20, %v1220_v23  ;;  %v1221_v11 = vld [vmem:[%s19895_s1 + $0x24e8] sm:$0xff] }
 0x23b   :  { %9937 = vmatprep.subr.bf16.mxu0 %v13679_v30  ;;  %v13689_v30 = vcombine.high %v1185_v58, %v1189_v24 }
 0x23c   :  { %10461 = vmatpush1.bf16.msra.mxu1 %v13640_v38  ;;  %v13719_v38 = vcombine.high %v1216_v20, %v1220_v23  ;;  %v1260_v20 = vld [vmem:[%s19895_s1 + $0x2620] sm:$0xff]  ;;  %v1225_v23 = vld [vmem:[%s19895_s1 + $0x2508] sm:$0xff] }
 0x23d   :  { %10462 = vmatprep.subr.bf16.mxu1 %v13649_v31  ;;  %v1224_v31 = vld [vmem:[%s19895_s1 + $0x2500] sm:$0xff] }
 0x23e   :  { %9938 = vmatpush1.bf16.msra.mxu0 %v13678_v36  ;;  %v13688_v36 = vcombine.low %v1185_v58, %v1189_v24  ;;  %v13726_v47 = vcombine.low %v1224_v31, %v1228_v32  ;;  %v1229_v58 = vld [vmem:[%s19895_s1 + $0x2528] sm:$0xff] }
 0x23f   :  { %9939 = vmatprep.subr.bf16.mxu0 %v13687_v39  ;;  %v13697_v39 = vcombine.high %v1193_v34, %v1197_v35 }
 0x240   :  { %10463 = vmatpush1.bf16.msra.mxu1 %v13648_v37  ;;  %v13727_v37 = vcombine.high %v1224_v31, %v1228_v32  ;;  %v1268_v31 = vld [vmem:[%s19895_s1 + $0x2660] sm:$0xff]  ;;  %v1233_v32 = vld [vmem:[%s19895_s1 + $0x2548] sm:$0xff] }
 0x241   :  { %10464 = vmatprep.subr.bf16.mxu1 %v13657_v40  ;;  %v1232_v40 = vld [vmem:[%s19895_s1 + $0x2540] sm:$0xff] }
 0x242   :  { %9940 = vmatpush1.bf16.msra.mxu0 %v13686_v50  ;;  %v13696_v50 = vcombine.low %v1193_v34, %v1197_v35  ;;  %v13734_v62 = vcombine.low %v1232_v40, %v1236_v42  ;;  %v1237_v34 = vld [vmem:[%s19895_s1 + $0x2568] sm:$0xff] }
 0x243   :  { %9950 = vmatprep.subr.bf16.mxu0 %v13695_v4  ;;  %v13705_v4 = vcombine.high %v1201_v44, %v1205_v46 }
 0x244   :  { %10465 = vmatpush1.bf16.msra.mxu1 %v13656_v51  ;;  %v13735_v51 = vcombine.high %v1232_v40, %v1236_v42  ;;  %v1276_v40 = vld [vmem:[%s19895_s1 + $0x26a0] sm:$0xff]  ;;  %v1241_v42 = vld [vmem:[%s19895_s1 + $0x2588] sm:$0xff] }
 0x245   :  { %10466 = vmatprep.subr.bf16.mxu1 %v13665_v53  ;;  %9942 = vmatmul.mubr.bf16.vlgmr.msra.gmra.mrb[0].mxu0 %v16558_v57  ;;  %v1240_v53 = vld [vmem:[%s19895_s1 + $0x2580] sm:$0xff] }
 0x246   :  { %9951 = vmatpush1.bf16.msra.mxu0 %v13694_v0  ;;  %9982 = vmatprep.mubr.bf16.mxu0 %v16568_v2  ;;  %v13704_v0 = vcombine.low %v1201_v44, %v1205_v46  ;;  %v13742_v18 = vcombine.low %v1240_v53, %v1244_v54  ;;  %v1245_v44 = vld [vmem:[%s19895_s1 + $0x25a8] sm:$0xff] }
 0x247   :  { %9952 = vmatprep.subr.bf16.mxu0 %v13703_v5  ;;  %v13713_v5 = vcombine.high %v1209_v55, %v1213_v59 }
 0x248   :  { %10467 = vmatpush1.bf16.msra.mxu1 %v13664_v60  ;;  %v13743_v60 = vcombine.high %v1240_v53, %v1244_v54  ;;  %v1284_v53 = vld [vmem:[%s19895_s1 + $0x26e0] sm:$0xff]  ;;  %v1249_v54 = vld [vmem:[%s19895_s1 + $0x25c8] sm:$0xff] }
 0x249   :  { %10468 = vmatprep.subr.bf16.mxu1 %v13673_v52  ;;  %v1248_v52 = vld [vmem:[%s19895_s1 + $0x25c0] sm:$0xff] }
 0x24a   :  { %9953 = vmatpush1.bf16.msra.mxu0 %v13702_v12  ;;  %v13712_v12 = vcombine.low %v1209_v55, %v1213_v59  ;;  %v13750_v24 = vcombine.low %v1248_v52, %v1252_v6  ;;  %v1253_v55 = vld [vmem:[%s19895_s1 + $0x25e8] sm:$0xff] }
 0x24b   :  { %9954 = vmatprep.subr.bf16.mxu0 %v13711_v41  ;;  %v13721_v41 = vcombine.high %v1217_v9, %v1221_v11 }
 0x24c   :  { %10469 = vmatpush1.bf16.msra.mxu1 %v13672_v16  ;;  %v13751_v16 = vcombine.high %v1248_v52, %v1252_v6  ;;  %v1292_v52 = vld [vmem:[%s19895_s1 + $0x2720] sm:$0xff]  ;;  %v1257_v6 = vld [vmem:[%s19895_s1 + $0x2608] sm:$0xff] }
 0x24d   :  { %10470 = vmatprep.subr.bf16.mxu1 %v13681_v19  ;;  %v1256_v19 = vld [vmem:[%s19895_s1 + $0x2600] sm:$0xff] }
 0x24e   :  { %9955 = vmatpush1.bf16.msra.mxu0 %v13710_v27  ;;  %v13720_v27 = vcombine.low %v1217_v9, %v1221_v11  ;;  %v13758_v35 = vcombine.low %v1256_v19, %v1260_v20  ;;  %v1261_v9 = vld [vmem:[%s19895_s1 + $0x2628] sm:$0xff] }
 0x24f   :  { %9956 = vmatprep.subr.bf16.mxu0 %v13719_v38  ;;  %v13729_v38 = vcombine.high %v1225_v23, %v1229_v58 }
 0x250   :  { %10471 = vmatpush1.bf16.msra.mxu1 %v13680_v28  ;;  %v13759_v28 = vcombine.high %v1256_v19, %v1260_v20  ;;  %v1300_v19 = vld [vmem:[%s19895_s1 + $0x2760] sm:$0xff]  ;;  %v1265_v20 = vld [vmem:[%s19895_s1 + $0x2648] sm:$0xff] }
 0x251   :  { %10472 = vmatprep.subr.bf16.mxu1 %v13689_v30  ;;  %v1264_v30 = vld [vmem:[%s19895_s1 + $0x2640] sm:$0xff] }
 0x252   :  { %9957 = vmatpush1.bf16.msra.mxu0 %v13718_v13  ;;  %v13728_v13 = vcombine.low %v1225_v23, %v1229_v58  ;;  %v13766_v46 = vcombine.low %v1264_v30, %v1268_v31  ;;  %v1269_v23 = vld [vmem:[%s19895_s1 + $0x2668] sm:$0xff] }
 0x253   :  { %9958 = vmatprep.subr.bf16.mxu0 %v13727_v37  ;;  %v13737_v37 = vcombine.high %v1233_v32, %v1237_v34 }
 0x254   :  { %10473 = vmatpush1.bf16.msra.mxu1 %v13688_v36  ;;  %v13767_v36 = vcombine.high %v1264_v30, %v1268_v31  ;;  %v1308_v30 = vld [vmem:[%s19895_s1 + $0x27a0] sm:$0xff]  ;;  %v1273_v31 = vld [vmem:[%s19895_s1 + $0x2688] sm:$0xff] }
 0x255   :  { %10483 = vmatprep.subr.bf16.mxu1 %v13697_v39  ;;  %v1272_v39 = vld [vmem:[%s19895_s1 + $0x2680] sm:$0xff] }
 0x256   :  { %9959 = vmatpush1.bf16.msra.mxu0 %v13726_v47  ;;  %v13736_v47 = vcombine.low %v1233_v32, %v1237_v34  ;;  %v13774_v59 = vcombine.low %v1272_v39, %v1276_v40  ;;  %v1277_v32 = vld [vmem:[%s19895_s1 + $0x26a8] sm:$0xff] }
 0x257   :  { %10475 = vmatmul.mubr.bf16.vlgmr.msra.gmra.mrb[4].mxu1 %v16558_v57  ;;  %9960 = vmatprep.subr.bf16.mxu0 %v13735_v51  ;;  %v13745_v51 = vcombine.high %v1241_v42, %v1245_v44 }
 0x258   :  { %10484 = vmatpush1.bf16.msra.mxu1 %v13696_v50  ;;  %10515 = vmatprep.mubr.bf16.mxu1 %v16568_v2  ;;  %v13775_v50 = vcombine.high %v1272_v39, %v1276_v40  ;;  %v1316_v39 = vld [vmem:[%s19895_s1 + $0x27e0] sm:$0xff]  ;;  %v1281_v40 = vld [vmem:[%s19895_s1 + $0x26c8] sm:$0xff] }
 0x259   :  { %10485 = vmatprep.subr.bf16.mxu1 %v13705_v4  ;;  %v1280_v4 = vld [vmem:[%s19895_s1 + $0x26c0] sm:$0xff] }
 0x25a   :  { %9961 = vmatpush1.bf16.msra.mxu0 %v13734_v62  ;;  %v13744_v62 = vcombine.low %v1241_v42, %v1245_v44  ;;  %v13782_v11 = vcombine.low %v1280_v4, %v1284_v53  ;;  %v1285_v42 = vld [vmem:[%s19895_s1 + $0x26e8] sm:$0xff] }
 0x25b   :  { %9962 = vmatprep.subr.bf16.mxu0 %v13743_v60  ;;  %v13753_v60 = vcombine.high %v1249_v54, %v1253_v55 }
 0x25c   :  { %10486 = vmatpush1.bf16.msra.mxu1 %v13704_v0  ;;  %v13783_v0 = vcombine.high %v1280_v4, %v1284_v53  ;;  %v1324_v4 = vld [vmem:[%s19895_s1 + $0x2820] sm:$0xff]  ;;  %v1289_v53 = vld [vmem:[%s19895_s1 + $0x2708] sm:$0xff] }
 0x25d   :  { %10487 = vmatprep.subr.bf16.mxu1 %v13713_v5  ;;  %v1288_v5 = vld [vmem:[%s19895_s1 + $0x2700] sm:$0xff] }
 0x25e   :  { %9963 = vmatpush1.bf16.msra.mxu0 %v13742_v18  ;;  %v13752_v18 = vcombine.low %v1249_v54, %v1253_v55  ;;  %v13790_v58 = vcombine.low %v1288_v5, %v1292_v52  ;;  %v1293_v54 = vld [vmem:[%s19895_s1 + $0x2728] sm:$0xff] }
 0x25f   :  { %9964 = vmatprep.subr.bf16.mxu0 %v13751_v16  ;;  %v13761_v16 = vcombine.high %v1257_v6, %v1261_v9 }
 0x260   :  { %10488 = vmatpush1.bf16.msra.mxu1 %v13712_v12  ;;  %v13791_v12 = vcombine.high %v1288_v5, %v1292_v52  ;;  %v1328_v5 = vld [vmem:[%s19895_s1 + $0x2840] sm:$0xff] }
 0x261   :  { %10489 = vmatprep.subr.bf16.mxu1 %v13721_v41  ;;  %v1296_v41 = vld [vmem:[%s19895_s1 + $0x2740] sm:$0xff] }
 0x262   :  { %9965 = vmatpush1.bf16.msra.mxu0 %v13750_v24  ;;  %v13760_v24 = vcombine.low %v1257_v6, %v1261_v9  ;;  %v13798_v34 = vcombine.low %v1296_v41, %v1300_v19  ;;  %v1332_v52 = vld [vmem:[%s19895_s1 + $0x2860] sm:$0xff]  ;;  %v16767_v6 = vcombine.low %v16548_v25, %v16548_v25  ;;  %v1297_v9 = vld [vmem:[%s19895_s1 + $0x2748] sm:$0xff] }
 0x263   :  { %9966 = vmatprep.subr.bf16.mxu0 %v13759_v28  ;;  %v13769_v28 = vcombine.high %v1265_v20, %v1269_v23 }
 0x264   :  { %10490 = vmatpush1.bf16.msra.mxu1 %v13720_v27  ;;  %v13799_v27 = vcombine.high %v1296_v41, %v1300_v19  ;;  %v13831_v41 = vcombine.high %v1328_v5, %v1332_v52  ;;  %v1336_v19 = vld [vmem:[%s19895_s1 + $0x2880] sm:$0xff] }
 0x265   :  { %10491 = vmatprep.subr.bf16.mxu1 %v13729_v38  ;;  %v1304_v38 = vld [vmem:[%s19895_s1 + $0x2780] sm:$0xff] }
 0x266   :  { %9967 = vmatpush1.bf16.msra.mxu0 %v13758_v35  ;;  %v13768_v35 = vcombine.low %v1265_v20, %v1269_v23  ;;  %v13806_v44 = vcombine.low %v1304_v38, %v1308_v30  ;;  %v1340_v20 = vld [vmem:[%s19895_s1 + $0x28a0] sm:$0xff]  ;;  %v1305_v23 = vld [vmem:[%s19895_s1 + $0x2788] sm:$0xff] }
 0x267   :  { %9968 = vmatprep.subr.bf16.mxu0 %v13767_v36  ;;  %v13777_v36 = vcombine.high %v1273_v31, %v1277_v32 }
 0x268   :  { %10492 = vmatpush1.bf16.msra.mxu1 %v13728_v13  ;;  %v13807_v13 = vcombine.high %v1304_v38, %v1308_v30  ;;  %v1344_v30 = vld [vmem:[%s19895_s1 + $0x28c0] sm:$0xff] }
 0x269   :  { %10493 = vmatprep.subr.bf16.mxu1 %v13737_v37  ;;  %v1312_v37 = vld [vmem:[%s19895_s1 + $0x27c0] sm:$0xff] }
 0x26a   :  { %9969 = vmatpush1.bf16.msra.mxu0 %v13766_v46  ;;  %v13776_v46 = vcombine.low %v1273_v31, %v1277_v32  ;;  %v13814_v55 = vcombine.low %v1312_v37, %v1316_v39  ;;  %v1348_v31 = vld [vmem:[%s19895_s1 + $0x28e0] sm:$0xff]  ;;  %v1313_v32 = vld [vmem:[%s19895_s1 + $0x27c8] sm:$0xff] }
 0x26b   :  { %9970 = vmatprep.subr.bf16.mxu0 %v13775_v50  ;;  %v13785_v50 = vcombine.high %v1281_v40, %v1285_v42 }
 0x26c   :  { %10494 = vmatpush1.bf16.msra.mxu1 %v13736_v47  ;;  %v13815_v47 = vcombine.high %v1312_v37, %v1316_v39  ;;  %v1352_v39 = vld [vmem:[%s19895_s1 + $0x2900] sm:$0xff] }
 0x26d   :  { %10495 = vmatprep.subr.bf16.mxu1 %v13745_v51  ;;  %v1320_v51 = vld [vmem:[%s19895_s1 + $0x2800] sm:$0xff] }
 0x26e   :  { %9971 = vmatpush1.bf16.msra.mxu0 %v13774_v59  ;;  %v13784_v59 = vcombine.low %v1281_v40, %v1285_v42  ;;  %v1356_v40 = vld [vmem:[%s19895_s1 + $0x2920] sm:$0xff]  ;;  %v1321_v42 = vld [vmem:[%s19895_s1 + $0x2808] sm:$0xff] }
 0x26f   :  { %9972 = vmatprep.subr.bf16.mxu0 %v13783_v0  ;;  %v16757_v0 = vld [vmem:[%s19896_s0 + $0x50] sm:$0xff] }
 0x270   :  { %10496 = vmatpush1.bf16.msra.mxu1 %v13744_v62  ;;  %v13823_v62 = vcombine.high %v1320_v51, %v1324_v4 }
 0x271   :  { %10497 = vmatprep.subr.bf16.mxu1 %v13753_v60  ;;  %v13793_v60 = vcombine.high %v1289_v53, %v1293_v54 }
 0x272   :  { %9973 = vmatpush1.bf16.msra.mxu0 %v13782_v11  ;;  %v1301_v11 = vld [vmem:[%s19895_s1 + $0x2768] sm:$0xff] }
 0x273   :  { %9974 = vmatprep.subr.bf16.mxu0 %v13791_v12  ;;  %v16777_v12 = vcombine.high %v16757_v0, %v16757_v0  ;;  %v13801_v25 = vcombine.high %v1297_v9, %v1301_v11 }
 0x274   :  { %10498 = vmatpush1.bf16.msra.mxu1 %v13752_v18  ;;  %v13822_v18 = vcombine.low %v1320_v51, %v1324_v4  ;;  %v1360_v4 = vld [vmem:[%s19895_s1 + $0x2940] sm:$0xff] }
 0x275   :  { %10499 = vmatprep.subr.bf16.mxu1 %v13761_v16  ;;  %v13792_v16 = vcombine.low %v1289_v53, %v1293_v54  ;;  %v1364_v53 = vld [vmem:[%s19895_s1 + $0x2960] sm:$0xff]  ;;  %v1329_v54 = vld [vmem:[%s19895_s1 + $0x2848] sm:$0xff] }
 0x276   :  { %9975 = vmatpush1.bf16.msra.mxu0 %v13790_v58  ;;  %v1309_v58 = vld [vmem:[%s19895_s1 + $0x27a8] sm:$0xff] }
 0x277   :  { %9976 = vmatprep.subr.bf16.mxu0 %v13799_v27  ;;  %v13800_v27 = vcombine.low %v1297_v9, %v1301_v11  ;;  %v13809_v38 = vcombine.high %v1305_v23, %v1309_v58  ;;  %v1372_v9 = vld [vmem:[%s19895_s1 + $0x29a0] sm:$0xff]  ;;  %v1337_v11 = vld [vmem:[%s19895_s1 + $0x2888] sm:$0xff] }
 0x278   :  { %10500 = vmatpush1.bf16.msra.mxu1 %v13760_v24  ;;  %v13830_v24 = vcombine.low %v1328_v5, %v1332_v52  ;;  %v1368_v52 = vld [vmem:[%s19895_s1 + $0x2980] sm:$0xff] }
 0x279   :  { %10501 = vmatprep.subr.bf16.mxu1 %v13769_v28  ;;  %v13839_v28 = vcombine.high %v1336_v19, %v1340_v20 }
 0x27a   :  { %9977 = vmatpush1.bf16.msra.mxu0 %v13798_v34  ;;  %v1317_v34 = vld [vmem:[%s19895_s1 + $0x27e8] sm:$0xff] }
 0x27b   :  { %9978 = vmatprep.subr.bf16.mxu0 %v13807_v13  ;;  %v13808_v13 = vcombine.low %v1305_v23, %v1309_v58  ;;  %v13817_v37 = vcombine.high %v1313_v32, %v1317_v34  ;;  %v1380_v23 = vld [vmem:[%s19895_s1 + $0x29e0] sm:$0xff]  ;;  %v1345_v58 = vld [vmem:[%s19895_s1 + $0x28c8] sm:$0xff] }
 0x27c   :  { %10502 = vmatpush1.bf16.msra.mxu1 %v13768_v35  ;;  %v13838_v35 = vcombine.low %v1336_v19, %v1340_v20  ;;  %v1376_v20 = vld [vmem:[%s19895_s1 + $0x29c0] sm:$0xff] }
 0x27d   :  { %10503 = vmatprep.subr.bf16.mxu1 %v13777_v36  ;;  %v13847_v36 = vcombine.high %v1344_v30, %v1348_v31 }
 0x27e   :  { %9979 = vmatpush1.bf16.msra.mxu0 %v13806_v44  ;;  %v1325_v44 = vld [vmem:[%s19895_s1 + $0x2828] sm:$0xff] }
 0x27f   :  { %9980 = vmatprep.subr.bf16.mxu0 %v13815_v47  ;;  %v13816_v47 = vcombine.low %v1313_v32, %v1317_v34  ;;  %v13825_v51 = vcombine.high %v1321_v42, %v1325_v44  ;;  %v1388_v32 = vld [vmem:[%s19895_s1 + $0x2a20] sm:$0xff]  ;;  %v1353_v34 = vld [vmem:[%s19895_s1 + $0x2908] sm:$0xff] }
 0x280   :  { %10504 = vmatpush1.bf16.msra.mxu1 %v13776_v46  ;;  %v13846_v46 = vcombine.low %v1344_v30, %v1348_v31  ;;  %v1384_v31 = vld [vmem:[%s19895_s1 + $0x2a00] sm:$0xff] }
 0x281   :  { %10505 = vmatprep.subr.bf16.mxu1 %v13785_v50  ;;  %v13855_v50 = vcombine.high %v1352_v39, %v1356_v40 }
 0x282   :  { %9981 = vmatpush1.bf16.msra.mxu0 %v13814_v55  ;;  %v1333_v55 = vld [vmem:[%s19895_s1 + $0x2868] sm:$0xff] }
 0x283   :  { %9991 = vmatprep.subr.bf16.mxu0 %v13823_v62  ;;  %v13824_v62 = vcombine.low %v1321_v42, %v1325_v44  ;;  %v13833_v5 = vcombine.high %v1329_v54, %v1333_v55  ;;  %v1396_v42 = vld [vmem:[%s19895_s1 + $0x2a60] sm:$0xff]  ;;  %v1361_v44 = vld [vmem:[%s19895_s1 + $0x2948] sm:$0xff] }
 0x284   :  { %10506 = vmatpush1.bf16.msra.mxu1 %v13784_v59  ;;  %v13854_v59 = vcombine.low %v1352_v39, %v1356_v40  ;;  %v1392_v40 = vld [vmem:[%s19895_s1 + $0x2a40] sm:$0xff] }
 0x285   :  { %10507 = vmatprep.subr.bf16.mxu1 %v13793_v60  ;;  %9983 = vmatmul.mubr.bf16.vlgmr.msra.gmra.mrb[0].mxu0 %v16767_v6  ;;  %v13863_v60 = vcombine.high %v1360_v4, %v1364_v53 }
 0x286   :  { %9992 = vmatpush1.bf16.msra.mxu0 %v13822_v18  ;;  %10023 = vmatprep.mubr.bf16.mxu0 %v16777_v12  ;;  %v1341_v18 = vld [vmem:[%s19895_s1 + $0x28a8] sm:$0xff] }
 0x287   :  { %9993 = vmatprep.subr.bf16.mxu0 %v13831_v41  ;;  %v13832_v41 = vcombine.low %v1329_v54, %v1333_v55  ;;  %v13841_v19 = vcombine.high %v1337_v11, %v1341_v18  ;;  %v1404_v54 = vld [vmem:[%s19895_s1 + $0x2aa0] sm:$0xff]  ;;  %v1369_v55 = vld [vmem:[%s19895_s1 + $0x2988] sm:$0xff] }
 0x288   :  { %10508 = vmatpush1.bf16.msra.mxu1 %v13792_v16  ;;  %v13862_v16 = vcombine.low %v1360_v4, %v1364_v53  ;;  %v1400_v53 = vld [vmem:[%s19895_s1 + $0x2a80] sm:$0xff] }
 0x289   :  { %10509 = vmatprep.subr.bf16.mxu1 %v13801_v25  ;;  %v13871_v25 = vcombine.high %v1368_v52, %v1372_v9 }
 0x28a   :  { %9994 = vmatpush1.bf16.msra.mxu0 %v13830_v24  ;;  %v1349_v24 = vld [vmem:[%s19895_s1 + $0x28e8] sm:$0xff] }
 0x28b   :  { %9995 = vmatprep.subr.bf16.mxu0 %v13839_v28  ;;  %v13840_v28 = vcombine.low %v1337_v11, %v1341_v18  ;;  %v13849_v30 = vcombine.high %v1345_v58, %v1349_v24  ;;  %v1412_v11 = vld [vmem:[%s19895_s1 + $0x2ae0] sm:$0xff]  ;;  %v1377_v18 = vld [vmem:[%s19895_s1 + $0x29c8] sm:$0xff] }
 0x28c   :  { %10510 = vmatpush1.bf16.msra.mxu1 %v13800_v27  ;;  %v13870_v27 = vcombine.low %v1368_v52, %v1372_v9  ;;  %v1408_v9 = vld [vmem:[%s19895_s1 + $0x2ac0] sm:$0xff] }
 0x28d   :  { %10511 = vmatprep.subr.bf16.mxu1 %v13809_v38  ;;  %v13879_v38 = vcombine.high %v1376_v20, %v1380_v23 }
 0x28e   :  { %9996 = vmatpush1.bf16.msra.mxu0 %v13838_v35  ;;  %v1357_v35 = vld [vmem:[%s19895_s1 + $0x2928] sm:$0xff] }
 0x28f   :  { %9997 = vmatprep.subr.bf16.mxu0 %v13847_v36  ;;  %v13848_v36 = vcombine.low %v1345_v58, %v1349_v24  ;;  %v13857_v39 = vcombine.high %v1353_v34, %v1357_v35  ;;  %v1420_v58 = vld [vmem:[%s19895_s1 + $0x2b20] sm:$0xff]  ;;  %v1385_v24 = vld [vmem:[%s19895_s1 + $0x2a08] sm:$0xff] }
 0x290   :  { %10512 = vmatpush1.bf16.msra.mxu1 %v13808_v13  ;;  %v13878_v13 = vcombine.low %v1376_v20, %v1380_v23  ;;  %v1416_v23 = vld [vmem:[%s19895_s1 + $0x2b00] sm:$0xff] }
 0x291   :  { %10513 = vmatprep.subr.bf16.mxu1 %v13817_v37  ;;  %v13887_v37 = vcombine.high %v1384_v31, %v1388_v32 }
 0x292   :  { %9998 = vmatpush1.bf16.msra.mxu0 %v13846_v46  ;;  %v1365_v46 = vld [vmem:[%s19895_s1 + $0x2968] sm:$0xff] }
 0x293   :  { %9999 = vmatprep.subr.bf16.mxu0 %v13855_v50  ;;  %v13856_v50 = vcombine.low %v1353_v34, %v1357_v35  ;;  %v13865_v4 = vcombine.high %v1361_v44, %v1365_v46  ;;  %v1428_v34 = vld [vmem:[%s19895_s1 + $0x2b60] sm:$0xff]  ;;  %v1393_v35 = vld [vmem:[%s19895_s1 + $0x2a48] sm:$0xff] }
 0x294   :  { %10514 = vmatpush1.bf16.msra.mxu1 %v13816_v47  ;;  %v13886_v47 = vcombine.low %v1384_v31, %v1388_v32  ;;  %v1424_v32 = vld [vmem:[%s19895_s1 + $0x2b40] sm:$0xff] }
 0x295   :  { %10524 = vmatprep.subr.bf16.mxu1 %v13825_v51  ;;  %v13895_v51 = vcombine.high %v1392_v40, %v1396_v42 }
 0x296   :  { %10000 = vmatpush1.bf16.msra.mxu0 %v13854_v59  ;;  %v1373_v59 = vld [vmem:[%s19895_s1 + $0x29a8] sm:$0xff] }
 0x297   :  { %10516 = vmatmul.mubr.bf16.vlgmr.msra.gmra.mrb[4].mxu1 %v16767_v6  ;;  %10001 = vmatprep.subr.bf16.mxu0 %v13863_v60  ;;  %v13864_v60 = vcombine.low %v1361_v44, %v1365_v46  ;;  %v13873_v52 = vcombine.high %v1369_v55, %v1373_v59  ;;  %v1436_v44 = vld [vmem:[%s19895_s1 + $0x2ba0] sm:$0xff]  ;;  %v1401_v46 = vld [vmem:[%s19895_s1 + $0x2a88] sm:$0xff] }
 0x298   :  { %10525 = vmatpush1.bf16.msra.mxu1 %v13824_v62  ;;  %10556 = vmatprep.mubr.bf16.mxu1 %v16777_v12  ;;  %v13894_v62 = vcombine.low %v1392_v40, %v1396_v42  ;;  %v1432_v42 = vld [vmem:[%s19895_s1 + $0x2b80] sm:$0xff] }
 0x299   :  { %10526 = vmatprep.subr.bf16.mxu1 %v13833_v5  ;;  %v13903_v5 = vcombine.high %v1400_v53, %v1404_v54 }
 0x29a   :  { %10002 = vmatpush1.bf16.msra.mxu0 %v13862_v16  ;;  %v1381_v16 = vld [vmem:[%s19895_s1 + $0x29e8] sm:$0xff] }
 0x29b   :  { %10003 = vmatprep.subr.bf16.mxu0 %v13871_v25  ;;  %v13872_v25 = vcombine.low %v1369_v55, %v1373_v59  ;;  %v13881_v20 = vcombine.high %v1377_v18, %v1381_v16  ;;  %v1444_v55 = vld [vmem:[%s19895_s1 + $0x2be0] sm:$0xff]  ;;  %v1409_v59 = vld [vmem:[%s19895_s1 + $0x2ac8] sm:$0xff] }
 0x29c   :  { %10527 = vmatpush1.bf16.msra.mxu1 %v13832_v41  ;;  %v13902_v41 = vcombine.low %v1400_v53, %v1404_v54  ;;  %v1440_v54 = vld [vmem:[%s19895_s1 + $0x2bc0] sm:$0xff] }
 0x29d   :  { %10528 = vmatprep.subr.bf16.mxu1 %v13841_v19  ;;  %v13911_v19 = vcombine.high %v1408_v9, %v1412_v11 }
 0x29e   :  { %10004 = vmatpush1.bf16.msra.mxu0 %v13870_v27  ;;  %v1389_v27 = vld [vmem:[%s19895_s1 + $0x2a28] sm:$0xff] }
 0x29f   :  { %10005 = vmatprep.subr.bf16.mxu0 %v13879_v38  ;;  %v13880_v38 = vcombine.low %v1377_v18, %v1381_v16  ;;  %v13889_v31 = vcombine.high %v1385_v24, %v1389_v27  ;;  %v1452_v18 = vld [vmem:[%s19895_s1 + $0x2c20] sm:$0xff]  ;;  %v1417_v16 = vld [vmem:[%s19895_s1 + $0x2b08] sm:$0xff] }
 0x2a0   :  { %10529 = vmatpush1.bf16.msra.mxu1 %v13840_v28  ;;  %v13910_v28 = vcombine.low %v1408_v9, %v1412_v11  ;;  %v1448_v11 = vld [vmem:[%s19895_s1 + $0x2c00] sm:$0xff] }
 0x2a1   :  { %10530 = vmatprep.subr.bf16.mxu1 %v13849_v30  ;;  %v13919_v30 = vcombine.high %v1416_v23, %v1420_v58 }
 0x2a2   :  { %10006 = vmatpush1.bf16.msra.mxu0 %v13878_v13  ;;  %v1397_v13 = vld [vmem:[%s19895_s1 + $0x2a68] sm:$0xff] }
 0x2a3   :  { %10007 = vmatprep.subr.bf16.mxu0 %v13887_v37  ;;  %v13888_v37 = vcombine.low %v1385_v24, %v1389_v27  ;;  %v13897_v40 = vcombine.high %v1393_v35, %v1397_v13  ;;  %v1456_v24 = vld [vmem:[%s19895_s1 + $0x2c40] sm:$0xff] }
 0x2a4   :  { %10531 = vmatpush1.bf16.msra.mxu1 %v13848_v36  ;;  %v13918_v36 = vcombine.low %v1416_v23, %v1420_v58  ;;  %v16966_v23 = vld [vmem:[%s19896_s0 + $0x58] sm:$0xff]  ;;  %v1460_v27 = vld [vmem:[%s19895_s1 + $0x2c60] sm:$0xff] }
 0x2a5   :  { %10532 = vmatprep.subr.bf16.mxu1 %v13857_v39  ;;  %v13927_v39 = vcombine.high %v1424_v32, %v1428_v34 }
 0x2a6   :  { %10008 = vmatpush1.bf16.msra.mxu0 %v13886_v47  ;;  %v1405_v47 = vld [vmem:[%s19895_s1 + $0x2aa8] sm:$0xff] }
 0x2a7   :  { %10009 = vmatprep.subr.bf16.mxu0 %v13895_v51  ;;  %v13896_v51 = vcombine.low %v1393_v35, %v1397_v13  ;;  %v13905_v53 = vcombine.high %v1401_v46, %v1405_v47  ;;  %v13959_v35 = vcombine.high %v1456_v24, %v1460_v27  ;;  %v1464_v13 = vld [vmem:[%s19895_s1 + $0x2c80] sm:$0xff] }
 0x2a8   :  { %10533 = vmatpush1.bf16.msra.mxu1 %v13856_v50  ;;  %v13926_v50 = vcombine.low %v1424_v32, %v1428_v34  ;;  %v16986_v32 = vcombine.high %v16966_v23, %v16966_v23 }
 0x2a9   :  { %10534 = vmatprep.subr.bf16.mxu1 %v13865_v4  ;;  %v13935_v4 = vcombine.high %v1432_v42, %v1436_v44 }
 0x2aa   :  { %10010 = vmatpush1.bf16.msra.mxu0 %v13894_v62  ;;  %v1413_v62 = vld [vmem:[%s19895_s1 + $0x2ae8] sm:$0xff] }
 0x2ab   :  { %10011 = vmatprep.subr.bf16.mxu0 %v13903_v5  ;;  %v13904_v5 = vcombine.low %v1401_v46, %v1405_v47  ;;  %v13913_v9 = vcombine.high %v1409_v59, %v1413_v62  ;;  %v1472_v47 = vld [vmem:[%s19895_s1 + $0x2cc0] sm:$0xff] }
 0x2ac   :  { %10535 = vmatpush1.bf16.msra.mxu1 %v13864_v60  ;;  %v13934_v60 = vcombine.low %v1432_v42, %v1436_v44 }
 0x2ad   :  { %10536 = vmatprep.subr.bf16.mxu1 %v13873_v52  ;;  %v13943_v52 = vcombine.high %v1440_v54, %v1444_v55 }
 0x2ae   :  { %10012 = vmatpush1.bf16.msra.mxu0 %v13902_v41  ;;  %v1421_v41 = vld [vmem:[%s19895_s1 + $0x2b28] sm:$0xff] }
 0x2af   :  { %10013 = vmatprep.subr.bf16.mxu0 %v13911_v19  ;;  %v13912_v19 = vcombine.low %v1409_v59, %v1413_v62  ;;  %v13921_v58 = vcombine.high %v1417_v16, %v1421_v41  ;;  %v13920_v34 = vcombine.low %v1417_v16, %v1421_v41  ;;  %v1480_v62 = vld [vmem:[%s19895_s1 + $0x2d00] sm:$0xff] }
 0x2b0   :  { %10537 = vmatpush1.bf16.msra.mxu1 %v13872_v25  ;;  %v13942_v25 = vcombine.low %v1440_v54, %v1444_v55  ;;  %v1488_v41 = vld [vmem:[%s19895_s1 + $0x2d40] sm:$0xff] }
 0x2b1   :  { %10538 = vmatprep.subr.bf16.mxu1 %v13881_v20  ;;  %v13951_v20 = vcombine.high %v1448_v11, %v1452_v18 }
 0x2b2   :  { %10014 = vmatpush1.bf16.msra.mxu0 %v13910_v28  ;;  %v16976_v28 = vcombine.low %v16757_v0, %v16757_v0 }
 0x2b3   :  { %10015 = vmatprep.subr.bf16.mxu0 %v13919_v30  ;;  %v1429_v30 = vld [vmem:[%s19895_s1 + $0x2b68] sm:$0xff] }
 0x2b4   :  { %10539 = vmatpush1.bf16.msra.mxu1 %v13880_v38  ;;  %v1425_v38 = vld [vmem:[%s19895_s1 + $0x2b48] sm:$0xff] }
 0x2b5   :  { %10540 = vmatprep.subr.bf16.mxu1 %v13889_v31  ;;  %v13950_v31 = vcombine.low %v1448_v11, %v1452_v18  ;;  %v13929_v0 = vcombine.high %v1425_v38, %v1429_v30  ;;  %v13928_v42 = vcombine.low %v1425_v38, %v1429_v30  ;;  %v1496_v30 = vld [vmem:[%s19895_s1 + $0x2d80] sm:$0xff] }
 0x2b6   :  { %10016 = vmatpush1.bf16.msra.mxu0 %v13918_v36  ;;  %v1468_v36 = vld [vmem:[%s19895_s1 + $0x2ca0] sm:$0xff] }
 0x2b7   :  { %10017 = vmatprep.subr.bf16.mxu0 %v13927_v39  ;;  %v1437_v39 = vld [vmem:[%s19895_s1 + $0x2ba8] sm:$0xff]  ;;  %v13967_v44 = vcombine.high %v1464_v13, %v1468_v36 }
 0x2b8   :  { %10541 = vmatpush1.bf16.msra.mxu1 %v13888_v37  ;;  %v1433_v37 = vld [vmem:[%s19895_s1 + $0x2b88] sm:$0xff] }
 0x2b9   :  { %10542 = vmatprep.subr.bf16.mxu1 %v13897_v40  ;;  %v13958_v40 = vcombine.low %v1456_v24, %v1460_v27  ;;  %v13937_v46 = vcombine.high %v1433_v37, %v1437_v39  ;;  %v13936_v54 = vcombine.low %v1433_v37, %v1437_v39  ;;  %v1504_v39 = vld [vmem:[%s19895_s1 + $0x2dc0] sm:$0xff] }
 0x2ba   :  { %10018 = vmatpush1.bf16.msra.mxu0 %v13926_v50  ;;  %v1476_v50 = vld [vmem:[%s19895_s1 + $0x2ce0] sm:$0xff] }
 0x2bb   :  { %10019 = vmatprep.subr.bf16.mxu0 %v13935_v4  ;;  %v1445_v4 = vld [vmem:[%s19895_s1 + $0x2be8] sm:$0xff]  ;;  %v13975_v55 = vcombine.high %v1472_v47, %v1476_v50 }
 0x2bc   :  { %10543 = vmatpush1.bf16.msra.mxu1 %v13896_v51  ;;  %v1441_v51 = vld [vmem:[%s19895_s1 + $0x2bc8] sm:$0xff] }
 0x2bd   :  { %10544 = vmatprep.subr.bf16.mxu1 %v13905_v53  ;;  %v13966_v53 = vcombine.low %v1464_v13, %v1468_v36  ;;  %v13945_v59 = vcombine.high %v1441_v51, %v1445_v4  ;;  %v13944_v11 = vcombine.low %v1441_v51, %v1445_v4  ;;  %v1512_v4 = vld [vmem:[%s19895_s1 + $0x2e00] sm:$0xff] }
 0x2be   :  { %10020 = vmatpush1.bf16.msra.mxu0 %v13934_v60  ;;  %v1484_v60 = vld [vmem:[%s19895_s1 + $0x2d20] sm:$0xff] }
 0x2bf   :  { %10021 = vmatprep.subr.bf16.mxu0 %v13943_v52  ;;  %v1453_v52 = vld [vmem:[%s19895_s1 + $0x2c28] sm:$0xff]  ;;  %v13983_v18 = vcombine.high %v1480_v62, %v1484_v60 }
 0x2c0   :  { %10545 = vmatpush1.bf16.msra.mxu1 %v13904_v5  ;;  %v1449_v5 = vld [vmem:[%s19895_s1 + $0x2c08] sm:$0xff] }
 0x2c1   :  { %10546 = vmatprep.subr.bf16.mxu1 %v13913_v9  ;;  %v13974_v9 = vcombine.low %v1472_v47, %v1476_v50  ;;  %v13953_v16 = vcombine.high %v1449_v5, %v1453_v52  ;;  %v13952_v24 = vcombine.low %v1449_v5, %v1453_v52  ;;  %v1520_v52 = vld [vmem:[%s19895_s1 + $0x2e40] sm:$0xff] }
 0x2c2   :  { %10022 = vmatpush1.bf16.msra.mxu0 %v13942_v25  ;;  %v1492_v25 = vld [vmem:[%s19895_s1 + $0x2d60] sm:$0xff] }
 0x2c3   :  { %10032 = vmatprep.subr.bf16.mxu0 %v13951_v20  ;;  %v1461_v20 = vld [vmem:[%s19895_s1 + $0x2c68] sm:$0xff]  ;;  %v13991_v27 = vcombine.high %v1488_v41, %v1492_v25 }
 0x2c4   :  { %10547 = vmatpush1.bf16.msra.mxu1 %v13912_v19  ;;  %v1457_v19 = vld [vmem:[%s19895_s1 + $0x2c48] sm:$0xff] }
 0x2c5   :  { %10548 = vmatprep.subr.bf16.mxu1 %v13921_v58  ;;  %10024 = vmatmul.mubr.bf16.vlgmr.msra.gmra.mrb[0].mxu0 %v16976_v28  ;;  %v13982_v58 = vcombine.low %v1480_v62, %v1484_v60  ;;  %v13961_v38 = vcombine.high %v1457_v19, %v1461_v20  ;;  %v13960_v13 = vcombine.low %v1457_v19, %v1461_v20  ;;  %v1528_v20 = vld [vmem:[%s19895_s1 + $0x2e80] sm:$0xff] }
 0x2c6   :  { %10033 = vmatpush1.bf16.msra.mxu0 %v13950_v31  ;;  %10064 = vmatprep.mubr.bf16.mxu0 %v16986_v32  ;;  %v1500_v31 = vld [vmem:[%s19895_s1 + $0x2da0] sm:$0xff] }
 0x2c7   :  { %10034 = vmatprep.subr.bf16.mxu0 %v13959_v35  ;;  %v1469_v35 = vld [vmem:[%s19895_s1 + $0x2ca8] sm:$0xff]  ;;  %v13999_v36 = vcombine.high %v1496_v30, %v1500_v31 }
 0x2c8   :  { %10549 = vmatpush1.bf16.msra.mxu1 %v13920_v34  ;;  %v1465_v34 = vld [vmem:[%s19895_s1 + $0x2c88] sm:$0xff] }
 0x2c9   :  { %10550 = vmatprep.subr.bf16.mxu1 %v13929_v0  ;;  %v13990_v0 = vcombine.low %v1488_v41, %v1492_v25  ;;  %v13969_v37 = vcombine.high %v1465_v34, %v1469_v35  ;;  %v13968_v47 = vcombine.low %v1465_v34, %v1469_v35  ;;  %v1536_v35 = vld [vmem:[%s19895_s1 + $0x2ec0] sm:$0xff] }
 0x2ca   :  { %10035 = vmatpush1.bf16.msra.mxu0 %v13958_v40  ;;  %v1508_v40 = vld [vmem:[%s19895_s1 + $0x2de0] sm:$0xff] }
 0x2cb   :  { %10036 = vmatprep.subr.bf16.mxu0 %v13967_v44  ;;  %v1477_v44 = vld [vmem:[%s19895_s1 + $0x2ce8] sm:$0xff]  ;;  %v14007_v50 = vcombine.high %v1504_v39, %v1508_v40 }
 0x2cc   :  { %10551 = vmatpush1.bf16.msra.mxu1 %v13928_v42  ;;  %v1473_v42 = vld [vmem:[%s19895_s1 + $0x2cc8] sm:$0xff] }
 0x2cd   :  { %10552 = vmatprep.subr.bf16.mxu1 %v13937_v46  ;;  %v13998_v46 = vcombine.low %v1496_v30, %v1500_v31  ;;  %v13977_v51 = vcombine.high %v1473_v42, %v1477_v44  ;;  %v13976_v62 = vcombine.low %v1473_v42, %v1477_v44  ;;  %v1544_v44 = vld [vmem:[%s19895_s1 + $0x2f00] sm:$0xff] }
 0x2ce   :  { %10037 = vmatpush1.bf16.msra.mxu0 %v13966_v53  ;;  %v1516_v53 = vld [vmem:[%s19895_s1 + $0x2e20] sm:$0xff] }
 0x2cf   :  { %10038 = vmatprep.subr.bf16.mxu0 %v13975_v55  ;;  %v1485_v55 = vld [vmem:[%s19895_s1 + $0x2d28] sm:$0xff]  ;;  %v14015_v60 = vcombine.high %v1512_v4, %v1516_v53 }
 0x2d0   :  { %10553 = vmatpush1.bf16.msra.mxu1 %v13936_v54  ;;  %v1481_v54 = vld [vmem:[%s19895_s1 + $0x2d08] sm:$0xff] }
 0x2d1   :  { %10554 = vmatprep.subr.bf16.mxu1 %v13945_v59  ;;  %v14006_v59 = vcombine.low %v1504_v39, %v1508_v40  ;;  %v13985_v5 = vcombine.high %v1481_v54, %v1485_v55  ;;  %v13984_v41 = vcombine.low %v1481_v54, %v1485_v55  ;;  %v1552_v55 = vld [vmem:[%s19895_s1 + $0x2f40] sm:$0xff] }
 0x2d2   :  { %10039 = vmatpush1.bf16.msra.mxu0 %v13974_v9  ;;  %v1524_v9 = vld [vmem:[%s19895_s1 + $0x2e60] sm:$0xff] }
 0x2d3   :  { %10040 = vmatprep.subr.bf16.mxu0 %v13983_v18  ;;  %v1493_v18 = vld [vmem:[%s19895_s1 + $0x2d68] sm:$0xff]  ;;  %v14023_v25 = vcombine.high %v1520_v52, %v1524_v9 }
 0x2d4   :  { %10555 = vmatpush1.bf16.msra.mxu1 %v13944_v11  ;;  %v1489_v11 = vld [vmem:[%s19895_s1 + $0x2d48] sm:$0xff] }
 0x2d5   :  { %10565 = vmatprep.subr.bf16.mxu1 %v13953_v16  ;;  %v14014_v16 = vcombine.low %v1512_v4, %v1516_v53  ;;  %v13993_v19 = vcombine.high %v1489_v11, %v1493_v18  ;;  %v13992_v30 = vcombine.low %v1489_v11, %v1493_v18  ;;  %v1560_v18 = vld [vmem:[%s19895_s1 + $0x2f80] sm:$0xff] }
 0x2d6   :  { %10041 = vmatpush1.bf16.msra.mxu0 %v13982_v58  ;;  %v1532_v58 = vld [vmem:[%s19895_s1 + $0x2ea0] sm:$0xff] }
 0x2d7   :  { %10557 = vmatmul.mubr.bf16.vlgmr.msra.gmra.mrb[4].mxu1 %v16976_v28  ;;  %10042 = vmatprep.subr.bf16.mxu0 %v13991_v27  ;;  %v1501_v27 = vld [vmem:[%s19895_s1 + $0x2da8] sm:$0xff]  ;;  %v14031_v31 = vcombine.high %v1528_v20, %v1532_v58 }
 0x2d8   :  { %10566 = vmatpush1.bf16.msra.mxu1 %v13952_v24  ;;  %10597 = vmatprep.mubr.bf16.mxu1 %v16986_v32  ;;  %v1497_v24 = vld [vmem:[%s19895_s1 + $0x2d88] sm:$0xff] }
 0x2d9   :  { %10567 = vmatprep.subr.bf16.mxu1 %v13961_v38  ;;  %v14022_v38 = vcombine.low %v1520_v52, %v1524_v9  ;;  %v14001_v34 = vcombine.high %v1497_v24, %v1501_v27  ;;  %v14000_v39 = vcombine.low %v1497_v24, %v1501_v27  ;;  %v1568_v27 = vld [vmem:[%s19895_s1 + $0x2fc0] sm:$0xff] }
 0x2da   :  { %10043 = vmatpush1.bf16.msra.mxu0 %v13990_v0  ;;  %v1540_v0 = vld [vmem:[%s19895_s1 + $0x2ee0] sm:$0xff] }
 0x2db   :  { %10044 = vmatprep.subr.bf16.mxu0 %v13999_v36  ;;  %v1509_v36 = vld [vmem:[%s19895_s1 + $0x2de8] sm:$0xff]  ;;  %v14039_v40 = vcombine.high %v1536_v35, %v1540_v0 }
 0x2dc   :  { %10568 = vmatpush1.bf16.msra.mxu1 %v13960_v13  ;;  %v1505_v13 = vld [vmem:[%s19895_s1 + $0x2dc8] sm:$0xff] }
 0x2dd   :  { %10569 = vmatprep.subr.bf16.mxu1 %v13969_v37  ;;  %v14030_v37 = vcombine.low %v1528_v20, %v1532_v58  ;;  %v14009_v42 = vcombine.high %v1505_v13, %v1509_v36  ;;  %v14008_v4 = vcombine.low %v1505_v13, %v1509_v36  ;;  %v42_v36 = vld [vmem:[%s19895_s1 + $0x10] sm:$0xff] }
 0x2de   :  { %10045 = vmatpush1.bf16.msra.mxu0 %v13998_v46  ;;  %v1548_v46 = vld [vmem:[%s19895_s1 + $0x2f20] sm:$0xff] }
 0x2df   :  { %10046 = vmatprep.subr.bf16.mxu0 %v14007_v50  ;;  %v1517_v50 = vld [vmem:[%s19895_s1 + $0x2e28] sm:$0xff]  ;;  %v14047_v53 = vcombine.high %v1544_v44, %v1548_v46 }
 0x2e0   :  { %10570 = vmatpush1.bf16.msra.mxu1 %v13968_v47  ;;  %v1513_v47 = vld [vmem:[%s19895_s1 + $0x2e08] sm:$0xff] }
 0x2e1   :  { %10571 = vmatprep.subr.bf16.mxu1 %v13977_v51  ;;  %v14038_v51 = vcombine.low %v1536_v35, %v1540_v0  ;;  %v14017_v54 = vcombine.high %v1513_v47, %v1517_v50  ;;  %v14016_v52 = vcombine.low %v1513_v47, %v1517_v50  ;;  %v50_v50 = vld [vmem:[%s19895_s1 + $0x50] sm:$0xff] }
 0x2e2   :  { %10047 = vmatpush1.bf16.msra.mxu0 %v14006_v59  ;;  %v1556_v59 = vld [vmem:[%s19895_s1 + $0x2f60] sm:$0xff] }
 0x2e3   :  { %10048 = vmatprep.subr.bf16.mxu0 %v14015_v60  ;;  %v1525_v60 = vld [vmem:[%s19895_s1 + $0x2e68] sm:$0xff]  ;;  %v14055_v9 = vcombine.high %v1552_v55, %v1556_v59 }
 0x2e4   :  { %10572 = vmatpush1.bf16.msra.mxu1 %v13976_v62  ;;  %v1521_v62 = vld [vmem:[%s19895_s1 + $0x2e48] sm:$0xff] }
 0x2e5   :  { %10573 = vmatprep.subr.bf16.mxu1 %v13985_v5  ;;  %v14046_v5 = vcombine.low %v1544_v44, %v1548_v46  ;;  %v14025_v11 = vcombine.high %v1521_v62, %v1525_v60  ;;  %v14024_v20 = vcombine.low %v1521_v62, %v1525_v60 }
 0x2e6   :  { %10049 = vmatpush1.bf16.msra.mxu0 %v14014_v16  ;;  %v1564_v16 = vld [vmem:[%s19895_s1 + $0x2fa0] sm:$0xff] }
 0x2e7   :  { %10050 = vmatprep.subr.bf16.mxu0 %v14023_v25  ;;  %v1533_v25 = vld [vmem:[%s19895_s1 + $0x2ea8] sm:$0xff]  ;;  %v14063_v58 = vcombine.high %v1560_v18, %v1564_v16 }
 0x2e8   :  { %10574 = vmatpush1.bf16.msra.mxu1 %v13984_v41  ;;  %v1529_v41 = vld [vmem:[%s19895_s1 + $0x2e88] sm:$0xff] }
 0x2e9   :  { %10575 = vmatprep.subr.bf16.mxu1 %v13993_v19  ;;  %v14054_v19 = vcombine.low %v1552_v55, %v1556_v59  ;;  %v14033_v24 = vcombine.high %v1529_v41, %v1533_v25  ;;  %v14032_v35 = vcombine.low %v1529_v41, %v1533_v25  ;;  %v66_v25 = vld [vmem:[%s19895_s1 + $0xd0] sm:$0xff] }
 0x2ea   :  { %10051 = vmatpush1.bf16.msra.mxu0 %v14022_v38  ;;  %v1572_v38 = vld [vmem:[%s19895_s1 + $0x2fe0] sm:$0xff] }
 0x2eb   :  { %10052 = vmatprep.subr.bf16.mxu0 %v14031_v31  ;;  %v1541_v31 = vld [vmem:[%s19895_s1 + $0x2ee8] sm:$0xff]  ;;  %v14071_v0 = vcombine.high %v1568_v27, %v1572_v38 }
 0x2ec   :  { %10576 = vmatpush1.bf16.msra.mxu1 %v13992_v30  ;;  %v1537_v30 = vld [vmem:[%s19895_s1 + $0x2ec8] sm:$0xff] }
 0x2ed   :  { %10577 = vmatprep.subr.bf16.mxu1 %v14001_v34  ;;  %v14062_v34 = vcombine.low %v1560_v18, %v1564_v16  ;;  %v14041_v13 = vcombine.high %v1537_v30, %v1541_v31  ;;  %v14040_v44 = vcombine.low %v1537_v30, %v1541_v31  ;;  %v74_v31 = vld [vmem:[%s19895_s1 + $0x110] sm:$0xff] }
 0x2ee   :  { %10053 = vmatpush1.bf16.msra.mxu0 %v14030_v37  ;;  %v46_v37 = vld [vmem:[%s19895_s1 + $0x30] sm:$0xff] }
 0x2ef   :  { %10054 = vmatprep.subr.bf16.mxu0 %v14039_v40  ;;  %v1549_v40 = vld [vmem:[%s19895_s1 + $0x2f28] sm:$0xff]  ;;  %v12547_v46 = vcombine.high %v42_v36, %v46_v37  ;;  %v12546_v55 = vcombine.low %v42_v36, %v46_v37 }
 0x2f0   :  { %10578 = vmatpush1.bf16.msra.mxu1 %v14000_v39  ;;  %v1545_v39 = vld [vmem:[%s19895_s1 + $0x2f08] sm:$0xff] }
 0x2f1   :  { %10579 = vmatprep.subr.bf16.mxu1 %v14009_v42  ;;  %v14070_v42 = vcombine.low %v1568_v27, %v1572_v38  ;;  %v14049_v47 = vcombine.high %v1545_v39, %v1549_v40  ;;  %v14048_v59 = vcombine.low %v1545_v39, %v1549_v40  ;;  %v82_v40 = vld [vmem:[%s19895_s1 + $0x150] sm:$0xff] }
 0x2f2   :  { %10055 = vmatpush1.bf16.msra.mxu0 %v14038_v51  ;;  %v54_v51 = vld [vmem:[%s19895_s1 + $0x70] sm:$0xff] }
 0x2f3   :  { %10056 = vmatprep.subr.bf16.mxu0 %v14047_v53  ;;  %v1553_v53 = vld [vmem:[%s19895_s1 + $0x2f48] sm:$0xff]  ;;  %v12555_v62 = vcombine.high %v50_v50, %v54_v51 }
 0x2f4   :  { %10580 = vmatpush1.bf16.msra.mxu1 %v14008_v4  ;;  %v17180_v4 = vcombine.low %v16966_v23, %v16966_v23  ;;  %v58_v23 = vld [vmem:[%s19895_s1 + $0x90] sm:$0xff] }
 0x2f5   :  { %10581 = vmatprep.subr.bf16.mxu1 %v14017_v54  ;;  %v1557_v54 = vld [vmem:[%s19895_s1 + $0x2f68] sm:$0xff] }
 0x2f6   :  { %10057 = vmatpush1.bf16.msra.mxu0 %v14046_v5  ;;  %v14057_v60 = vcombine.high %v1553_v53, %v1557_v54  ;;  %v62_v5 = vld [vmem:[%s19895_s1 + $0xb0] sm:$0xff]  ;;  %v14056_v18 = vcombine.low %v1553_v53, %v1557_v54 }
 0x2f7   :  { %10058 = vmatprep.subr.bf16.mxu0 %v14055_v9  ;;  %v1565_v9 = vld [vmem:[%s19895_s1 + $0x2fa8] sm:$0xff]  ;;  %v12563_v16 = vcombine.high %v58_v23, %v62_v5  ;;  %v90_v54 = vld [vmem:[%s19895_s1 + $0x190] sm:$0xff] }
 0x2f8   :  { %10582 = vmatpush1.bf16.msra.mxu1 %v14016_v52  ;;  %v1561_v52 = vld [vmem:[%s19895_s1 + $0x2f88] sm:$0xff] }
 0x2f9   :  { %10583 = vmatprep.subr.bf16.mxu1 %v14025_v11  ;;  %v12554_v11 = vcombine.low %v50_v50, %v54_v51  ;;  %v14065_v41 = vcombine.high %v1561_v52, %v1565_v9  ;;  %v14064_v27 = vcombine.low %v1561_v52, %v1565_v9  ;;  %v98_v9 = vld [vmem:[%s19895_s1 + $0x1d0] sm:$0xff] }
 0x2fa   :  { %10059 = vmatpush1.bf16.msra.mxu0 %v14054_v19  ;;  %v70_v19 = vld [vmem:[%s19895_s1 + $0xf0] sm:$0xff] }
 0x2fb   :  { %10060 = vmatprep.subr.bf16.mxu0 %v14063_v58  ;;  %v1573_v58 = vld [vmem:[%s19895_s1 + $0x2fe8] sm:$0xff]  ;;  %v12571_v38 = vcombine.high %v66_v25, %v70_v19 }
 0x2fc   :  { %10584 = vmatpush1.bf16.msra.mxu1 %v14024_v20  ;;  %v1569_v20 = vld [vmem:[%s19895_s1 + $0x2fc8] sm:$0xff] }
 0x2fd   :  { %10585 = vmatprep.subr.bf16.mxu1 %v14033_v24  ;;  %v12562_v24 = vcombine.low %v58_v23, %v62_v5  ;;  %v14073_v30 = vcombine.high %v1569_v20, %v1573_v58  ;;  %v14072_v36 = vcombine.low %v1569_v20, %v1573_v58  ;;  %v106_v58 = vld [vmem:[%s19895_s1 + $0x210] sm:$0xff] }
 0x2fe   :  { %10061 = vmatpush1.bf16.msra.mxu0 %v14062_v34  ;;  %v78_v34 = vld [vmem:[%s19895_s1 + $0x130] sm:$0xff] }
 0x2ff   :  { %10062 = vmatprep.subr.bf16.mxu0 %v14071_v0  ;;  %v1581_v0 = vld [vmem:[%s19895_s1 + $0x3028] sm:$0xff]  ;;  %v12579_v37 = vcombine.high %v74_v31, %v78_v34 }
 0x300   :  { %10586 = vmatpush1.bf16.msra.mxu1 %v14032_v35  ;;  %v1577_v35 = vld [vmem:[%s19895_s1 + $0x3008] sm:$0xff] }
 0x301   :  { %10587 = vmatprep.subr.bf16.mxu1 %v14041_v13  ;;  %v12570_v13 = vcombine.low %v66_v25, %v70_v19  ;;  %v14081_v39 = vcombine.high %v1577_v35, %v1581_v0  ;;  %v14080_v50 = vcombine.low %v1577_v35, %v1581_v0  ;;  %v114_v0 = vld [vmem:[%s19895_s1 + $0x250] sm:$0xff] }
 0x302   :  { %10063 = vmatpush1.bf16.msra.mxu0 %v14070_v42  ;;  %v86_v42 = vld [vmem:[%s19895_s1 + $0x170] sm:$0xff] }
 0x303   :  { %10647 = vmatprep.subr.bf16.mxu0 %v12547_v46  ;;  %v1589_v46 = vld [vmem:[%s19895_s1 + $0x3068] sm:$0xff]  ;;  %v12587_v51 = vcombine.high %v82_v40, %v86_v42 }
 0x304   :  { %10588 = vmatpush1.bf16.msra.mxu1 %v14040_v44  ;;  %v1585_v44 = vld [vmem:[%s19895_s1 + $0x3048] sm:$0xff] }
 0x305   :  { %10589 = vmatprep.subr.bf16.mxu1 %v14049_v47  ;;  %10065 = vmatmul.mubr.bf16.vlgmr.msra.gmra.mrb[0].mxu0 %v17180_v4  ;;  %v12578_v47 = vcombine.low %v74_v31, %v78_v34  ;;  %v14089_v53 = vcombine.high %v1585_v44, %v1589_v46  ;;  %v14088_v23 = vcombine.low %v1585_v44, %v1589_v46  ;;  %v122_v46 = vld [vmem:[%s19895_s1 + $0x290] sm:$0xff] }
 0x306   :  { %10648 = vmatpush1.bf16.msra.mxu0 %v12546_v55  ;;  %10679 = vmatprep.mubr.bf16.mxu0 %v14757_v61  ;;  %v94_v55 = vld [vmem:[%s19895_s1 + $0x1b0] sm:$0xff] }
 0x307   :  { %10649 = vmatprep.subr.bf16.mxu0 %v12555_v62  ;;  %v1597_v62 = vld [vmem:[%s19895_s1 + $0x30a8] sm:$0xff]  ;;  %v12595_v5 = vcombine.high %v90_v54, %v94_v55 }
 0x308   :  { %10590 = vmatpush1.bf16.msra.mxu1 %v14048_v59  ;;  %v1593_v59 = vld [vmem:[%s19895_s1 + $0x3088] sm:$0xff] }
 0x309   :  { %10591 = vmatprep.subr.bf16.mxu1 %v14057_v60  ;;  %v12586_v60 = vcombine.low %v82_v40, %v86_v42  ;;  %v14097_v52 = vcombine.high %v1593_v59, %v1597_v62  ;;  %v14096_v25 = vcombine.low %v1593_v59, %v1597_v62 }
 0x30a   :  { %10650 = vmatpush1.bf16.msra.mxu0 %v12554_v11  ;;  %v102_v11 = vld [vmem:[%s19895_s1 + $0x1f0] sm:$0xff] }
 0x30b   :  { %10651 = vmatprep.subr.bf16.mxu0 %v12563_v16  ;;  %v1605_v16 = vld [vmem:[%s19895_s1 + $0x30e8] sm:$0xff]  ;;  %v12603_v19 = vcombine.high %v98_v9, %v102_v11 }
 0x30c   :  { %10592 = vmatpush1.bf16.msra.mxu1 %v14056_v18  ;;  %v1601_v18 = vld [vmem:[%s19895_s1 + $0x30c8] sm:$0xff] }
 0x30d   :  { %10593 = vmatprep.subr.bf16.mxu1 %v14065_v41  ;;  %v12594_v41 = vcombine.low %v90_v54, %v94_v55  ;;  %v14105_v20 = vcombine.high %v1601_v18, %v1605_v16  ;;  %v14104_v31 = vcombine.low %v1601_v18, %v1605_v16 }
 0x30e   :  { %10652 = vmatpush1.bf16.msra.mxu0 %v12562_v24  ;;  %v110_v24 = vld [vmem:[%s19895_s1 + $0x230] sm:$0xff] }
 0x30f   :  { %10653 = vmatprep.subr.bf16.mxu0 %v12571_v38  ;;  %v47_v38 = vld [vmem:[%s19895_s1 + $0x38] sm:$0xff]  ;;  %v12611_v34 = vcombine.high %v106_v58, %v110_v24 }
 0x310   :  { %10594 = vmatpush1.bf16.msra.mxu1 %v14064_v27  ;;  %v43_v27 = vld [vmem:[%s19895_s1 + $0x18] sm:$0xff] }
 0x311   :  { %10595 = vmatprep.subr.bf16.mxu1 %v14073_v30  ;;  %v12602_v30 = vcombine.low %v98_v9, %v102_v11  ;;  %v12549_v35 = vcombine.high %v43_v27, %v47_v38  ;;  %v12548_v40 = vcombine.low %v43_v27, %v47_v38  ;;  %v146_v38 = vld [vmem:[%s19895_s1 + $0x350] sm:$0xff] }
 0x312   :  { %10654 = vmatpush1.bf16.msra.mxu0 %v12570_v13  ;;  %v118_v13 = vld [vmem:[%s19895_s1 + $0x270] sm:$0xff] }
 0x313   :  { %10655 = vmatprep.subr.bf16.mxu0 %v12579_v37  ;;  %v55_v37 = vld [vmem:[%s19895_s1 + $0x78] sm:$0xff]  ;;  %v12619_v42 = vcombine.high %v114_v0, %v118_v13  ;;  %v12618_v54 = vcombine.low %v114_v0, %v118_v13 }
 0x314   :  { %10596 = vmatpush1.bf16.msra.mxu1 %v14072_v36  ;;  %v51_v36 = vld [vmem:[%s19895_s1 + $0x58] sm:$0xff] }
 0x315   :  { %10606 = vmatprep.subr.bf16.mxu1 %v14081_v39  ;;  %v12610_v39 = vcombine.low %v106_v58, %v110_v24  ;;  %v12557_v44 = vcombine.high %v51_v36, %v55_v37  ;;  %v12556_v55 = vcombine.low %v51_v36, %v55_v37  ;;  %v154_v37 = vld [vmem:[%s19895_s1 + $0x390] sm:$0xff] }
 0x316   :  { %10656 = vmatpush1.bf16.msra.mxu0 %v12578_v47  ;;  %v126_v47 = vld [vmem:[%s19895_s1 + $0x2b0] sm:$0xff] }
 0x317   :  { %10598 = vmatmul.mubr.bf16.vlgmr.msra.gmra.mrb[4].mxu1 %v17180_v4  ;;  %10657 = vmatprep.subr.bf16.mxu0 %v12587_v51  ;;  %v63_v51 = vld [vmem:[%s19895_s1 + $0xb8] sm:$0xff]  ;;  %v12627_v59 = vcombine.high %v122_v46, %v126_v47  ;;  %v12626_v9 = vcombine.low %v122_v46, %v126_v47 }
 0x318   :  { %10607 = vmatpush1.bf16.msra.mxu1 %v14080_v50  ;;  %10638 = vmatprep.mubr.bf16.mxu1 %v14606_v3  ;;  %v59_v50 = vld [vmem:[%s19895_s1 + $0x98] sm:$0xff] }
 0x319   :  { %10608 = vmatprep.subr.bf16.mxu1 %v14089_v53  ;;  %v14603_v53 = vld [vmem:[%s19896_s0 + $0x60] ss:$0 sps:$4 sm:$0xff]   ;;  %v12565_v62 = vcombine.high %v59_v50, %v63_v51  ;;  %v12564_v11 = vcombine.low %v59_v50, %v63_v51  ;;  %v162_v51 = vld [vmem:[%s19895_s1 + $0x3d0] sm:$0xff] }
 0x31a   :  { %10658 = vmatpush1.bf16.msra.mxu0 %v12586_v60  ;;  %v130_v60 = vld [vmem:[%s19895_s1 + $0x2d0] sm:$0xff] }
 0x31b   :  { %10659 = vmatprep.subr.bf16.mxu0 %v12595_v5  ;;  %v67_v5 = vld [vmem:[%s19895_s1 + $0xd8] sm:$0xff] }
 0x31c   :  { %10609 = vmatpush1.bf16.msra.mxu1 %v14088_v23  ;;  %v134_v23 = vld [vmem:[%s19895_s1 + $0x2f0] sm:$0xff] }
 0x31d   :  { %10610 = vmatprep.subr.bf16.mxu1 %v14097_v52  ;;  %v71_v52 = vld [vmem:[%s19895_s1 + $0xf8] sm:$0xff]  ;;  %v12635_v18 = vcombine.high %v130_v60, %v134_v23 }
 0x31e   :  { %10660 = vmatpush1.bf16.msra.mxu0 %v12594_v41  ;;  %v12573_v16 = vcombine.high %v67_v5, %v71_v52  ;;  %v142_v41 = vld [vmem:[%s19895_s1 + $0x330] sm:$0xff]  ;;  %v12572_v58 = vcombine.low %v67_v5, %v71_v52 }
 0x31f   :  { %10661 = vmatprep.subr.bf16.mxu0 %v12603_v19  ;;  %v79_v19 = vld [vmem:[%s19895_s1 + $0x138] sm:$0xff]  ;;  %v170_v5 = vld [vmem:[%s19895_s1 + $0x410] sm:$0xff] }
 0x320   :  { %10611 = vmatpush1.bf16.msra.mxu1 %v14096_v25  ;;  %v75_v25 = vld [vmem:[%s19895_s1 + $0x118] sm:$0xff]  ;;  %v174_v52 = vld [vmem:[%s19895_s1 + $0x430] sm:$0xff] }
 0x321   :  { %10612 = vmatprep.subr.bf16.mxu1 %v14105_v20  ;;  %v12634_v20 = vcombine.low %v130_v60, %v134_v23  ;;  %v12581_v27 = vcombine.high %v75_v25, %v79_v19  ;;  %v12580_v0 = vcombine.low %v75_v25, %v79_v19  ;;  %v178_v25 = vld [vmem:[%s19895_s1 + $0x450] sm:$0xff] }
 0x322   :  { %10662 = vmatpush1.bf16.msra.mxu0 %v12602_v30  ;;  %v150_v30 = vld [vmem:[%s19895_s1 + $0x370] sm:$0xff] }
 0x323   :  { %10663 = vmatprep.subr.bf16.mxu0 %v12611_v34  ;;  %v87_v34 = vld [vmem:[%s19895_s1 + $0x178] sm:$0xff]  ;;  %v12651_v13 = vcombine.high %v146_v38, %v150_v30  ;;  %v182_v19 = vld [vmem:[%s19895_s1 + $0x470] sm:$0xff] }
 0x324   :  { %10613 = vmatpush1.bf16.msra.mxu1 %v14104_v31  ;;  %v83_v31 = vld [vmem:[%s19895_s1 + $0x158] sm:$0xff] }
 0x325   :  { %11180 = vmatprep.subr.bf16.mxu1 %v12549_v35  ;;  %v12589_v36 = vcombine.high %v83_v31, %v87_v34  ;;  %v12588_v46 = vcombine.low %v83_v31, %v87_v34  ;;  %v186_v31 = vld [vmem:[%s19895_s1 + $0x490] sm:$0xff] }
 0x326   :  { %10664 = vmatpush1.bf16.msra.mxu0 %v12610_v39  ;;  %v158_v39 = vld [vmem:[%s19895_s1 + $0x3b0] sm:$0xff] }
 0x327   :  { %14111 = vmatmul.mubr.msk.bf16.vlgmr.msra.gmra.mrb[4].mxu1 %vm9577_vm0, %v14603_v53  ;;  %10665 = vmatprep.subr.bf16.mxu0 %v12619_v42  ;;  %v95_v42 = vld [vmem:[%s19895_s1 + $0x1b8] sm:$0xff]  ;;  %v12659_v47 = vcombine.high %v154_v37, %v158_v39  ;;  %v166_v53 = vld [vmem:[%s19895_s1 + $0x3f0] sm:$0xff] }
 0x328   :  { %11181 = vmatpush1.bf16.msra.mxu1 %v12548_v40  ;;  %11212 = vmatprep.mubr.bf16.mxu1 %v14757_v61  ;;  %v138_v61 = vld [vmem:[%s19895_s1 + $0x310] sm:$0xff]  ;;  %v91_v40 = vld [vmem:[%s19895_s1 + $0x198] sm:$0xff]  ;;  %v12667_v60 = vcombine.high %v162_v51, %v166_v53 }
 0x329   :  { %11182 = vmatprep.subr.bf16.mxu1 %v12557_v44  ;;  %v12643_v24 = vcombine.high %v138_v61, %v142_v41  ;;  %v12642_v35 = vcombine.low %v138_v61, %v142_v41  ;;  %v12650_v44 = vcombine.low %v146_v38, %v150_v30  ;;  %v12597_v50 = vcombine.high %v91_v40, %v95_v42  ;;  %v190_v34 = vld [vmem:[%s19895_s1 + $0x4b0] sm:$0xff] }
 0x32a   :  { %10666 = vmatpush1.bf16.msra.mxu0 %v12618_v54  ;;  %v99_v54 = vld [vmem:[%s19895_s1 + $0x1d8] sm:$0xff]  ;;  %v12675_v61 = vcombine.high %v170_v5, %v174_v52  ;;  %v12683_v38 = vcombine.high %v178_v25, %v182_v19 }
 0x32b   :  { %10667 = vmatprep.subr.bf16.mxu0 %v12627_v59  ;;  %v12658_v59 = vcombine.low %v154_v37, %v158_v39  ;;  %v12691_v37 = vcombine.high %v186_v31, %v190_v34 }
 0x32c   :  { %11183 = vmatpush1.bf16.msra.mxu1 %v12556_v55  ;;  %v103_v55 = vld [vmem:[%s19895_s1 + $0x1f8] sm:$0xff] }
 0x32d   :  { %11184 = vmatprep.subr.bf16.mxu1 %v12565_v62  ;;  %v12596_v62 = vcombine.low %v91_v40, %v95_v42  ;;  %v12605_v23 = vcombine.high %v99_v54, %v103_v55  ;;  %v194_v40 = vld [vmem:[%s19895_s1 + $0x4d0] sm:$0xff] }
 0x32e   :  { %10668 = vmatpush1.bf16.msra.mxu0 %v12626_v9  ;;  %v107_v9 = vld [vmem:[%s19895_s1 + $0x218] sm:$0xff]  ;;  %v198_v42 = vld [vmem:[%s19895_s1 + $0x4f0] sm:$0xff] }
 0x32f   :  { %10669 = vmatprep.subr.bf16.mxu0 %v12635_v18  ;;  %v12666_v18 = vcombine.low %v162_v51, %v166_v53  ;;  %v12699_v51 = vcombine.high %v194_v40, %v198_v42 }
 0x330   :  { %11185 = vmatpush1.bf16.msra.mxu1 %v12564_v11  ;;  %v111_v11 = vld [vmem:[%s19895_s1 + $0x238] sm:$0xff] }
 0x331   :  { %11186 = vmatprep.subr.bf16.mxu1 %v12573_v16  ;;  %v12604_v16 = vcombine.low %v99_v54, %v103_v55  ;;  %v12613_v41 = vcombine.high %v107_v9, %v111_v11  ;;  %v202_v54 = vld [vmem:[%s19895_s1 + $0x510] sm:$0xff] }
 0x332   :  { %10670 = vmatpush1.bf16.msra.mxu0 %v12634_v20  ;;  %v115_v20 = vld [vmem:[%s19895_s1 + $0x258] sm:$0xff]  ;;  %v206_v55 = vld [vmem:[%s19895_s1 + $0x530] sm:$0xff] }
 0x333   :  { %10671 = vmatprep.subr.bf16.mxu0 %v12643_v24  ;;  %v12674_v24 = vcombine.low %v170_v5, %v174_v52  ;;  %v12707_v5 = vcombine.high %v202_v54, %v206_v55 }
 0x334   :  { %11187 = vmatpush1.bf16.msra.mxu1 %v12572_v58  ;;  %v119_v58 = vld [vmem:[%s19895_s1 + $0x278] sm:$0xff] }
 0x335   :  { %11188 = vmatprep.subr.bf16.mxu1 %v12581_v27  ;;  %v12612_v27 = vcombine.low %v107_v9, %v111_v11  ;;  %v12621_v30 = vcombine.high %v115_v20, %v119_v58  ;;  %v210_v9 = vld [vmem:[%s19895_s1 + $0x550] sm:$0xff] }
 0x336   :  { %10672 = vmatpush1.bf16.msra.mxu0 %v12642_v35  ;;  %v123_v35 = vld [vmem:[%s19895_s1 + $0x298] sm:$0xff]  ;;  %v214_v11 = vld [vmem:[%s19895_s1 + $0x570] sm:$0xff] }
 0x337   :  { %10673 = vmatprep.subr.bf16.mxu0 %v12651_v13  ;;  %v12682_v13 = vcombine.low %v178_v25, %v182_v19  ;;  %v12715_v25 = vcombine.high %v210_v9, %v214_v11 }
 0x338   :  { %11189 = vmatpush1.bf16.msra.mxu1 %v12580_v0  ;;  %v127_v0 = vld [vmem:[%s19895_s1 + $0x2b8] sm:$0xff] }
 0x339   :  { %11190 = vmatprep.subr.bf16.mxu1 %v12589_v36  ;;  %v12620_v36 = vcombine.low %v115_v20, %v119_v58  ;;  %v12629_v39 = vcombine.high %v123_v35, %v127_v0  ;;  %v218_v20 = vld [vmem:[%s19895_s1 + $0x590] sm:$0xff] }
 0x33a   :  { %10674 = vmatpush1.bf16.msra.mxu0 %v12650_v44  ;;  %v131_v44 = vld [vmem:[%s19895_s1 + $0x2d8] sm:$0xff]  ;;  %v222_v58 = vld [vmem:[%s19895_s1 + $0x5b0] sm:$0xff] }
 0x33b   :  { %10675 = vmatprep.subr.bf16.mxu0 %v12659_v47  ;;  %v12690_v47 = vcombine.low %v186_v31, %v190_v34  ;;  %v12723_v31 = vcombine.high %v218_v20, %v222_v58 }
 0x33c   :  { %11191 = vmatpush1.bf16.msra.mxu1 %v12588_v46  ;;  %v135_v46 = vld [vmem:[%s19895_s1 + $0x2f8] sm:$0xff] }
 0x33d   :  { %11192 = vmatprep.subr.bf16.mxu1 %v12597_v50  ;;  %v12628_v50 = vcombine.low %v123_v35, %v127_v0  ;;  %v12637_v53 = vcombine.high %v131_v44, %v135_v46  ;;  %v226_v35 = vld [vmem:[%s19895_s1 + $0x5d0] sm:$0xff] }
 0x33e   :  { %10676 = vmatpush1.bf16.msra.mxu0 %v12658_v59  ;;  %v139_v59 = vld [vmem:[%s19895_s1 + $0x318] sm:$0xff]  ;;  %v230_v0 = vld [vmem:[%s19895_s1 + $0x5f0] sm:$0xff] }
 0x33f   :  { %10677 = vmatprep.subr.bf16.mxu0 %v12667_v60  ;;  %v12698_v60 = vcombine.low %v194_v40, %v198_v42  ;;  %v12731_v40 = vcombine.high %v226_v35, %v230_v0 }
 0x340   :  { %11193 = vmatpush1.bf16.msra.mxu1 %v12596_v62  ;;  %v143_v62 = vld [vmem:[%s19895_s1 + $0x338] sm:$0xff] }
 0x341   :  { %11194 = vmatprep.subr.bf16.mxu1 %v12605_v23  ;;  %v12636_v23 = vcombine.low %v131_v44, %v135_v46  ;;  %v12645_v52 = vcombine.high %v139_v59, %v143_v62  ;;  %v234_v44 = vld [vmem:[%s19895_s1 + $0x610] sm:$0xff] }
 0x342   :  { %10678 = vmatpush1.bf16.msra.mxu0 %v12666_v18  ;;  %v147_v18 = vld [vmem:[%s19895_s1 + $0x358] sm:$0xff]  ;;  %v238_v46 = vld [vmem:[%s19895_s1 + $0x630] sm:$0xff] }
 0x343   :  { %10688 = vmatprep.subr.bf16.mxu0 %v12675_v61  ;;  %v12706_v61 = vcombine.low %v202_v54, %v206_v55  ;;  %v12739_v54 = vcombine.high %v234_v44, %v238_v46 }
 0x344   :  { %11195 = vmatpush1.bf16.msra.mxu1 %v12604_v16  ;;  %v151_v16 = vld [vmem:[%s19895_s1 + $0x378] sm:$0xff] }
 0x345   :  { %11196 = vmatprep.subr.bf16.mxu1 %v12613_v41  ;;  %10680 = vmatmul.mubr.bf16.vlgmr.msra.gmra.mrb[4].mxu0 %v14882_v17  ;;  %v12644_v41 = vcombine.low %v139_v59, %v143_v62  ;;  %v12653_v19 = vcombine.high %v147_v18, %v151_v16  ;;  %v242_v59 = vld [vmem:[%s19895_s1 + $0x650] sm:$0xff] }
 0x346   :  { %10689 = vmatpush1.bf16.msra.mxu0 %v12674_v24  ;;  %10720 = vmatprep.mubr.bf16.mxu0 %v14892_v21  ;;  %v155_v24 = vld [vmem:[%s19895_s1 + $0x398] sm:$0xff]  ;;  %v246_v62 = vld [vmem:[%s19895_s1 + $0x670] sm:$0xff] }
 0x347   :  { %10690 = vmatprep.subr.bf16.mxu0 %v12683_v38  ;;  %v12714_v38 = vcombine.low %v210_v9, %v214_v11  ;;  %v12747_v9 = vcombine.high %v242_v59, %v246_v62 }
 0x348   :  { %11197 = vmatpush1.bf16.msra.mxu1 %v12612_v27  ;;  %v159_v27 = vld [vmem:[%s19895_s1 + $0x3b8] sm:$0xff] }
 0x349   :  { %11198 = vmatprep.subr.bf16.mxu1 %v12621_v30  ;;  %v12652_v30 = vcombine.low %v147_v18, %v151_v16  ;;  %v12661_v34 = vcombine.high %v155_v24, %v159_v27  ;;  %v250_v18 = vld [vmem:[%s19895_s1 + $0x690] sm:$0xff] }
 0x34a   :  { %10691 = vmatpush1.bf16.msra.mxu0 %v12682_v13  ;;  %v163_v13 = vld [vmem:[%s19895_s1 + $0x3d8] sm:$0xff]  ;;  %v254_v16 = vld [vmem:[%s19895_s1 + $0x6b0] sm:$0xff] }
 0x34b   :  { %10692 = vmatprep.subr.bf16.mxu0 %v12691_v37  ;;  %v12722_v37 = vcombine.low %v218_v20, %v222_v58  ;;  %v12755_v20 = vcombine.high %v250_v18, %v254_v16 }
 0x34c   :  { %11199 = vmatpush1.bf16.msra.mxu1 %v12620_v36  ;;  %v167_v36 = vld [vmem:[%s19895_s1 + $0x3f8] sm:$0xff] }
 0x34d   :  { %11200 = vmatprep.subr.bf16.mxu1 %v12629_v39  ;;  %v12660_v39 = vcombine.low %v155_v24, %v159_v27  ;;  %v12669_v42 = vcombine.high %v163_v13, %v167_v36  ;;  %v258_v24 = vld [vmem:[%s19895_s1 + $0x6d0] sm:$0xff] }
 0x34e   :  { %10693 = vmatpush1.bf16.msra.mxu0 %v12690_v47  ;;  %v171_v47 = vld [vmem:[%s19895_s1 + $0x418] sm:$0xff]  ;;  %v262_v27 = vld [vmem:[%s19895_s1 + $0x6f0] sm:$0xff] }
 0x34f   :  { %10694 = vmatprep.subr.bf16.mxu0 %v12699_v51  ;;  %v12730_v51 = vcombine.low %v226_v35, %v230_v0  ;;  %v270_v0 = vld [vmem:[%s19895_s1 + $0x730] sm:$0xff] }
 0x350   :  { %11201 = vmatpush1.bf16.msra.mxu1 %v12628_v50  ;;  %v175_v50 = vld [vmem:[%s19895_s1 + $0x438] sm:$0xff] }
 0x351   :  { %11202 = vmatprep.subr.bf16.mxu1 %v12637_v53  ;;  %v12668_v53 = vcombine.low %v163_v13, %v167_v36  ;;  %v12677_v55 = vcombine.high %v171_v47, %v175_v50  ;;  %v203_v13 = vld [vmem:[%s19895_s1 + $0x518] sm:$0xff] }
 0x352   :  { %10695 = vmatpush1.bf16.msra.mxu0 %v12698_v60  ;;  %v179_v60 = vld [vmem:[%s19895_s1 + $0x458] sm:$0xff] }
 0x353   :  { %10696 = vmatprep.subr.bf16.mxu0 %v12707_v5  ;;  %v12738_v5 = vcombine.low %v234_v44, %v238_v46  ;;  %v207_v36 = vld [vmem:[%s19895_s1 + $0x538] sm:$0xff]  ;;  %v274_v44 = vld [vmem:[%s19895_s1 + $0x750] sm:$0xff] }
 0x354   :  { %11203 = vmatpush1.bf16.msra.mxu1 %v12636_v23  ;;  %v183_v23 = vld [vmem:[%s19895_s1 + $0x478] sm:$0xff]  ;;  %v278_v46 = vld [vmem:[%s19895_s1 + $0x770] sm:$0xff] }
 0x355   :  { %11204 = vmatprep.subr.bf16.mxu1 %v12645_v52  ;;  %v12676_v52 = vcombine.low %v171_v47, %v175_v50  ;;  %v12685_v11 = vcombine.high %v179_v60, %v183_v23  ;;  %v211_v47 = vld [vmem:[%s19895_s1 + $0x558] sm:$0xff] }
 0x356   :  { %10697 = vmatpush1.bf16.msra.mxu0 %v12706_v61  ;;  %v187_v61 = vld [vmem:[%s19895_s1 + $0x498] sm:$0xff] }
 0x357   :  { %10698 = vmatprep.subr.bf16.mxu0 %v12715_v25  ;;  %v12746_v25 = vcombine.low %v242_v59, %v246_v62  ;;  %v215_v50 = vld [vmem:[%s19895_s1 + $0x578] sm:$0xff]  ;;  %v282_v59 = vld [vmem:[%s19895_s1 + $0x790] sm:$0xff] }
 0x358   :  { %11205 = vmatpush1.bf16.msra.mxu1 %v12644_v41  ;;  %v191_v41 = vld [vmem:[%s19895_s1 + $0x4b8] sm:$0xff]  ;;  %v286_v62 = vld [vmem:[%s19895_s1 + $0x7b0] sm:$0xff] }
 0x359   :  { %11206 = vmatprep.subr.bf16.mxu1 %v12653_v19  ;;  %v12684_v19 = vcombine.low %v179_v60, %v183_v23  ;;  %v12693_v58 = vcombine.high %v187_v61, %v191_v41  ;;  %v219_v60 = vld [vmem:[%s19895_s1 + $0x598] sm:$0xff] }
 0x35a   :  { %10699 = vmatpush1.bf16.msra.mxu0 %v12714_v38  ;;  %v199_v38 = vld [vmem:[%s19895_s1 + $0x4f8] sm:$0xff] }
 0x35b   :  { %10700 = vmatprep.subr.bf16.mxu0 %v12723_v31  ;;  %v12692_v31 = vcombine.low %v187_v61, %v191_v41  ;;  %v223_v23 = vld [vmem:[%s19895_s1 + $0x5b8] sm:$0xff] }
 0x35c   :  { %11207 = vmatpush1.bf16.msra.mxu1 %v12652_v30  ;;  %v12754_v30 = vcombine.low %v250_v18, %v254_v16  ;;  %v290_v18 = vld [vmem:[%s19895_s1 + $0x7d0] sm:$0xff]  ;;  %v227_v61 = vld [vmem:[%s19895_s1 + $0x5d8] sm:$0xff] }
 0x35d   :  { %11208 = vmatprep.subr.bf16.mxu1 %v12661_v34  ;;  %v12763_v34 = vcombine.high %v258_v24, %v262_v27  ;;  %v294_v16 = vld [vmem:[%s19895_s1 + $0x7f0] sm:$0xff]  ;;  %v231_v41 = vld [vmem:[%s19895_s1 + $0x5f8] sm:$0xff] }
 0x35e   :  { %10701 = vmatpush1.bf16.msra.mxu0 %v12722_v37  ;;  %v12762_v37 = vcombine.low %v258_v24, %v262_v27  ;;  %v298_v24 = vld [vmem:[%s19895_s1 + $0x810] sm:$0xff] }
 0x35f   :  { %10702 = vmatprep.subr.bf16.mxu0 %v12731_v40  ;;  %v302_v27 = vld [vmem:[%s19895_s1 + $0x830] sm:$0xff] }
 0x360   :  { %11209 = vmatpush1.bf16.msra.mxu1 %v12660_v39 }
 0x361   :  { %11210 = vmatprep.subr.bf16.mxu1 %v12669_v42  ;;  %v12709_v42 = vcombine.high %v203_v13, %v207_v36 }
 0x362   :  { %10703 = vmatpush1.bf16.msra.mxu0 %v12730_v51 }
 0x363   :  { %10704 = vmatprep.subr.bf16.mxu0 %v12739_v54  ;;  %v12779_v54 = vcombine.high %v274_v44, %v278_v46 }
 0x364   :  { %11211 = vmatpush1.bf16.msra.mxu1 %v12668_v53  ;;  %v12708_v53 = vcombine.low %v203_v13, %v207_v36  ;;  %v243_v13 = vld [vmem:[%s19895_s1 + $0x658] sm:$0xff] }
 0x365   :  { %11221 = vmatprep.subr.bf16.mxu1 %v12677_v55  ;;  %v12717_v55 = vcombine.high %v211_v47, %v215_v50  ;;  %v247_v36 = vld [vmem:[%s19895_s1 + $0x678] sm:$0xff] }
 0x366   :  { %10705 = vmatpush1.bf16.msra.mxu0 %v12738_v5  ;;  %v12778_v5 = vcombine.low %v274_v44, %v278_v46  ;;  %v314_v44 = vld [vmem:[%s19895_s1 + $0x890] sm:$0xff] }
 0x367   :  { %11213 = vmatmul.mubr.bf16.vlgmr.msra.gmra.mrb[8].mxu1 %v14882_v17  ;;  %10706 = vmatprep.subr.bf16.mxu0 %v12747_v9  ;;  %v195_v17 = vld [vmem:[%s19895_s1 + $0x4d8] sm:$0xff]  ;;  %v12787_v9 = vcombine.high %v282_v59, %v286_v62  ;;  %v318_v46 = vld [vmem:[%s19895_s1 + $0x8b0] sm:$0xff] }
 0x368   :  { %11222 = vmatpush1.bf16.msra.mxu1 %v12676_v52  ;;  %11253 = vmatprep.mubr.bf16.mxu1 %v14892_v21  ;;  %v12701_v35 = vcombine.high %v195_v17, %v199_v38  ;;  %v266_v21 = vld [vmem:[%s19895_s1 + $0x710] sm:$0xff]  ;;  %v12700_v39 = vcombine.low %v195_v17, %v199_v38  ;;  %v12716_v52 = vcombine.low %v211_v47, %v215_v50  ;;  %v235_v17 = vld [vmem:[%s19895_s1 + $0x618] sm:$0xff] }
 0x369   :  { %11223 = vmatprep.subr.bf16.mxu1 %v12685_v11  ;;  %v12771_v40 = vcombine.high %v266_v21, %v270_v0  ;;  %v12770_v51 = vcombine.low %v266_v21, %v270_v0  ;;  %v12725_v11 = vcombine.high %v219_v60, %v223_v23  ;;  %v239_v38 = vld [vmem:[%s19895_s1 + $0x638] sm:$0xff]  ;;  %v306_v21 = vld [vmem:[%s19895_s1 + $0x850] sm:$0xff] }
 0x36a   :  { %10707 = vmatpush1.bf16.msra.mxu0 %v12746_v25  ;;  %v12786_v25 = vcombine.low %v282_v59, %v286_v62  ;;  %v310_v0 = vld [vmem:[%s19895_s1 + $0x870] sm:$0xff]  ;;  %v251_v47 = vld [vmem:[%s19895_s1 + $0x698] sm:$0xff] }
 0x36b   :  { %10708 = vmatprep.subr.bf16.mxu0 %v12755_v20  ;;  %v12795_v20 = vcombine.high %v290_v18, %v294_v16  ;;  %v255_v50 = vld [vmem:[%s19895_s1 + $0x6b8] sm:$0xff]  ;;  %v322_v59 = vld [vmem:[%s19895_s1 + $0x8d0] sm:$0xff] }
 0x36c   :  { %11224 = vmatpush1.bf16.msra.mxu1 %v12684_v19  ;;  %v12724_v19 = vcombine.low %v219_v60, %v223_v23  ;;  %v326_v62 = vld [vmem:[%s19895_s1 + $0x8f0] sm:$0xff]  ;;  %v259_v60 = vld [vmem:[%s19895_s1 + $0x6d8] sm:$0xff] }
 0x36d   :  { %11225 = vmatprep.subr.bf16.mxu1 %v12693_v58  ;;  %v12733_v58 = vcombine.high %v227_v61, %v231_v41  ;;  %v263_v23 = vld [vmem:[%s19895_s1 + $0x6f8] sm:$0xff] }
 0x36e   :  { %10709 = vmatpush1.bf16.msra.mxu0 %v12754_v30  ;;  %v12794_v30 = vcombine.low %v290_v18, %v294_v16  ;;  %v330_v18 = vld [vmem:[%s19895_s1 + $0x910] sm:$0xff] }
 0x36f   :  { %10710 = vmatprep.subr.bf16.mxu0 %v12763_v34  ;;  %v12803_v34 = vcombine.high %v298_v24, %v302_v27  ;;  %v334_v16 = vld [vmem:[%s19895_s1 + $0x930] sm:$0xff] }
 0x370   :  { %11226 = vmatpush1.bf16.msra.mxu1 %v12692_v31  ;;  %v12732_v31 = vcombine.low %v227_v61, %v231_v41  ;;  %v267_v61 = vld [vmem:[%s19895_s1 + $0x718] sm:$0xff] }
 0x371   :  { %11227 = vmatprep.subr.bf16.mxu1 %v12701_v35  ;;  %v12741_v35 = vcombine.high %v235_v17, %v239_v38  ;;  %v271_v41 = vld [vmem:[%s19895_s1 + $0x738] sm:$0xff] }
 0x372   :  { %10711 = vmatpush1.bf16.msra.mxu0 %v12762_v37  ;;  %v12802_v37 = vcombine.low %v298_v24, %v302_v27  ;;  %v338_v24 = vld [vmem:[%s19895_s1 + $0x950] sm:$0xff] }
 0x373   :  { %10712 = vmatprep.subr.bf16.mxu0 %v12771_v40  ;;  %v12811_v40 = vcombine.high %v306_v21, %v310_v0  ;;  %v342_v27 = vld [vmem:[%s19895_s1 + $0x970] sm:$0xff] }
 0x374   :  { %11228 = vmatpush1.bf16.msra.mxu1 %v12700_v39  ;;  %v12740_v39 = vcombine.low %v235_v17, %v239_v38  ;;  %v275_v17 = vld [vmem:[%s19895_s1 + $0x758] sm:$0xff] }
 0x375   :  { %11229 = vmatprep.subr.bf16.mxu1 %v12709_v42  ;;  %v12749_v42 = vcombine.high %v243_v13, %v247_v36  ;;  %v279_v38 = vld [vmem:[%s19895_s1 + $0x778] sm:$0xff] }
 0x376   :  { %10713 = vmatpush1.bf16.msra.mxu0 %v12770_v51  ;;  %v12810_v51 = vcombine.low %v306_v21, %v310_v0  ;;  %v346_v21 = vld [vmem:[%s19895_s1 + $0x990] sm:$0xff] }
 0x377   :  { %10714 = vmatprep.subr.bf16.mxu0 %v12779_v54  ;;  %v12819_v54 = vcombine.high %v314_v44, %v318_v46  ;;  %v350_v0 = vld [vmem:[%s19895_s1 + $0x9b0] sm:$0xff] }
 0x378   :  { %11230 = vmatpush1.bf16.msra.mxu1 %v12708_v53  ;;  %v12748_v53 = vcombine.low %v243_v13, %v247_v36  ;;  %v283_v13 = vld [vmem:[%s19895_s1 + $0x798] sm:$0xff] }
 0x379   :  { %11231 = vmatprep.subr.bf16.mxu1 %v12717_v55  ;;  %v12757_v55 = vcombine.high %v251_v47, %v255_v50  ;;  %v287_v36 = vld [vmem:[%s19895_s1 + $0x7b8] sm:$0xff] }
 0x37a   :  { %10715 = vmatpush1.bf16.msra.mxu0 %v12778_v5  ;;  %v12818_v5 = vcombine.low %v314_v44, %v318_v46  ;;  %v354_v44 = vld [vmem:[%s19895_s1 + $0x9d0] sm:$0xff] }
 0x37b   :  { %10716 = vmatprep.subr.bf16.mxu0 %v12787_v9  ;;  %v12827_v9 = vcombine.high %v322_v59, %v326_v62  ;;  %v358_v46 = vld [vmem:[%s19895_s1 + $0x9f0] sm:$0xff] }
 0x37c   :  { %11232 = vmatpush1.bf16.msra.mxu1 %v12716_v52  ;;  %v12756_v52 = vcombine.low %v251_v47, %v255_v50  ;;  %v291_v47 = vld [vmem:[%s19895_s1 + $0x7d8] sm:$0xff] }
 0x37d   :  { %11233 = vmatprep.subr.bf16.mxu1 %v12725_v11  ;;  %v12765_v11 = vcombine.high %v259_v60, %v263_v23  ;;  %v295_v50 = vld [vmem:[%s19895_s1 + $0x7f8] sm:$0xff] }
 0x37e   :  { %10717 = vmatpush1.bf16.msra.mxu0 %v12786_v25  ;;  %v12826_v25 = vcombine.low %v322_v59, %v326_v62  ;;  %v362_v59 = vld [vmem:[%s19895_s1 + $0xa10] sm:$0xff] }
 0x37f   :  { %10718 = vmatprep.subr.bf16.mxu0 %v12795_v20  ;;  %v12835_v20 = vcombine.high %v330_v18, %v334_v16  ;;  %v366_v62 = vld [vmem:[%s19895_s1 + $0xa30] sm:$0xff] }
 0x380   :  { %11234 = vmatpush1.bf16.msra.mxu1 %v12724_v19  ;;  %v12764_v19 = vcombine.low %v259_v60, %v263_v23  ;;  %v299_v60 = vld [vmem:[%s19895_s1 + $0x818] sm:$0xff] }
 0x381   :  { %11235 = vmatprep.subr.bf16.mxu1 %v12733_v58  ;;  %v12773_v58 = vcombine.high %v267_v61, %v271_v41  ;;  %v303_v23 = vld [vmem:[%s19895_s1 + $0x838] sm:$0xff] }
 0x382   :  { %10719 = vmatpush1.bf16.msra.mxu0 %v12794_v30  ;;  %v12834_v30 = vcombine.low %v330_v18, %v334_v16  ;;  %v370_v18 = vld [vmem:[%s19895_s1 + $0xa50] sm:$0xff] }
 0x383   :  { %10729 = vmatprep.subr.bf16.mxu0 %v12803_v34  ;;  %v12843_v34 = vcombine.high %v338_v24, %v342_v27  ;;  %v374_v16 = vld [vmem:[%s19895_s1 + $0xa70] sm:$0xff] }
 0x384   :  { %11236 = vmatpush1.bf16.msra.mxu1 %v12732_v31  ;;  %v12772_v31 = vcombine.low %v267_v61, %v271_v41  ;;  %v307_v61 = vld [vmem:[%s19895_s1 + $0x858] sm:$0xff] }
 0x385   :  { %11237 = vmatprep.subr.bf16.mxu1 %v12741_v35  ;;  %10721 = vmatmul.mubr.bf16.vlgmr.msra.gmra.mrb[4].mxu0 %v15091_v29  ;;  %v12781_v35 = vcombine.high %v275_v17, %v279_v38  ;;  %v311_v41 = vld [vmem:[%s19895_s1 + $0x878] sm:$0xff] }
 0x386   :  { %10730 = vmatpush1.bf16.msra.mxu0 %v12802_v37  ;;  %10761 = vmatprep.mubr.bf16.mxu0 %v15101_v33  ;;  %v12842_v37 = vcombine.low %v338_v24, %v342_v27  ;;  %v378_v24 = vld [vmem:[%s19895_s1 + $0xa90] sm:$0xff] }
 0x387   :  { %10731 = vmatprep.subr.bf16.mxu0 %v12811_v40  ;;  %v12851_v40 = vcombine.high %v346_v21, %v350_v0  ;;  %v382_v27 = vld [vmem:[%s19895_s1 + $0xab0] sm:$0xff] }
 0x388   :  { %11238 = vmatpush1.bf16.msra.mxu1 %v12740_v39  ;;  %v12780_v39 = vcombine.low %v275_v17, %v279_v38  ;;  %v315_v17 = vld [vmem:[%s19895_s1 + $0x898] sm:$0xff] }
 0x389   :  { %11239 = vmatprep.subr.bf16.mxu1 %v12749_v42  ;;  %v12789_v42 = vcombine.high %v283_v13, %v287_v36  ;;  %v319_v38 = vld [vmem:[%s19895_s1 + $0x8b8] sm:$0xff] }
 0x38a   :  { %10732 = vmatpush1.bf16.msra.mxu0 %v12810_v51  ;;  %v12850_v51 = vcombine.low %v346_v21, %v350_v0  ;;  %v386_v21 = vld [vmem:[%s19895_s1 + $0xad0] sm:$0xff] }
 0x38b   :  { %10733 = vmatprep.subr.bf16.mxu0 %v12819_v54  ;;  %v12859_v54 = vcombine.high %v354_v44, %v358_v46  ;;  %v390_v0 = vld [vmem:[%s19895_s1 + $0xaf0] sm:$0xff] }
 0x38c   :  { %11240 = vmatpush1.bf16.msra.mxu1 %v12748_v53  ;;  %v12788_v53 = vcombine.low %v283_v13, %v287_v36  ;;  %v327_v13 = vld [vmem:[%s19895_s1 + $0x8f8] sm:$0xff]  ;;  %v12882_v36 = vcombine.low %v378_v24, %v382_v27 }
 0x38d   :  { %11241 = vmatprep.subr.bf16.mxu1 %v12757_v55  ;;  %v12797_v55 = vcombine.high %v291_v47, %v295_v50 }
 0x38e   :  { %10734 = vmatpush1.bf16.msra.mxu0 %v12818_v5  ;;  %v12858_v5 = vcombine.low %v354_v44, %v358_v46  ;;  %v331_v44 = vld [vmem:[%s19895_s1 + $0x918] sm:$0xff] }
 0x38f   :  { %10735 = vmatprep.subr.bf16.mxu0 %v12827_v9  ;;  %v12867_v9 = vcombine.high %v362_v59, %v366_v62  ;;  %v335_v46 = vld [vmem:[%s19895_s1 + $0x938] sm:$0xff] }
 0x390   :  { %11242 = vmatpush1.bf16.msra.mxu1 %v12756_v52  ;;  %v12796_v52 = vcombine.low %v291_v47, %v295_v50  ;;  %v12890_v47 = vcombine.low %v386_v21, %v390_v0 }
 0x391   :  { %11243 = vmatprep.subr.bf16.mxu1 %v12765_v11  ;;  %v12805_v11 = vcombine.high %v299_v60, %v303_v23 }
 0x392   :  { %10736 = vmatpush1.bf16.msra.mxu0 %v12826_v25  ;;  %v12866_v25 = vcombine.low %v362_v59, %v366_v62  ;;  %v339_v59 = vld [vmem:[%s19895_s1 + $0x958] sm:$0xff] }
 0x393   :  { %10737 = vmatprep.subr.bf16.mxu0 %v12835_v20  ;;  %v12875_v20 = vcombine.high %v370_v18, %v374_v16  ;;  %v343_v62 = vld [vmem:[%s19895_s1 + $0x978] sm:$0xff] }
 0x394   :  { %11244 = vmatpush1.bf16.msra.mxu1 %v12764_v19  ;;  %v12804_v19 = vcombine.low %v299_v60, %v303_v23  ;;  %v12836_v23 = vcombine.low %v331_v44, %v335_v46 }
 0x395   :  { %11245 = vmatprep.subr.bf16.mxu1 %v12773_v58  ;;  %v12813_v58 = vcombine.high %v307_v61, %v311_v41 }
 0x396   :  { %10738 = vmatpush1.bf16.msra.mxu0 %v12834_v30  ;;  %v12874_v30 = vcombine.low %v370_v18, %v374_v16  ;;  %v347_v18 = vld [vmem:[%s19895_s1 + $0x998] sm:$0xff] }
 0x397   :  { %10739 = vmatprep.subr.bf16.mxu0 %v12843_v34  ;;  %v12883_v34 = vcombine.high %v378_v24, %v382_v27  ;;  %v351_v16 = vld [vmem:[%s19895_s1 + $0x9b8] sm:$0xff] }
 0x398   :  { %11246 = vmatpush1.bf16.msra.mxu1 %v12772_v31  ;;  %v12812_v31 = vcombine.low %v307_v61, %v311_v41  ;;  %v12844_v41 = vcombine.low %v339_v59, %v343_v62  ;;  %v355_v24 = vld [vmem:[%s19895_s1 + $0x9d8] sm:$0xff] }
 0x399   :  { %11247 = vmatprep.subr.bf16.mxu1 %v12781_v35  ;;  %v12821_v35 = vcombine.high %v315_v17, %v319_v38  ;;  %v359_v27 = vld [vmem:[%s19895_s1 + $0x9f8] sm:$0xff] }
 0x39a   :  { %10740 = vmatpush1.bf16.msra.mxu0 %v12842_v37  ;;  %v12820_v37 = vcombine.low %v315_v17, %v319_v38  ;;  %v12852_v38 = vcombine.low %v347_v18, %v351_v16 }
 0x39b   :  { %10741 = vmatprep.subr.bf16.mxu0 %v12851_v40 }
 0x39c   :  { %11248 = vmatpush1.bf16.msra.mxu1 %v12780_v39  ;;  %v12891_v39 = vcombine.high %v386_v21, %v390_v0  ;;  %v363_v21 = vld [vmem:[%s19895_s1 + $0xa18] sm:$0xff] }
 0x39d   :  { %11249 = vmatprep.subr.bf16.mxu1 %v12789_v42  ;;  %v398_v42 = vld [vmem:[%s19895_s1 + $0xb30] sm:$0xff]  ;;  %v367_v0 = vld [vmem:[%s19895_s1 + $0xa38] sm:$0xff] }
 0x39e   :  { %10742 = vmatpush1.bf16.msra.mxu0 %v12850_v51 }
 0x39f   :  { %10743 = vmatprep.subr.bf16.mxu0 %v12859_v54  ;;  %v402_v54 = vld [vmem:[%s19895_s1 + $0xb50] sm:$0xff] }
 0x3a0   :  { %11250 = vmatpush1.bf16.msra.mxu1 %v12788_v53  ;;  %v12837_v53 = vcombine.high %v331_v44, %v335_v46  ;;  %v12868_v46 = vcombine.low %v363_v21, %v367_v0 }
 0x3a1   :  { %11251 = vmatprep.subr.bf16.mxu1 %v12797_v55  ;;  %v406_v55 = vld [vmem:[%s19895_s1 + $0xb70] sm:$0xff] }
 0x3a2   :  { %10744 = vmatpush1.bf16.msra.mxu0 %v12858_v5  ;;  %v12907_v5 = vcombine.high %v402_v54, %v406_v55  ;;  %v12906_v61 = vcombine.low %v402_v54, %v406_v55  ;;  %v379_v54 = vld [vmem:[%s19895_s1 + $0xa98] sm:$0xff] }
 0x3a3   :  { %10745 = vmatprep.subr.bf16.mxu0 %v12867_v9  ;;  %v410_v9 = vld [vmem:[%s19895_s1 + $0xb90] sm:$0xff]  ;;  %v383_v55 = vld [vmem:[%s19895_s1 + $0xab8] sm:$0xff] }
 0x3a4   :  { %11252 = vmatpush1.bf16.msra.mxu1 %v12796_v52  ;;  %v12845_v52 = vcombine.high %v339_v59, %v343_v62 }
 0x3a5   :  { %11262 = vmatprep.subr.bf16.mxu1 %v12805_v11  ;;  %v414_v11 = vld [vmem:[%s19895_s1 + $0xbb0] sm:$0xff] }
 0x3a6   :  { %10746 = vmatpush1.bf16.msra.mxu0 %v12866_v25  ;;  %v12915_v25 = vcombine.high %v410_v9, %v414_v11  ;;  %v12914_v17 = vcombine.low %v410_v9, %v414_v11  ;;  %v387_v9 = vld [vmem:[%s19895_s1 + $0xad8] sm:$0xff] }
 0x3a7   :  { %11254 = vmatmul.mubr.bf16.vlgmr.msra.gmra.mrb[8].mxu1 %v15091_v29  ;;  %10747 = vmatprep.subr.bf16.mxu0 %v12875_v20  ;;  %v323_v29 = vld [vmem:[%s19895_s1 + $0x8d8] sm:$0xff]  ;;  %v418_v20 = vld [vmem:[%s19895_s1 + $0xbd0] sm:$0xff] }
 0x3a8   :  { %11263 = vmatpush1.bf16.msra.mxu1 %v12804_v19  ;;  %11294 = vmatprep.mubr.bf16.mxu1 %v15101_v33  ;;  %v12829_v40 = vcombine.high %v323_v29, %v327_v13  ;;  %v394_v33 = vld [vmem:[%s19895_s1 + $0xb10] sm:$0xff]  ;;  %v12828_v50 = vcombine.low %v323_v29, %v327_v13  ;;  %v12853_v19 = vcombine.high %v347_v18, %v351_v16  ;;  %v391_v11 = vld [vmem:[%s19895_s1 + $0xaf8] sm:$0xff]  ;;  %v1610_v18 = vlaneseq }
 0x3a9   :  { %11264 = vmatprep.subr.bf16.mxu1 %v12813_v58  ;;  %v12899_v51 = vcombine.high %v394_v33, %v398_v42  ;;  %v12898_v60 = vcombine.low %v394_v33, %v398_v42  ;;  %v422_v58 = vld [vmem:[%s19895_s1 + $0xbf0] sm:$0xff]  ;;  %v12860_v13 = vcombine.low %v355_v24, %v359_v27  ;;  %v371_v33 = vld [vmem:[%s19895_s1 + $0xa58] sm:$0xff] }
 0x3aa   :  { %10748 = vmatpush1.bf16.msra.mxu0 %v12874_v30  ;;  %v12923_v30 = vcombine.high %v418_v20, %v422_v58  ;;  %v12922_v29 = vcombine.low %v418_v20, %v422_v58  ;;  %v375_v42 = vld [vmem:[%s19895_s1 + $0xa78] sm:$0xff]  ;;  %v462_v20 = vld [vmem:[%s19895_s1 + $0xd30] sm:$0xff] }
 0x3ab   :  { %10749 = vmatprep.subr.bf16.mxu0 %v12883_v34  ;;  %v426_v34 = vld [vmem:[%s19895_s1 + $0xc10] sm:$0xff]  ;;  %v12876_v62 = vcombine.low %v371_v33, %v375_v42  ;;  %v395_v58 = vld [vmem:[%s19895_s1 + $0xb18] sm:$0xff] }
 0x3ac   :  { %11265 = vmatpush1.bf16.msra.mxu1 %v12812_v31  ;;  %v12861_v31 = vcombine.high %v355_v24, %v359_v27  ;;  %v399_v24 = vld [vmem:[%s19895_s1 + $0xb38] sm:$0xff]  ;;  %v17819_v27 = vshrl.u32 %v1610_v18, 7 }
 0x3ad   :  { %11266 = vmatprep.subr.bf16.mxu1 %v12821_v35  ;;  %v430_v35 = vld [vmem:[%s19895_s1 + $0xc30] sm:$0xff] }
 0x3ae   :  { %10750 = vmatpush1.bf16.msra.mxu0 %v12882_v36  ;;  %v12931_v36 = vcombine.high %v426_v34, %v430_v35  ;;  %v12930_v44 = vcombine.low %v426_v34, %v430_v35  ;;  %v466_v34 = vld [vmem:[%s19895_s1 + $0xd50] sm:$0xff] }
 0x3af   :  { %10751 = vmatprep.subr.bf16.mxu0 %v12891_v39  ;;  %v434_v39 = vld [vmem:[%s19895_s1 + $0xc50] sm:$0xff] }
 0x3b0   :  { %11267 = vmatpush1.bf16.msra.mxu1 %v12820_v37  ;;  %v12869_v37 = vcombine.high %v363_v21, %v367_v0  ;;  %v470_v35 = vld [vmem:[%s19895_s1 + $0xd70] sm:$0xff]  ;;  %v1612_v21 = vsub.s32 0, %v17819_v27  ;;  %v403_v0 = vld [vmem:[%s19895_s1 + $0xb58] sm:$0xff] }
 0x3b1   :  { %11268 = vmatprep.subr.bf16.mxu1 %v12829_v40  ;;  %v438_v40 = vld [vmem:[%s19895_s1 + $0xc70] sm:$0xff] }
 0x3b2   :  { %10752 = vmatpush1.bf16.msra.mxu0 %v12890_v47  ;;  %v12939_v47 = vcombine.high %v434_v39, %v438_v40  ;;  %v12938_v59 = vcombine.low %v434_v39, %v438_v40  ;;  %v12900_v39 = vcombine.low %v395_v58, %v399_v24  ;;  %v12971_v40 = vcombine.high %v466_v34, %v470_v35 }
 0x3b3   :  { %10753 = vmatprep.subr.bf16.mxu0 %v12899_v51  ;;  %v442_v51 = vld [vmem:[%s19895_s1 + $0xc90] sm:$0xff] }
 0x3b4   :  { %11269 = vmatpush1.bf16.msra.mxu1 %v12828_v50  ;;  %v12877_v50 = vcombine.high %v371_v33, %v375_v42  ;;  %v474_v42 = vld [vmem:[%s19895_s1 + $0xd90] sm:$0xff] }
 0x3b5   :  { %11270 = vmatprep.subr.bf16.mxu1 %v12837_v53  ;;  %v446_v53 = vld [vmem:[%s19895_s1 + $0xcb0] sm:$0xff] }
 0x3b6   :  { %10754 = vmatpush1.bf16.msra.mxu0 %v12898_v60  ;;  %v12947_v60 = vcombine.high %v442_v51, %v446_v53  ;;  %v12946_v16 = vcombine.low %v442_v51, %v446_v53  ;;  %v12970_v53 = vcombine.low %v466_v34, %v470_v35 }
 0x3b7   :  { %10755 = vmatprep.subr.bf16.mxu0 %v12907_v5  ;;  %v450_v5 = vld [vmem:[%s19895_s1 + $0xcd0] sm:$0xff] }
 0x3b8   :  { %11271 = vmatpush1.bf16.msra.mxu1 %v12836_v23  ;;  %v12885_v23 = vcombine.high %v379_v54, %v383_v55 }
 0x3b9   :  { %11272 = vmatprep.subr.bf16.mxu1 %v12845_v52  ;;  %v454_v52 = vld [vmem:[%s19895_s1 + $0xcf0] sm:$0xff] }
 0x3ba   :  { %10756 = vmatpush1.bf16.msra.mxu0 %v12906_v61  ;;  %v12884_v61 = vcombine.low %v379_v54, %v383_v55 }
 0x3bb   :  { %10757 = vmatprep.subr.bf16.mxu0 %v12915_v25  ;;  %v12893_v25 = vcombine.high %v387_v9, %v391_v11 }
 0x3bc   :  { %11273 = vmatpush1.bf16.msra.mxu1 %v12844_v41  ;;  %v12955_v41 = vcombine.high %v450_v5, %v454_v52 }
 0x3bd   :  { %11274 = vmatprep.subr.bf16.mxu1 %v12853_v19  ;;  %v458_v19 = vld [vmem:[%s19895_s1 + $0xd10] sm:$0xff] }
 0x3be   :  { %10758 = vmatpush1.bf16.msra.mxu0 %v12914_v17  ;;  %v12954_v17 = vcombine.low %v450_v5, %v454_v52 }
 0x3bf   :  { %10759 = vmatprep.subr.bf16.mxu0 %v12923_v30  ;;  %v12963_v30 = vcombine.high %v458_v19, %v462_v20 }
 0x3c0   :  { %11275 = vmatpush1.bf16.msra.mxu1 %v12852_v38  ;;  %v12892_v38 = vcombine.low %v387_v9, %v391_v11  ;;  %v419_v9 = vld [vmem:[%s19895_s1 + $0xbd8] sm:$0xff] }
 0x3c1   :  { %11276 = vmatprep.subr.bf16.mxu1 %v12861_v31  ;;  %v12901_v31 = vcombine.high %v395_v58, %v399_v24  ;;  %v423_v11 = vld [vmem:[%s19895_s1 + $0xbf8] sm:$0xff] }
 0x3c2   :  { %10760 = vmatpush1.bf16.msra.mxu0 %v12922_v29  ;;  %v407_v29 = vld [vmem:[%s19895_s1 + $0xb78] sm:$0xff]  ;;  %v12925_v24 = vcombine.high %v419_v9, %v423_v11 }
 0x3c3   :  { %10770 = vmatprep.subr.bf16.mxu0 %v12931_v36  ;;  %v1608_v36 = vld [vmem:[%s19897_s2] sm:$0xff]  ;;  %v12909_v33 = vcombine.high %v403_v0, %v407_v29  ;;  %v12908_v54 = vcombine.low %v403_v0, %v407_v29  ;;  %v502_v0 = vld [vmem:[%s19895_s1 + $0xe70] sm:$0xff]  ;;  %v435_v29 = vld [vmem:[%s19895_s1 + $0xc58] sm:$0xff] }
 0x3c4   :  { %11277 = vmatpush1.bf16.msra.mxu1 %v12860_v13  ;;  %v12962_v13 = vcombine.low %v458_v19, %v462_v20 }
 0x3c5   :  { %11278 = vmatprep.subr.bf16.mxu1 %v12869_v37  ;;  %10762 = vmatmul.mubr.bf16.vlgmr.msra.gmra.mrb[4].mxu0 %v15300_v45  ;;  %v1616_v37 = vsub.s32 1, %v17819_v27 }
 0x3c6   :  { %10771 = vmatpush1.bf16.msra.mxu0 %v12930_v44  ;;  %10802 = vmatprep.mubr.bf16.mxu0 %v15310_v49  ;;  %v478_v44 = vld [vmem:[%s19895_s1 + $0xdb0] sm:$0xff] }
 0x3c7   :  { %10772 = vmatprep.subr.bf16.mxu0 %v12939_v47  ;;  %v411_v47 = vld [vmem:[%s19895_s1 + $0xb98] sm:$0xff]  ;;  %v1617_v51 = vrot.slane %v1608_v36, %v1616_v37  ;;  %v12979_v55 = vcombine.high %v474_v42, %v478_v44 }
 0x3c8   :  { %11279 = vmatpush1.bf16.msra.mxu1 %v12868_v46  ;;  %v1613_v46 = vrot.slane %v1608_v36, %v1612_v21  ;;  %v498_v21 = vld [vmem:[%s19895_s1 + $0xe50] sm:$0xff] }
 0x3c9   :  { %11280 = vmatprep.subr.bf16.mxu1 %v12877_v50  ;;  %v415_v50 = vld [vmem:[%s19895_s1 + $0xbb8] sm:$0xff] }
 0x3ca   :  { %10773 = vmatpush1.bf16.msra.mxu0 %v12938_v59  ;;  %v12916_v19 = vcombine.low %v411_v47, %v415_v50 }
 0x3cb   :  { %10774 = vmatprep.subr.bf16.mxu0 %v12947_v60  ;;  %v482_v60 = vld [vmem:[%s19895_s1 + $0xdd0] sm:$0xff] }
 0x3cc   :  { %11281 = vmatpush1.bf16.msra.mxu1 %v12876_v62  ;;  %v12917_v62 = vcombine.high %v411_v47, %v415_v50  ;;  %v13002_v47 = vcombine.low %v498_v21, %v502_v0 }
 0x3cd   :  { %11282 = vmatprep.subr.bf16.mxu1 %v12885_v23  ;;  %v486_v23 = vld [vmem:[%s19895_s1 + $0xdf0] sm:$0xff] }
 0x3ce   :  { %10775 = vmatpush1.bf16.msra.mxu0 %v12946_v16  ;;  %v12987_v20 = vcombine.high %v482_v60, %v486_v23 }
 0x3cf   :  { %10776 = vmatprep.subr.bf16.mxu0 %v12955_v41 }
 0x3d0   :  { %11283 = vmatpush1.bf16.msra.mxu1 %v12884_v61  ;;  %v12978_v61 = vcombine.low %v474_v42, %v478_v44  ;;  %v510_v42 = vld [vmem:[%s19895_s1 + $0xeb0] sm:$0xff]  ;;  %v443_v44 = vld [vmem:[%s19895_s1 + $0xc98] sm:$0xff] }
 0x3d1   :  { %11284 = vmatprep.subr.bf16.mxu1 %v12893_v25 }
 0x3d2   :  { %10777 = vmatpush1.bf16.msra.mxu0 %v12954_v17  ;;  %v490_v17 = vld [vmem:[%s19895_s1 + $0xe10] sm:$0xff] }
 0x3d3   :  { %10778 = vmatprep.subr.bf16.mxu0 %v12963_v30  ;;  %v431_v30 = vld [vmem:[%s19895_s1 + $0xc38] sm:$0xff] }
 0x3d4   :  { %11285 = vmatpush1.bf16.msra.mxu1 %v12892_v38  ;;  %v494_v38 = vld [vmem:[%s19895_s1 + $0xe30] sm:$0xff] }
 0x3d5   :  { %11286 = vmatprep.subr.bf16.mxu1 %v12901_v31  ;;  %v12924_v31 = vcombine.low %v419_v9, %v423_v11  ;;  %v12995_v34 = vcombine.high %v490_v17, %v494_v38  ;;  %v12994_v36 = vcombine.low %v490_v17, %v494_v38  ;;  %v459_v9 = vld [vmem:[%s19895_s1 + $0xd18] sm:$0xff] }
 0x3d6   :  { %10779 = vmatpush1.bf16.msra.mxu0 %v12962_v13  ;;  %v439_v13 = vld [vmem:[%s19895_s1 + $0xc78] sm:$0xff] }
 0x3d7   :  { %10780 = vmatprep.subr.bf16.mxu0 %v12971_v40  ;;  %v12941_v40 = vcombine.high %v435_v29, %v439_v13  ;;  %v12940_v50 = vcombine.low %v435_v29, %v439_v13  ;;  %v463_v11 = vld [vmem:[%s19895_s1 + $0xd38] sm:$0xff] }
 0x3d8   :  { %11287 = vmatpush1.bf16.msra.mxu1 %v12900_v39  ;;  %v10066_v59 = vpop.f32.mrb[0].mxu0  ;;  %v13003_v39 = vcombine.high %v498_v21, %v502_v0  ;;  %v471_v17 = vld [vmem:[%s19895_s1 + $0xd78] sm:$0xff] }
 0x3d9   :  { %11288 = vmatprep.subr.bf16.mxu1 %v12909_v33  ;;  %v14305_v5 = vadd.f32 %v10066_v59, %v1613_v46  ;;  %v10068_v52 = vpop.f32.mrb[1].mxu0  ;;  %v506_v33 = vld [vmem:[%s19895_s1 + $0xe90] sm:$0xff]  ;;  %v447_v46 = vld [vmem:[%s19895_s1 + $0xcb8] sm:$0xff] }
 0x3da   :  { %v14307_v18 = vadd.f32 %v10068_v52, %v1617_v51  ;;  %v10070_v16 = vpop.f32.mrb[2].mxu0  ;;  %10781 = vmatpush1.bf16.msra.mxu0 %v12970_v53  ;;  %v13011_v51 = vcombine.high %v506_v33, %v510_v42  ;;  %v12949_v53 = vcombine.high %v443_v44, %v447_v46  ;;  %v455_v59 = vld [vmem:[%s19895_s1 + $0xcf8] sm:$0xff]  ;;  %v526_v52 = vld [vmem:[%s19895_s1 + $0xf30] sm:$0xff] }
 0x3db   :  { %v17863_v41 = vadd.f32 %v14305_v5, %v15430_v10  ;;  %v10071_v25 = vpop.f32.mrb[3].mxu0  ;;  %10782 = vmatprep.subr.bf16.mxu0 %v12979_v55  ;;  %v427_v10 = vld [vmem:[%s19895_s1 + $0xc18] sm:$0xff]  ;;  %v518_v55 = vld [vmem:[%s19895_s1 + $0xef0] sm:$0xff] }
 0x3dc   :  { %11289 = vmatpush1.bf16.msra.mxu1 %v12908_v54  ;;  %v17866_v58 = vadd.f32 %v14307_v18, %v15438_v14  ;;  %v12986_v14 = vcombine.low %v482_v60, %v486_v23  ;;  %v12933_v35 = vcombine.high %v427_v10, %v431_v30  ;;  %v12932_v37 = vcombine.low %v427_v10, %v431_v30  ;;  %v514_v54 = vld [vmem:[%s19895_s1 + $0xed0] sm:$0xff]  ;;  %v479_v21 = vld [vmem:[%s19895_s1 + $0xdb8] sm:$0xff] }
 0x3dd   :  { %11290 = vmatprep.subr.bf16.mxu1 %v12917_v62  ;;  %v13010_v62 = vcombine.low %v506_v33, %v510_v42  ;;  %v12948_v60 = vcombine.low %v443_v44, %v447_v46  ;;  %v13019_v23 = vcombine.high %v514_v54, %v518_v55  ;;  %v13018_v18 = vcombine.low %v514_v54, %v518_v55  ;;  %v483_v33 = vld [vmem:[%s19895_s1 + $0xdd8] sm:$0xff]  ;;  %v554_v55 = vld [vmem:[%s19895_s1 + $0x1010] sm:$0xff] }
 0x3de   :  { %10783 = vmatpush1.bf16.msra.mxu0 %v12978_v61  ;;  %v12965_v25 = vcombine.high %v459_v9, %v463_v11  ;;  %v12964_v10 = vcombine.low %v459_v9, %v463_v11  ;;  %v487_v42 = vld [vmem:[%s19895_s1 + $0xdf8] sm:$0xff]  ;;  %v566_v9 = vld [vmem:[%s19895_s1 + $0x1070] sm:$0xff] }
 0x3df   :  { %10784 = vmatprep.subr.bf16.mxu0 %v12987_v20  ;;  %v534_v20 = vld [vmem:[%s19895_s1 + $0xf70] sm:$0xff]  ;;  %v12989_v54 = vcombine.high %v483_v33, %v487_v42  ;;  %v499_v11 = vld [vmem:[%s19895_s1 + $0xe58] sm:$0xff] }
 0x3e0   :  { %11291 = vmatpush1.bf16.msra.mxu1 %v12916_v19  ;;  %v530_v19 = vld [vmem:[%s19895_s1 + $0xf50] sm:$0xff] }
 0x3e1   :  { %11292 = vmatprep.subr.bf16.mxu1 %v12925_v24  ;;  %v467_v24 = vld [vmem:[%s19895_s1 + $0xd58] sm:$0xff]  ;;  %v13035_v30 = vcombine.high %v530_v19, %v534_v20  ;;  %v13034_v0 = vcombine.low %v530_v19, %v534_v20  ;;  %v570_v20 = vld [vmem:[%s19895_s1 + $0x1090] sm:$0xff] }
 0x3e2   :  { %10785 = vmatpush1.bf16.msra.mxu0 %v12986_v14  ;;  %v12973_v14 = vcombine.high %v467_v24, %v471_v17  ;;  %v12972_v29 = vcombine.low %v467_v24, %v471_v17  ;;  %v574_v24 = vld [vmem:[%s19895_s1 + $0x10b0] sm:$0xff]  ;;  %v507_v17 = vld [vmem:[%s19895_s1 + $0xe98] sm:$0xff] }
 0x3e3   :  { %10786 = vmatprep.subr.bf16.mxu0 %v12995_v34  ;;  %v542_v34 = vld [vmem:[%s19895_s1 + $0xfb0] sm:$0xff] }
 0x3e4   :  { %11293 = vmatpush1.bf16.msra.mxu1 %v12924_v31  ;;  %v538_v31 = vld [vmem:[%s19895_s1 + $0xf90] sm:$0xff] }
 0x3e5   :  { %11303 = vmatprep.subr.bf16.mxu1 %v12933_v35  ;;  %v475_v35 = vld [vmem:[%s19895_s1 + $0xd98] sm:$0xff]  ;;  %v13043_v13 = vcombine.high %v538_v31, %v542_v34  ;;  %v13042_v46 = vcombine.low %v538_v31, %v542_v34  ;;  %v578_v34 = vld [vmem:[%s19895_s1 + $0x10d0] sm:$0xff] }
 0x3e6   :  { %10787 = vmatpush1.bf16.msra.mxu0 %v12994_v36  ;;  %v12981_v36 = vcombine.high %v475_v35, %v479_v21 }
 0x3e7   :  { %11295 = vmatmul.mubr.bf16.vlgmr.msra.gmra.mrb[8].mxu1 %v15300_v45  ;;  %10788 = vmatprep.subr.bf16.mxu0 %v13003_v39  ;;  %v451_v45 = vld [vmem:[%s19895_s1 + $0xcd8] sm:$0xff]  ;;  %v550_v39 = vld [vmem:[%s19895_s1 + $0xff0] sm:$0xff] }
 0x3e8   :  { %11304 = vmatpush1.bf16.msra.mxu1 %v12932_v37  ;;  %11335 = vmatprep.mubr.bf16.mxu1 %v15310_v49  ;;  %v12957_v5 = vcombine.high %v451_v45, %v455_v59  ;;  %v522_v49 = vld [vmem:[%s19895_s1 + $0xf10] sm:$0xff]  ;;  %v12956_v16 = vcombine.low %v451_v45, %v455_v59  ;;  %v491_v59 = vld [vmem:[%s19895_s1 + $0xe18] sm:$0xff] }
 0x3e9   :  { %11305 = vmatprep.subr.bf16.mxu1 %v12941_v40  ;;  %v13027_v61 = vcombine.high %v522_v49, %v526_v52  ;;  %v13026_v38 = vcombine.low %v522_v49, %v526_v52  ;;  %v546_v37 = vld [vmem:[%s19895_s1 + $0xfd0] sm:$0xff] }
 0x3ea   :  { %10789 = vmatpush1.bf16.msra.mxu0 %v13002_v47  ;;  %v558_v45 = vld [vmem:[%s19895_s1 + $0x1030] sm:$0xff] }
 0x3eb   :  { %10790 = vmatprep.subr.bf16.mxu0 %v13011_v51  ;;  %v13051_v51 = vcombine.high %v546_v37, %v550_v39  ;;  %v562_v52 = vld [vmem:[%s19895_s1 + $0x1050] sm:$0xff] }
 0x3ec   :  { %11306 = vmatpush1.bf16.msra.mxu1 %v12940_v50  ;;  %v12980_v50 = vcombine.low %v475_v35, %v479_v21  ;;  %v582_v35 = vld [vmem:[%s19895_s1 + $0x10f0] sm:$0xff]  ;;  %v515_v21 = vld [vmem:[%s19895_s1 + $0xed8] sm:$0xff] }
 0x3ed   :  { %11307 = vmatprep.subr.bf16.mxu1 %v12949_v53 }
 0x3ee   :  { %10791 = vmatpush1.bf16.msra.mxu0 %v13010_v62  ;;  %v495_v62 = vld [vmem:[%s19895_s1 + $0xe38] sm:$0xff] }
 0x3ef   :  { %10792 = vmatprep.subr.bf16.mxu0 %v13019_v23  ;;  %v12988_v23 = vcombine.low %v483_v33, %v487_v42  ;;  %v12997_v49 = vcombine.high %v491_v59, %v495_v62  ;;  %v590_v33 = vld [vmem:[%s19895_s1 + $0x1130] sm:$0xff]  ;;  %v523_v42 = vld [vmem:[%s19895_s1 + $0xf18] sm:$0xff] }
 0x3f0   :  { %11308 = vmatpush1.bf16.msra.mxu1 %v12948_v60  ;;  %v13050_v60 = vcombine.low %v546_v37, %v550_v39  ;;  %v586_v39 = vld [vmem:[%s19895_s1 + $0x1110] sm:$0xff] }
 0x3f1   :  { %11309 = vmatprep.subr.bf16.mxu1 %v12957_v5  ;;  %v13059_v5 = vcombine.high %v554_v55, %v558_v45 }
 0x3f2   :  { %10793 = vmatpush1.bf16.msra.mxu0 %v13018_v18  ;;  %v503_v18 = vld [vmem:[%s19895_s1 + $0xe78] sm:$0xff] }
 0x3f3   :  { %10794 = vmatprep.subr.bf16.mxu0 %v13027_v61  ;;  %v12996_v61 = vcombine.low %v491_v59, %v495_v62  ;;  %v13005_v19 = vcombine.high %v499_v11, %v503_v18  ;;  %v535_v59 = vld [vmem:[%s19895_s1 + $0xf78] sm:$0xff]  ;;  %v13090_v62 = vcombine.low %v586_v39, %v590_v33 }
 0x3f4   :  { %11310 = vmatpush1.bf16.msra.mxu1 %v12956_v16  ;;  %v13058_v16 = vcombine.low %v554_v55, %v558_v45  ;;  %v598_v55 = vld [vmem:[%s19895_s1 + $0x1170] sm:$0xff]  ;;  %v531_v45 = vld [vmem:[%s19895_s1 + $0xf58] sm:$0xff] }
 0x3f5   :  { %11311 = vmatprep.subr.bf16.mxu1 %v12965_v25  ;;  %v13067_v25 = vcombine.high %v562_v52, %v566_v9 }
 0x3f6   :  { %10795 = vmatpush1.bf16.msra.mxu0 %v13026_v38  ;;  %v511_v38 = vld [vmem:[%s19895_s1 + $0xeb8] sm:$0xff] }
 0x3f7   :  { %10796 = vmatprep.subr.bf16.mxu0 %v13035_v30  ;;  %v13004_v30 = vcombine.low %v499_v11, %v503_v18  ;;  %v13013_v31 = vcombine.high %v507_v17, %v511_v38  ;;  %v543_v11 = vld [vmem:[%s19895_s1 + $0xfb8] sm:$0xff] }
 0x3f8   :  { %11312 = vmatpush1.bf16.msra.mxu1 %v12964_v10  ;;  %v13066_v10 = vcombine.low %v562_v52, %v566_v9  ;;  %v606_v52 = vld [vmem:[%s19895_s1 + $0x11b0] sm:$0xff]  ;;  %v539_v9 = vld [vmem:[%s19895_s1 + $0xf98] sm:$0xff] }
 0x3f9   :  { %11313 = vmatprep.subr.bf16.mxu1 %v12973_v14  ;;  %v13075_v14 = vcombine.high %v570_v20, %v574_v24 }
 0x3fa   :  { %v17960_v40 = vpop.f32.mrb[4].mxu1  ;;  %10797 = vmatpush1.bf16.msra.mxu0 %v13034_v0  ;;  %v519_v0 = vld [vmem:[%s19895_s1 + $0xef8] sm:$0xff] }
 0x3fb   :  { %v17968_v44 = vpop.f32.mrb[5].mxu1  ;;  %10798 = vmatprep.subr.bf16.mxu0 %v13043_v13  ;;  %v13012_v13 = vcombine.low %v507_v17, %v511_v38  ;;  %v13021_v37 = vcombine.high %v515_v21, %v519_v0  ;;  %v551_v17 = vld [vmem:[%s19895_s1 + $0xff8] sm:$0xff] }
 0x3fc   :  { %v10644_v47 = vpop.f32.mrb[6].mxu1  ;;  %11314 = vmatpush1.bf16.msra.mxu1 %v12972_v29  ;;  %v13074_v29 = vcombine.low %v570_v20, %v574_v24  ;;  %v614_v20 = vld [vmem:[%s19895_s1 + $0x11f0] sm:$0xff]  ;;  %v547_v24 = vld [vmem:[%s19895_s1 + $0xfd8] sm:$0xff] }
 0x3fd   :  { %v10645_v53 = vpop.f32.mrb[7].mxu1  ;;  %11315 = vmatprep.subr.bf16.mxu1 %v12981_v36  ;;  %v13083_v36 = vcombine.high %v578_v34, %v582_v35  ;;  %v13082_v47 = vcombine.low %v578_v34, %v582_v35  ;;  %v622_v34 = vld [vmem:[%s19895_s1 + $0x1230] sm:$0xff]  ;;  %v555_v35 = vld [vmem:[%s19895_s1 + $0x1018] sm:$0xff] }
 0x3fe   :  { %10799 = vmatpush1.bf16.msra.mxu0 %v13042_v46  ;;  %v527_v46 = vld [vmem:[%s19895_s1 + $0xf38] sm:$0xff] }
 0x3ff   :  { %10800 = vmatprep.subr.bf16.mxu0 %v13051_v51  ;;  %v13091_v51 = vcombine.high %v586_v39, %v590_v33  ;;  %v13029_v53 = vcombine.high %v523_v42, %v527_v46  ;;  %v630_v39 = vld [vmem:[%s19895_s1 + $0x1270] sm:$0xff]  ;;  %v563_v33 = vld [vmem:[%s19895_s1 + $0x1058] sm:$0xff] }
 0x400   :  { %11316 = vmatpush1.bf16.msra.mxu1 %v12980_v50  ;;  %v13020_v50 = vcombine.low %v515_v21, %v519_v0  ;;  %v559_v21 = vld [vmem:[%s19895_s1 + $0x1038] sm:$0xff] }
 0x401   :  { %11317 = vmatprep.subr.bf16.mxu1 %v12989_v54  ;;  %v594_v54 = vld [vmem:[%s19895_s1 + $0x1150] sm:$0xff] }
 0x402   :  { %10801 = vmatpush1.bf16.msra.mxu0 %v13050_v60  ;;  %v13028_v60 = vcombine.low %v523_v42, %v527_v46  ;;  %v13098_v18 = vcombine.low %v594_v54, %v598_v55  ;;  %v567_v42 = vld [vmem:[%s19895_s1 + $0x1078] sm:$0xff] }
 0x403   :  { %10811 = vmatprep.subr.bf16.mxu0 %v13059_v5  ;;  %v13037_v5 = vcombine.high %v531_v45, %v535_v59 }
 0x404   :  { %11318 = vmatpush1.bf16.msra.mxu1 %v12988_v23  ;;  %v13099_v23 = vcombine.high %v594_v54, %v598_v55  ;;  %v638_v54 = vld [vmem:[%s19895_s1 + $0x12b0] sm:$0xff]  ;;  %v571_v55 = vld [vmem:[%s19895_s1 + $0x1098] sm:$0xff] }
 0x405   :  { %11319 = vmatprep.subr.bf16.mxu1 %v12997_v49  ;;  %10803 = vmatmul.mubr.bf16.vlgmr.msra.gmra.mrb[4].mxu0 %v15513_v8  ;;  %v602_v49 = vld [vmem:[%s19895_s1 + $0x1190] sm:$0xff] }
 0x406   :  { %10812 = vmatpush1.bf16.msra.mxu0 %v13058_v16  ;;  %10843 = vmatprep.mubr.bf16.mxu0 %v15523_v15  ;;  %v13036_v16 = vcombine.low %v531_v45, %v535_v59  ;;  %v13106_v38 = vcombine.low %v602_v49, %v606_v52  ;;  %v575_v45 = vld [vmem:[%s19895_s1 + $0x10b8] sm:$0xff] }
 0x407   :  { %10813 = vmatprep.subr.bf16.mxu0 %v13067_v25  ;;  %v13045_v25 = vcombine.high %v539_v9, %v543_v11 }
 0x408   :  { %11320 = vmatpush1.bf16.msra.mxu1 %v12996_v61  ;;  %v13107_v61 = vcombine.high %v602_v49, %v606_v52  ;;  %v646_v49 = vld [vmem:[%s19895_s1 + $0x12f0] sm:$0xff]  ;;  %v583_v52 = vld [vmem:[%s19895_s1 + $0x10f8] sm:$0xff] }
 0x409   :  { %11321 = vmatprep.subr.bf16.mxu1 %v13005_v19  ;;  %v610_v19 = vld [vmem:[%s19895_s1 + $0x11d0] sm:$0xff] }
 0x40a   :  { %10814 = vmatpush1.bf16.msra.mxu0 %v13066_v10  ;;  %v13044_v10 = vcombine.low %v539_v9, %v543_v11  ;;  %v13114_v0 = vcombine.low %v610_v19, %v614_v20  ;;  %v13076_v11 = vcombine.low %v571_v55, %v575_v45 }
 0x40b   :  { %10815 = vmatprep.subr.bf16.mxu0 %v13075_v14  ;;  %v13053_v14 = vcombine.high %v547_v24, %v551_v17 }
 0x40c   :  { %11322 = vmatpush1.bf16.msra.mxu1 %v13004_v30  ;;  %v13115_v30 = vcombine.high %v610_v19, %v614_v20  ;;  %v591_v19 = vld [vmem:[%s19895_s1 + $0x1138] sm:$0xff] }
 0x40d   :  { %11323 = vmatprep.subr.bf16.mxu1 %v13013_v31  ;;  %v618_v31 = vld [vmem:[%s19895_s1 + $0x1210] sm:$0xff] }
 0x40e   :  { %10816 = vmatpush1.bf16.msra.mxu0 %v13074_v29  ;;  %v13052_v29 = vcombine.low %v547_v24, %v551_v17  ;;  %v13122_v46 = vcombine.low %v618_v31, %v622_v34 }
 0x40f   :  { %10817 = vmatprep.subr.bf16.mxu0 %v13083_v36  ;;  %v13061_v36 = vcombine.high %v555_v35, %v559_v21 }
 0x410   :  { %11324 = vmatpush1.bf16.msra.mxu1 %v13012_v13  ;;  %v13123_v13 = vcombine.high %v618_v31, %v622_v34  ;;  %v599_v31 = vld [vmem:[%s19895_s1 + $0x1178] sm:$0xff] }
 0x411   :  { %11325 = vmatprep.subr.bf16.mxu1 %v13021_v37  ;;  %v626_v37 = vld [vmem:[%s19895_s1 + $0x1250] sm:$0xff] }
 0x412   :  { %10818 = vmatpush1.bf16.msra.mxu0 %v13082_v47  ;;  %v13060_v47 = vcombine.low %v555_v35, %v559_v21  ;;  %v13130_v59 = vcombine.low %v626_v37, %v630_v39 }
 0x413   :  { %10819 = vmatprep.subr.bf16.mxu0 %v13091_v51  ;;  %v13069_v51 = vcombine.high %v563_v33, %v567_v42 }
 0x414   :  { %11326 = vmatpush1.bf16.msra.mxu1 %v13020_v50  ;;  %v13131_v50 = vcombine.high %v626_v37, %v630_v39  ;;  %v607_v37 = vld [vmem:[%s19895_s1 + $0x11b8] sm:$0xff] }
 0x415   :  { %11327 = vmatprep.subr.bf16.mxu1 %v13029_v53  ;;  %v634_v53 = vld [vmem:[%s19895_s1 + $0x1290] sm:$0xff] }
 0x416   :  { %10820 = vmatpush1.bf16.msra.mxu0 %v13090_v62  ;;  %v13068_v62 = vcombine.low %v563_v33, %v567_v42  ;;  %v13138_v9 = vcombine.low %v634_v53, %v638_v54 }
 0x417   :  { %10821 = vmatprep.subr.bf16.mxu0 %v13099_v23  ;;  %v13077_v23 = vcombine.high %v571_v55, %v575_v45 }
 0x418   :  { %11328 = vmatpush1.bf16.msra.mxu1 %v13028_v60  ;;  %v13139_v60 = vcombine.high %v634_v53, %v638_v54  ;;  %v615_v53 = vld [vmem:[%s19895_s1 + $0x11f8] sm:$0xff] }
 0x419   :  { %11329 = vmatprep.subr.bf16.mxu1 %v13037_v5  ;;  %v642_v5 = vld [vmem:[%s19895_s1 + $0x12d0] sm:$0xff] }
 0x41a   :  { %10822 = vmatpush1.bf16.msra.mxu0 %v13098_v18  ;;  %v13147_v18 = vcombine.high %v642_v5, %v646_v49  ;;  %v13146_v20 = vcombine.low %v642_v5, %v646_v49  ;;  %v623_v5 = vld [vmem:[%s19895_s1 + $0x1238] sm:$0xff] }
 0x41b   :  { %10823 = vmatprep.subr.bf16.mxu0 %v13107_v61  ;;  %v654_v61 = vld [vmem:[%s19895_s1 + $0x1330] sm:$0xff] }
 0x41c   :  { %11330 = vmatpush1.bf16.msra.mxu1 %v13036_v16 }
 0x41d   :  { %11331 = vmatprep.subr.bf16.mxu1 %v13045_v25  ;;  %v587_v25 = vld [vmem:[%s19895_s1 + $0x1118] sm:$0xff] }
 0x41e   :  { %10824 = vmatpush1.bf16.msra.mxu0 %v13106_v38  ;;  %v13093_v38 = vcombine.high %v587_v25, %v591_v19  ;;  %v13092_v35 = vcombine.low %v587_v25, %v591_v19 }
 0x41f   :  { %10825 = vmatprep.subr.bf16.mxu0 %v13115_v30  ;;  %v662_v30 = vld [vmem:[%s19895_s1 + $0x1370] sm:$0xff] }
 0x420   :  { %11332 = vmatpush1.bf16.msra.mxu1 %v13044_v10  ;;  %v658_v10 = vld [vmem:[%s19895_s1 + $0x1350] sm:$0xff] }
 0x421   :  { %11333 = vmatprep.subr.bf16.mxu1 %v13053_v14  ;;  %v595_v14 = vld [vmem:[%s19895_s1 + $0x1158] sm:$0xff]  ;;  %v13163_v21 = vcombine.high %v658_v10, %v662_v30  ;;  %v13162_v39 = vcombine.low %v658_v10, %v662_v30 }
 0x422   :  { %10826 = vmatpush1.bf16.msra.mxu0 %v13114_v0  ;;  %v13101_v0 = vcombine.high %v595_v14, %v599_v31  ;;  %v13100_v33 = vcombine.low %v595_v14, %v599_v31  ;;  %v639_v10 = vld [vmem:[%s19895_s1 + $0x12b8] sm:$0xff] }
 0x423   :  { %10827 = vmatprep.subr.bf16.mxu0 %v13123_v13  ;;  %v670_v13 = vld [vmem:[%s19895_s1 + $0x13b0] sm:$0xff] }
 0x424   :  { %11334 = vmatpush1.bf16.msra.mxu1 %v13052_v29  ;;  %v666_v29 = vld [vmem:[%s19895_s1 + $0x1390] sm:$0xff] }
 0x425   :  { %11344 = vmatprep.subr.bf16.mxu1 %v13061_v36  ;;  %v603_v36 = vld [vmem:[%s19895_s1 + $0x1198] sm:$0xff]  ;;  %v13171_v42 = vcombine.high %v666_v29, %v670_v13  ;;  %v13170_v54 = vcombine.low %v666_v29, %v670_v13 }
 0x426   :  { %10828 = vmatpush1.bf16.msra.mxu0 %v13122_v46  ;;  %v13109_v46 = vcombine.high %v603_v36, %v607_v37  ;;  %v13108_v55 = vcombine.low %v603_v36, %v607_v37  ;;  %v647_v29 = vld [vmem:[%s19895_s1 + $0x12f8] sm:$0xff] }
 0x427   :  { %11336 = vmatmul.mubr.bf16.vlgmr.msra.gmra.mrb[8].mxu1 %v15513_v8  ;;  %10829 = vmatprep.subr.bf16.mxu0 %v13131_v50  ;;  %v579_v8 = vld [vmem:[%s19895_s1 + $0x10d8] sm:$0xff]  ;;  %v678_v50 = vld [vmem:[%s19895_s1 + $0x13f0] sm:$0xff] }
 0x428   :  { %11345 = vmatpush1.bf16.msra.mxu1 %v13060_v47  ;;  %11376 = vmatprep.mubr.bf16.mxu1 %v15523_v15  ;;  %v13085_v16 = vcombine.high %v579_v8, %v583_v52  ;;  %v650_v15 = vld [vmem:[%s19895_s1 + $0x1310] sm:$0xff]  ;;  %v13084_v24 = vcombine.low %v579_v8, %v583_v52 }
 0x429   :  { %11346 = vmatprep.subr.bf16.mxu1 %v13069_v51  ;;  %v13155_v17 = vcombine.high %v650_v15, %v654_v61  ;;  %v13154_v34 = vcombine.low %v650_v15, %v654_v61  ;;  %v674_v47 = vld [vmem:[%s19895_s1 + $0x13d0] sm:$0xff]  ;;  %v611_v51 = vld [vmem:[%s19895_s1 + $0x11d8] sm:$0xff] }
 0x42a   :  { %10830 = vmatpush1.bf16.msra.mxu0 %v13130_v59  ;;  %v13179_v45 = vcombine.high %v674_v47, %v678_v50  ;;  %v13117_v59 = vcombine.high %v611_v51, %v615_v53  ;;  %v13178_v49 = vcombine.low %v674_v47, %v678_v50  ;;  %v13116_v8 = vcombine.low %v611_v51, %v615_v53  ;;  %v631_v15 = vld [vmem:[%s19895_s1 + $0x1278] sm:$0xff] }
 0x42b   :  { %10831 = vmatprep.subr.bf16.mxu0 %v13139_v60  ;;  %v686_v60 = vld [vmem:[%s19895_s1 + $0x1430] sm:$0xff]  ;;  %v655_v47 = vld [vmem:[%s19895_s1 + $0x1338] sm:$0xff] }
 0x42c   :  { %11347 = vmatpush1.bf16.msra.mxu1 %v13068_v62  ;;  %v682_v62 = vld [vmem:[%s19895_s1 + $0x1410] sm:$0xff] }
 0x42d   :  { %11348 = vmatprep.subr.bf16.mxu1 %v13077_v23  ;;  %v619_v23 = vld [vmem:[%s19895_s1 + $0x1218] sm:$0xff]  ;;  %v13187_v52 = vcombine.high %v682_v62, %v686_v60  ;;  %v13186_v61 = vcombine.low %v682_v62, %v686_v60 }
 0x42e   :  { %10832 = vmatpush1.bf16.msra.mxu0 %v13138_v9  ;;  %v13125_v9 = vcombine.high %v619_v23, %v623_v5  ;;  %v13124_v25 = vcombine.low %v619_v23, %v623_v5  ;;  %v663_v62 = vld [vmem:[%s19895_s1 + $0x1378] sm:$0xff] }
 0x42f   :  { %10833 = vmatprep.subr.bf16.mxu0 %v13147_v18  ;;  %v694_v18 = vld [vmem:[%s19895_s1 + $0x1470] sm:$0xff] }
 0x430   :  { %11349 = vmatpush1.bf16.msra.mxu1 %v13076_v11  ;;  %v690_v11 = vld [vmem:[%s19895_s1 + $0x1450] sm:$0xff] }
 0x431   :  { %11350 = vmatprep.subr.bf16.mxu1 %v13085_v16  ;;  %v627_v16 = vld [vmem:[%s19895_s1 + $0x1258] sm:$0xff]  ;;  %v13195_v19 = vcombine.high %v690_v11, %v694_v18  ;;  %v13194_v30 = vcombine.low %v690_v11, %v694_v18 }
 0x432   :  { %10834 = vmatpush1.bf16.msra.mxu0 %v13146_v20  ;;  %v13133_v20 = vcombine.high %v627_v16, %v631_v15  ;;  %v13132_v14 = vcombine.low %v627_v16, %v631_v15  ;;  %v671_v11 = vld [vmem:[%s19895_s1 + $0x13b8] sm:$0xff] }
 0x433   :  { %10835 = vmatprep.subr.bf16.mxu0 %v13155_v17  ;;  %v702_v17 = vld [vmem:[%s19895_s1 + $0x14b0] sm:$0xff] }
 0x434   :  { %11351 = vmatpush1.bf16.msra.mxu1 %v13084_v24  ;;  %v698_v24 = vld [vmem:[%s19895_s1 + $0x1490] sm:$0xff] }
 0x435   :  { %11352 = vmatprep.subr.bf16.mxu1 %v13093_v38  ;;  %v635_v38 = vld [vmem:[%s19895_s1 + $0x1298] sm:$0xff]  ;;  %v13203_v31 = vcombine.high %v698_v24, %v702_v17  ;;  %v13202_v13 = vcombine.low %v698_v24, %v702_v17 }
 0x436   :  { %10836 = vmatpush1.bf16.msra.mxu0 %v13154_v34  ;;  %v13141_v34 = vcombine.high %v635_v38, %v639_v10  ;;  %v13140_v36 = vcombine.low %v635_v38, %v639_v10  ;;  %v679_v24 = vld [vmem:[%s19895_s1 + $0x13f8] sm:$0xff] }
 0x437   :  { %10837 = vmatprep.subr.bf16.mxu0 %v13163_v21  ;;  %v710_v21 = vld [vmem:[%s19895_s1 + $0x14f0] sm:$0xff] }
 0x438   :  { %11353 = vmatpush1.bf16.msra.mxu1 %v13092_v35  ;;  %v706_v35 = vld [vmem:[%s19895_s1 + $0x14d0] sm:$0xff] }
 0x439   :  { %11354 = vmatprep.subr.bf16.mxu1 %v13101_v0  ;;  %v643_v0 = vld [vmem:[%s19895_s1 + $0x12d8] sm:$0xff]  ;;  %v13211_v37 = vcombine.high %v706_v35, %v710_v21  ;;  %v13210_v50 = vcombine.low %v706_v35, %v710_v21 }
 0x43a   :  { %10838 = vmatpush1.bf16.msra.mxu0 %v13162_v39  ;;  %v13149_v39 = vcombine.high %v643_v0, %v647_v29  ;;  %v13148_v51 = vcombine.low %v643_v0, %v647_v29  ;;  %v687_v35 = vld [vmem:[%s19895_s1 + $0x1438] sm:$0xff] }
 0x43b   :  { %10839 = vmatprep.subr.bf16.mxu0 %v13171_v42  ;;  %v718_v42 = vld [vmem:[%s19895_s1 + $0x1530] sm:$0xff] }
 0x43c   :  { %11355 = vmatpush1.bf16.msra.mxu1 %v13100_v33  ;;  %v714_v33 = vld [vmem:[%s19895_s1 + $0x1510] sm:$0xff] }
 0x43d   :  { %11356 = vmatprep.subr.bf16.mxu1 %v13109_v46  ;;  %v651_v46 = vld [vmem:[%s19895_s1 + $0x1318] sm:$0xff]  ;;  %v13219_v53 = vcombine.high %v714_v33, %v718_v42  ;;  %v13218_v60 = vcombine.low %v714_v33, %v718_v42 }
 0x43e   :  { %10840 = vmatpush1.bf16.msra.mxu0 %v13170_v54  ;;  %v13157_v54 = vcombine.high %v651_v46, %v655_v47  ;;  %v13156_v23 = vcombine.low %v651_v46, %v655_v47  ;;  %v695_v33 = vld [vmem:[%s19895_s1 + $0x1478] sm:$0xff] }
 0x43f   :  { %10841 = vmatprep.subr.bf16.mxu0 %v13179_v45  ;;  %v726_v45 = vld [vmem:[%s19895_s1 + $0x1570] sm:$0xff] }
 0x440   :  { %11357 = vmatpush1.bf16.msra.mxu1 %v13108_v55  ;;  %v722_v55 = vld [vmem:[%s19895_s1 + $0x1550] sm:$0xff] }
 0x441   :  { %11358 = vmatprep.subr.bf16.mxu1 %v13117_v59  ;;  %v659_v59 = vld [vmem:[%s19895_s1 + $0x1358] sm:$0xff]  ;;  %v13227_v5 = vcombine.high %v722_v55, %v726_v45  ;;  %v13226_v18 = vcombine.low %v722_v55, %v726_v45 }
 0x442   :  { %10842 = vmatpush1.bf16.msra.mxu0 %v13178_v49  ;;  %v13165_v49 = vcombine.high %v659_v59, %v663_v62  ;;  %v13164_v16 = vcombine.low %v659_v59, %v663_v62  ;;  %v703_v55 = vld [vmem:[%s19895_s1 + $0x14b8] sm:$0xff] }
 0x443   :  { %10852 = vmatprep.subr.bf16.mxu0 %v13187_v52  ;;  %v734_v52 = vld [vmem:[%s19895_s1 + $0x15b0] sm:$0xff] }
 0x444   :  { %11359 = vmatpush1.bf16.msra.mxu1 %v13116_v8  ;;  %v730_v8 = vld [vmem:[%s19895_s1 + $0x1590] sm:$0xff] }
 0x445   :  { %11360 = vmatprep.subr.bf16.mxu1 %v13125_v9  ;;  %10844 = vmatmul.mubr.bf16.vlgmr.msra.gmra.mrb[4].mxu0 %v15722_v43  ;;  %v667_v9 = vld [vmem:[%s19895_s1 + $0x1398] sm:$0xff]  ;;  %v13235_v15 = vcombine.high %v730_v8, %v734_v52  ;;  %v13234_v17 = vcombine.low %v730_v8, %v734_v52 }
 0x446   :  { %10853 = vmatpush1.bf16.msra.mxu0 %v13186_v61  ;;  %10884 = vmatprep.mubr.bf16.mxu0 %v15732_v48  ;;  %v13173_v61 = vcombine.high %v667_v9, %v671_v11  ;;  %v13172_v38 = vcombine.low %v667_v9, %v671_v11 }
 0x447   :  { %10854 = vmatprep.subr.bf16.mxu0 %v13195_v19  ;;  %v742_v19 = vld [vmem:[%s19895_s1 + $0x15f0] sm:$0xff] }
 0x448   :  { %11361 = vmatpush1.bf16.msra.mxu1 %v13124_v25  ;;  %v738_v25 = vld [vmem:[%s19895_s1 + $0x15d0] sm:$0xff] }
 0x449   :  { %11362 = vmatprep.subr.bf16.mxu1 %v13133_v20  ;;  %v675_v20 = vld [vmem:[%s19895_s1 + $0x13d8] sm:$0xff]  ;;  %v13243_v10 = vcombine.high %v738_v25, %v742_v19  ;;  %v13242_v21 = vcombine.low %v738_v25, %v742_v19 }
 0x44a   :  { %10855 = vmatpush1.bf16.msra.mxu0 %v13194_v30  ;;  %v13181_v30 = vcombine.high %v675_v20, %v679_v24  ;;  %v13180_v0 = vcombine.low %v675_v20, %v679_v24  ;;  %v786_v24 = vld [vmem:[%s19895_s1 + $0x1750] sm:$0xff] }
 0x44b   :  { %10856 = vmatprep.subr.bf16.mxu0 %v13203_v31  ;;  %v750_v31 = vld [vmem:[%s19895_s1 + $0x1630] sm:$0xff] }
 0x44c   :  { %11363 = vmatpush1.bf16.msra.mxu1 %v13132_v14  ;;  %v746_v14 = vld [vmem:[%s19895_s1 + $0x1610] sm:$0xff] }
 0x44d   :  { %11364 = vmatprep.subr.bf16.mxu1 %v13141_v34  ;;  %v683_v34 = vld [vmem:[%s19895_s1 + $0x1418] sm:$0xff]  ;;  %v13251_v29 = vcombine.high %v746_v14, %v750_v31  ;;  %v13250_v42 = vcombine.low %v746_v14, %v750_v31 }
 0x44e   :  { %10857 = vmatpush1.bf16.msra.mxu0 %v13202_v13  ;;  %v13189_v13 = vcombine.high %v683_v34, %v687_v35  ;;  %v13188_v46 = vcombine.low %v683_v34, %v687_v35  ;;  %v794_v35 = vld [vmem:[%s19895_s1 + $0x1790] sm:$0xff] }
 0x44f   :  { %10858 = vmatprep.subr.bf16.mxu0 %v13211_v37  ;;  %v758_v37 = vld [vmem:[%s19895_s1 + $0x1670] sm:$0xff] }
 0x450   :  { %11365 = vmatpush1.bf16.msra.mxu1 %v13140_v36  ;;  %v754_v36 = vld [vmem:[%s19895_s1 + $0x1650] sm:$0xff] }
 0x451   :  { %11366 = vmatprep.subr.bf16.mxu1 %v13149_v39  ;;  %v691_v39 = vld [vmem:[%s19895_s1 + $0x1458] sm:$0xff]  ;;  %v13259_v47 = vcombine.high %v754_v36, %v758_v37  ;;  %v13258_v45 = vcombine.low %v754_v36, %v758_v37 }
 0x452   :  { %10859 = vmatpush1.bf16.msra.mxu0 %v13210_v50  ;;  %v13197_v50 = vcombine.high %v691_v39, %v695_v33  ;;  %v13196_v59 = vcombine.low %v691_v39, %v695_v33  ;;  %v802_v33 = vld [vmem:[%s19895_s1 + $0x17d0] sm:$0xff] }
 0x453   :  { %10860 = vmatprep.subr.bf16.mxu0 %v13219_v53  ;;  %v766_v53 = vld [vmem:[%s19895_s1 + $0x16b0] sm:$0xff] }
 0x454   :  { %11367 = vmatpush1.bf16.msra.mxu1 %v13148_v51  ;;  %v762_v51 = vld [vmem:[%s19895_s1 + $0x1690] sm:$0xff] }
 0x455   :  { %11368 = vmatprep.subr.bf16.mxu1 %v13157_v54  ;;  %v699_v54 = vld [vmem:[%s19895_s1 + $0x1498] sm:$0xff]  ;;  %v13267_v62 = vcombine.high %v762_v51, %v766_v53  ;;  %v13266_v8 = vcombine.low %v762_v51, %v766_v53 }
 0x456   :  { %10861 = vmatpush1.bf16.msra.mxu0 %v13218_v60  ;;  %v13205_v60 = vcombine.high %v699_v54, %v703_v55  ;;  %v13204_v52 = vcombine.low %v699_v54, %v703_v55  ;;  %v810_v55 = vld [vmem:[%s19895_s1 + $0x1810] sm:$0xff] }
 0x457   :  { %10862 = vmatprep.subr.bf16.mxu0 %v13227_v5  ;;  %v774_v5 = vld [vmem:[%s19895_s1 + $0x16f0] sm:$0xff] }
 0x458   :  { %11369 = vmatpush1.bf16.msra.mxu1 %v13156_v23  ;;  %v770_v23 = vld [vmem:[%s19895_s1 + $0x16d0] sm:$0xff] }
 0x459   :  { %11370 = vmatprep.subr.bf16.mxu1 %v13165_v49  ;;  %v711_v49 = vld [vmem:[%s19895_s1 + $0x14f8] sm:$0xff]  ;;  %v13275_v9 = vcombine.high %v770_v23, %v774_v5 }
 0x45a   :  { %10863 = vmatpush1.bf16.msra.mxu0 %v13226_v18  ;;  %v782_v18 = vld [vmem:[%s19895_s1 + $0x1730] sm:$0xff] }
 0x45b   :  { %10864 = vmatprep.subr.bf16.mxu0 %v13235_v15  ;;  %v719_v15 = vld [vmem:[%s19895_s1 + $0x1538] sm:$0xff] }
 0x45c   :  { %11371 = vmatpush1.bf16.msra.mxu1 %v13164_v16  ;;  %v715_v16 = vld [vmem:[%s19895_s1 + $0x1518] sm:$0xff] }
 0x45d   :  { %11372 = vmatprep.subr.bf16.mxu1 %v13173_v61  ;;  %v13274_v61 = vcombine.low %v770_v23, %v774_v5  ;;  %v13221_v20 = vcombine.high %v715_v16, %v719_v15  ;;  %v13220_v14 = vcombine.low %v715_v16, %v719_v15  ;;  %v826_v15 = vld [vmem:[%s19895_s1 + $0x1890] sm:$0xff] }
 0x45e   :  { %10865 = vmatpush1.bf16.msra.mxu0 %v13234_v17  ;;  %v790_v17 = vld [vmem:[%s19895_s1 + $0x1770] sm:$0xff] }
 0x45f   :  { %10866 = vmatprep.subr.bf16.mxu0 %v13243_v10  ;;  %v727_v10 = vld [vmem:[%s19895_s1 + $0x1578] sm:$0xff]  ;;  %v13291_v31 = vcombine.high %v786_v24, %v790_v17 }
 0x460   :  { %11373 = vmatpush1.bf16.msra.mxu1 %v13172_v38  ;;  %v723_v38 = vld [vmem:[%s19895_s1 + $0x1558] sm:$0xff] }
 0x461   :  { %11374 = vmatprep.subr.bf16.mxu1 %v13181_v30  ;;  %v13229_v34 = vcombine.high %v723_v38, %v727_v10  ;;  %v13228_v36 = vcombine.low %v723_v38, %v727_v10  ;;  %v834_v10 = vld [vmem:[%s19895_s1 + $0x18d0] sm:$0xff] }
 0x462   :  { %10867 = vmatpush1.bf16.msra.mxu0 %v13242_v21  ;;  %v798_v21 = vld [vmem:[%s19895_s1 + $0x17b0] sm:$0xff] }
 0x463   :  { %10868 = vmatprep.subr.bf16.mxu0 %v13251_v29  ;;  %v735_v29 = vld [vmem:[%s19895_s1 + $0x15b8] sm:$0xff]  ;;  %v13299_v37 = vcombine.high %v794_v35, %v798_v21 }
 0x464   :  { %11375 = vmatpush1.bf16.msra.mxu1 %v13180_v0  ;;  %v731_v0 = vld [vmem:[%s19895_s1 + $0x1598] sm:$0xff] }
 0x465   :  { %11385 = vmatprep.subr.bf16.mxu1 %v13189_v13  ;;  %v13290_v13 = vcombine.low %v786_v24, %v790_v17  ;;  %v13237_v39 = vcombine.high %v731_v0, %v735_v29  ;;  %v13236_v51 = vcombine.low %v731_v0, %v735_v29  ;;  %v842_v29 = vld [vmem:[%s19895_s1 + $0x1910] sm:$0xff] }
 0x466   :  { %10869 = vmatpush1.bf16.msra.mxu0 %v13250_v42  ;;  %v806_v42 = vld [vmem:[%s19895_s1 + $0x17f0] sm:$0xff] }
 0x467   :  { %11377 = vmatmul.mubr.bf16.vlgmr.msra.gmra.mrb[8].mxu1 %v15722_v43  ;;  %10870 = vmatprep.subr.bf16.mxu0 %v13259_v47  ;;  %v707_v43 = vld [vmem:[%s19895_s1 + $0x14d8] sm:$0xff]  ;;  %v13307_v53 = vcombine.high %v802_v33, %v806_v42 }
 0x468   :  { %11386 = vmatpush1.bf16.msra.mxu1 %v13188_v46  ;;  %11417 = vmatprep.mubr.bf16.mxu1 %v15732_v48  ;;  %v13213_v11 = vcombine.high %v707_v43, %v711_v49  ;;  %v778_v48 = vld [vmem:[%s19895_s1 + $0x1710] sm:$0xff]  ;;  %v13212_v25 = vcombine.low %v707_v43, %v711_v49  ;;  %v739_v46 = vld [vmem:[%s19895_s1 + $0x15d8] sm:$0xff] }
 0x469   :  { %11387 = vmatprep.subr.bf16.mxu1 %v13197_v50  ;;  %v13283_v19 = vcombine.high %v778_v48, %v782_v18  ;;  %v13282_v30 = vcombine.low %v778_v48, %v782_v18  ;;  %v743_v47 = vld [vmem:[%s19895_s1 + $0x15f8] sm:$0xff]  ;;  %v13298_v50 = vcombine.low %v794_v35, %v798_v21  ;;  %v818_v49 = vld [vmem:[%s19895_s1 + $0x1850] sm:$0xff] }
 0x46a   :  { %10871 = vmatpush1.bf16.msra.mxu0 %v13258_v45  ;;  %v13245_v54 = vcombine.high %v739_v46, %v743_v47  ;;  %v814_v45 = vld [vmem:[%s19895_s1 + $0x1830] sm:$0xff]  ;;  %v13244_v23 = vcombine.low %v739_v46, %v743_v47 }
 0x46b   :  { %10872 = vmatprep.subr.bf16.mxu0 %v13267_v62  ;;  %v751_v62 = vld [vmem:[%s19895_s1 + $0x1638] sm:$0xff]  ;;  %v13315_v5 = vcombine.high %v810_v55, %v814_v45  ;;  %v850_v47 = vld [vmem:[%s19895_s1 + $0x1950] sm:$0xff] }
 0x46c   :  { %11388 = vmatpush1.bf16.msra.mxu1 %v13196_v59  ;;  %v747_v59 = vld [vmem:[%s19895_s1 + $0x1618] sm:$0xff] }
 0x46d   :  { %11389 = vmatprep.subr.bf16.mxu1 %v13205_v60  ;;  %v13306_v60 = vcombine.low %v802_v33, %v806_v42  ;;  %v13253_v43 = vcombine.high %v747_v59, %v751_v62  ;;  %v13252_v48 = vcombine.low %v747_v59, %v751_v62  ;;  %v858_v62 = vld [vmem:[%s19895_s1 + $0x1990] sm:$0xff] }
 0x46e   :  { %10873 = vmatpush1.bf16.msra.mxu0 %v13266_v8  ;;  %v822_v8 = vld [vmem:[%s19895_s1 + $0x1870] sm:$0xff] }
 0x46f   :  { %10874 = vmatprep.subr.bf16.mxu0 %v13275_v9  ;;  %v759_v9 = vld [vmem:[%s19895_s1 + $0x1678] sm:$0xff]  ;;  %v13323_v18 = vcombine.high %v818_v49, %v822_v8 }
 0x470   :  { %11390 = vmatpush1.bf16.msra.mxu1 %v13204_v52  ;;  %v755_v52 = vld [vmem:[%s19895_s1 + $0x1658] sm:$0xff] }
 0x471   :  { %11391 = vmatprep.subr.bf16.mxu1 %v13213_v11  ;;  %v13314_v11 = vcombine.low %v810_v55, %v814_v45  ;;  %v13261_v16 = vcombine.high %v755_v52, %v759_v9  ;;  %v13260_v24 = vcombine.low %v755_v52, %v759_v9  ;;  %v866_v9 = vld [vmem:[%s19895_s1 + $0x19d0] sm:$0xff] }
 0x472   :  { %10875 = vmatpush1.bf16.msra.mxu0 %v13274_v61  ;;  %v830_v61 = vld [vmem:[%s19895_s1 + $0x18b0] sm:$0xff] }
 0x473   :  { %10876 = vmatprep.subr.bf16.mxu0 %v13283_v19  ;;  %v767_v19 = vld [vmem:[%s19895_s1 + $0x16b8] sm:$0xff]  ;;  %v13331_v17 = vcombine.high %v826_v15, %v830_v61 }
 0x474   :  { %11392 = vmatpush1.bf16.msra.mxu1 %v13212_v25  ;;  %v763_v25 = vld [vmem:[%s19895_s1 + $0x1698] sm:$0xff] }
 0x475   :  { %11393 = vmatprep.subr.bf16.mxu1 %v13221_v20  ;;  %v13322_v20 = vcombine.low %v818_v49, %v822_v8  ;;  %v13269_v38 = vcombine.high %v763_v25, %v767_v19  ;;  %v13268_v35 = vcombine.low %v763_v25, %v767_v19  ;;  %v874_v19 = vld [vmem:[%s19895_s1 + $0x1a10] sm:$0xff] }
 0x476   :  { %10877 = vmatpush1.bf16.msra.mxu0 %v13282_v30  ;;  %v838_v30 = vld [vmem:[%s19895_s1 + $0x18f0] sm:$0xff] }
 0x477   :  { %10878 = vmatprep.subr.bf16.mxu0 %v13291_v31  ;;  %v775_v31 = vld [vmem:[%s19895_s1 + $0x16f8] sm:$0xff]  ;;  %v13339_v21 = vcombine.high %v834_v10, %v838_v30 }
 0x478   :  { %11394 = vmatpush1.bf16.msra.mxu1 %v13220_v14  ;;  %v771_v14 = vld [vmem:[%s19895_s1 + $0x16d8] sm:$0xff] }
 0x479   :  { %11395 = vmatprep.subr.bf16.mxu1 %v13229_v34  ;;  %v13330_v34 = vcombine.low %v826_v15, %v830_v61  ;;  %v13277_v0 = vcombine.high %v771_v14, %v775_v31  ;;  %v13276_v33 = vcombine.low %v771_v14, %v775_v31  ;;  %v882_v31 = vld [vmem:[%s19895_s1 + $0x1a50] sm:$0xff] }
 0x47a   :  { %10879 = vmatpush1.bf16.msra.mxu0 %v13290_v13  ;;  %v846_v13 = vld [vmem:[%s19895_s1 + $0x1930] sm:$0xff] }
 0x47b   :  { %10880 = vmatprep.subr.bf16.mxu0 %v13299_v37  ;;  %v783_v37 = vld [vmem:[%s19895_s1 + $0x1738] sm:$0xff]  ;;  %v13347_v42 = vcombine.high %v842_v29, %v846_v13 }
 0x47c   :  { %11396 = vmatpush1.bf16.msra.mxu1 %v13228_v36  ;;  %v779_v36 = vld [vmem:[%s19895_s1 + $0x1718] sm:$0xff] }
 0x47d   :  { %11397 = vmatprep.subr.bf16.mxu1 %v13237_v39  ;;  %v13338_v39 = vcombine.low %v834_v10, %v838_v30  ;;  %v13285_v46 = vcombine.high %v779_v36, %v783_v37  ;;  %v13284_v55 = vcombine.low %v779_v36, %v783_v37  ;;  %v890_v37 = vld [vmem:[%s19895_s1 + $0x1a90] sm:$0xff] }
 0x47e   :  { %10881 = vmatpush1.bf16.msra.mxu0 %v13298_v50  ;;  %v854_v50 = vld [vmem:[%s19895_s1 + $0x1970] sm:$0xff] }
 0x47f   :  { %10882 = vmatprep.subr.bf16.mxu0 %v13307_v53  ;;  %v791_v53 = vld [vmem:[%s19895_s1 + $0x1778] sm:$0xff]  ;;  %v13355_v45 = vcombine.high %v850_v47, %v854_v50 }
 0x480   :  { %11398 = vmatpush1.bf16.msra.mxu1 %v13236_v51  ;;  %v787_v51 = vld [vmem:[%s19895_s1 + $0x1758] sm:$0xff] }
 0x481   :  { %11399 = vmatprep.subr.bf16.mxu1 %v13245_v54  ;;  %v13346_v54 = vcombine.low %v842_v29, %v846_v13  ;;  %v13293_v59 = vcombine.high %v787_v51, %v791_v53  ;;  %v13292_v49 = vcombine.low %v787_v51, %v791_v53  ;;  %v898_v53 = vld [vmem:[%s19895_s1 + $0x1ad0] sm:$0xff] }
 0x482   :  { %10883 = vmatpush1.bf16.msra.mxu0 %v13306_v60  ;;  %v862_v60 = vld [vmem:[%s19895_s1 + $0x19b0] sm:$0xff] }
 0x483   :  { %10893 = vmatprep.subr.bf16.mxu0 %v13315_v5  ;;  %v799_v5 = vld [vmem:[%s19895_s1 + $0x17b8] sm:$0xff]  ;;  %v13363_v8 = vcombine.high %v858_v62, %v862_v60 }
 0x484   :  { %11400 = vmatpush1.bf16.msra.mxu1 %v13244_v23  ;;  %v795_v23 = vld [vmem:[%s19895_s1 + $0x1798] sm:$0xff] }
 0x485   :  { %11401 = vmatprep.subr.bf16.mxu1 %v13253_v43  ;;  %10885 = vmatmul.mubr.bf16.vlgmr.msra.gmra.mrb[4].mxu0 %v15931_v22  ;;  %v13354_v43 = vcombine.low %v850_v47, %v854_v50  ;;  %v13301_v52 = vcombine.high %v795_v23, %v799_v5  ;;  %v13300_v15 = vcombine.low %v795_v23, %v799_v5  ;;  %v910_v23 = vld [vmem:[%s19895_s1 + $0x1b30] sm:$0xff]  ;;  %v843_v5 = vld [vmem:[%s19895_s1 + $0x1918] sm:$0xff] }
 0x486   :  { %10894 = vmatpush1.bf16.msra.mxu0 %v13314_v11  ;;  %10925 = vmatprep.mubr.bf16.mxu0 %v15941_v26  ;;  %v870_v11 = vld [vmem:[%s19895_s1 + $0x19f0] sm:$0xff] }
 0x487   :  { %10895 = vmatprep.subr.bf16.mxu0 %v13323_v18  ;;  %v807_v18 = vld [vmem:[%s19895_s1 + $0x17f8] sm:$0xff]  ;;  %v13371_v61 = vcombine.high %v866_v9, %v870_v11 }
 0x488   :  { %11402 = vmatpush1.bf16.msra.mxu1 %v13252_v48  ;;  %v803_v48 = vld [vmem:[%s19895_s1 + $0x17d8] sm:$0xff] }
 0x489   :  { %11403 = vmatprep.subr.bf16.mxu1 %v13261_v16  ;;  %v13362_v16 = vcombine.low %v858_v62, %v862_v60  ;;  %v13309_v25 = vcombine.high %v803_v48, %v807_v18  ;;  %v13308_v10 = vcombine.low %v803_v48, %v807_v18  ;;  %v918_v48 = vld [vmem:[%s19895_s1 + $0x1b70] sm:$0xff]  ;;  %v851_v18 = vld [vmem:[%s19895_s1 + $0x1958] sm:$0xff] }
 0x48a   :  { %10896 = vmatpush1.bf16.msra.mxu0 %v13322_v20  ;;  %v878_v20 = vld [vmem:[%s19895_s1 + $0x1a30] sm:$0xff] }
 0x48b   :  { %10897 = vmatprep.subr.bf16.mxu0 %v13331_v17  ;;  %v815_v17 = vld [vmem:[%s19895_s1 + $0x1838] sm:$0xff]  ;;  %v13379_v30 = vcombine.high %v874_v19, %v878_v20 }
 0x48c   :  { %11404 = vmatpush1.bf16.msra.mxu1 %v13260_v24  ;;  %v811_v24 = vld [vmem:[%s19895_s1 + $0x1818] sm:$0xff] }
 0x48d   :  { %11405 = vmatprep.subr.bf16.mxu1 %v13269_v38  ;;  %v13370_v38 = vcombine.low %v866_v9, %v870_v11  ;;  %v13317_v14 = vcombine.high %v811_v24, %v815_v17  ;;  %v13316_v29 = vcombine.low %v811_v24, %v815_v17  ;;  %v914_v11 = vld [vmem:[%s19895_s1 + $0x1b50] sm:$0xff]  ;;  %v859_v17 = vld [vmem:[%s19895_s1 + $0x1998] sm:$0xff] }
 0x48e   :  { %10898 = vmatpush1.bf16.msra.mxu0 %v13330_v34  ;;  %v886_v34 = vld [vmem:[%s19895_s1 + $0x1a70] sm:$0xff] }
 0x48f   :  { %10899 = vmatprep.subr.bf16.mxu0 %v13339_v21  ;;  %v823_v21 = vld [vmem:[%s19895_s1 + $0x1878] sm:$0xff]  ;;  %v13387_v13 = vcombine.high %v882_v31, %v886_v34  ;;  %v926_v24 = vld [vmem:[%s19895_s1 + $0x1bb0] sm:$0xff] }
 0x490   :  { %11406 = vmatpush1.bf16.msra.mxu1 %v13268_v35  ;;  %v819_v35 = vld [vmem:[%s19895_s1 + $0x1858] sm:$0xff] }
 0x491   :  { %11407 = vmatprep.subr.bf16.mxu1 %v13277_v0  ;;  %v13378_v0 = vcombine.low %v874_v19, %v878_v20  ;;  %v13325_v36 = vcombine.high %v819_v35, %v823_v21  ;;  %v13324_v47 = vcombine.low %v819_v35, %v823_v21  ;;  %v922_v20 = vld [vmem:[%s19895_s1 + $0x1b90] sm:$0xff]  ;;  %v867_v21 = vld [vmem:[%s19895_s1 + $0x19d8] sm:$0xff] }
 0x492   :  { %10900 = vmatpush1.bf16.msra.mxu0 %v13338_v39  ;;  %v894_v39 = vld [vmem:[%s19895_s1 + $0x1ab0] sm:$0xff] }
 0x493   :  { %10901 = vmatprep.subr.bf16.mxu0 %v13347_v42  ;;  %v831_v42 = vld [vmem:[%s19895_s1 + $0x18b8] sm:$0xff]  ;;  %v13395_v50 = vcombine.high %v890_v37, %v894_v39  ;;  %v934_v35 = vld [vmem:[%s19895_s1 + $0x1bf0] sm:$0xff] }
 0x494   :  { %11408 = vmatpush1.bf16.msra.mxu1 %v13276_v33  ;;  %v827_v33 = vld [vmem:[%s19895_s1 + $0x1898] sm:$0xff] }
 0x495   :  { %11409 = vmatprep.subr.bf16.mxu1 %v13285_v46  ;;  %v13386_v46 = vcombine.low %v882_v31, %v886_v34  ;;  %v13333_v51 = vcombine.high %v827_v33, %v831_v42  ;;  %v930_v34 = vld [vmem:[%s19895_s1 + $0x1bd0] sm:$0xff] }
 0x496   :  { %10902 = vmatpush1.bf16.msra.mxu0 %v13346_v54  ;;  %v902_v54 = vld [vmem:[%s19895_s1 + $0x1af0] sm:$0xff] }
 0x497   :  { %10903 = vmatprep.subr.bf16.mxu0 %v13355_v45  ;;  %v13394_v45 = vcombine.low %v890_v37, %v894_v39  ;;  %v13403_v62 = vcombine.high %v898_v53, %v902_v54  ;;  %v938_v39 = vld [vmem:[%s19895_s1 + $0x1c10] sm:$0xff] }
 0x498   :  { %11410 = vmatpush1.bf16.msra.mxu1 %v13284_v55  ;;  %v839_v55 = vld [vmem:[%s19895_s1 + $0x18f8] sm:$0xff] }
 0x499   :  { %11411 = vmatprep.subr.bf16.mxu1 %v13293_v59  ;;  %v13332_v59 = vcombine.low %v827_v33, %v831_v42  ;;  %v942_v33 = vld [vmem:[%s19895_s1 + $0x1c30] sm:$0xff]  ;;  %v875_v42 = vld [vmem:[%s19895_s1 + $0x1a18] sm:$0xff] }
 0x49a   :  { %10904 = vmatpush1.bf16.msra.mxu0 %v13354_v43  ;;  %v847_v43 = vld [vmem:[%s19895_s1 + $0x1938] sm:$0xff] }
 0x49b   :  { %10905 = vmatprep.subr.bf16.mxu0 %v13363_v8  ;;  %v13349_v9 = vcombine.high %v843_v5, %v847_v43 }
 0x49c   :  { %11412 = vmatpush1.bf16.msra.mxu1 %v13292_v49  ;;  %v13402_v49 = vcombine.low %v898_v53, %v902_v54  ;;  %v946_v54 = vld [vmem:[%s19895_s1 + $0x1c50] sm:$0xff] }
 0x49d   :  { %11413 = vmatprep.subr.bf16.mxu1 %v13301_v52 }
 0x49e   :  { %10906 = vmatpush1.bf16.msra.mxu0 %v13362_v16  ;;  %v855_v16 = vld [vmem:[%s19895_s1 + $0x1978] sm:$0xff] }
 0x49f   :  { %10907 = vmatprep.subr.bf16.mxu0 %v13371_v61  ;;  %v13348_v61 = vcombine.low %v843_v5, %v847_v43  ;;  %v13357_v19 = vcombine.high %v851_v18, %v855_v16  ;;  %v958_v5 = vld [vmem:[%s19895_s1 + $0x1cb0] sm:$0xff]  ;;  %v891_v43 = vld [vmem:[%s19895_s1 + $0x1a98] sm:$0xff] }
 0x4a0   :  { %11414 = vmatpush1.bf16.msra.mxu1 %v13300_v15 }
 0x4a1   :  { %11415 = vmatprep.subr.bf16.mxu1 %v13309_v25  ;;  %v13419_v25 = vcombine.high %v914_v11, %v918_v48 }
 0x4a2   :  { %10908 = vmatpush1.bf16.msra.mxu0 %v13370_v38  ;;  %v863_v38 = vld [vmem:[%s19895_s1 + $0x19b8] sm:$0xff] }
 0x4a3   :  { %10909 = vmatprep.subr.bf16.mxu0 %v13379_v30  ;;  %v13356_v30 = vcombine.low %v851_v18, %v855_v16  ;;  %v13365_v31 = vcombine.high %v859_v17, %v863_v38  ;;  %v966_v18 = vld [vmem:[%s19895_s1 + $0x1cf0] sm:$0xff]  ;;  %v899_v16 = vld [vmem:[%s19895_s1 + $0x1ad8] sm:$0xff] }
 0x4a4   :  { %11416 = vmatpush1.bf16.msra.mxu1 %v13308_v10  ;;  %v13418_v10 = vcombine.low %v914_v11, %v918_v48  ;;  %v962_v48 = vld [vmem:[%s19895_s1 + $0x1cd0] sm:$0xff] }
 0x4a5   :  { %11426 = vmatprep.subr.bf16.mxu1 %v13317_v14  ;;  %v13427_v14 = vcombine.high %v922_v20, %v926_v24 }
 0x4a6   :  { %10910 = vmatpush1.bf16.msra.mxu0 %v13378_v0  ;;  %v871_v0 = vld [vmem:[%s19895_s1 + $0x19f8] sm:$0xff] }
 0x4a7   :  { %11418 = vmatmul.mubr.bf16.vlgmr.msra.gmra.mrb[8].mxu1 %v15931_v22  ;;  %10911 = vmatprep.subr.bf16.mxu0 %v13387_v13  ;;  %v835_v22 = vld [vmem:[%s19895_s1 + $0x18d8] sm:$0xff]  ;;  %v13364_v13 = vcombine.low %v859_v17, %v863_v38  ;;  %v13373_v37 = vcombine.high %v867_v21, %v871_v0  ;;  %v974_v17 = vld [vmem:[%s19895_s1 + $0x1d30] sm:$0xff] }
 0x4a8   :  { %11427 = vmatpush1.bf16.msra.mxu1 %v13316_v29  ;;  %11458 = vmatprep.mubr.bf16.mxu1 %v15941_v26  ;;  %v13341_v60 = vcombine.high %v835_v22, %v839_v55  ;;  %v906_v26 = vld [vmem:[%s19895_s1 + $0x1b10] sm:$0xff]  ;;  %v13340_v8 = vcombine.low %v835_v22, %v839_v55  ;;  %v13426_v29 = vcombine.low %v922_v20, %v926_v24  ;;  %v883_v55 = vld [vmem:[%s19895_s1 + $0x1a58] sm:$0xff] }
 0x4a9   :  { %11428 = vmatprep.subr.bf16.mxu1 %v13325_v36  ;;  %v13411_v52 = vcombine.high %v906_v26, %v910_v23  ;;  %v13410_v15 = vcombine.low %v906_v26, %v910_v23  ;;  %v13435_v36 = vcombine.high %v930_v34, %v934_v35  ;;  %v950_v22 = vld [vmem:[%s19895_s1 + $0x1c70] sm:$0xff]  ;;  %v907_v38 = vld [vmem:[%s19895_s1 + $0x1b18] sm:$0xff] }
 0x4aa   :  { %10912 = vmatpush1.bf16.msra.mxu0 %v13386_v46  ;;  %v879_v46 = vld [vmem:[%s19895_s1 + $0x1a38] sm:$0xff]  ;;  %v954_v23 = vld [vmem:[%s19895_s1 + $0x1c90] sm:$0xff] }
 0x4ab   :  { %10913 = vmatprep.subr.bf16.mxu0 %v13395_v50  ;;  %v13372_v50 = vcombine.low %v867_v21, %v871_v0  ;;  %v13381_v53 = vcombine.high %v875_v42, %v879_v46  ;;  %v970_v24 = vld [vmem:[%s19895_s1 + $0x1d10] sm:$0xff]  ;;  %v915_v0 = vld [vmem:[%s19895_s1 + $0x1b58] sm:$0xff] }
 0x4ac   :  { %11429 = vmatpush1.bf16.msra.mxu1 %v13324_v47  ;;  %v13434_v47 = vcombine.low %v930_v34, %v934_v35  ;;  %v978_v35 = vld [vmem:[%s19895_s1 + $0x1d50] sm:$0xff] }
 0x4ad   :  { %11430 = vmatprep.subr.bf16.mxu1 %v13333_v51  ;;  %v13443_v51 = vcombine.high %v938_v39, %v942_v33  ;;  %v982_v21 = vld [vmem:[%s19895_s1 + $0x1d70] sm:$0xff] }
 0x4ae   :  { %10914 = vmatpush1.bf16.msra.mxu0 %v13394_v45  ;;  %v887_v45 = vld [vmem:[%s19895_s1 + $0x1a78] sm:$0xff] }
 0x4af   :  { %10915 = vmatprep.subr.bf16.mxu0 %v13403_v62  ;;  %v13380_v62 = vcombine.low %v875_v42, %v879_v46  ;;  %v13389_v26 = vcombine.high %v883_v55, %v887_v45  ;;  %v990_v42 = vld [vmem:[%s19895_s1 + $0x1db0] sm:$0xff]  ;;  %v923_v46 = vld [vmem:[%s19895_s1 + $0x1b98] sm:$0xff] }
 0x4b0   :  { %11431 = vmatpush1.bf16.msra.mxu1 %v13332_v59  ;;  %v13442_v59 = vcombine.low %v938_v39, %v942_v33  ;;  %v986_v33 = vld [vmem:[%s19895_s1 + $0x1d90] sm:$0xff] }
 0x4b1   :  { %11432 = vmatprep.subr.bf16.mxu1 %v13341_v60  ;;  %v13451_v60 = vcombine.high %v946_v54, %v950_v22 }
 0x4b2   :  { %10916 = vmatpush1.bf16.msra.mxu0 %v13402_v49  ;;  %v895_v49 = vld [vmem:[%s19895_s1 + $0x1ab8] sm:$0xff] }
 0x4b3   :  { %10917 = vmatprep.subr.bf16.mxu0 %v13411_v52  ;;  %v13388_v52 = vcombine.low %v883_v55, %v887_v45  ;;  %v13397_v11 = vcombine.high %v891_v43, %v895_v49  ;;  %v998_v55 = vld [vmem:[%s19895_s1 + $0x1df0] sm:$0xff]  ;;  %v931_v45 = vld [vmem:[%s19895_s1 + $0x1bd8] sm:$0xff] }
 0x4b4   :  { %11433 = vmatpush1.bf16.msra.mxu1 %v13340_v8  ;;  %v13450_v8 = vcombine.low %v946_v54, %v950_v22  ;;  %v994_v22 = vld [vmem:[%s19895_s1 + $0x1dd0] sm:$0xff] }
 0x4b5   :  { %11434 = vmatprep.subr.bf16.mxu1 %v13349_v9  ;;  %v13459_v9 = vcombine.high %v954_v23, %v958_v5 }
 0x4b6   :  { %10918 = vmatpush1.bf16.msra.mxu0 %v13410_v15  ;;  %v903_v15 = vld [vmem:[%s19895_s1 + $0x1af8] sm:$0xff] }
 0x4b7   :  { %10919 = vmatprep.subr.bf16.mxu0 %v13419_v25  ;;  %v13396_v25 = vcombine.low %v891_v43, %v895_v49  ;;  %v13405_v20 = vcombine.high %v899_v16, %v903_v15  ;;  %v1006_v43 = vld [vmem:[%s19895_s1 + $0x1e30] sm:$0xff]  ;;  %v939_v49 = vld [vmem:[%s19895_s1 + $0x1c18] sm:$0xff] }
 0x4b8   :  { %11435 = vmatpush1.bf16.msra.mxu1 %v13348_v61  ;;  %v13458_v61 = vcombine.low %v954_v23, %v958_v5  ;;  %v1002_v5 = vld [vmem:[%s19895_s1 + $0x1e10] sm:$0xff] }
 0x4b9   :  { %11436 = vmatprep.subr.bf16.mxu1 %v13357_v19  ;;  %v13467_v19 = vcombine.high %v962_v48, %v966_v18 }
 0x4ba   :  { %10920 = vmatpush1.bf16.msra.mxu0 %v13418_v10  ;;  %v911_v10 = vld [vmem:[%s19895_s1 + $0x1b38] sm:$0xff] }
 0x4bb   :  { %10921 = vmatprep.subr.bf16.mxu0 %v13427_v14  ;;  %v13404_v14 = vcombine.low %v899_v16, %v903_v15  ;;  %v13413_v34 = vcombine.high %v907_v38, %v911_v10  ;;  %v1014_v16 = vld [vmem:[%s19895_s1 + $0x1e70] sm:$0xff]  ;;  %v947_v15 = vld [vmem:[%s19895_s1 + $0x1c58] sm:$0xff] }
 0x4bc   :  { %11437 = vmatpush1.bf16.msra.mxu1 %v13356_v30  ;;  %v13466_v30 = vcombine.low %v962_v48, %v966_v18  ;;  %v1010_v18 = vld [vmem:[%s19895_s1 + $0x1e50] sm:$0xff] }
 0x4bd   :  { %11438 = vmatprep.subr.bf16.mxu1 %v13365_v31  ;;  %v13475_v31 = vcombine.high %v970_v24, %v974_v17 }
 0x4be   :  { %10922 = vmatpush1.bf16.msra.mxu0 %v13426_v29  ;;  %v919_v29 = vld [vmem:[%s19895_s1 + $0x1b78] sm:$0xff] }
 0x4bf   :  { %10923 = vmatprep.subr.bf16.mxu0 %v13435_v36  ;;  %v13412_v36 = vcombine.low %v907_v38, %v911_v10  ;;  %v13421_v39 = vcombine.high %v915_v0, %v919_v29  ;;  %v1022_v38 = vld [vmem:[%s19895_s1 + $0x1eb0] sm:$0xff]  ;;  %v955_v10 = vld [vmem:[%s19895_s1 + $0x1c98] sm:$0xff] }
 0x4c0   :  { %11439 = vmatpush1.bf16.msra.mxu1 %v13364_v13  ;;  %v13474_v13 = vcombine.low %v970_v24, %v974_v17  ;;  %v1018_v17 = vld [vmem:[%s19895_s1 + $0x1e90] sm:$0xff] }
 0x4c1   :  { %11440 = vmatprep.subr.bf16.mxu1 %v13373_v37  ;;  %v13483_v37 = vcombine.high %v978_v35, %v982_v21 }
 0x4c2   :  { %10924 = vmatpush1.bf16.msra.mxu0 %v13434_v47  ;;  %v927_v47 = vld [vmem:[%s19895_s1 + $0x1bb8] sm:$0xff] }
 0x4c3   :  { %10934 = vmatprep.subr.bf16.mxu0 %v13443_v51  ;;  %v13420_v51 = vcombine.low %v915_v0, %v919_v29  ;;  %v13429_v54 = vcombine.high %v923_v46, %v927_v47  ;;  %v1030_v0 = vld [vmem:[%s19895_s1 + $0x1ef0] sm:$0xff]  ;;  %v967_v29 = vld [vmem:[%s19895_s1 + $0x1cf8] sm:$0xff] }
 0x4c4   :  { %11441 = vmatpush1.bf16.msra.mxu1 %v13372_v50  ;;  %v13482_v50 = vcombine.low %v978_v35, %v982_v21  ;;  %v1026_v21 = vld [vmem:[%s19895_s1 + $0x1ed0] sm:$0xff] }
 0x4c5   :  { %11442 = vmatprep.subr.bf16.mxu1 %v13381_v53  ;;  %10926 = vmatmul.mubr.bf16.vlgmr.msra.gmra.mrb[4].mxu0 %v16140_v1  ;;  %v13491_v53 = vcombine.high %v986_v33, %v990_v42 }
 0x4c6   :  { %10935 = vmatpush1.bf16.msra.mxu0 %v13442_v59  ;;  %10966 = vmatprep.mubr.bf16.mxu0 %v16150_v7  ;;  %v935_v59 = vld [vmem:[%s19895_s1 + $0x1bf8] sm:$0xff] }
 0x4c7   :  { %10936 = vmatprep.subr.bf16.mxu0 %v13451_v60  ;;  %v13428_v60 = vcombine.low %v923_v46, %v927_v47  ;;  %v13437_v23 = vcombine.high %v931_v45, %v935_v59  ;;  %v975_v46 = vld [vmem:[%s19895_s1 + $0x1d38] sm:$0xff]  ;;  %v13530_v47 = vcombine.low %v1026_v21, %v1030_v0 }
 0x4c8   :  { %11443 = vmatpush1.bf16.msra.mxu1 %v13380_v62  ;;  %v13490_v62 = vcombine.low %v986_v33, %v990_v42  ;;  %v1038_v33 = vld [vmem:[%s19895_s1 + $0x1f30] sm:$0xff]  ;;  %v971_v42 = vld [vmem:[%s19895_s1 + $0x1d18] sm:$0xff] }
 0x4c9   :  { %11444 = vmatprep.subr.bf16.mxu1 %v13389_v26  ;;  %v13499_v26 = vcombine.high %v994_v22, %v998_v55 }
 0x4ca   :  { %10937 = vmatpush1.bf16.msra.mxu0 %v13450_v8  ;;  %v943_v8 = vld [vmem:[%s19895_s1 + $0x1c38] sm:$0xff] }
 0x4cb   :  { %10938 = vmatprep.subr.bf16.mxu0 %v13459_v9  ;;  %v13436_v9 = vcombine.low %v931_v45, %v935_v59  ;;  %v13445_v48 = vcombine.high %v939_v49, %v943_v8  ;;  %v983_v45 = vld [vmem:[%s19895_s1 + $0x1d78] sm:$0xff] }
 0x4cc   :  { %11445 = vmatpush1.bf16.msra.mxu1 %v13388_v52  ;;  %v13498_v52 = vcombine.low %v994_v22, %v998_v55  ;;  %v1046_v22 = vld [vmem:[%s19895_s1 + $0x1f70] sm:$0xff]  ;;  %v979_v55 = vld [vmem:[%s19895_s1 + $0x1d58] sm:$0xff] }
 0x4cd   :  { %11446 = vmatprep.subr.bf16.mxu1 %v13397_v11  ;;  %v13507_v11 = vcombine.high %v1002_v5, %v1006_v43 }
 0x4ce   :  { %10939 = vmatpush1.bf16.msra.mxu0 %v13458_v61  ;;  %v951_v61 = vld [vmem:[%s19895_s1 + $0x1c78] sm:$0xff] }
 0x4cf   :  { %10940 = vmatprep.subr.bf16.mxu0 %v13467_v19  ;;  %v13444_v19 = vcombine.low %v939_v49, %v943_v8  ;;  %v13453_v24 = vcombine.high %v947_v15, %v951_v61  ;;  %v991_v49 = vld [vmem:[%s19895_s1 + $0x1db8] sm:$0xff] }
 0x4d0   :  { %11447 = vmatpush1.bf16.msra.mxu1 %v13396_v25  ;;  %v13506_v25 = vcombine.low %v1002_v5, %v1006_v43  ;;  %v1054_v5 = vld [vmem:[%s19895_s1 + $0x1fb0] sm:$0xff]  ;;  %v987_v43 = vld [vmem:[%s19895_s1 + $0x1d98] sm:$0xff] }
 0x4d1   :  { %11448 = vmatprep.subr.bf16.mxu1 %v13405_v20  ;;  %v13515_v20 = vcombine.high %v1010_v18, %v1014_v16 }
 0x4d2   :  { %10941 = vmatpush1.bf16.msra.mxu0 %v13466_v30  ;;  %v959_v30 = vld [vmem:[%s19895_s1 + $0x1cb8] sm:$0xff] }
 0x4d3   :  { %10942 = vmatprep.subr.bf16.mxu0 %v13475_v31  ;;  %v13452_v31 = vcombine.low %v947_v15, %v951_v61  ;;  %v13461_v35 = vcombine.high %v955_v10, %v959_v30  ;;  %v999_v15 = vld [vmem:[%s19895_s1 + $0x1df8] sm:$0xff] }
 0x4d4   :  { %11449 = vmatpush1.bf16.msra.mxu1 %v13404_v14  ;;  %v13514_v14 = vcombine.low %v1010_v18, %v1014_v16  ;;  %v1062_v18 = vld [vmem:[%s19895_s1 + $0x1ff0] sm:$0xff]  ;;  %v995_v16 = vld [vmem:[%s19895_s1 + $0x1dd8] sm:$0xff] }
 0x4d5   :  { %11450 = vmatprep.subr.bf16.mxu1 %v13413_v34  ;;  %v13523_v34 = vcombine.high %v1018_v17, %v1022_v38 }
 0x4d6   :  { %10943 = vmatpush1.bf16.msra.mxu0 %v13474_v13  ;;  %v13522_v13 = vcombine.low %v1018_v17, %v1022_v38  ;;  %v1070_v17 = vld [vmem:[%s19895_s1 + $0x2030] sm:$0xff]  ;;  %v1003_v38 = vld [vmem:[%s19895_s1 + $0x1e18] sm:$0xff] }
 0x4d7   :  { %10944 = vmatprep.subr.bf16.mxu0 %v13483_v37  ;;  %v13531_v37 = vcombine.high %v1026_v21, %v1030_v0  ;;  %v1078_v21 = vld [vmem:[%s19895_s1 + $0x2070] sm:$0xff]  ;;  %v1011_v0 = vld [vmem:[%s19895_s1 + $0x1e58] sm:$0xff] }
 0x4d8   :  { %11451 = vmatpush1.bf16.msra.mxu1 %v13412_v36  ;;  %v13460_v36 = vcombine.low %v955_v10, %v959_v30  ;;  %v1007_v10 = vld [vmem:[%s19895_s1 + $0x1e38] sm:$0xff] }
 0x4d9   :  { %11452 = vmatprep.subr.bf16.mxu1 %v13421_v39 }
 0x4da   :  { %10945 = vmatpush1.bf16.msra.mxu0 %v13482_v50 }
 0x4db   :  { %10946 = vmatprep.subr.bf16.mxu0 %v13491_v53  ;;  %v13477_v53 = vcombine.high %v971_v42, %v975_v46 }
 0x4dc   :  { %11453 = vmatpush1.bf16.msra.mxu1 %v13420_v51 }
 0x4dd   :  { %11454 = vmatprep.subr.bf16.mxu1 %v13429_v54  ;;  %v1042_v54 = vld [vmem:[%s19895_s1 + $0x1f50] sm:$0xff] }
 0x4de   :  { %10947 = vmatpush1.bf16.msra.mxu0 %v13490_v62  ;;  %v13476_v62 = vcombine.low %v971_v42, %v975_v46  ;;  %v13546_v8 = vcombine.low %v1042_v54, %v1046_v22  ;;  %v1023_v42 = vld [vmem:[%s19895_s1 + $0x1eb8] sm:$0xff] }
 0x4df   :  { %10948 = vmatprep.subr.bf16.mxu0 %v13499_v26  ;;  %v13485_v26 = vcombine.high %v979_v55, %v983_v45 }
 0x4e0   :  { %11455 = vmatpush1.bf16.msra.mxu1 %v13428_v60  ;;  %v13547_v60 = vcombine.high %v1042_v54, %v1046_v22  ;;  %v1094_v54 = vld [vmem:[%s19895_s1 + $0x20f0] sm:$0xff]  ;;  %v1027_v22 = vld [vmem:[%s19895_s1 + $0x1ed8] sm:$0xff] }
 0x4e1   :  { %11456 = vmatprep.subr.bf16.mxu1 %v13437_v23  ;;  %v1050_v23 = vld [vmem:[%s19895_s1 + $0x1f90] sm:$0xff] }
 0x4e2   :  { %10949 = vmatpush1.bf16.msra.mxu0 %v13498_v52  ;;  %v13484_v52 = vcombine.low %v979_v55, %v983_v45  ;;  %v13554_v61 = vcombine.low %v1050_v23, %v1054_v5  ;;  %v1031_v55 = vld [vmem:[%s19895_s1 + $0x1ef8] sm:$0xff] }
 0x4e3   :  { %10950 = vmatprep.subr.bf16.mxu0 %v13507_v11  ;;  %v13493_v11 = vcombine.high %v987_v43, %v991_v49 }
 0x4e4   :  { %11457 = vmatpush1.bf16.msra.mxu1 %v13436_v9  ;;  %v13555_v9 = vcombine.high %v1050_v23, %v1054_v5  ;;  %v1102_v23 = vld [vmem:[%s19895_s1 + $0x2130] sm:$0xff]  ;;  %v1035_v5 = vld [vmem:[%s19895_s1 + $0x1f18] sm:$0xff] }
 0x4e5   :  { %11467 = vmatprep.subr.bf16.mxu1 %v13445_v48  ;;  %v1058_v48 = vld [vmem:[%s19895_s1 + $0x1fd0] sm:$0xff] }
 0x4e6   :  { %10951 = vmatpush1.bf16.msra.mxu0 %v13506_v25  ;;  %v13492_v25 = vcombine.low %v987_v43, %v991_v49  ;;  %v13562_v30 = vcombine.low %v1058_v48, %v1062_v18  ;;  %v1039_v43 = vld [vmem:[%s19895_s1 + $0x1f38] sm:$0xff] }
 0x4e7   :  { %11459 = vmatmul.mubr.bf16.vlgmr.msra.gmra.mrb[8].mxu1 %v16140_v1  ;;  %10952 = vmatprep.subr.bf16.mxu0 %v13515_v20  ;;  %v963_v1 = vld [vmem:[%s19895_s1 + $0x1cd8] sm:$0xff]  ;;  %v13501_v20 = vcombine.high %v995_v16, %v999_v15 }
 0x4e8   :  { %11468 = vmatpush1.bf16.msra.mxu1 %v13444_v19  ;;  %11499 = vmatprep.mubr.bf16.mxu1 %v16150_v7  ;;  %v13469_v39 = vcombine.high %v963_v1, %v967_v29  ;;  %v1034_v7 = vld [vmem:[%s19895_s1 + $0x1f10] sm:$0xff]  ;;  %v13468_v50 = vcombine.low %v963_v1, %v967_v29  ;;  %v13563_v19 = vcombine.high %v1058_v48, %v1062_v18  ;;  %v1015_v1 = vld [vmem:[%s19895_s1 + $0x1e78] sm:$0xff] }
 0x4e9   :  { %11469 = vmatprep.subr.bf16.mxu1 %v13453_v24  ;;  %v13539_v51 = vcombine.high %v1034_v7, %v1038_v33  ;;  %v13538_v59 = vcombine.low %v1034_v7, %v1038_v33  ;;  %v1066_v24 = vld [vmem:[%s19895_s1 + $0x2010] sm:$0xff]  ;;  %v1019_v33 = vld [vmem:[%s19895_s1 + $0x1e98] sm:$0xff] }
 0x4ea   :  { %10953 = vmatpush1.bf16.msra.mxu0 %v13514_v14  ;;  %v13500_v14 = vcombine.low %v995_v16, %v999_v15  ;;  %v13570_v29 = vcombine.low %v1066_v24, %v1070_v17  ;;  %v1086_v7 = vld [vmem:[%s19895_s1 + $0x20b0] sm:$0xff]  ;;  %v1043_v18 = vld [vmem:[%s19895_s1 + $0x1f58] sm:$0xff] }
 0x4eb   :  { %10954 = vmatprep.subr.bf16.mxu0 %v13523_v34  ;;  %v13509_v34 = vcombine.high %v1003_v38, %v1007_v10  ;;  %v1110_v48 = vld [vmem:[%s19895_s1 + $0x2170] sm:$0xff]  ;;  %v1047_v16 = vld [vmem:[%s19895_s1 + $0x1f78] sm:$0xff] }
 0x4ec   :  { %11470 = vmatpush1.bf16.msra.mxu1 %v13452_v31  ;;  %v13571_v31 = vcombine.high %v1066_v24, %v1070_v17  ;;  %v1118_v24 = vld [vmem:[%s19895_s1 + $0x21b0] sm:$0xff]  ;;  %v1051_v17 = vld [vmem:[%s19895_s1 + $0x1f98] sm:$0xff] }
 0x4ed   :  { %11471 = vmatprep.subr.bf16.mxu1 %v13461_v35  ;;  %v1074_v35 = vld [vmem:[%s19895_s1 + $0x2050] sm:$0xff] }
 0x4ee   :  { %10955 = vmatpush1.bf16.msra.mxu0 %v13522_v13  ;;  %v13508_v13 = vcombine.low %v1003_v38, %v1007_v10  ;;  %v13578_v46 = vcombine.low %v1074_v35, %v1078_v21  ;;  %v1055_v38 = vld [vmem:[%s19895_s1 + $0x1fb8] sm:$0xff] }
 0x4ef   :  { %10956 = vmatprep.subr.bf16.mxu0 %v13531_v37  ;;  %v13517_v37 = vcombine.high %v1011_v0, %v1015_v1 }
 0x4f0   :  { %11472 = vmatpush1.bf16.msra.mxu1 %v13460_v36  ;;  %v13579_v36 = vcombine.high %v1074_v35, %v1078_v21  ;;  %v1126_v35 = vld [vmem:[%s19895_s1 + $0x21f0] sm:$0xff]  ;;  %v1059_v21 = vld [vmem:[%s19895_s1 + $0x1fd8] sm:$0xff] }
 0x4f1   :  { %11473 = vmatprep.subr.bf16.mxu1 %v13469_v39  ;;  %v1082_v39 = vld [vmem:[%s19895_s1 + $0x2090] sm:$0xff] }
 0x4f2   :  { %10957 = vmatpush1.bf16.msra.mxu0 %v13530_v47  ;;  %v13516_v47 = vcombine.low %v1011_v0, %v1015_v1  ;;  %v13586_v45 = vcombine.low %v1082_v39, %v1086_v7  ;;  %v1063_v0 = vld [vmem:[%s19895_s1 + $0x1ff8] sm:$0xff] }
 0x4f3   :  { %10958 = vmatprep.subr.bf16.mxu0 %v13539_v51  ;;  %v13525_v51 = vcombine.high %v1019_v33, %v1023_v42 }
 0x4f4   :  { %11474 = vmatpush1.bf16.msra.mxu1 %v13468_v50  ;;  %v13587_v50 = vcombine.high %v1082_v39, %v1086_v7  ;;  %v1134_v39 = vld [vmem:[%s19895_s1 + $0x2230] sm:$0xff]  ;;  %v1067_v7 = vld [vmem:[%s19895_s1 + $0x2018] sm:$0xff] }
 0x4f5   :  { %11475 = vmatprep.subr.bf16.mxu1 %v13477_v53  ;;  %v1090_v53 = vld [vmem:[%s19895_s1 + $0x20d0] sm:$0xff] }
 0x4f6   :  { %10959 = vmatpush1.bf16.msra.mxu0 %v13538_v59  ;;  %v13524_v59 = vcombine.low %v1019_v33, %v1023_v42  ;;  %v13594_v49 = vcombine.low %v1090_v53, %v1094_v54  ;;  %v1071_v33 = vld [vmem:[%s19895_s1 + $0x2038] sm:$0xff] }
 0x4f7   :  { %10960 = vmatprep.subr.bf16.mxu0 %v13547_v60  ;;  %v13533_v60 = vcombine.high %v1027_v22, %v1031_v55 }
 0x4f8   :  { %11476 = vmatpush1.bf16.msra.mxu1 %v13476_v62  ;;  %v13595_v62 = vcombine.high %v1090_v53, %v1094_v54  ;;  %v1142_v53 = vld [vmem:[%s19895_s1 + $0x2270] sm:$0xff]  ;;  %v1075_v54 = vld [vmem:[%s19895_s1 + $0x2058] sm:$0xff] }
 0x4f9   :  { %11477 = vmatprep.subr.bf16.mxu1 %v13485_v26  ;;  %v1098_v26 = vld [vmem:[%s19895_s1 + $0x2110] sm:$0xff] }
 0x4fa   :  { %10961 = vmatpush1.bf16.msra.mxu0 %v13546_v8  ;;  %v13532_v8 = vcombine.low %v1027_v22, %v1031_v55  ;;  %v13602_v15 = vcombine.low %v1098_v26, %v1102_v23  ;;  %v1079_v22 = vld [vmem:[%s19895_s1 + $0x2078] sm:$0xff] }
 0x4fb   :  { %10962 = vmatprep.subr.bf16.mxu0 %v13555_v9  ;;  %v13541_v9 = vcombine.high %v1035_v5, %v1039_v43 }
 0x4fc   :  { %11478 = vmatpush1.bf16.msra.mxu1 %v13484_v52  ;;  %v13603_v52 = vcombine.high %v1098_v26, %v1102_v23  ;;  %v1150_v26 = vld [vmem:[%s19895_s1 + $0x22b0] sm:$0xff]  ;;  %v1083_v23 = vld [vmem:[%s19895_s1 + $0x2098] sm:$0xff] }
 0x4fd   :  { %11479 = vmatprep.subr.bf16.mxu1 %v13493_v11  ;;  %v1106_v11 = vld [vmem:[%s19895_s1 + $0x2150] sm:$0xff] }
 0x4fe   :  { %10963 = vmatpush1.bf16.msra.mxu0 %v13554_v61  ;;  %v13540_v61 = vcombine.low %v1035_v5, %v1039_v43  ;;  %v13610_v10 = vcombine.low %v1106_v11, %v1110_v48  ;;  %v1087_v5 = vld [vmem:[%s19895_s1 + $0x20b8] sm:$0xff] }
 0x4ff   :  { %10964 = vmatprep.subr.bf16.mxu0 %v13563_v19  ;;  %v13549_v19 = vcombine.high %v1043_v18, %v1047_v16 }
 0x500   :  { %11480 = vmatpush1.bf16.msra.mxu1 %v13492_v25  ;;  %v13611_v25 = vcombine.high %v1106_v11, %v1110_v48  ;;  %v1158_v11 = vld [vmem:[%s19895_s1 + $0x22f0] sm:$0xff]  ;;  %v1095_v48 = vld [vmem:[%s19895_s1 + $0x20f8] sm:$0xff] }
 0x501   :  { %11481 = vmatprep.subr.bf16.mxu1 %v13501_v20  ;;  %v1114_v20 = vld [vmem:[%s19895_s1 + $0x2190] sm:$0xff] }
 0x502   :  { %10965 = vmatpush1.bf16.msra.mxu0 %v13562_v30  ;;  %v13548_v30 = vcombine.low %v1043_v18, %v1047_v16  ;;  %v13618_v1 = vcombine.low %v1114_v20, %v1118_v24  ;;  %v13588_v16 = vcombine.low %v1083_v23, %v1087_v5 }
 0x503   :  { %10975 = vmatprep.subr.bf16.mxu0 %v13571_v31  ;;  %v13557_v31 = vcombine.high %v1051_v17, %v1055_v38 }
 0x504   :  { %11482 = vmatpush1.bf16.msra.mxu1 %v13500_v14  ;;  %v13619_v14 = vcombine.high %v1114_v20, %v1118_v24  ;;  %v1103_v20 = vld [vmem:[%s19895_s1 + $0x2138] sm:$0xff] }
 0x505   :  { %11483 = vmatprep.subr.bf16.mxu1 %v13509_v34  ;;  %10967 = vmatmul.mubr.bf16.vlgmr.msra.gmra.mrb[4].mxu0 %v16349_v56  ;;  %v1122_v34 = vld [vmem:[%s19895_s1 + $0x21d0] sm:$0xff] }
 0x506   :  { %10976 = vmatpush1.bf16.msra.mxu0 %v13570_v29  ;;  %11007 = vmatprep.mubr.bf16.mxu0 %v16359_v63  ;;  %v13556_v29 = vcombine.low %v1051_v17, %v1055_v38  ;;  %v13626_v42 = vcombine.low %v1122_v34, %v1126_v35 }
 0x507   :  { %10977 = vmatprep.subr.bf16.mxu0 %v13579_v36  ;;  %v13565_v36 = vcombine.high %v1059_v21, %v1063_v0 }
 0x508   :  { %11484 = vmatpush1.bf16.msra.mxu1 %v13508_v13  ;;  %v13627_v13 = vcombine.high %v1122_v34, %v1126_v35  ;;  %v1111_v34 = vld [vmem:[%s19895_s1 + $0x2178] sm:$0xff] }
 0x509   :  { %11485 = vmatprep.subr.bf16.mxu1 %v13517_v37  ;;  %v1130_v37 = vld [vmem:[%s19895_s1 + $0x2210] sm:$0xff] }
 0x50a   :  { %10978 = vmatpush1.bf16.msra.mxu0 %v13578_v46  ;;  %v13564_v46 = vcombine.low %v1059_v21, %v1063_v0  ;;  %v13634_v55 = vcombine.low %v1130_v37, %v1134_v39 }
 0x50b   :  { %10979 = vmatprep.subr.bf16.mxu0 %v13587_v50  ;;  %v13573_v50 = vcombine.high %v1067_v7, %v1071_v33 }
 0x50c   :  { %11486 = vmatpush1.bf16.msra.mxu1 %v13516_v47  ;;  %v13635_v47 = vcombine.high %v1130_v37, %v1134_v39  ;;  %v1119_v37 = vld [vmem:[%s19895_s1 + $0x21b8] sm:$0xff] }
 0x50d   :  { %11487 = vmatprep.subr.bf16.mxu1 %v13525_v51  ;;  %v1138_v51 = vld [vmem:[%s19895_s1 + $0x2250] sm:$0xff] }
 0x50e   :  { %10980 = vmatpush1.bf16.msra.mxu0 %v13586_v45  ;;  %v13572_v45 = vcombine.low %v1067_v7, %v1071_v33  ;;  %v13642_v43 = vcombine.low %v1138_v51, %v1142_v53 }
 0x50f   :  { %10981 = vmatprep.subr.bf16.mxu0 %v13595_v62  ;;  %v13581_v62 = vcombine.high %v1075_v54, %v1079_v22 }
 0x510   :  { %11488 = vmatpush1.bf16.msra.mxu1 %v13524_v59  ;;  %v13643_v59 = vcombine.high %v1138_v51, %v1142_v53  ;;  %v1127_v51 = vld [vmem:[%s19895_s1 + $0x21f8] sm:$0xff] }
 0x511   :  { %11489 = vmatprep.subr.bf16.mxu1 %v13533_v60  ;;  %v1146_v60 = vld [vmem:[%s19895_s1 + $0x2290] sm:$0xff] }
 0x512   :  { %10982 = vmatpush1.bf16.msra.mxu0 %v13594_v49  ;;  %v13580_v49 = vcombine.low %v1075_v54, %v1079_v22  ;;  %v13650_v18 = vcombine.low %v1146_v60, %v1150_v26 }
 0x513   :  { %10983 = vmatprep.subr.bf16.mxu0 %v13603_v52  ;;  %v13589_v52 = vcombine.high %v1083_v23, %v1087_v5 }
 0x514   :  { %11490 = vmatpush1.bf16.msra.mxu1 %v13532_v8  ;;  %v13651_v8 = vcombine.high %v1146_v60, %v1150_v26  ;;  %v1135_v60 = vld [vmem:[%s19895_s1 + $0x2238] sm:$0xff] }
 0x515   :  { %11491 = vmatprep.subr.bf16.mxu1 %v13541_v9  ;;  %v1154_v9 = vld [vmem:[%s19895_s1 + $0x22d0] sm:$0xff] }
 0x516   :  { %10984 = vmatpush1.bf16.msra.mxu0 %v13602_v15  ;;  %v13659_v15 = vcombine.high %v1154_v9, %v1158_v11  ;;  %v13658_v24 = vcombine.low %v1154_v9, %v1158_v11  ;;  %v1143_v9 = vld [vmem:[%s19895_s1 + $0x2278] sm:$0xff] }
 0x517   :  { %10985 = vmatprep.subr.bf16.mxu0 %v13611_v25  ;;  %v1166_v25 = vld [vmem:[%s19895_s1 + $0x2330] sm:$0xff] }
 0x518   :  { %11492 = vmatpush1.bf16.msra.mxu1 %v13540_v61 }
 0x519   :  { %11493 = vmatprep.subr.bf16.mxu1 %v13549_v19  ;;  %v1099_v19 = vld [vmem:[%s19895_s1 + $0x2118] sm:$0xff] }
 0x51a   :  { %10986 = vmatpush1.bf16.msra.mxu0 %v13610_v10  ;;  %v13605_v10 = vcombine.high %v1099_v19, %v1103_v20  ;;  %v13604_v21 = vcombine.low %v1099_v19, %v1103_v20 }
 0x51b   :  { %10987 = vmatprep.subr.bf16.mxu0 %v13619_v14  ;;  %v1174_v14 = vld [vmem:[%s19895_s1 + $0x2370] sm:$0xff] }
 0x51c   :  { %11494 = vmatpush1.bf16.msra.mxu1 %v13548_v30  ;;  %v1170_v30 = vld [vmem:[%s19895_s1 + $0x2350] sm:$0xff] }
 0x51d   :  { %11495 = vmatprep.subr.bf16.mxu1 %v13557_v31  ;;  %v1107_v31 = vld [vmem:[%s19895_s1 + $0x2158] sm:$0xff]  ;;  %v13675_v0 = vcombine.high %v1170_v30, %v1174_v14  ;;  %v13674_v39 = vcombine.low %v1170_v30, %v1174_v14 }
 0x51e   :  { %10988 = vmatpush1.bf16.msra.mxu0 %v13618_v1  ;;  %v13613_v1 = vcombine.high %v1107_v31, %v1111_v34  ;;  %v13612_v7 = vcombine.low %v1107_v31, %v1111_v34  ;;  %v1159_v30 = vld [vmem:[%s19895_s1 + $0x22f8] sm:$0xff] }
 0x51f   :  { %10989 = vmatprep.subr.bf16.mxu0 %v13627_v13  ;;  %v1182_v13 = vld [vmem:[%s19895_s1 + $0x23b0] sm:$0xff] }
 0x520   :  { %11496 = vmatpush1.bf16.msra.mxu1 %v13556_v29  ;;  %v1178_v29 = vld [vmem:[%s19895_s1 + $0x2390] sm:$0xff] }
 0x521   :  { %11497 = vmatprep.subr.bf16.mxu1 %v13565_v36  ;;  %v1115_v36 = vld [vmem:[%s19895_s1 + $0x2198] sm:$0xff]  ;;  %v13683_v33 = vcombine.high %v1178_v29, %v1182_v13  ;;  %v13682_v53 = vcombine.low %v1178_v29, %v1182_v13 }
 0x522   :  { %10990 = vmatpush1.bf16.msra.mxu0 %v13626_v42  ;;  %v13621_v42 = vcombine.high %v1115_v36, %v1119_v37  ;;  %v13620_v54 = vcombine.low %v1115_v36, %v1119_v37  ;;  %v1167_v29 = vld [vmem:[%s19895_s1 + $0x2338] sm:$0xff] }
 0x523   :  { %10991 = vmatprep.subr.bf16.mxu0 %v13635_v47  ;;  %v1190_v47 = vld [vmem:[%s19895_s1 + $0x23f0] sm:$0xff] }
 0x524   :  { %11498 = vmatpush1.bf16.msra.mxu1 %v13564_v46  ;;  %v1186_v46 = vld [vmem:[%s19895_s1 + $0x23d0] sm:$0xff] }
 0x525   :  { %11508 = vmatprep.subr.bf16.mxu1 %v13573_v50  ;;  %v1123_v50 = vld [vmem:[%s19895_s1 + $0x21d8] sm:$0xff]  ;;  %v13691_v22 = vcombine.high %v1186_v46, %v1190_v47  ;;  %v13690_v26 = vcombine.low %v1186_v46, %v1190_v47 }
 0x526   :  { %10992 = vmatpush1.bf16.msra.mxu0 %v13634_v55  ;;  %v13629_v55 = vcombine.high %v1123_v50, %v1127_v51  ;;  %v13628_v23 = vcombine.low %v1123_v50, %v1127_v51  ;;  %v1175_v46 = vld [vmem:[%s19895_s1 + $0x2378] sm:$0xff] }
 0x527   :  { %11500 = vmatmul.mubr.bf16.vlgmr.msra.gmra.mrb[8].mxu1 %v16349_v56  ;;  %10993 = vmatprep.subr.bf16.mxu0 %v13643_v59  ;;  %v1091_v56 = vld [vmem:[%s19895_s1 + $0x20d8] sm:$0xff]  ;;  %v1198_v59 = vld [vmem:[%s19895_s1 + $0x2430] sm:$0xff] }
 0x528   :  { %11509 = vmatpush1.bf16.msra.mxu1 %v13572_v45  ;;  %11540 = vmatprep.mubr.bf16.mxu1 %v16359_v63  ;;  %v13597_v61 = vcombine.high %v1091_v56, %v1095_v48  ;;  %v1162_v63 = vld [vmem:[%s19895_s1 + $0x2310] sm:$0xff]  ;;  %v13596_v17 = vcombine.low %v1091_v56, %v1095_v48 }
 0x529   :  { %11510 = vmatprep.subr.bf16.mxu1 %v13581_v62  ;;  %v13667_v38 = vcombine.high %v1162_v63, %v1166_v25  ;;  %v13666_v35 = vcombine.low %v1162_v63, %v1166_v25  ;;  %v1194_v45 = vld [vmem:[%s19895_s1 + $0x2410] sm:$0xff]  ;;  %v1131_v62 = vld [vmem:[%s19895_s1 + $0x2218] sm:$0xff] }
 0x52a   :  { %10994 = vmatpush1.bf16.msra.mxu0 %v13642_v43  ;;  %v13699_v5 = vcombine.high %v1194_v45, %v1198_v59  ;;  %v13637_v43 = vcombine.high %v1131_v62, %v1135_v60  ;;  %v13698_v11 = vcombine.low %v1194_v45, %v1198_v59  ;;  %v13636_v56 = vcombine.low %v1131_v62, %v1135_v60  ;;  %v1151_v63 = vld [vmem:[%s19895_s1 + $0x22b8] sm:$0xff] }
 0x52b   :  { %10995 = vmatprep.subr.bf16.mxu0 %v13651_v8  ;;  %v1206_v8 = vld [vmem:[%s19895_s1 + $0x2470] sm:$0xff]  ;;  %v1183_v45 = vld [vmem:[%s19895_s1 + $0x23b8] sm:$0xff] }
 0x52c   :  { %11511 = vmatpush1.bf16.msra.mxu1 %v13580_v49  ;;  %v1202_v49 = vld [vmem:[%s19895_s1 + $0x2450] sm:$0xff] }
 0x52d   :  { %11512 = vmatprep.subr.bf16.mxu1 %v13589_v52  ;;  %v1139_v52 = vld [vmem:[%s19895_s1 + $0x2258] sm:$0xff]  ;;  %v13707_v48 = vcombine.high %v1202_v49, %v1206_v8  ;;  %v13706_v25 = vcombine.low %v1202_v49, %v1206_v8 }
 0x52e   :  { %10996 = vmatpush1.bf16.msra.mxu0 %v13650_v18  ;;  %v13645_v18 = vcombine.high %v1139_v52, %v1143_v9  ;;  %v13644_v19 = vcombine.low %v1139_v52, %v1143_v9  ;;  %v1191_v49 = vld [vmem:[%s19895_s1 + $0x23f8] sm:$0xff] }
 0x52f   :  { %10997 = vmatprep.subr.bf16.mxu0 %v13659_v15  ;;  %v1214_v15 = vld [vmem:[%s19895_s1 + $0x24b0] sm:$0xff] }
 0x530   :  { %11513 = vmatpush1.bf16.msra.mxu1 %v13588_v16  ;;  %v1210_v16 = vld [vmem:[%s19895_s1 + $0x2490] sm:$0xff] }
 0x531   :  { %11514 = vmatprep.subr.bf16.mxu1 %v13597_v61  ;;  %v1147_v61 = vld [vmem:[%s19895_s1 + $0x2298] sm:$0xff]  ;;  %v13715_v20 = vcombine.high %v1210_v16, %v1214_v15  ;;  %v13714_v14 = vcombine.low %v1210_v16, %v1214_v15 }
 0x532   :  { %10998 = vmatpush1.bf16.msra.mxu0 %v13658_v24  ;;  %v13653_v24 = vcombine.high %v1147_v61, %v1151_v63  ;;  %v13652_v31 = vcombine.low %v1147_v61, %v1151_v63  ;;  %v1199_v16 = vld [vmem:[%s19895_s1 + $0x2438] sm:$0xff] }
 0x533   :  { %10999 = vmatprep.subr.bf16.mxu0 %v13667_v38  ;;  %v1222_v38 = vld [vmem:[%s19895_s1 + $0x24f0] sm:$0xff] }
 0x534   :  { %11515 = vmatpush1.bf16.msra.mxu1 %v13596_v17  ;;  %v1218_v17 = vld [vmem:[%s19895_s1 + $0x24d0] sm:$0xff] }
 0x535   :  { %11516 = vmatprep.subr.bf16.mxu1 %v13605_v10  ;;  %v1155_v10 = vld [vmem:[%s19895_s1 + $0x22d8] sm:$0xff]  ;;  %v13723_v34 = vcombine.high %v1218_v17, %v1222_v38  ;;  %v13722_v13 = vcombine.low %v1218_v17, %v1222_v38 }
 0x536   :  { %11000 = vmatpush1.bf16.msra.mxu0 %v13666_v35  ;;  %v13661_v35 = vcombine.high %v1155_v10, %v1159_v30  ;;  %v13660_v36 = vcombine.low %v1155_v10, %v1159_v30  ;;  %v1207_v17 = vld [vmem:[%s19895_s1 + $0x2478] sm:$0xff] }
 0x537   :  { %11001 = vmatprep.subr.bf16.mxu0 %v13675_v0  ;;  %v1230_v0 = vld [vmem:[%s19895_s1 + $0x2530] sm:$0xff] }
 0x538   :  { %11517 = vmatpush1.bf16.msra.mxu1 %v13604_v21  ;;  %v1226_v21 = vld [vmem:[%s19895_s1 + $0x2510] sm:$0xff] }
 0x539   :  { %11518 = vmatprep.subr.bf16.mxu1 %v13613_v1  ;;  %v1163_v1 = vld [vmem:[%s19895_s1 + $0x2318] sm:$0xff]  ;;  %v13731_v37 = vcombine.high %v1226_v21, %v1230_v0  ;;  %v13730_v47 = vcombine.low %v1226_v21, %v1230_v0 }
 0x53a   :  { %11002 = vmatpush1.bf16.msra.mxu0 %v13674_v39  ;;  %v13669_v39 = vcombine.high %v1163_v1, %v1167_v29  ;;  %v13668_v50 = vcombine.low %v1163_v1, %v1167_v29  ;;  %v1215_v21 = vld [vmem:[%s19895_s1 + $0x24b8] sm:$0xff] }
 0x53b   :  { %11003 = vmatprep.subr.bf16.mxu0 %v13683_v33  ;;  %v1238_v33 = vld [vmem:[%s19895_s1 + $0x2570] sm:$0xff] }
 0x53c   :  { %11519 = vmatpush1.bf16.msra.mxu1 %v13612_v7  ;;  %v1234_v7 = vld [vmem:[%s19895_s1 + $0x2550] sm:$0xff] }
 0x53d   :  { %11520 = vmatprep.subr.bf16.mxu1 %v13621_v42  ;;  %v1171_v42 = vld [vmem:[%s19895_s1 + $0x2358] sm:$0xff]  ;;  %v13739_v51 = vcombine.high %v1234_v7, %v1238_v33  ;;  %v13738_v59 = vcombine.low %v1234_v7, %v1238_v33 }
 0x53e   :  { %11004 = vmatpush1.bf16.msra.mxu0 %v13682_v53  ;;  %v13677_v53 = vcombine.high %v1171_v42, %v1175_v46  ;;  %v13676_v62 = vcombine.low %v1171_v42, %v1175_v46 }
 0x53f   :  { %11005 = vmatprep.subr.bf16.mxu0 %v13691_v22  ;;  %v1246_v22 = vld [vmem:[%s19895_s1 + $0x25b0] sm:$0xff] }
 0x540   :  { %11521 = vmatpush1.bf16.msra.mxu1 %v13620_v54  ;;  %v1242_v54 = vld [vmem:[%s19895_s1 + $0x2590] sm:$0xff] }
 0x541   :  { %11522 = vmatprep.subr.bf16.mxu1 %v13629_v55  ;;  %v1179_v55 = vld [vmem:[%s19895_s1 + $0x2398] sm:$0xff]  ;;  %v13747_v60 = vcombine.high %v1242_v54, %v1246_v22  ;;  %v13746_v8 = vcombine.low %v1242_v54, %v1246_v22 }
 0x542   :  { %11006 = vmatpush1.bf16.msra.mxu0 %v13690_v26  ;;  %v13685_v26 = vcombine.high %v1179_v55, %v1183_v45  ;;  %v13684_v52 = vcombine.low %v1179_v55, %v1183_v45  ;;  %v1298_v45 = vld [vmem:[%s19895_s1 + $0x2750] sm:$0xff] }
 0x543   :  { %11016 = vmatprep.subr.bf16.mxu0 %v13699_v5  ;;  %v1254_v5 = vld [vmem:[%s19895_s1 + $0x25f0] sm:$0xff] }
 0x544   :  { %11523 = vmatpush1.bf16.msra.mxu1 %v13628_v23  ;;  %v1250_v23 = vld [vmem:[%s19895_s1 + $0x25d0] sm:$0xff] }
 0x545   :  { %11524 = vmatprep.subr.bf16.mxu1 %v13637_v43  ;;  %11008 = vmatmul.mubr.bf16.vlgmr.msra.gmra.mrb[4].mxu0 %v16558_v57  ;;  %v1187_v43 = vld [vmem:[%s19895_s1 + $0x23d8] sm:$0xff]  ;;  %v13755_v9 = vcombine.high %v1250_v23, %v1254_v5  ;;  %v13754_v15 = vcombine.low %v1250_v23, %v1254_v5 }
 0x546   :  { %11017 = vmatpush1.bf16.msra.mxu0 %v13698_v11  ;;  %11048 = vmatprep.mubr.bf16.mxu0 %v16568_v2  ;;  %v13693_v11 = vcombine.high %v1187_v43, %v1191_v49  ;;  %v13692_v61 = vcombine.low %v1187_v43, %v1191_v49  ;;  %v1306_v49 = vld [vmem:[%s19895_s1 + $0x2790] sm:$0xff] }
 0x547   :  { %11018 = vmatprep.subr.bf16.mxu0 %v13707_v48  ;;  %v1262_v48 = vld [vmem:[%s19895_s1 + $0x2630] sm:$0xff] }
 0x548   :  { %11525 = vmatpush1.bf16.msra.mxu1 %v13636_v56  ;;  %v1258_v56 = vld [vmem:[%s19895_s1 + $0x2610] sm:$0xff] }
 0x549   :  { %11526 = vmatprep.subr.bf16.mxu1 %v13645_v18  ;;  %v1195_v18 = vld [vmem:[%s19895_s1 + $0x2418] sm:$0xff]  ;;  %v13763_v63 = vcombine.high %v1258_v56, %v1262_v48  ;;  %v13762_v38 = vcombine.low %v1258_v56, %v1262_v48 }
 0x54a   :  { %11019 = vmatpush1.bf16.msra.mxu0 %v13706_v25  ;;  %v13701_v25 = vcombine.high %v1195_v18, %v1199_v16  ;;  %v13700_v10 = vcombine.low %v1195_v18, %v1199_v16  ;;  %v1314_v16 = vld [vmem:[%s19895_s1 + $0x27d0] sm:$0xff] }
 0x54b   :  { %11020 = vmatprep.subr.bf16.mxu0 %v13715_v20  ;;  %v1270_v20 = vld [vmem:[%s19895_s1 + $0x2670] sm:$0xff] }
 0x54c   :  { %11527 = vmatpush1.bf16.msra.mxu1 %v13644_v19  ;;  %v1266_v19 = vld [vmem:[%s19895_s1 + $0x2650] sm:$0xff] }
 0x54d   :  { %11528 = vmatprep.subr.bf16.mxu1 %v13653_v24  ;;  %v1203_v24 = vld [vmem:[%s19895_s1 + $0x2458] sm:$0xff]  ;;  %v13771_v30 = vcombine.high %v1266_v19, %v1270_v20  ;;  %v13770_v0 = vcombine.low %v1266_v19, %v1270_v20 }
 0x54e   :  { %11021 = vmatpush1.bf16.msra.mxu0 %v13714_v14  ;;  %v13709_v14 = vcombine.high %v1203_v24, %v1207_v17  ;;  %v13708_v1 = vcombine.low %v1203_v24, %v1207_v17  ;;  %v1322_v17 = vld [vmem:[%s19895_s1 + $0x2810] sm:$0xff] }
 0x54f   :  { %11022 = vmatprep.subr.bf16.mxu0 %v13723_v34  ;;  %v1278_v34 = vld [vmem:[%s19895_s1 + $0x26b0] sm:$0xff] }
 0x550   :  { %11529 = vmatpush1.bf16.msra.mxu1 %v13652_v31  ;;  %v1274_v31 = vld [vmem:[%s19895_s1 + $0x2690] sm:$0xff] }
 0x551   :  { %11530 = vmatprep.subr.bf16.mxu1 %v13661_v35  ;;  %v1211_v35 = vld [vmem:[%s19895_s1 + $0x2498] sm:$0xff]  ;;  %v13779_v29 = vcombine.high %v1274_v31, %v1278_v34  ;;  %v13778_v7 = vcombine.low %v1274_v31, %v1278_v34 }
 0x552   :  { %11023 = vmatpush1.bf16.msra.mxu0 %v13722_v13  ;;  %v13717_v13 = vcombine.high %v1211_v35, %v1215_v21  ;;  %v13716_v33 = vcombine.low %v1211_v35, %v1215_v21  ;;  %v1330_v21 = vld [vmem:[%s19895_s1 + $0x2850] sm:$0xff] }
 0x553   :  { %11024 = vmatprep.subr.bf16.mxu0 %v13731_v37  ;;  %v1286_v37 = vld [vmem:[%s19895_s1 + $0x26f0] sm:$0xff] }
 0x554   :  { %11531 = vmatpush1.bf16.msra.mxu1 %v13660_v36  ;;  %v1282_v36 = vld [vmem:[%s19895_s1 + $0x26d0] sm:$0xff] }
 0x555   :  { %11532 = vmatprep.subr.bf16.mxu1 %v13669_v39  ;;  %v1223_v39 = vld [vmem:[%s19895_s1 + $0x24f8] sm:$0xff]  ;;  %v13787_v42 = vcombine.high %v1282_v36, %v1286_v37 }
 0x556   :  { %11025 = vmatpush1.bf16.msra.mxu0 %v13730_v47  ;;  %v1294_v47 = vld [vmem:[%s19895_s1 + $0x2730] sm:$0xff] }
 0x557   :  { %11026 = vmatprep.subr.bf16.mxu0 %v13739_v51  ;;  %v1231_v51 = vld [vmem:[%s19895_s1 + $0x2538] sm:$0xff] }
 0x558   :  { %11533 = vmatpush1.bf16.msra.mxu1 %v13668_v50  ;;  %v1227_v50 = vld [vmem:[%s19895_s1 + $0x2518] sm:$0xff] }
 0x559   :  { %11534 = vmatprep.subr.bf16.mxu1 %v13677_v53  ;;  %v13786_v53 = vcombine.low %v1282_v36, %v1286_v37  ;;  %v13733_v55 = vcombine.high %v1227_v50, %v1231_v51  ;;  %v13732_v23 = vcombine.low %v1227_v50, %v1231_v51  ;;  %v1346_v51 = vld [vmem:[%s19895_s1 + $0x28d0] sm:$0xff] }
 0x55a   :  { %11027 = vmatpush1.bf16.msra.mxu0 %v13738_v59  ;;  %v1302_v59 = vld [vmem:[%s19895_s1 + $0x2770] sm:$0xff] }
 0x55b   :  { %11028 = vmatprep.subr.bf16.mxu0 %v13747_v60  ;;  %v1239_v60 = vld [vmem:[%s19895_s1 + $0x2578] sm:$0xff]  ;;  %v13803_v5 = vcombine.high %v1298_v45, %v1302_v59 }
 0x55c   :  { %11535 = vmatpush1.bf16.msra.mxu1 %v13676_v62  ;;  %v1235_v62 = vld [vmem:[%s19895_s1 + $0x2558] sm:$0xff] }
 0x55d   :  { %11536 = vmatprep.subr.bf16.mxu1 %v13685_v26  ;;  %v13741_v43 = vcombine.high %v1235_v62, %v1239_v60  ;;  %v13740_v56 = vcombine.low %v1235_v62, %v1239_v60  ;;  %v1354_v60 = vld [vmem:[%s19895_s1 + $0x2910] sm:$0xff] }
 0x55e   :  { %11029 = vmatpush1.bf16.msra.mxu0 %v13746_v8  ;;  %v1310_v8 = vld [vmem:[%s19895_s1 + $0x27b0] sm:$0xff] }
 0x55f   :  { %11030 = vmatprep.subr.bf16.mxu0 %v13755_v9  ;;  %v1247_v9 = vld [vmem:[%s19895_s1 + $0x25b8] sm:$0xff]  ;;  %v13811_v48 = vcombine.high %v1306_v49, %v1310_v8 }
 0x560   :  { %11537 = vmatpush1.bf16.msra.mxu1 %v13684_v52  ;;  %v1243_v52 = vld [vmem:[%s19895_s1 + $0x2598] sm:$0xff] }
 0x561   :  { %11538 = vmatprep.subr.bf16.mxu1 %v13693_v11  ;;  %v13802_v11 = vcombine.low %v1298_v45, %v1302_v59  ;;  %v13749_v18 = vcombine.high %v1243_v52, %v1247_v9  ;;  %v13748_v19 = vcombine.low %v1243_v52, %v1247_v9  ;;  %v1362_v9 = vld [vmem:[%s19895_s1 + $0x2950] sm:$0xff] }
 0x562   :  { %11031 = vmatpush1.bf16.msra.mxu0 %v13754_v15  ;;  %v1318_v15 = vld [vmem:[%s19895_s1 + $0x27f0] sm:$0xff] }
 0x563   :  { %11032 = vmatprep.subr.bf16.mxu0 %v13763_v63  ;;  %v1255_v63 = vld [vmem:[%s19895_s1 + $0x25f8] sm:$0xff]  ;;  %v13819_v20 = vcombine.high %v1314_v16, %v1318_v15 }
 0x564   :  { %11539 = vmatpush1.bf16.msra.mxu1 %v13692_v61  ;;  %v1251_v61 = vld [vmem:[%s19895_s1 + $0x25d8] sm:$0xff] }
 0x565   :  { %11549 = vmatprep.subr.bf16.mxu1 %v13701_v25  ;;  %v13810_v25 = vcombine.low %v1306_v49, %v1310_v8  ;;  %v13757_v24 = vcombine.high %v1251_v61, %v1255_v63  ;;  %v13756_v31 = vcombine.low %v1251_v61, %v1255_v63  ;;  %v1370_v61 = vld [vmem:[%s19895_s1 + $0x2990] sm:$0xff] }
 0x566   :  { %11033 = vmatpush1.bf16.msra.mxu0 %v13762_v38  ;;  %v1326_v38 = vld [vmem:[%s19895_s1 + $0x2830] sm:$0xff] }
 0x567   :  { %11541 = vmatmul.mubr.bf16.vlgmr.msra.gmra.mrb[8].mxu1 %v16558_v57  ;;  %11034 = vmatprep.subr.bf16.mxu0 %v13771_v30  ;;  %v1219_v57 = vld [vmem:[%s19895_s1 + $0x24d8] sm:$0xff]  ;;  %v13827_v34 = vcombine.high %v1322_v17, %v1326_v38  ;;  %v1374_v63 = vld [vmem:[%s19895_s1 + $0x29b0] sm:$0xff] }
 0x568   :  { %11550 = vmatpush1.bf16.msra.mxu1 %v13700_v10  ;;  %11581 = vmatprep.mubr.bf16.mxu1 %v16568_v2  ;;  %v13725_v46 = vcombine.high %v1219_v57, %v1223_v39  ;;  %v1290_v2 = vld [vmem:[%s19895_s1 + $0x2710] sm:$0xff]  ;;  %v13724_v54 = vcombine.low %v1219_v57, %v1223_v39  ;;  %v1259_v10 = vld [vmem:[%s19895_s1 + $0x2618] sm:$0xff] }
 0x569   :  { %11551 = vmatprep.subr.bf16.mxu1 %v13709_v14  ;;  %v13795_v22 = vcombine.high %v1290_v2, %v1294_v47  ;;  %v13794_v26 = vcombine.low %v1290_v2, %v1294_v47  ;;  %v1263_v30 = vld [vmem:[%s19895_s1 + $0x2638] sm:$0xff]  ;;  %v13818_v14 = vcombine.low %v1314_v16, %v1318_v15  ;;  %v1338_v39 = vld [vmem:[%s19895_s1 + $0x2890] sm:$0xff] }
 0x56a   :  { %11035 = vmatpush1.bf16.msra.mxu0 %v13770_v0  ;;  %v13765_v35 = vcombine.high %v1259_v10, %v1263_v30  ;;  %v1334_v0 = vld [vmem:[%s19895_s1 + $0x2870] sm:$0xff]  ;;  %v13764_v36 = vcombine.low %v1259_v10, %v1263_v30 }
 0x56b   :  { %11036 = vmatprep.subr.bf16.mxu0 %v13779_v29  ;;  %v1271_v29 = vld [vmem:[%s19895_s1 + $0x2678] sm:$0xff]  ;;  %v13835_v37 = vcombine.high %v1330_v21, %v1334_v0  ;;  %v1378_v10 = vld [vmem:[%s19895_s1 + $0x29d0] sm:$0xff] }
 0x56c   :  { %11552 = vmatpush1.bf16.msra.mxu1 %v13708_v1  ;;  %v1267_v1 = vld [vmem:[%s19895_s1 + $0x2658] sm:$0xff]  ;;  %v1382_v30 = vld [vmem:[%s19895_s1 + $0x29f0] sm:$0xff] }
 0x56d   :  { %11553 = vmatprep.subr.bf16.mxu1 %v13717_v13  ;;  %v13826_v13 = vcombine.low %v1322_v17, %v1326_v38  ;;  %v13773_v57 = vcombine.high %v1267_v1, %v1271_v29  ;;  %v13772_v2 = vcombine.low %v1267_v1, %v1271_v29  ;;  %v13875_v38 = vcombine.high %v1370_v61, %v1374_v63  ;;  %v1386_v1 = vld [vmem:[%s19895_s1 + $0x2a10] sm:$0xff] }
 0x56e   :  { %11037 = vmatpush1.bf16.msra.mxu0 %v13778_v7  ;;  %v1342_v7 = vld [vmem:[%s19895_s1 + $0x28b0] sm:$0xff] }
 0x56f   :  { %11038 = vmatprep.subr.bf16.mxu0 %v13787_v42  ;;  %v1279_v42 = vld [vmem:[%s19895_s1 + $0x26b8] sm:$0xff]  ;;  %v13843_v47 = vcombine.high %v1338_v39, %v1342_v7  ;;  %v1390_v29 = vld [vmem:[%s19895_s1 + $0x2a30] sm:$0xff] }
 0x570   :  { %11554 = vmatpush1.bf16.msra.mxu1 %v13716_v33  ;;  %v1275_v33 = vld [vmem:[%s19895_s1 + $0x2698] sm:$0xff] }
 0x571   :  { %11555 = vmatprep.subr.bf16.mxu1 %v13725_v46  ;;  %v13834_v46 = vcombine.low %v1330_v21, %v1334_v0  ;;  %v13781_v50 = vcombine.high %v1275_v33, %v1279_v42  ;;  %v13780_v45 = vcombine.low %v1275_v33, %v1279_v42  ;;  %v13883_v0 = vcombine.high %v1378_v10, %v1382_v30  ;;  %v1394_v33 = vld [vmem:[%s19895_s1 + $0x2a50] sm:$0xff] }
 0x572   :  { %11039 = vmatpush1.bf16.msra.mxu0 %v13786_v53  ;;  %v1350_v53 = vld [vmem:[%s19895_s1 + $0x28f0] sm:$0xff] }
 0x573   :  { %11040 = vmatprep.subr.bf16.mxu0 %v13795_v22  ;;  %v1287_v22 = vld [vmem:[%s19895_s1 + $0x26f8] sm:$0xff]  ;;  %v13851_v59 = vcombine.high %v1346_v51, %v1350_v53  ;;  %v1398_v42 = vld [vmem:[%s19895_s1 + $0x2a70] sm:$0xff] }
 0x574   :  { %11556 = vmatpush1.bf16.msra.mxu1 %v13724_v54  ;;  %v1283_v54 = vld [vmem:[%s19895_s1 + $0x26d8] sm:$0xff] }
 0x575   :  { %11557 = vmatprep.subr.bf16.mxu1 %v13733_v55  ;;  %v13842_v55 = vcombine.low %v1338_v39, %v1342_v7  ;;  %v13789_v62 = vcombine.high %v1283_v54, %v1287_v22  ;;  %v13788_v49 = vcombine.low %v1283_v54, %v1287_v22  ;;  %v13891_v7 = vcombine.high %v1386_v1, %v1390_v29  ;;  %v1402_v54 = vld [vmem:[%s19895_s1 + $0x2a90] sm:$0xff] }
 0x576   :  { %11041 = vmatpush1.bf16.msra.mxu0 %v13794_v26  ;;  %v1358_v26 = vld [vmem:[%s19895_s1 + $0x2930] sm:$0xff] }
 0x577   :  { %11042 = vmatprep.subr.bf16.mxu0 %v13803_v5  ;;  %v1295_v5 = vld [vmem:[%s19895_s1 + $0x2738] sm:$0xff]  ;;  %v13859_v8 = vcombine.high %v1354_v60, %v1358_v26  ;;  %v1406_v22 = vld [vmem:[%s19895_s1 + $0x2ab0] sm:$0xff] }
 0x578   :  { %11558 = vmatpush1.bf16.msra.mxu1 %v13732_v23  ;;  %v1291_v23 = vld [vmem:[%s19895_s1 + $0x2718] sm:$0xff] }
 0x579   :  { %11559 = vmatprep.subr.bf16.mxu1 %v13741_v43  ;;  %v13850_v43 = vcombine.low %v1346_v51, %v1350_v53  ;;  %v13797_v52 = vcombine.high %v1291_v23, %v1295_v5  ;;  %v13796_v16 = vcombine.low %v1291_v23, %v1295_v5  ;;  %v13899_v53 = vcombine.high %v1394_v33, %v1398_v42  ;;  %v1410_v23 = vld [vmem:[%s19895_s1 + $0x2ad0] sm:$0xff] }
 0x57a   :  { %11043 = vmatpush1.bf16.msra.mxu0 %v13802_v11  ;;  %v1366_v11 = vld [vmem:[%s19895_s1 + $0x2970] sm:$0xff] }
 0x57b   :  { %11044 = vmatprep.subr.bf16.mxu0 %v13811_v48  ;;  %v1303_v48 = vld [vmem:[%s19895_s1 + $0x2778] sm:$0xff]  ;;  %v13867_v15 = vcombine.high %v1362_v9, %v1366_v11  ;;  %v1414_v5 = vld [vmem:[%s19895_s1 + $0x2af0] sm:$0xff] }
 0x57c   :  { %11560 = vmatpush1.bf16.msra.mxu1 %v13740_v56  ;;  %v1299_v56 = vld [vmem:[%s19895_s1 + $0x2758] sm:$0xff] }
 0x57d   :  { %11561 = vmatprep.subr.bf16.mxu1 %v13749_v18  ;;  %v13858_v18 = vcombine.low %v1354_v60, %v1358_v26  ;;  %v13804_v17 = vcombine.low %v1299_v56, %v1303_v48  ;;  %v13907_v26 = vcombine.high %v1402_v54, %v1406_v22 }
 0x57e   :  { %11045 = vmatpush1.bf16.msra.mxu0 %v13810_v25  ;;  %v13805_v25 = vcombine.high %v1299_v56, %v1303_v48  ;;  %v1422_v56 = vld [vmem:[%s19895_s1 + $0x2b30] sm:$0xff]  ;;  %v1355_v48 = vld [vmem:[%s19895_s1 + $0x2918] sm:$0xff] }
 0x57f   :  { %11046 = vmatprep.subr.bf16.mxu0 %v13819_v20  ;;  %v1311_v20 = vld [vmem:[%s19895_s1 + $0x27b8] sm:$0xff] }
 0x580   :  { %11562 = vmatpush1.bf16.msra.mxu1 %v13748_v19  ;;  %v1307_v19 = vld [vmem:[%s19895_s1 + $0x2798] sm:$0xff] }
 0x581   :  { %11563 = vmatprep.subr.bf16.mxu1 %v13757_v24  ;;  %v13866_v24 = vcombine.low %v1362_v9, %v1366_v11  ;;  %v13812_v21 = vcombine.low %v1307_v19, %v1311_v20  ;;  %v13915_v9 = vcombine.high %v1410_v23, %v1414_v5  ;;  %v1418_v11 = vld [vmem:[%s19895_s1 + $0x2b10] sm:$0xff] }
 0x582   :  { %11047 = vmatpush1.bf16.msra.mxu0 %v13818_v14  ;;  %v13813_v14 = vcombine.high %v1307_v19, %v1311_v20  ;;  %v1363_v20 = vld [vmem:[%s19895_s1 + $0x2958] sm:$0xff] }
 0x583   :  { %11057 = vmatprep.subr.bf16.mxu0 %v13827_v34  ;;  %v1319_v34 = vld [vmem:[%s19895_s1 + $0x27f8] sm:$0xff] }
 0x584   :  { %11564 = vmatpush1.bf16.msra.mxu1 %v13756_v31  ;;  %v1315_v31 = vld [vmem:[%s19895_s1 + $0x27d8] sm:$0xff] }
 0x585   :  { %11565 = vmatprep.subr.bf16.mxu1 %v13765_v35  ;;  %11049 = vmatmul.mubr.bf16.vlgmr.msra.gmra.mrb[4].mxu0 %v16767_v6  ;;  %v13874_v35 = vcombine.low %v1370_v61, %v1374_v63  ;;  %v13820_v39 = vcombine.low %v1315_v31, %v1319_v34  ;;  %v13923_v61 = vcombine.high %v1418_v11, %v1422_v56  ;;  %v1426_v63 = vld [vmem:[%s19895_s1 + $0x2b50] sm:$0xff] }
 0x586   :  { %11058 = vmatpush1.bf16.msra.mxu0 %v13826_v13  ;;  %11089 = vmatprep.mubr.bf16.mxu0 %v16777_v12  ;;  %v13821_v13 = vcombine.high %v1315_v31, %v1319_v34  ;;  %v1371_v34 = vld [vmem:[%s19895_s1 + $0x2998] sm:$0xff] }
 0x587   :  { %11059 = vmatprep.subr.bf16.mxu0 %v13835_v37  ;;  %v1327_v37 = vld [vmem:[%s19895_s1 + $0x2838] sm:$0xff] }
 0x588   :  { %11566 = vmatpush1.bf16.msra.mxu1 %v13764_v36  ;;  %v1323_v36 = vld [vmem:[%s19895_s1 + $0x2818] sm:$0xff] }
 0x589   :  { %11567 = vmatprep.subr.bf16.mxu1 %v13773_v57  ;;  %v13882_v57 = vcombine.low %v1378_v10, %v1382_v30  ;;  %v13828_v51 = vcombine.low %v1323_v36, %v1327_v37  ;;  %v1438_v10 = vld [vmem:[%s19895_s1 + $0x2bb0] sm:$0xff] }
 0x58a   :  { %11060 = vmatpush1.bf16.msra.mxu0 %v13834_v46  ;;  %v13829_v46 = vcombine.high %v1323_v36, %v1327_v37  ;;  %v1379_v36 = vld [vmem:[%s19895_s1 + $0x29d8] sm:$0xff] }
 0x58b   :  { %11061 = vmatprep.subr.bf16.mxu0 %v13843_v47  ;;  %v1335_v47 = vld [vmem:[%s19895_s1 + $0x2878] sm:$0xff] }
 0x58c   :  { %11568 = vmatpush1.bf16.msra.mxu1 %v13772_v2  ;;  %v1331_v2 = vld [vmem:[%s19895_s1 + $0x2858] sm:$0xff] }
 0x58d   :  { %11569 = vmatprep.subr.bf16.mxu1 %v13781_v50  ;;  %v13890_v50 = vcombine.low %v1386_v1, %v1390_v29  ;;  %v13836_v60 = vcombine.low %v1331_v2, %v1335_v47  ;;  %v1446_v1 = vld [vmem:[%s19895_s1 + $0x2bf0] sm:$0xff] }
 0x58e   :  { %11062 = vmatpush1.bf16.msra.mxu0 %v13842_v55  ;;  %v13837_v55 = vcombine.high %v1331_v2, %v1335_v47  ;;  %v1387_v2 = vld [vmem:[%s19895_s1 + $0x2a18] sm:$0xff] }
 0x58f   :  { %11063 = vmatprep.subr.bf16.mxu0 %v13851_v59  ;;  %v1343_v59 = vld [vmem:[%s19895_s1 + $0x28b8] sm:$0xff] }
 0x590   :  { %11570 = vmatpush1.bf16.msra.mxu1 %v13780_v45  ;;  %v1339_v45 = vld [vmem:[%s19895_s1 + $0x2898] sm:$0xff] }
 0x591   :  { %11571 = vmatprep.subr.bf16.mxu1 %v13789_v62  ;;  %v13898_v62 = vcombine.low %v1394_v33, %v1398_v42  ;;  %v1454_v33 = vld [vmem:[%s19895_s1 + $0x2c30] sm:$0xff] }
 0x592   :  { %11064 = vmatpush1.bf16.msra.mxu0 %v13850_v43  ;;  %v13845_v43 = vcombine.high %v1339_v45, %v1343_v59 }
 0x593   :  { %11065 = vmatprep.subr.bf16.mxu0 %v13859_v8  ;;  %v13906_v8 = vcombine.low %v1402_v54, %v1406_v22  ;;  %v1462_v54 = vld [vmem:[%s19895_s1 + $0x2c70] sm:$0xff] }
 0x594   :  { %11572 = vmatpush1.bf16.msra.mxu1 %v13788_v49  ;;  %v1347_v49 = vld [vmem:[%s19895_s1 + $0x28d8] sm:$0xff] }
 0x595   :  { %11573 = vmatprep.subr.bf16.mxu1 %v13797_v52  ;;  %v13844_v52 = vcombine.low %v1339_v45, %v1343_v59  ;;  %v1395_v45 = vld [vmem:[%s19895_s1 + $0x2a58] sm:$0xff] }
 0x596   :  { %11066 = vmatpush1.bf16.msra.mxu0 %v13858_v18  ;;  %v1359_v18 = vld [vmem:[%s19895_s1 + $0x2938] sm:$0xff] }
 0x597   :  { %11067 = vmatprep.subr.bf16.mxu0 %v13867_v15  ;;  %v13861_v19 = vcombine.high %v1355_v48, %v1359_v18  ;;  %v13860_v30 = vcombine.low %v1355_v48, %v1359_v18  ;;  %v1411_v48 = vld [vmem:[%s19895_s1 + $0x2ad8] sm:$0xff] }
 0x598   :  { %11574 = vmatpush1.bf16.msra.mxu1 %v13796_v16  ;;  %v13914_v16 = vcombine.low %v1410_v23, %v1414_v5  ;;  %v1470_v23 = vld [vmem:[%s19895_s1 + $0x2cb0] sm:$0xff] }
 0x599   :  { %11575 = vmatprep.subr.bf16.mxu1 %v13805_v25  ;;  %v1430_v25 = vld [vmem:[%s19895_s1 + $0x2b70] sm:$0xff] }
 0x59a   :  { %11068 = vmatpush1.bf16.msra.mxu0 %v13866_v24  ;;  %v1367_v24 = vld [vmem:[%s19895_s1 + $0x2978] sm:$0xff] }
 0x59b   :  { %11069 = vmatprep.subr.bf16.mxu0 %v13875_v38  ;;  %v1434_v38 = vld [vmem:[%s19895_s1 + $0x2b90] sm:$0xff]  ;;  %v13869_v31 = vcombine.high %v1363_v20, %v1367_v24  ;;  %v13868_v29 = vcombine.low %v1363_v20, %v1367_v24  ;;  %v1419_v24 = vld [vmem:[%s19895_s1 + $0x2b18] sm:$0xff] }
 0x59c   :  { %11576 = vmatpush1.bf16.msra.mxu1 %v13804_v17  ;;  %v13922_v17 = vcombine.low %v1418_v11, %v1422_v56  ;;  %v1478_v11 = vld [vmem:[%s19895_s1 + $0x2cf0] sm:$0xff] }
 0x59d   :  { %11577 = vmatprep.subr.bf16.mxu1 %v13813_v14  ;;  %v13931_v14 = vcombine.high %v1426_v63, %v1430_v25  ;;  %v1486_v20 = vld [vmem:[%s19895_s1 + $0x2d30] sm:$0xff] }
 0x59e   :  { %11070 = vmatpush1.bf16.msra.mxu0 %v13874_v35  ;;  %v1375_v35 = vld [vmem:[%s19895_s1 + $0x29b8] sm:$0xff] }
 0x59f   :  { %11071 = vmatprep.subr.bf16.mxu0 %v13883_v0  ;;  %v1442_v0 = vld [vmem:[%s19895_s1 + $0x2bd0] sm:$0xff]  ;;  %v13877_v37 = vcombine.high %v1371_v34, %v1375_v35  ;;  %v13876_v42 = vcombine.low %v1371_v34, %v1375_v35  ;;  %v1427_v35 = vld [vmem:[%s19895_s1 + $0x2b58] sm:$0xff] }
 0x5a0   :  { %11578 = vmatpush1.bf16.msra.mxu1 %v13812_v21  ;;  %v13930_v21 = vcombine.low %v1426_v63, %v1430_v25  ;;  %v1482_v25 = vld [vmem:[%s19895_s1 + $0x2d10] sm:$0xff] }
 0x5a1   :  { %11579 = vmatprep.subr.bf16.mxu1 %v13821_v13  ;;  %v13939_v13 = vcombine.high %v1434_v38, %v1438_v10  ;;  %v1494_v34 = vld [vmem:[%s19895_s1 + $0x2d70] sm:$0xff] }
 0x5a2   :  { %11072 = vmatpush1.bf16.msra.mxu0 %v13882_v57  ;;  %v1383_v57 = vld [vmem:[%s19895_s1 + $0x29f8] sm:$0xff] }
 0x5a3   :  { %11073 = vmatprep.subr.bf16.mxu0 %v13891_v7  ;;  %v1450_v7 = vld [vmem:[%s19895_s1 + $0x2c10] sm:$0xff]  ;;  %v13885_v47 = vcombine.high %v1379_v36, %v1383_v57  ;;  %v13884_v22 = vcombine.low %v1379_v36, %v1383_v57  ;;  %v1435_v57 = vld [vmem:[%s19895_s1 + $0x2b98] sm:$0xff] }
 0x5a4   :  { %11580 = vmatpush1.bf16.msra.mxu1 %v13820_v39  ;;  %v13938_v39 = vcombine.low %v1434_v38, %v1438_v10  ;;  %v1498_v36 = vld [vmem:[%s19895_s1 + $0x2d90] sm:$0xff] }
 0x5a5   :  { %11590 = vmatprep.subr.bf16.mxu1 %v13829_v46  ;;  %v13947_v46 = vcombine.high %v1442_v0, %v1446_v1 }
 0x5a6   :  { %11074 = vmatpush1.bf16.msra.mxu0 %v13890_v50  ;;  %v1391_v50 = vld [vmem:[%s19895_s1 + $0x2a38] sm:$0xff] }
 0x5a7   :  { %11582 = vmatmul.mubr.bf16.vlgmr.msra.gmra.mrb[8].mxu1 %v16767_v6  ;;  %11075 = vmatprep.subr.bf16.mxu0 %v13899_v53  ;;  %v1351_v6 = vld [vmem:[%s19895_s1 + $0x28f8] sm:$0xff]  ;;  %v1458_v53 = vld [vmem:[%s19895_s1 + $0x2c50] sm:$0xff]  ;;  %v13893_v59 = vcombine.high %v1387_v2, %v1391_v50  ;;  %v13892_v5 = vcombine.low %v1387_v2, %v1391_v50 }
 0x5a8   :  { %11591 = vmatpush1.bf16.msra.mxu1 %v13828_v51  ;;  %11622 = vmatprep.mubr.bf16.mxu1 %v16777_v12  ;;  %v13853_v12 = vcombine.high %v1347_v49, %v1351_v6  ;;  %v13852_v15 = vcombine.low %v1347_v49, %v1351_v6  ;;  %v13946_v51 = vcombine.low %v1442_v0, %v1446_v1  ;;  %v1403_v49 = vld [vmem:[%s19895_s1 + $0x2a98] sm:$0xff]  ;;  %v1506_v2 = vld [vmem:[%s19895_s1 + $0x2dd0] sm:$0xff] }
 0x5a9   :  { %11592 = vmatprep.subr.bf16.mxu1 %v13837_v55  ;;  %v13955_v55 = vcombine.high %v1450_v7, %v1454_v33  ;;  %v13986_v0 = vcombine.low %v1482_v25, %v1486_v20  ;;  %v1443_v50 = vld [vmem:[%s19895_s1 + $0x2bd8] sm:$0xff] }
 0x5aa   :  { %11076 = vmatpush1.bf16.msra.mxu0 %v13898_v62  ;;  %v1399_v62 = vld [vmem:[%s19895_s1 + $0x2a78] sm:$0xff] }
 0x5ab   :  { %11077 = vmatprep.subr.bf16.mxu0 %v13907_v26  ;;  %v1466_v26 = vld [vmem:[%s19895_s1 + $0x2c90] sm:$0xff]  ;;  %v13901_v6 = vcombine.high %v1395_v45, %v1399_v62  ;;  %v13900_v56 = vcombine.low %v1395_v45, %v1399_v62  ;;  %v1451_v62 = vld [vmem:[%s19895_s1 + $0x2c18] sm:$0xff] }
 0x5ac   :  { %11593 = vmatpush1.bf16.msra.mxu1 %v13836_v60  ;;  %v13954_v60 = vcombine.low %v1450_v7, %v1454_v33  ;;  %v1514_v45 = vld [vmem:[%s19895_s1 + $0x2e10] sm:$0xff] }
 0x5ad   :  { %11594 = vmatprep.subr.bf16.mxu1 %v13845_v43  ;;  %v13963_v43 = vcombine.high %v1458_v53, %v1462_v54 }
 0x5ae   :  { %11078 = vmatpush1.bf16.msra.mxu0 %v13906_v8  ;;  %v1407_v8 = vld [vmem:[%s19895_s1 + $0x2ab8] sm:$0xff] }
 0x5af   :  { %11079 = vmatprep.subr.bf16.mxu0 %v13915_v9  ;;  %v1474_v9 = vld [vmem:[%s19895_s1 + $0x2cd0] sm:$0xff]  ;;  %v13909_v18 = vcombine.high %v1403_v49, %v1407_v8 }
 0x5b0   :  { %11595 = vmatpush1.bf16.msra.mxu1 %v13844_v52  ;;  %v13962_v52 = vcombine.low %v1458_v53, %v1462_v54  ;;  %v13979_v63 = vcombine.high %v1474_v9, %v1478_v11  ;;  %v13978_v38 = vcombine.low %v1474_v9, %v1478_v11 }
 0x5b1   :  { %11596 = vmatprep.subr.bf16.mxu1 %v13853_v12  ;;  %v13971_v12 = vcombine.high %v1466_v26, %v1470_v23 }
 0x5b2   :  { %11080 = vmatpush1.bf16.msra.mxu0 %v13914_v16  ;;  %v1415_v16 = vld [vmem:[%s19895_s1 + $0x2af8] sm:$0xff] }
 0x5b3   :  { %11081 = vmatprep.subr.bf16.mxu0 %v13923_v61  ;;  %v13908_v61 = vcombine.low %v1403_v49, %v1407_v8  ;;  %v13916_v10 = vcombine.low %v1411_v48, %v1415_v16  ;;  %v1522_v49 = vld [vmem:[%s19895_s1 + $0x2e50] sm:$0xff]  ;;  %v1459_v8 = vld [vmem:[%s19895_s1 + $0x2c58] sm:$0xff] }
 0x5b4   :  { %11597 = vmatpush1.bf16.msra.mxu1 %v13852_v15  ;;  %v13970_v15 = vcombine.low %v1466_v26, %v1470_v23 }
 0x5b5   :  { %11598 = vmatprep.subr.bf16.mxu1 %v13861_v19  ;;  %v13917_v19 = vcombine.high %v1411_v48, %v1415_v16  ;;  %v1530_v48 = vld [vmem:[%s19895_s1 + $0x2e90] sm:$0xff]  ;;  %v1467_v16 = vld [vmem:[%s19895_s1 + $0x2c98] sm:$0xff] }
 0x5b6   :  { %11082 = vmatpush1.bf16.msra.mxu0 %v13922_v17  ;;  %v1423_v17 = vld [vmem:[%s19895_s1 + $0x2b38] sm:$0xff] }
 0x5b7   :  { %11083 = vmatprep.subr.bf16.mxu0 %v13931_v14  ;;  %v13925_v14 = vcombine.high %v1419_v24, %v1423_v17  ;;  %v13924_v1 = vcombine.low %v1419_v24, %v1423_v17  ;;  %v1542_v24 = vld [vmem:[%s19895_s1 + $0x2ef0] sm:$0xff]  ;;  %v1479_v17 = vld [vmem:[%s19895_s1 + $0x2cf8] sm:$0xff] }
 0x5b8   :  { %11599 = vmatpush1.bf16.msra.mxu1 %v13860_v30  ;;  %v13987_v30 = vcombine.high %v1482_v25, %v1486_v20  ;;  %v1538_v20 = vld [vmem:[%s19895_s1 + $0x2ed0] sm:$0xff] }
 0x5b9   :  { %11600 = vmatprep.subr.bf16.mxu1 %v13869_v31  ;;  %v1490_v31 = vld [vmem:[%s19895_s1 + $0x2d50] sm:$0xff] }
 0x5ba   :  { %11084 = vmatpush1.bf16.msra.mxu0 %v13930_v21  ;;  %v1431_v21 = vld [vmem:[%s19895_s1 + $0x2b78] sm:$0xff]  ;;  %v13994_v7 = vcombine.low %v1490_v31, %v1494_v34 }
 0x5bb   :  { %11085 = vmatprep.subr.bf16.mxu0 %v13939_v13  ;;  %v13933_v13 = vcombine.high %v1427_v35, %v1431_v21  ;;  %v13932_v33 = vcombine.low %v1427_v35, %v1431_v21  ;;  %v1487_v35 = vld [vmem:[%s19895_s1 + $0x2d38] sm:$0xff]  ;;  %v14042_v21 = vcombine.low %v1538_v20, %v1542_v24 }
 0x5bc   :  { %11601 = vmatpush1.bf16.msra.mxu1 %v13868_v29  ;;  %v13995_v29 = vcombine.high %v1490_v31, %v1494_v34  ;;  %v1550_v31 = vld [vmem:[%s19895_s1 + $0x2f30] sm:$0xff]  ;;  %v1483_v34 = vld [vmem:[%s19895_s1 + $0x2d18] sm:$0xff] }
 0x5bd   :  { %11602 = vmatprep.subr.bf16.mxu1 %v13877_v37  ;;  %v1502_v37 = vld [vmem:[%s19895_s1 + $0x2db0] sm:$0xff] }
 0x5be   :  { %11086 = vmatpush1.bf16.msra.mxu0 %v13938_v39  ;;  %v1439_v39 = vld [vmem:[%s19895_s1 + $0x2bb8] sm:$0xff]  ;;  %v14002_v53 = vcombine.low %v1498_v36, %v1502_v37 }
 0x5bf   :  { %11087 = vmatprep.subr.bf16.mxu0 %v13947_v46  ;;  %v13941_v46 = vcombine.high %v1435_v57, %v1439_v39  ;;  %v13940_v54 = vcombine.low %v1435_v57, %v1439_v39  ;;  %v1495_v57 = vld [vmem:[%s19895_s1 + $0x2d78] sm:$0xff] }
 0x5c0   :  { %11603 = vmatpush1.bf16.msra.mxu1 %v13876_v42  ;;  %v14003_v42 = vcombine.high %v1498_v36, %v1502_v37  ;;  %v1558_v36 = vld [vmem:[%s19895_s1 + $0x2f70] sm:$0xff]  ;;  %v1491_v37 = vld [vmem:[%s19895_s1 + $0x2d58] sm:$0xff] }
 0x5c1   :  { %11604 = vmatprep.subr.bf16.mxu1 %v13885_v47  ;;  %v1510_v47 = vld [vmem:[%s19895_s1 + $0x2df0] sm:$0xff] }
 0x5c2   :  { %11088 = vmatpush1.bf16.msra.mxu0 %v13946_v51  ;;  %v1447_v51 = vld [vmem:[%s19895_s1 + $0x2bf8] sm:$0xff]  ;;  %v14010_v26 = vcombine.low %v1506_v2, %v1510_v47 }
 0x5c3   :  { %11098 = vmatprep.subr.bf16.mxu0 %v13955_v55  ;;  %v13949_v55 = vcombine.high %v1443_v50, %v1447_v51  ;;  %v13948_v23 = vcombine.low %v1443_v50, %v1447_v51  ;;  %v1503_v50 = vld [vmem:[%s19895_s1 + $0x2db8] sm:$0xff] }
 0x5c4   :  { %11605 = vmatpush1.bf16.msra.mxu1 %v13884_v22  ;;  %v14011_v22 = vcombine.high %v1506_v2, %v1510_v47  ;;  %v1566_v2 = vld [vmem:[%s19895_s1 + $0x2fb0] sm:$0xff]  ;;  %v1499_v47 = vld [vmem:[%s19895_s1 + $0x2d98] sm:$0xff] }
 0x5c5   :  { %11606 = vmatprep.subr.bf16.mxu1 %v13893_v59  ;;  %11090 = vmatmul.mubr.bf16.vlgmr.msra.gmra.mrb[4].mxu0 %v16976_v28  ;;  %v1518_v59 = vld [vmem:[%s19895_s1 + $0x2e30] sm:$0xff] }
 0x5c6   :  { %11099 = vmatpush1.bf16.msra.mxu0 %v13954_v60  ;;  %11130 = vmatprep.mubr.bf16.mxu0 %v16986_v32  ;;  %v1455_v60 = vld [vmem:[%s19895_s1 + $0x2c38] sm:$0xff]  ;;  %v14018_v9 = vcombine.low %v1514_v45, %v1518_v59 }
 0x5c7   :  { %11100 = vmatprep.subr.bf16.mxu0 %v13963_v43  ;;  %v13957_v43 = vcombine.high %v1451_v62, %v1455_v60  ;;  %v13956_v11 = vcombine.low %v1451_v62, %v1455_v60  ;;  %v1511_v62 = vld [vmem:[%s19895_s1 + $0x2df8] sm:$0xff] }
 0x5c8   :  { %11607 = vmatpush1.bf16.msra.mxu1 %v13892_v5  ;;  %v14019_v5 = vcombine.high %v1514_v45, %v1518_v59  ;;  %v1574_v45 = vld [vmem:[%s19895_s1 + $0x2ff0] sm:$0xff]  ;;  %v1507_v59 = vld [vmem:[%s19895_s1 + $0x2dd8] sm:$0xff] }
 0x5c9   :  { %11608 = vmatprep.subr.bf16.mxu1 %v13901_v6  ;;  %v1526_v6 = vld [vmem:[%s19895_s1 + $0x2e70] sm:$0xff] }
 0x5ca   :  { %11101 = vmatpush1.bf16.msra.mxu0 %v13962_v52  ;;  %v1463_v52 = vld [vmem:[%s19895_s1 + $0x2c78] sm:$0xff] }
 0x5cb   :  { %11102 = vmatprep.subr.bf16.mxu0 %v13971_v12  ;;  %v13965_v12 = vcombine.high %v1459_v8, %v1463_v52 }
 0x5cc   :  { %11609 = vmatpush1.bf16.msra.mxu1 %v13900_v56  ;;  %v14027_v56 = vcombine.high %v1522_v49, %v1526_v6 }
 0x5cd   :  { %11610 = vmatprep.subr.bf16.mxu1 %v13909_v18  ;;  %v1534_v18 = vld [vmem:[%s19895_s1 + $0x2eb0] sm:$0xff] }
 0x5ce   :  { %11103 = vmatpush1.bf16.msra.mxu0 %v13970_v15  ;;  %v1471_v15 = vld [vmem:[%s19895_s1 + $0x2cb8] sm:$0xff]  ;;  %v14035_v25 = vcombine.high %v1530_v48, %v1534_v18 }
 0x5cf   :  { %11104 = vmatprep.subr.bf16.mxu0 %v13979_v63  ;;  %v13964_v63 = vcombine.low %v1459_v8, %v1463_v52  ;;  %v1519_v8 = vld [vmem:[%s19895_s1 + $0x2e38] sm:$0xff] }
 0x5d0   :  { %11611 = vmatpush1.bf16.msra.mxu1 %v13908_v61  ;;  %v14026_v61 = vcombine.low %v1522_v49, %v1526_v6  ;;  %v1582_v49 = vld [vmem:[%s19895_s1 + $0x3030] sm:$0xff]  ;;  %v1515_v6 = vld [vmem:[%s19895_s1 + $0x2e18] sm:$0xff] }
 0x5d1   :  { %11612 = vmatprep.subr.bf16.mxu1 %v13917_v19  ;;  %v13973_v19 = vcombine.high %v1467_v16, %v1471_v15 }
 0x5d2   :  { %11105 = vmatpush1.bf16.msra.mxu0 %v13978_v38  ;;  %v14034_v38 = vcombine.low %v1530_v48, %v1534_v18  ;;  %v1590_v48 = vld [vmem:[%s19895_s1 + $0x3070] sm:$0xff]  ;;  %v1523_v18 = vld [vmem:[%s19895_s1 + $0x2e58] sm:$0xff] }
 0x5d3   :  { %11106 = vmatprep.subr.bf16.mxu0 %v13987_v30  ;;  %v14043_v30 = vcombine.high %v1538_v20, %v1542_v24  ;;  %v1598_v20 = vld [vmem:[%s19895_s1 + $0x30b0] sm:$0xff]  ;;  %v1531_v24 = vld [vmem:[%s19895_s1 + $0x2e98] sm:$0xff] }
 0x5d4   :  { %11613 = vmatpush1.bf16.msra.mxu1 %v13916_v10  ;;  %v13972_v10 = vcombine.low %v1467_v16, %v1471_v15  ;;  %v1527_v16 = vld [vmem:[%s19895_s1 + $0x2e78] sm:$0xff] }
 0x5d5   :  { %11614 = vmatprep.subr.bf16.mxu1 %v13925_v14 }
 0x5d6   :  { %11107 = vmatpush1.bf16.msra.mxu0 %v13986_v0 }
 0x5d7   :  { %11108 = vmatprep.subr.bf16.mxu0 %v13995_v29  ;;  %v13989_v29 = vcombine.high %v1483_v34, %v1487_v35 }
 0x5d8   :  { %11615 = vmatpush1.bf16.msra.mxu1 %v13924_v1 }
 0x5d9   :  { %11616 = vmatprep.subr.bf16.mxu1 %v13933_v13  ;;  %v1554_v13 = vld [vmem:[%s19895_s1 + $0x2f50] sm:$0xff] }
 0x5da   :  { %11109 = vmatpush1.bf16.msra.mxu0 %v13994_v7  ;;  %v13988_v7 = vcombine.low %v1483_v34, %v1487_v35  ;;  %v14058_v51 = vcombine.low %v1554_v13, %v1558_v36  ;;  %v1543_v34 = vld [vmem:[%s19895_s1 + $0x2ef8] sm:$0xff] }
 0x5db   :  { %11110 = vmatprep.subr.bf16.mxu0 %v14003_v42  ;;  %v13997_v42 = vcombine.high %v1491_v37, %v1495_v57 }
 0x5dc   :  { %11617 = vmatpush1.bf16.msra.mxu1 %v13932_v33  ;;  %v14059_v33 = vcombine.high %v1554_v13, %v1558_v36  ;;  %v1551_v13 = vld [vmem:[%s19895_s1 + $0x2f38] sm:$0xff] }
 0x5dd   :  { %11618 = vmatprep.subr.bf16.mxu1 %v13941_v46  ;;  %v1562_v46 = vld [vmem:[%s19895_s1 + $0x2f90] sm:$0xff] }
 0x5de   :  { %11111 = vmatpush1.bf16.msra.mxu0 %v14002_v53  ;;  %v13996_v53 = vcombine.low %v1491_v37, %v1495_v57  ;;  %v14066_v60 = vcombine.low %v1562_v46, %v1566_v2  ;;  %v14531_v57 = vld [vmem:[%s19898_s3 + $0x40] sm:$0xff]  }
 0x5df   :  { %11112 = vmatprep.subr.bf16.mxu0 %v14011_v22  ;;  %v14005_v22 = vcombine.high %v1499_v47, %v1503_v50 }
 0x5e0   :  { %11619 = vmatpush1.bf16.msra.mxu1 %v13940_v54  ;;  %v14067_v54 = vcombine.high %v1562_v46, %v1566_v2  ;;  %v14533_v2 = vld [vmem:[%s19898_s3 + $0x48] sm:$0xff]  }
 0x5e1   :  { %11620 = vmatprep.subr.bf16.mxu1 %v13949_v55  ;;  %v1570_v55 = vld [vmem:[%s19895_s1 + $0x2fd0] sm:$0xff] }
 0x5e2   :  { %11113 = vmatpush1.bf16.msra.mxu0 %v14010_v26  ;;  %v14004_v26 = vcombine.low %v1499_v47, %v1503_v50  ;;  %v14074_v52 = vcombine.low %v1570_v55, %v1574_v45  ;;  %v11714_v47 = vpack.c.bf16 %v17866_v58, %v17866_v58  ;;  %v14534_v58 = vld [vmem:[%s19898_s3 + $0x8] sm:$0xff]  }
 0x5e3   :  { %11114 = vmatprep.subr.bf16.mxu0 %v14019_v5  ;;  %v14013_v5 = vcombine.high %v1507_v59, %v1511_v62 }
 0x5e4   :  { %11621 = vmatpush1.bf16.msra.mxu1 %v13948_v23  ;;  %v14075_v23 = vcombine.high %v1570_v55, %v1574_v45  ;;  %v14535_v55 = vld [vmem:[%s19898_s3 + $0x50] sm:$0xff]  }
 0x5e5   :  { %11631 = vmatprep.subr.bf16.mxu1 %v13957_v43  ;;  %v1578_v43 = vld [vmem:[%s19895_s1 + $0x3010] sm:$0xff] }
 0x5e6   :  { %11115 = vmatpush1.bf16.msra.mxu0 %v14018_v9  ;;  %v14012_v9 = vcombine.low %v1507_v59, %v1511_v62  ;;  %v14082_v15 = vcombine.low %v1578_v43, %v1582_v49  ;;  %v1571_v59 = vld [vmem:[%s19895_s1 + $0x2fd8] sm:$0xff] }
 0x5e7   :  { %11623 = vmatmul.mubr.bf16.vlgmr.msra.gmra.mrb[8].mxu1 %v16976_v28  ;;  %11116 = vmatprep.subr.bf16.mxu0 %v14027_v56  ;;  %v1475_v28 = vld [vmem:[%s19895_s1 + $0x2cd8] sm:$0xff]  ;;  %v14021_v56 = vcombine.high %v1515_v6, %v1519_v8 }
 0x5e8   :  { %11632 = vmatpush1.bf16.msra.mxu1 %v13956_v11  ;;  %11663 = vmatprep.mubr.bf16.mxu1 %v16986_v32  ;;  %v13981_v14 = vcombine.high %v1475_v28, %v1479_v17  ;;  %v1546_v32 = vld [vmem:[%s19895_s1 + $0x2f10] sm:$0xff]  ;;  %v13980_v0 = vcombine.low %v1475_v28, %v1479_v17  ;;  %v14083_v11 = vcombine.high %v1578_v43, %v1582_v49  ;;  %v1535_v28 = vld [vmem:[%s19895_s1 + $0x2eb8] sm:$0xff] }
 0x5e9   :  { %11633 = vmatprep.subr.bf16.mxu1 %v13965_v12  ;;  %v14051_v1 = vcombine.high %v1546_v32, %v1550_v31  ;;  %v14050_v39 = vcombine.low %v1546_v32, %v1550_v31  ;;  %v1586_v12 = vld [vmem:[%s19895_s1 + $0x3050] sm:$0xff]  ;;  %v1539_v31 = vld [vmem:[%s19895_s1 + $0x2ed8] sm:$0xff] }
 0x5ea   :  { %11117 = vmatpush1.bf16.msra.mxu0 %v14026_v61  ;;  %v14020_v61 = vcombine.low %v1515_v6, %v1519_v8  ;;  %v14090_v17 = vcombine.low %v1586_v12, %v1590_v48  ;;  %v1606_v32 = vld [vmem:[%s19895_s1 + $0x30f0] sm:$0xff]  ;;  %v14044_v37 = vcombine.low %v1539_v31, %v1543_v34  ;;  %v1575_v62 = vld [vmem:[%s19895_s1 + $0x2ff8] sm:$0xff] }
 0x5eb   :  { %11118 = vmatprep.subr.bf16.mxu0 %v14035_v25  ;;  %v14029_v25 = vcombine.high %v1523_v18, %v1527_v16  ;;  %v1579_v43 = vld [vmem:[%s19895_s1 + $0x3018] sm:$0xff]  ;;  %v14076_v8 = vcombine.low %v1571_v59, %v1575_v62 }
 0x5ec   :  { %11634 = vmatpush1.bf16.msra.mxu1 %v13964_v63  ;;  %v14091_v63 = vcombine.high %v1586_v12, %v1590_v48  ;;  %v1583_v49 = vld [vmem:[%s19895_s1 + $0x3038] sm:$0xff]  ;;  %v14540_v12 = vld [vmem:[%s19898_s3 + $0x20] sm:$0xff]  }
 0x5ed   :  { %11635 = vmatprep.subr.bf16.mxu1 %v13973_v19  ;;  %v1594_v19 = vld [vmem:[%s19895_s1 + $0x3090] sm:$0xff]  ;;  %v14538_v6 = vld [vmem:[%s19898_s3 + $0x18] sm:$0xff]   ;;  %v14084_v48 = vcombine.low %v1579_v43, %v1583_v49 }
 0x5ee   :  { %11119 = vmatpush1.bf16.msra.mxu0 %v14034_v38  ;;  %v14028_v38 = vcombine.low %v1523_v18, %v1527_v16  ;;  %v14098_v35 = vcombine.low %v1594_v19, %v1598_v20  ;;  %v14541_v18 = vld [vmem:[%s19898_s3 + $0x68] sm:$0xff]  }
 0x5ef   :  { %11120 = vmatprep.subr.bf16.mxu0 %v14043_v30  ;;  %v14037_v30 = vcombine.high %v1531_v24, %v1535_v28 }
 0x5f0   :  { %11636 = vmatpush1.bf16.msra.mxu1 %v13972_v10  ;;  %v14099_v10 = vcombine.high %v1594_v19, %v1598_v20  ;;  %v14543_v19 = vld [vmem:[%s19898_s3 + $0x70] sm:$0xff]  }
 0x5f1   :  { %11637 = vmatprep.subr.bf16.mxu1 %v13981_v14  ;;  %v1602_v14 = vld [vmem:[%s19895_s1 + $0x30d0] sm:$0xff] }
 0x5f2   :  { %11121 = vmatpush1.bf16.msra.mxu0 %v14042_v21  ;;  %v14036_v21 = vcombine.low %v1531_v24, %v1535_v28  ;;  %v14106_v36 = vcombine.low %v1602_v14, %v1606_v32  ;;  %v1624_v24 = vsub.s32 3, %v17819_v27  ;;  %v1607_v28 = vld [vmem:[%s19895_s1 + $0x30f8] sm:$0xff] }
 0x5f3   :  { %11122 = vmatprep.subr.bf16.mxu0 %v14051_v1  ;;  %v14045_v1 = vcombine.high %v1539_v31, %v1543_v34  ;;  %v14563_v34 = vld [vmem:[%s19898_s3 + $0x140] sm:$0xff]  }
 0x5f4   :  { %11638 = vmatpush1.bf16.msra.mxu1 %v13980_v0  ;;  %v14107_v0 = vcombine.high %v1602_v14, %v1606_v32  ;;  %v14546_v32 = vld [vmem:[%s19898_s3 + $0x38] sm:$0xff]  }
 0x5f5   :  { %11639 = vmatprep.subr.bf16.mxu1 %v13989_v29  ;;  %v1547_v29 = vld [vmem:[%s19895_s1 + $0x2f18] sm:$0xff] }
 0x5f6   :  { %11123 = vmatpush1.bf16.msra.mxu0 %v14050_v39  ;;  %v14053_v39 = vcombine.high %v1547_v29, %v1551_v13  ;;  %v14052_v46 = vcombine.low %v1547_v29, %v1551_v13  ;;  %v14548_v29 = vld [vmem:[%s19898_s3 + $0x80] sm:$0xff]   ;;  %v14549_v13 = vld [vmem:[%s19898_s3 + $0xc8] sm:$0xff]  }
 0x5f7   :  { %11124 = vmatprep.subr.bf16.mxu0 %v14059_v33  ;;  %v1559_v33 = vld [vmem:[%s19895_s1 + $0x2f78] sm:$0xff] }
 0x5f8   :  { %11640 = vmatpush1.bf16.msra.mxu1 %v13988_v7  ;;  %v1555_v7 = vld [vmem:[%s19895_s1 + $0x2f58] sm:$0xff] }
 0x5f9   :  { %11641 = vmatprep.subr.bf16.mxu1 %v13997_v42  ;;  %v14532_v42 = vld [vmem:[%s19898_s3] sm:$0xff]   ;;  %v14061_v50 = vcombine.high %v1555_v7, %v1559_v33 }
 0x5fa   :  { %11125 = vmatpush1.bf16.msra.mxu0 %v14058_v51  ;;  %v19614_v51 = vld [vmem:[%s19896_s0 + $0x60] ss:$0 sps:$4 sm:$0xff]  }
 0x5fb   :  { %11126 = vmatprep.subr.bf16.mxu0 %v14067_v54  ;;  %v1567_v54 = vld [vmem:[%s19895_s1 + $0x2fb8] sm:$0xff] }
 0x5fc   :  { %11642 = vmatpush1.bf16.msra.mxu1 %v13996_v53  ;;  %v1563_v53 = vld [vmem:[%s19895_s1 + $0x2f98] sm:$0xff] }
 0x5fd   :  { %11643 = vmatprep.subr.bf16.mxu1 %v14005_v22  ;;  %v14060_v22 = vcombine.low %v1555_v7, %v1559_v33  ;;  %v14069_v45 = vcombine.high %v1563_v53, %v1567_v54  ;;  %v14568_v7 = vld [vmem:[%s19898_s3 + $0x110] sm:$0xff]  }
 0x5fe   :  { %11127 = vmatpush1.bf16.msra.mxu0 %v14066_v60  ;;  %v14536_v60 = vld [vmem:[%s19898_s3 + $0x10] sm:$0xff]  }
 0x5ff   :  { %11128 = vmatprep.subr.bf16.mxu0 %v14075_v23  ;;  %v14537_v23 = vld [vmem:[%s19898_s3 + $0x58] sm:$0xff]   ;;  %v14552_v33 = vld [vmem:[%s19898_s3 + $0x90] sm:$0xff]  }
 0x600   :  { %11644 = vmatpush1.bf16.msra.mxu1 %v14004_v26  ;;  %v14068_v26 = vcombine.low %v1563_v53, %v1567_v54  ;;  %v14572_v53 = vld [vmem:[%s19898_s3 + $0x120] sm:$0xff]  }
 0x601   :  { %11645 = vmatprep.subr.bf16.mxu1 %v14013_v5  ;;  %v14077_v5 = vcombine.high %v1571_v59, %v1575_v62  ;;  %v14556_v54 = vld [vmem:[%s19898_s3 + $0xa0] sm:$0xff]   ;;  %v14575_v59 = vld [vmem:[%s19898_s3 + $0x170] sm:$0xff]   ;;  %v1620_v62 = vsub.s32 2, %v17819_v27 }
 0x602   :  { %11129 = vmatpush1.bf16.msra.mxu0 %v14074_v52  ;;  %v14539_v52 = vld [vmem:[%s19898_s3 + $0x60] sm:$0xff]  }
 0x603   :  { %11139 = vmatprep.subr.bf16.mxu0 %v14083_v11  ;;  %v1587_v11 = vld [vmem:[%s19895_s1 + $0x3058] sm:$0xff] }
 0x604   :  { %11646 = vmatpush1.bf16.msra.mxu1 %v14012_v9  ;;  %v14085_v9 = vcombine.high %v1579_v43, %v1583_v49  ;;  %v14562_v43 = vld [vmem:[%s19898_s3 + $0xb8] sm:$0xff]  }
 0x605   :  { %11647 = vmatprep.subr.bf16.mxu1 %v14021_v56  ;;  %11131 = vmatmul.mubr.bf16.vlgmr.msra.gmra.mrb[4].mxu0 %v17180_v4  ;;  %v1591_v56 = vld [vmem:[%s19895_s1 + $0x3078] sm:$0xff] }
 0x606   :  { %11140 = vmatpush1.bf16.msra.mxu0 %v14082_v15  ;;  %11171 = vmatprep.mubr.bf16.mxu0 %v14606_v3  ;;  %v14093_v16 = vcombine.high %v1587_v11, %v1591_v56  ;;  %v1595_v15 = vld [vmem:[%s19895_s1 + $0x3098] sm:$0xff] }
 0x607   :  { %11141 = vmatprep.subr.bf16.mxu0 %v14091_v63  ;;  %v14542_v63 = vld [vmem:[%s19898_s3 + $0x28] sm:$0xff]  }
 0x608   :  { %11648 = vmatpush1.bf16.msra.mxu1 %v14020_v61  ;;  %v1599_v61 = vld [vmem:[%s19895_s1 + $0x30b8] sm:$0xff] }
 0x609   :  { %11649 = vmatprep.subr.bf16.mxu1 %v14029_v25  ;;  %v14092_v25 = vcombine.low %v1587_v11, %v1591_v56  ;;  %v14101_v20 = vcombine.high %v1595_v15, %v1599_v61  ;;  %v14580_v11 = vld [vmem:[%s19898_s3 + $0x180] sm:$0xff]   ;;  %v14581_v56 = vld [vmem:[%s19898_s3 + $0x1c8] sm:$0xff]  }
 0x60a   :  { %11142 = vmatpush1.bf16.msra.mxu0 %v14090_v17  ;;  %v14544_v17 = vld [vmem:[%s19898_s3 + $0x30] sm:$0xff]  }
 0x60b   :  { %11143 = vmatprep.subr.bf16.mxu0 %v14099_v10 }
 0x60c   :  { %11650 = vmatpush1.bf16.msra.mxu1 %v14028_v38  ;;  %v14100_v38 = vcombine.low %v1595_v15, %v1599_v61  ;;  %v14586_v15 = vld [vmem:[%s19898_s3 + $0x198] sm:$0xff]   ;;  %v14587_v61 = vld [vmem:[%s19898_s3 + $0x1e0] sm:$0xff]  }
 0x60d   :  { %11651 = vmatprep.subr.bf16.mxu1 %v14037_v30  ;;  %v19696_v30 = vld [vmem:[%s19897_s2] sm:$0xff] }
 0x60e   :  { %11144 = vmatpush1.bf16.msra.mxu0 %v14098_v35  ;;  %v1625_v14 = vrot.slane %v19696_v30, %v1624_v24  ;;  %v14547_v35 = vld [vmem:[%s19898_s3 + $0xc0] sm:$0xff]   ;;  %v14592_v24 = vld [vmem:[%s19898_s3 + $0x1b0] sm:$0xff]  }
 0x60f   :  { %11145 = vmatprep.subr.bf16.mxu0 %v14107_v0  ;;  %v14564_v0 = vld [vmem:[%s19898_s3 + $0x100] sm:$0xff]  }
 0x610   :  { %11652 = vmatpush1.bf16.msra.mxu1 %v14036_v21  ;;  %v14310_v21 = vadd.f32 %v17968_v44, %v1625_v14  ;;  %v14565_v44 = vld [vmem:[%s19898_s3 + $0x148] sm:$0xff]  }
 0x611   :  { %11653 = vmatprep.subr.bf16.mxu1 %v14045_v1  ;;  %v11713_v1 = vpack.c.bf16 %v17863_v41, %v17863_v41  ;;  %v14566_v41 = vld [vmem:[%s19898_s3 + $0x108] sm:$0xff]  }
 0x612   :  { %11146 = vmatpush1.bf16.msra.mxu0 %v14106_v36  ;;  %v11716_v36 = vpack.c.bf16 %v14310_v21, %v14310_v21 }
 0x613   :  { %14188 = vmatprep.subr.bf16.mxu0 %v14531_v57  ;;  %v14567_v57 = vld [vmem:[%s19898_s3 + $0x150] sm:$0xff]  }
 0x614   :  { %11654 = vmatpush1.bf16.msra.mxu1 %v14044_v37  ;;  %v14550_v37 = vld [vmem:[%s19898_s3 + $0x88] sm:$0xff]  }
 0x615   :  { %11655 = vmatprep.subr.bf16.mxu1 %v14053_v39  ;;  %14112 = vmatmul.mubr.msk.bf16.vlgmr.msra.gmra.mrb[4].mxu0 %vm9577_vm0, %v19614_v51  ;;  %v14551_v39 = vld [vmem:[%s19898_s3 + $0xd0] sm:$0xff]  }
 0x616   :  { %14189 = vmatpush3.bf16.msra.mxu0 %v14532_v42  ;;  %12272 = vmatprep.mubr.bf16.mxu0 %v11714_v47  ;;  %v14569_v42 = vld [vmem:[%s19898_s3 + $0x158] sm:$0xff]  }
 0x617   :  { %14190 = vmatprep.subr.bf16.mxu0 %v14533_v2  ;;  %v14570_v2 = vld [vmem:[%s19898_s3 + $0x118] sm:$0xff]  }
 0x618   :  { %11656 = vmatpush1.bf16.msra.mxu1 %v14052_v46  ;;  %v14553_v46 = vld [vmem:[%s19898_s3 + $0xd8] sm:$0xff]  }
 0x619   :  { %11657 = vmatprep.subr.bf16.mxu1 %v14061_v50  ;;  %v14554_v47 = vld [vmem:[%s19898_s3 + $0x98] sm:$0xff]   ;;  %v14571_v50 = vld [vmem:[%s19898_s3 + $0x160] sm:$0xff]  }
 0x61a   :  { %14191 = vmatpush3.bf16.msra.mxu0 %v14534_v58  ;;  %v14573_v58 = vld [vmem:[%s19898_s3 + $0x168] sm:$0xff]  }
 0x61b   :  { %14192 = vmatprep.subr.bf16.mxu0 %v14535_v55  ;;  %v14574_v55 = vld [vmem:[%s19898_s3 + $0x128] sm:$0xff]  }
 0x61c   :  { %11658 = vmatpush1.bf16.msra.mxu1 %v14060_v22  ;;  %v14557_v22 = vld [vmem:[%s19898_s3 + $0xe8] sm:$0xff]  }
 0x61d   :  { %11659 = vmatprep.subr.bf16.mxu1 %v14069_v45  ;;  %v14558_v45 = vld [vmem:[%s19898_s3 + $0xa8] sm:$0xff]  }
 0x61e   :  { %14193 = vmatpush3.bf16.msra.mxu0 %v14536_v60  ;;  %v14559_v60 = vld [vmem:[%s19898_s3 + $0xf0] sm:$0xff]  }
 0x61f   :  { %14194 = vmatprep.subr.bf16.mxu0 %v14537_v23  ;;  %v1621_v23 = vrot.slane %v19696_v30, %v1620_v62  ;;  %v14607_v62 = vmov 0.0  }
 0x620   :  { %11660 = vmatpush1.bf16.msra.mxu1 %v14068_v26  ;;  %v14560_v26 = vld [vmem:[%s19898_s3 + $0xb0] sm:$0xff]  }
 0x621   :  { %11661 = vmatprep.subr.bf16.mxu1 %v14077_v5  ;;  %v14561_v5 = vld [vmem:[%s19898_s3 + $0xf8] sm:$0xff]   ;;  %v14309_v49 = vadd.f32 %v17960_v40, %v1621_v23  ;;  %v14579_v40 = vld [vmem:[%s19898_s3 + $0x1c0] sm:$0xff]   ;;  %v14597_v23 = vld [vmem:[%s19900_s5 + $0x10] sm:$0xff]  }
 0x622   :  { %14195 = vmatpush3.bf16.msra.mxu0 %v14538_v6 }
 0x623   :  { %14196 = vmatprep.subr.bf16.mxu0 %v14539_v52  ;;  %v11715_v6 = vpack.c.bf16 %v14309_v49, %v14309_v49  ;;  %v14577_v52 = vld [vmem:[%s19898_s3 + $0x178] sm:$0xff]   ;;  %v14600_v49 = vld [vmem:[%s19900_s5 + $0x28] sm:$0xff]  }
 0x624   :  { %11662 = vmatpush1.bf16.msra.mxu1 %v14076_v8  ;;  %v14576_v8 = vld [vmem:[%s19898_s3 + $0x130] sm:$0xff]  }
 0x625   :  { %11672 = vmatprep.subr.bf16.mxu1 %v14085_v9  ;;  %v14578_v9 = vld [vmem:[%s19898_s3 + $0x138] sm:$0xff]  }
 0x626   :  { %14197 = vmatpush3.bf16.msra.mxu0 %v14540_v12  ;;  %v14582_v12 = vld [vmem:[%s19898_s3 + $0x188] sm:$0xff]  }
 0x627   :  { %11664 = vmatmul.mubr.bf16.vlgmr.msra.gmra.mrb[8].mxu1 %v17180_v4  ;;  %14198 = vmatprep.subr.bf16.mxu0 %v14541_v18  ;;  %v1603_v4 = vld [vmem:[%s19895_s1 + $0x30d8] sm:$0xff]  ;;  %v14584_v18 = vld [vmem:[%s19898_s3 + $0x190] sm:$0xff]  }
 0x628   :  { %11673 = vmatpush1.bf16.msra.mxu1 %v14084_v48  ;;  %11704 = vmatprep.mubr.bf16.mxu1 %v14606_v3  ;;  %v14545_v3 = vld [vmem:[%s19898_s3 + $0x78] sm:$0xff]   ;;  %v14109_v10 = vcombine.high %v1603_v4, %v1607_v28  ;;  %v14108_v31 = vcombine.low %v1603_v4, %v1607_v28  ;;  %v14583_v48 = vld [vmem:[%s19898_s3 + $0x1d0] sm:$0xff]  }
 0x629   :  { %11674 = vmatprep.subr.bf16.mxu1 %v14093_v16  ;;  %v14585_v16 = vld [vmem:[%s19898_s3 + $0x1d8] sm:$0xff]  }
 0x62a   :  { %14199 = vmatpush3.bf16.msra.mxu0 %v14542_v63  ;;  %v14588_v63 = vld [vmem:[%s19898_s3 + $0x1a0] sm:$0xff]   ;;  %v14593_v4 = vld [vmem:[%s19898_s3 + $0x1f8] sm:$0xff]  }
 0x62b   :  { %14200 = vmatprep.subr.bf16.mxu0 %v14543_v19  ;;  %v14590_v19 = vld [vmem:[%s19898_s3 + $0x1a8] sm:$0xff]   ;;  %v14594_v28 = vld [vmem:[%s19898_s3 + $0x1b8] sm:$0xff]  }
 0x62c   :  { %11675 = vmatpush1.bf16.msra.mxu1 %v14092_v25  ;;  %v14589_v25 = vld [vmem:[%s19898_s3 + $0x1e8] sm:$0xff]  }
 0x62d   :  { %11676 = vmatprep.subr.bf16.mxu1 %v14101_v20  ;;  %v14591_v20 = vld [vmem:[%s19898_s3 + $0x1f0] sm:$0xff]  }
 0x62e   :  { %14201 = vmatpush3.bf16.msra.mxu0 %v14544_v17  ;;  %v1628_v17 = vsub.s32 4, %v17819_v27 }
 0x62f   :  { %14202 = vmatprep.subr.bf16.mxu0 %v14545_v3 }
 0x630   :  { %11677 = vmatpush1.bf16.msra.mxu1 %v14100_v38  ;;  %v1632_v38 = vsub.s32 5, %v17819_v27  ;;  %v1629_v3 = vrot.slane %v19696_v30, %v1628_v17 }
 0x631   :  { %11678 = vmatprep.subr.bf16.mxu1 %v14109_v10 }
 0x632   :  { %14203 = vmatpush3.bf16.msra.mxu0 %v14546_v32  ;;  %v1633_v10 = vrot.slane %v19696_v30, %v1632_v38 }
 0x633   :  { %14232 = vmatprep.subr.bf16.mxu0 %v14563_v34 }
 0x634   :  { %11679 = vmatpush1.bf16.msra.mxu1 %v14108_v31 }
 0x635   :  { %14210 = vmatprep.subr.bf16.mxu1 %v14547_v35  ;;  %12273 = vmatmul.mubr.bf16.vlgmr.msra.gmra.mrb[8].mxu0 %v11713_v1 }
 0x636   :  { %14233 = vmatpush3.bf16.msra.mxu0 %v14564_v0 }
 0x637   :  { %14113 = vmatmul.mubr.msk.bf16.vlgmr.msra.gmra.mrb[8].mxu1 %vm9577_vm0, %v19614_v51  ;;  %14234 = vmatprep.subr.bf16.mxu0 %v14565_v44  ;;  %v14555_v51 = vld [vmem:[%s19898_s3 + $0xe0] sm:$0xff]  }
 0x638   :  { %14211 = vmatpush3.bf16.msra.mxu1 %v14548_v29  ;;  %12312 = vmatprep.mubr.bf16.mxu1 %v11716_v36  ;;  %v1636_v29 = vsub.s32 6, %v17819_v27 }
 0x639   :  { %14212 = vmatprep.subr.bf16.mxu1 %v14549_v13  ;;  %v1640_v13 = vsub.s32 7, %v17819_v27  ;;  %v14114_v27 = vld [vmem:[%s19899_s4] ss:$0 sm:$0xff] }
 0x63a   :  { %14235 = vmatpush3.bf16.msra.mxu0 %v14566_v41  ;;  %v1637_v44 = vrot.slane %v19696_v30, %v1636_v29 }
 0x63b   :  { %14236 = vmatprep.subr.bf16.mxu0 %v14567_v57  ;;  %v1641_v36 = vrot.slane %v19696_v30, %v1640_v13 }
 0x63c   :  { %14213 = vmatpush3.bf16.msra.mxu1 %v14550_v37 }
 0x63d   :  { %14214 = vmatprep.subr.bf16.mxu1 %v14551_v39 }
 0x63e   :  { %14237 = vmatpush3.bf16.msra.mxu0 %v14568_v7 }
 0x63f   :  { %14238 = vmatprep.subr.bf16.mxu0 %v14569_v42 }
 0x640   :  { %14215 = vmatpush3.bf16.msra.mxu1 %v14552_v33 }
 0x641   :  { %14216 = vmatprep.subr.bf16.mxu1 %v14553_v46 }
 0x642   :  { %14239 = vmatpush3.bf16.msra.mxu0 %v14570_v2 }
 0x643   :  { %14240 = vmatprep.subr.bf16.mxu0 %v14571_v50 }
 0x644   :  { %14217 = vmatpush3.bf16.msra.mxu1 %v14554_v47 }
 0x645   :  { %14218 = vmatprep.subr.bf16.mxu1 %v14555_v51 }
 0x646   :  { %14241 = vmatpush3.bf16.msra.mxu0 %v14572_v53 }
 0x647   :  { %14242 = vmatprep.subr.bf16.mxu0 %v14573_v58 }
 0x648   :  { %14219 = vmatpush3.bf16.msra.mxu1 %v14556_v54 }
 0x649   :  { %14220 = vmatprep.subr.bf16.mxu1 %v14557_v22 }
 0x64a   :  { %14243 = vmatpush3.bf16.msra.mxu0 %v14574_v55 }
 0x64b   :  { %14244 = vmatprep.subr.bf16.mxu0 %v14575_v59 }
 0x64c   :  { %14221 = vmatpush3.bf16.msra.mxu1 %v14558_v45 }
 0x64d   :  { %14222 = vmatprep.subr.bf16.mxu1 %v14559_v60  ;;  %v14595_v60 = vld [vmem:[%s19900_s5] sm:$0xff]  }
 0x64e   :  { %14245 = vmatpush3.bf16.msra.mxu0 %v14576_v8  ;;  %v14602_v8 = vld [vmem:[%s19900_s5 + $0x38] sm:$0xff]  }
 0x64f   :  { %14246 = vmatprep.subr.bf16.mxu0 %v14577_v52 }
 0x650   :  { %14223 = vmatpush3.bf16.msra.mxu1 %v14560_v26  ;;  %v14596_v26 = vld [vmem:[%s19900_s5 + $0x8] sm:$0xff]  }
 0x651   :  { %14224 = vmatprep.subr.bf16.mxu1 %v14561_v5  ;;  %v14598_v5 = vld [vmem:[%s19900_s5 + $0x18] sm:$0xff]  }
 0x652   :  { %14247 = vmatpush3.bf16.msra.mxu0 %v14578_v9 }
 0x653   :  { %14285 = vmatprep.subr.bf16.mxu0 %v14607_v62 }
 0x654   :  { %14225 = vmatpush3.bf16.msra.mxu1 %v14562_v43  ;;  %v14599_v43 = vld [vmem:[%s19900_s5 + $0x20] sm:$0xff]  }
 0x655   :  { %14254 = vmatprep.subr.bf16.mxu1 %v14579_v40 }
 0x657   :  { %12313 = vmatmul.mubr.bf16.vlgmr.msra.gmra.mrb[12].mxu1 %v11715_v6  ;;  %v14601_v6 = vld [vmem:[%s19900_s5 + $0x30] sm:$0xff]  }
 0x658   :  { %14255 = vmatpush3.bf16.msra.mxu1 %v14580_v11 }
 0x659   :  { %14256 = vmatprep.subr.bf16.mxu1 %v14581_v56 }
 0x65c   :  { %14257 = vmatpush3.bf16.msra.mxu1 %v14582_v12 }
 0x65d   :  { %14258 = vmatprep.subr.bf16.mxu1 %v14583_v48 }
 0x660   :  { %14259 = vmatpush3.bf16.msra.mxu1 %v14584_v18 }
 0x661   :  { %14260 = vmatprep.subr.bf16.mxu1 %v14585_v16 }
 0x664   :  { %14261 = vmatpush3.bf16.msra.mxu1 %v14586_v15 }
 0x665   :  { %14262 = vmatprep.subr.bf16.mxu1 %v14587_v61 }
 0x668   :  { %14263 = vmatpush3.bf16.msra.mxu1 %v14588_v63 }
 0x669   :  { %14264 = vmatprep.subr.bf16.mxu1 %v14589_v25 }
 0x66c   :  { %14265 = vmatpush3.bf16.msra.mxu1 %v14590_v19  ;;  %v14179_v19 = vld [vmem:[%s19901_s6] ss:$0 sm:$0xff] }
 0x66d   :  { %14266 = vmatprep.subr.bf16.mxu1 %v14591_v20 }
 0x670   :  { %14267 = vmatpush3.bf16.msra.mxu1 %v14592_v24 }
 0x671   :  { %14268 = vmatprep.subr.bf16.mxu1 %v14593_v4 }
 0x674   :  { %14269 = vmatpush3.bf16.msra.mxu1 %v14594_v28 }
 0x6e8   :  { %v11173_v14 = vpop.f32.mrb[4].mxu0 }
 0x6e9   :  { %v14311_v32 = vadd.f32 %v11173_v14, %v1629_v3  ;;  %v11175_v31 = vpop.f32.mrb[5].mxu0 }
 0x6ea   :  { %v14312_v34 = vadd.f32 %v11175_v31, %v1633_v10  ;;  %v11177_v35 = vpop.f32.mrb[6].mxu0 }
 0x6eb   :  { %v11178_v21 = vpop.f32.mrb[7].mxu0  ;;  %v11717_v1 = vpack.c.bf16 %v14311_v32, %v14311_v32 }
 0x6ec   :  { %v11718_v0 = vpack.c.bf16 %v14312_v34, %v14312_v34 }
 0x6ee   :  { %12352 = vmatprep.mubr.bf16.mxu0 %v11718_v0 }
 0x6ef   :  { %12353 = vmatmul.mubr.bf16.vlgmr.msra.gmra.mrb[12].mxu0 %v11717_v1 }
 0x6f0   :  { %14286 = vmatpush3.bf16.msra.mxu0 %v14595_v60  ;;  %14301 = vmatprep.mubr.msk.bf16.mxu0 %vm14608_vm1, %v14607_v62 }
 0x6f1   :  { %14287 = vmatprep.subr.bf16.mxu0 %v14607_v62 }
 0x6f4   :  { %14288 = vmatpush3.bf16.msra.mxu0 %v14596_v26 }
 0x6f5   :  { %14289 = vmatprep.subr.bf16.mxu0 %v14607_v62 }
 0x6f8   :  { %14290 = vmatpush3.bf16.msra.mxu0 %v14597_v23 }
 0x6f9   :  { %14291 = vmatprep.subr.bf16.mxu0 %v14607_v62 }
 0x6fc   :  { %14292 = vmatpush3.bf16.msra.mxu0 %v14598_v5 }
 0x6fd   :  { %14293 = vmatprep.subr.bf16.mxu0 %v14607_v62 }
 0x700   :  { %14294 = vmatpush3.bf16.msra.mxu0 %v14599_v43 }
 0x701   :  { %14295 = vmatprep.subr.bf16.mxu0 %v14607_v62 }
 0x704   :  { %14296 = vmatpush3.bf16.msra.mxu0 %v14600_v49 }
 0x705   :  { %14297 = vmatprep.subr.bf16.mxu0 %v14607_v62 }
 0x708   :  { %v14204_v41 = vpop.f32.mrb[8].mxu0  ;;  %14298 = vmatpush3.bf16.msra.mxu0 %v14601_v6 }
 0x709   :  { %v14205_v57 = vpop.f32.mrb[9].mxu0  ;;  %14299 = vmatprep.subr.bf16.mxu0 %v14607_v62 }
 0x70a   :  { %v11706_v37 = vpop.f32.mrb[8].mxu1  ;;  %v14206_v33 = vadd.f32 %v14205_v57, %v14204_v41  ;;  %v14207_v42 = vpop.f32.mrb[10].mxu0 }
 0x70b   :  { %v14313_v39 = vadd.f32 %v11706_v37, %v1637_v44  ;;  %v11708_v7 = vpop.f32.mrb[9].mxu1  ;;  %v14208_v47 = vpop.f32.mrb[11].mxu0 }
 0x70c   :  { %v14314_v46 = vadd.f32 %v11708_v7, %v1641_v36  ;;  %v11710_v2 = vpop.f32.mrb[10].mxu1  ;;  %v12275_v58 = vadd.f32 %v14206_v33, %v14114_v27  ;;  %14300 = vmatpush3.bf16.msra.mxu0 %v14602_v8 }
 0x70d   :  { %v11711_v50 = vpop.f32.mrb[11].mxu1  ;;  %v11719_v53 = vpack.c.bf16 %v14313_v39, %v14313_v39 }
 0x70e   :  { %v11720_v51 = vpack.c.bf16 %v14314_v46, %v14314_v46 }
 0x710   :  { %12392 = vmatprep.mubr.bf16.mxu1 %v11720_v51 }
 0x711   :  { %12393 = vmatmul.mubr.bf16.vlgmr.msra.gmra.mrb[16].mxu1 %v11719_v53 }
 0x72a   :  { %v14226_v30 = vpop.f32.mrb[12].mxu1 }
 0x72b   :  { %v14227_v54 = vpop.f32.mrb[13].mxu1 }
 0x72c   :  { %v14228_v22 = vadd.f32 %v14227_v54, %v14226_v30  ;;  %v14229_v55 = vpop.f32.mrb[14].mxu1 }
 0x72d   :  { %v14230_v45 = vpop.f32.mrb[15].mxu1 }
 0x72e   :  { %v12315_v59 = vadd.f32 %v14228_v22, %v12275_v58 }
 0x7c2   :  { %v14248_v52 = vpop.f32.mrb[12].mxu0 }
 0x7c3   :  { %v14249_v9 = vpop.f32.mrb[13].mxu0 }
 0x7c4   :  { %v14250_v40 = vadd.f32 %v14249_v9, %v14248_v52  ;;  %v14251_v11 = vpop.f32.mrb[14].mxu0 }
 0x7c5   :  { %v14252_v56 = vpop.f32.mrb[15].mxu0 }
 0x7c6   :  { %v12355_v12 = vadd.f32 %v14250_v40, %v12315_v59 }
 0x7e4   :  { %v14270_v48 = vpop.f32.mrb[16].mxu1 }
 0x7e5   :  { %v14271_v18 = vpop.f32.mrb[17].mxu1 }
 0x7e6   :  { %v14272_v16 = vadd.f32 %v14271_v18, %v14270_v48  ;;  %v14273_v15 = vpop.f32.mrb[18].mxu1 }
 0x7e7   :  { %v14274_v61 = vpop.f32.mrb[19].mxu1 }
 0x7e8   :  { %v12395_v63 = vadd.f32 %v14272_v16, %v12355_v12 }
 0x7ea   :  { %v12400_v25 = vpack.c.bf16 %v12395_v63, %v12395_v63 }
 0x7ec   :  { %14302 = vmatmul.mubr.bf16.vlgmr.msra.gmra.mrb[16].mxu0 %v12400_v25 }
 0x8bf   :  { %v12506_v20 = vpop.f32.mrb[16].mxu0 }
 0x8c0   :  { %v12507_v24 = vadd.f32 %v14179_v19, %v12506_v20  ;;  %v14303_v4 = vpop.f32.mrb[17].mxu0 }
 0x8c1   :  { %v12509_v28 = vpop.f32.mrb[18].mxu0 }
 0x8c2   :  { %12512 = vst [vmem:[%s19902_s7] sm:$0xff] %v12507_v24  ;;  %v14304_v17 = vpop.f32.mrb[19].mxu0 }

</bundles_post_ra>
